<compile_context>
chip_gen: v5e
topology: v5e:2x2
jax: 0.10.0
libtpu: 0.0.40
codegen_flags: <defaults>
</compile_context>

<pallas_src>
import functools

import jax
import jax.numpy as jnp
from jax.experimental import pallas as pl
from jax.experimental.pallas import tpu as pltpu

H1, H2, H3 = 256, 512, 1024
NEG_SLOPE = 0.2
LANE = 128


def _round_up(n, m):
    return ((n + m - 1) // m) * m


def _chip_config():
    """Pick tiling / epilogue strategy from the attached TPU generation."""
    try:
        kind = jax.devices()[0].device_kind.lower()
    except Exception:  # pragma: no cover - defensive
        kind = ""
    modern = ("v6" in kind) or ("v7" in kind)   # v6e / v7x: bf16 VPU, big MXU
    return {
        "bf16_epilogue": modern,                # v5e keeps the f32 epilogue
        "max_tile": 1024 if modern else 512,    # v5e: 16 MiB scoped VMEM default
        "row_gran": 256 if modern else 128,     # MXU rows per pass
    }


def _generator_kernel(x_ref,
                      w1_ref, b1_ref,
                      w2_ref, b2_ref,
                      w3_ref, b3_ref,
                      w4_ref, b4_ref,
                      o_ref, *, bf16_epilogue):
    """One batch tile of the 4-layer MLP, entirely in VMEM.

    bf16 matmul inputs, f32 MXU accumulation.  Hidden-layer epilogue
    (bias + leaky_relu) runs in bf16 on v6e/v7x, f32 on v5e.  The last layer's
    bias-add and tanh stay f32."""
    ew_dtype = jnp.bfloat16 if bf16_epilogue else jnp.float32

    def hidden_layer(h, w_ref, b_ref):
        acc = jnp.dot(h, w_ref[...], preferred_element_type=jnp.float32)
        acc = acc.astype(ew_dtype) + b_ref[...].astype(ew_dtype)
        # single VALU max per vreg instead of compare+select
        acc = jnp.maximum(acc, NEG_SLOPE * acc)
        return acc.astype(jnp.bfloat16)

    h = x_ref[...]                                   # already bf16
    h = hidden_layer(h, w1_ref, b1_ref)
    h = hidden_layer(h, w2_ref, b2_ref)
    h = hidden_layer(h, w3_ref, b3_ref)

    acc = jnp.dot(h, w4_ref[...], preferred_element_type=jnp.float32)
    acc = acc + b4_ref[...]                          # f32 bias
    o_ref[...] = jnp.tanh(acc).astype(o_ref.dtype)   # f32 tanh on the EUP


@functools.partial(jax.jit, static_argnames=("tile_b", "bf16_epilogue"))
def _generator_forward_padded(x, w1, b1, w2, b2, w3, b3, w4, b4,
                              *, tile_b, bf16_epilogue):
    """x: (B, d_in_padded) bf16 with B % tile_b == 0; d_* lane-aligned."""
    B, d_in = x.shape
    d_out = w4.shape[1]
    assert B % tile_b == 0
    grid = (B // tile_b,)

    # Weights / biases: resident whole in VMEM, no per-step pipelining (their
    # block index never changes) -> no wasted double buffer.
    vmem_whole = pl.BlockSpec(memory_space=pltpu.MemorySpace.VMEM)

    flops = 2 * B * (d_in * H1 + H1 * H2 + H2 * H3 + H3 * d_out)
    bytes_accessed = (
        x.size * x.dtype.itemsize
        + sum(a.size * a.dtype.itemsize
              for a in (w1, b1, w2, b2, w3, b3, w4, b4))
        + B * d_out * 4)

    kernel = functools.partial(_generator_kernel, bf16_epilogue=bf16_epilogue)

    return pl.pallas_call(
        kernel,
        out_shape=jax.ShapeDtypeStruct((B, d_out), jnp.float32),
        grid_spec=pltpu.PrefetchScalarGridSpec(
            num_scalar_prefetch=0,
            grid=grid,
            in_specs=[
                pl.BlockSpec((tile_b, d_in), lambda i: (i, 0)),   # x tile
                vmem_whole, vmem_whole,   # w1, b1
                vmem_whole, vmem_whole,   # w2, b2
                vmem_whole, vmem_whole,   # w3, b3
                vmem_whole, vmem_whole,   # w4, b4
            ],
            out_specs=pl.BlockSpec((tile_b, d_out), lambda i: (i, 0)),
        ),
        compiler_params=pltpu.CompilerParams(
            dimension_semantics=("parallel",),   # megacore / v7x dual-TC sharding
        ),
        cost_estimate=pl.CostEstimate(
            flops=flops,
            transcendentals=B * d_out,
            bytes_accessed=bytes_accessed),
    )(x, w1, b1, w2, b2, w3, b3, w4, b4)


def generator_forward(x, params, *, tile_b=None):
    """Generator forward pass.

    x: (B, d_in) float (any float dtype; cast to bf16 at the boundary).
    params: dict from init_generator_params (lane-padded bf16 weights,
            f32 biases, plus the original "d_in"/"d_out" ints).
    tile_b: optional batch-tile override; rounded to the MXU row granularity.
    """
    cfg = _chip_config()
    gran = cfg["row_gran"]
    B, d_in = x.shape
    d_in_p = params["w1"].shape[0]
    d_out = params["d_out"]

    # Batch tile: as large as the chip budget allows, but capped at
    # ceil(B/2) rounded up so the grid has >=2 steps when B permits
    # (v7x dual-TC), and always a multiple of the MXU row granularity.
    want = cfg["max_tile"] if tile_b is None else tile_b
    half = _round_up(pl.cdiv(B, 2), gran)
    tb = max(gran, min(_round_up(want, gran), half))
    Bp = _round_up(B, tb)

    # bf16 activations across the call boundary; zero-pad batch and d_in.
    xb = x.astype(jnp.bfloat16)
    if Bp != B or d_in_p != d_in:
        xb = jnp.pad(xb, ((0, Bp - B), (0, d_in_p - d_in)))

    out = _generator_forward_padded(
        xb,
        params["w1"], params["b1"],
        params["w2"], params["b2"],
        params["w3"], params["b3"],
        params["w4"], params["b4"],
        tile_b=tb, bf16_epilogue=cfg["bf16_epilogue"])
    return out[:B, :d_out]


def init_generator_params(key, gan_input_dimension, gan_output_dimension):
    """PyTorch-style uniform(-1/sqrt(fan_in), 1/sqrt(fan_in)) init.

    Weights stored as (in, out) bf16 (MXU-native), biases (1, out) f32.
    w1's rows and w4/b4's columns are zero-padded to a multiple of 128 so the
    fc1 K-dim and the output stores are lane-dense; the wrapper slices the
    padded output columns back off.  Note: bf16 weights (and the bf16
    epilogue on v6e/v7x) deviate slightly from an f32 PyTorch Generator."""
    dims = [gan_input_dimension, H1, H2, H3, gan_output_dimension]
    d_in_p = _round_up(gan_input_dimension, LANE)
    d_out_p = _round_up(gan_output_dimension, LANE)
    params = {"d_in": gan_input_dimension, "d_out": gan_output_dimension}
    for idx in range(4):
        fan_in, fan_out = dims[idx], dims[idx + 1]
        key, kw, kb = jax.random.split(key, 3)
        bound = 1.0 / float(jnp.sqrt(fan_in))
        w = jax.random.uniform(kw, (fan_in, fan_out), jnp.float32, -bound, bound)
        b = jax.random.uniform(kb, (1, fan_out), jnp.float32, -bound, bound)
        if idx == 0 and d_in_p != fan_in:
            w = jnp.pad(w, ((0, d_in_p - fan_in), (0, 0)))
        if idx == 3 and d_out_p != fan_out:
            w = jnp.pad(w, ((0, 0), (0, d_out_p - fan_out)))
            b = jnp.pad(b, ((0, 0), (0, d_out_p - fan_out)))
        params[f"w{idx + 1}"] = w.astype(jnp.bfloat16)
        params[f"b{idx + 1}"] = b
    return params


def _reference_forward(x, params, *, bf16_epilogue):
    """Pure-JAX reference mirroring the kernel's dtype recipe."""
    d_in_p = params["w1"].shape[0]
    d_out = params["d_out"]
    ew = jnp.bfloat16 if bf16_epilogue else jnp.float32
    h = x.astype(jnp.bfloat16)
    if d_in_p != h.shape[1]:
        h = jnp.pad(h, ((0, 0), (0, d_in_p - h.shape[1])))
    for i in range(1, 4):
        w, b = params[f"w{i}"], params[f"b{i}"]
        a = jnp.dot(h, w, preferred_element_type=jnp.float32).astype(ew)
        a = a + b.astype(ew)
        a = jnp.maximum(a, NEG_SLOPE * a)
        h = a.astype(jnp.bfloat16)
    a = jnp.dot(h, params["w4"], preferred_element_type=jnp.float32) + params["b4"]
    return jnp.tanh(a)[:, :d_out]


if __name__ == "__main__":
    gan_input_dimension = 64
    gan_output_dimension = 128
    batch = 16

    key = jax.random.PRNGKey(0)
    key, kx = jax.random.split(key)
    params = init_generator_params(key, gan_input_dimension, gan_output_dimension)
    x = jax.random.normal(kx, (batch, gan_input_dimension), jnp.float32)

    out = generator_forward(x, params)          # tile auto-picked per chip
    out = jax.block_until_ready(out)

    cfg = _chip_config()
    ref = _reference_forward(x, params, bf16_epilogue=cfg["bf16_epilogue"])
    assert out.shape == (batch, gan_output_dimension)
    assert jnp.allclose(out, ref, atol=2e-2, rtol=2e-2), "mismatch vs reference"

    print("KERNEL_OK")
</pallas_src>

<mosaic_0001>
module attributes {stable_mosaic.version = 11 : i64} {
  func.func @_generator_kernel(%arg0: i32, %arg1: memref<128x128xbf16, #tpu.memory_space<vmem>>, %arg2: memref<128x256xbf16, #tpu.memory_space<vmem>>, %arg3: memref<1x256xf32, #tpu.memory_space<vmem>>, %arg4: memref<256x512xbf16, #tpu.memory_space<vmem>>, %arg5: memref<1x512xf32, #tpu.memory_space<vmem>>, %arg6: memref<512x1024xbf16, #tpu.memory_space<vmem>>, %arg7: memref<1x1024xf32, #tpu.memory_space<vmem>>, %arg8: memref<1024x128xbf16, #tpu.memory_space<vmem>>, %arg9: memref<1x128xf32, #tpu.memory_space<vmem>>, %arg10: memref<128x128xf32, #tpu.memory_space<vmem>>) attributes {dimension_semantics = [#tpu.dimension_semantics<parallel>], iteration_bounds = array<i64: 1>, scalar_prefetch = 0 : i64, scratch_operands = 0 : i64, tpu.core_type = #tpu.core_type<tc>, window_params = [{transform_indices = @transform_0, window_bounds = array<i64: 128, 128>}, {pipeline_mode = #tpu.pipeline_mode<synchronous>, transform_indices = @transform_1, window_bounds = array<i64: 128, 256>}, {pipeline_mode = #tpu.pipeline_mode<synchronous>, transform_indices = @transform_2, window_bounds = array<i64: 1, 256>}, {pipeline_mode = #tpu.pipeline_mode<synchronous>, transform_indices = @transform_3, window_bounds = array<i64: 256, 512>}, {pipeline_mode = #tpu.pipeline_mode<synchronous>, transform_indices = @transform_4, window_bounds = array<i64: 1, 512>}, {pipeline_mode = #tpu.pipeline_mode<synchronous>, transform_indices = @transform_5, window_bounds = array<i64: 512, 1024>}, {pipeline_mode = #tpu.pipeline_mode<synchronous>, transform_indices = @transform_6, window_bounds = array<i64: 1, 1024>}, {pipeline_mode = #tpu.pipeline_mode<synchronous>, transform_indices = @transform_7, window_bounds = array<i64: 1024, 128>}, {pipeline_mode = #tpu.pipeline_mode<synchronous>, transform_indices = @transform_8, window_bounds = array<i64: 1, 128>}, {transform_indices = @transform_9, window_bounds = array<i64: 128, 128>}]} {
    %c0 = arith.constant 0 : index
    %c0_0 = arith.constant 0 : index
    %0 = vector.load %arg1[%c0, %c0_0] : memref<128x128xbf16, #tpu.memory_space<vmem>>, vector<128x128xbf16>
    %c0_1 = arith.constant 0 : index
    %c0_2 = arith.constant 0 : index
    %1 = vector.load %arg2[%c0_1, %c0_2] : memref<128x256xbf16, #tpu.memory_space<vmem>>, vector<128x256xbf16>
    %cst = arith.constant dense<0.000000e+00> : vector<128x256xf32>
    %2 = tpu.matmul %0, %1, %cst {dimension_numbers = #tpu.dot_dimension_numbers<[1], [0], [0], [1], [0, 0, 1, 1], [], []>} : vector<128x128xbf16>, vector<128x256xbf16>, vector<128x256xf32> -> vector<128x256xf32>
    %c0_3 = arith.constant 0 : index
    %c0_4 = arith.constant 0 : index
    %3 = vector.load %arg3[%c0_3, %c0_4] : memref<1x256xf32, #tpu.memory_space<vmem>>, vector<1x256xf32>
    %4 = vector.broadcast %3 : vector<1x256xf32> to vector<128x256xf32>
    %5 = arith.addf %2, %4 : vector<128x256xf32>
    %cst_5 = arith.constant 2.000000e-01 : f32
    %6 = vector.broadcast %cst_5 : f32 to vector<128x256xf32>
    %7 = arith.mulf %6, %5 : vector<128x256xf32>
    %8 = arith.maximumf %5, %7 : vector<128x256xf32>
    %9 = arith.truncf %8 : vector<128x256xf32> to vector<128x256xbf16>
    %c0_6 = arith.constant 0 : index
    %c0_7 = arith.constant 0 : index
    %10 = vector.load %arg4[%c0_6, %c0_7] : memref<256x512xbf16, #tpu.memory_space<vmem>>, vector<256x512xbf16>
    %cst_8 = arith.constant dense<0.000000e+00> : vector<128x512xf32>
    %11 = tpu.matmul %9, %10, %cst_8 {dimension_numbers = #tpu.dot_dimension_numbers<[1], [0], [0], [1], [0, 0, 1, 1], [], []>} : vector<128x256xbf16>, vector<256x512xbf16>, vector<128x512xf32> -> vector<128x512xf32>
    %c0_9 = arith.constant 0 : index
    %c0_10 = arith.constant 0 : index
    %12 = vector.load %arg5[%c0_9, %c0_10] : memref<1x512xf32, #tpu.memory_space<vmem>>, vector<1x512xf32>
    %13 = vector.broadcast %12 : vector<1x512xf32> to vector<128x512xf32>
    %14 = arith.addf %11, %13 : vector<128x512xf32>
    %cst_11 = arith.constant 2.000000e-01 : f32
    %15 = vector.broadcast %cst_11 : f32 to vector<128x512xf32>
    %16 = arith.mulf %15, %14 : vector<128x512xf32>
    %17 = arith.maximumf %14, %16 : vector<128x512xf32>
    %18 = arith.truncf %17 : vector<128x512xf32> to vector<128x512xbf16>
    %c0_12 = arith.constant 0 : index
    %c0_13 = arith.constant 0 : index
    %19 = vector.load %arg6[%c0_12, %c0_13] : memref<512x1024xbf16, #tpu.memory_space<vmem>>, vector<512x1024xbf16>
    %cst_14 = arith.constant dense<0.000000e+00> : vector<128x1024xf32>
    %20 = tpu.matmul %18, %19, %cst_14 {dimension_numbers = #tpu.dot_dimension_numbers<[1], [0], [0], [1], [0, 0, 1, 1], [], []>} : vector<128x512xbf16>, vector<512x1024xbf16>, vector<128x1024xf32> -> vector<128x1024xf32>
    %c0_15 = arith.constant 0 : index
    %c0_16 = arith.constant 0 : index
    %21 = vector.load %arg7[%c0_15, %c0_16] : memref<1x1024xf32, #tpu.memory_space<vmem>>, vector<1x1024xf32>
    %22 = vector.broadcast %21 : vector<1x1024xf32> to vector<128x1024xf32>
    %23 = arith.addf %20, %22 : vector<128x1024xf32>
    %cst_17 = arith.constant 2.000000e-01 : f32
    %24 = vector.broadcast %cst_17 : f32 to vector<128x1024xf32>
    %25 = arith.mulf %24, %23 : vector<128x1024xf32>
    %26 = arith.maximumf %23, %25 : vector<128x1024xf32>
    %27 = arith.truncf %26 : vector<128x1024xf32> to vector<128x1024xbf16>
    %c0_18 = arith.constant 0 : index
    %c0_19 = arith.constant 0 : index
    %28 = vector.load %arg8[%c0_18, %c0_19] : memref<1024x128xbf16, #tpu.memory_space<vmem>>, vector<1024x128xbf16>
    %cst_20 = arith.constant dense<0.000000e+00> : vector<128x128xf32>
    %29 = tpu.matmul %27, %28, %cst_20 {dimension_numbers = #tpu.dot_dimension_numbers<[1], [0], [0], [1], [0, 0, 1, 1], [], []>} : vector<128x1024xbf16>, vector<1024x128xbf16>, vector<128x128xf32> -> vector<128x128xf32>
    %c0_21 = arith.constant 0 : index
    %c0_22 = arith.constant 0 : index
    %30 = vector.load %arg9[%c0_21, %c0_22] : memref<1x128xf32, #tpu.memory_space<vmem>>, vector<1x128xf32>
    %31 = vector.broadcast %30 : vector<1x128xf32> to vector<128x128xf32>
    %32 = arith.addf %29, %31 : vector<128x128xf32>
    %33 = math.tanh %32 : vector<128x128xf32>
    %c0_23 = arith.constant 0 : index
    %c0_24 = arith.constant 0 : index
    %34 = vector.load %arg10[%c0_23, %c0_24] : memref<128x128xf32, #tpu.memory_space<vmem>>, vector<128x128xf32>
    tpu.vector_store %arg10[%c0_23, %c0_24], %33 {strides = array<i32>} : memref<128x128xf32, #tpu.memory_space<vmem>>, vector<128x128xf32>,
    return
  }
  func.func @transform_0(%arg0: i32) -> (i32, i32) {
    %c0_i32 = arith.constant 0 : i32
    %c0_i32_0 = arith.constant 0 : i32
    return %arg0, %c0_i32 : i32, i32
  }
  func.func @transform_1(%arg0: i32) -> (i32, i32) {
    %c0_i32 = arith.constant 0 : i32
    %c0_i32_0 = arith.constant 0 : i32
    %c0_i32_1 = arith.constant 0 : i32
    return %c0_i32, %c0_i32_0 : i32, i32
  }
  func.func @transform_2(%arg0: i32) -> (i32, i32) {
    %c0_i32 = arith.constant 0 : i32
    %c0_i32_0 = arith.constant 0 : i32
    %c0_i32_1 = arith.constant 0 : i32
    return %c0_i32, %c0_i32_0 : i32, i32
  }
  func.func @transform_3(%arg0: i32) -> (i32, i32) {
    %c0_i32 = arith.constant 0 : i32
    %c0_i32_0 = arith.constant 0 : i32
    %c0_i32_1 = arith.constant 0 : i32
    return %c0_i32, %c0_i32_0 : i32, i32
  }
  func.func @transform_4(%arg0: i32) -> (i32, i32) {
    %c0_i32 = arith.constant 0 : i32
    %c0_i32_0 = arith.constant 0 : i32
    %c0_i32_1 = arith.constant 0 : i32
    return %c0_i32, %c0_i32_0 : i32, i32
  }
  func.func @transform_5(%arg0: i32) -> (i32, i32) {
    %c0_i32 = arith.constant 0 : i32
    %c0_i32_0 = arith.constant 0 : i32
    %c0_i32_1 = arith.constant 0 : i32
    return %c0_i32, %c0_i32_0 : i32, i32
  }
  func.func @transform_6(%arg0: i32) -> (i32, i32) {
    %c0_i32 = arith.constant 0 : i32
    %c0_i32_0 = arith.constant 0 : i32
    %c0_i32_1 = arith.constant 0 : i32
    return %c0_i32, %c0_i32_0 : i32, i32
  }
  func.func @transform_7(%arg0: i32) -> (i32, i32) {
    %c0_i32 = arith.constant 0 : i32
    %c0_i32_0 = arith.constant 0 : i32
    %c0_i32_1 = arith.constant 0 : i32
    return %c0_i32, %c0_i32_0 : i32, i32
  }
  func.func @transform_8(%arg0: i32) -> (i32, i32) {
    %c0_i32 = arith.constant 0 : i32
    %c0_i32_0 = arith.constant 0 : i32
    %c0_i32_1 = arith.constant 0 : i32
    return %c0_i32, %c0_i32_0 : i32, i32
  }
  func.func @transform_9(%arg0: i32) -> (i32, i32) {
    %c0_i32 = arith.constant 0 : i32
    %c0_i32_0 = arith.constant 0 : i32
    return %arg0, %c0_i32 : i32, i32
  }
}

</mosaic_0001>

<bundles_post_ra>
// kernel: _generator_forward_padded.1
= control target key start
LH: loop header
LB: loop body
LE: loop exit
PB: predicated region body
PF: predicated region fallthrough
CT: control target
= control target key end

     0   :  { %14 = vsyncpa [#allocation3], 0  ;;  %s9275_s0 = inlined_call_operand.hbm [shape: bf16[128,128], index: 0, kind: input, shape index: {}]   ;;  %s9276_s1 = inlined_call_operand.hbm [shape: bf16[128,256], index: 1, kind: input, shape index: {}]   ;;  %s9277_s2 = inlined_call_operand.hbm [shape: f32[1,256], index: 2, kind: input, shape index: {}]   ;;  %s9278_s3 = inlined_call_operand.hbm [shape: bf16[256,512], index: 3, kind: input, shape index: {}]   ;;  %s9279_s4 = inlined_call_operand.hbm [shape: f32[1,512], index: 4, kind: input, shape index: {}]   ;;  %s9280_s5 = inlined_call_operand.hbm [shape: bf16[512,1024], index: 5, kind: input, shape index: {}]   ;;  %s9281_s6 = inlined_call_operand.hbm [shape: f32[1,1024], index: 6, kind: input, shape index: {}]   ;;  %s9282_s7 = inlined_call_operand.hbm [shape: bf16[1024,128], index: 7, kind: input, shape index: {}]   ;;  %s9283_s8 = inlined_call_operand.vmem [shape: f32[1,128], index: 8, kind: input, shape index: {}]   ;;  %s9284_s9 = inlined_call_operand.hbm [shape: f32[128,128], index: 9, kind: output, shape index: {}]  }
   0x1   :  { %15 = vsyncpa [#allocation6], 0 }
   0x2   :  { %16 = vsyncpa [#allocation9], 0 }
   0x3   :  { %17 = vsyncpa [#allocation12], 0 }
   0x4   :  { %18 = vsyncpa [#allocation15], 0  ;;  %s37_s11 = sshll.u32 %s9276_s1, 4  ;;  %s38_s11 = int_to_ptr.hbm [resolvable:$true] %s37_s11 }
   0x5   :  { %19 = vsyncpa [#allocation4], 0  ;;  %s8184_s12 = smov [#allocation5]   ;;  %s61_s16 = sshll.u32 %s9278_s3, 4  ;;  %s62_s16 = int_to_ptr.hbm [resolvable:$true] %s61_s16 }
   0x6   :  { %s39_s13 = sshll.u32 %s8184_s12, 4  ;;  %s8185_s17 = smov 128   ;;  %s40_s13 = int_to_ptr.vmem [resolvable:$true] %s39_s13 }
   0x7   :  { %s8186_s18 = smov 8   ;;  %s8187_s19 = smov [#allocation8]  }
   0x8   :  { %45 = dma.hbm_to_vmem [thread:$0]  %s38_s11, 2048, %s40_s13, [#allocation6], %s8185_s17, %s8185_s17, %s8186_s18  }
   0x9   :  { %s63_s20 = sshll.u32 %s8187_s19, 4  ;;  %s8188_s1 = smov 256   ;;  %s64_s20 = int_to_ptr.vmem [resolvable:$true] %s63_s20 }
   0xa   :  { %s8189_s21 = smov 16   ;;  %s85_s24 = sshll.u32 %s9280_s5, 4  ;;  %s86_s24 = int_to_ptr.hbm [resolvable:$true] %s85_s24 }
   0xb   :  { %69 = dma.hbm_to_vmem [thread:$0]  %s62_s16, 8192, %s64_s20, [#allocation9], %s8188_s1, %s8188_s1, %s8189_s21  }
   0xc   :  { %s8190_s25 = smov [#allocation11]   ;;  %s24_s28 = sshll.u32 %s9275_s0, 4  ;;  %s25_s28 = int_to_ptr.hbm [resolvable:$true] %s24_s28 }
   0xd   :  { %s87_s3 = sshll.u32 %s8190_s25, 4  ;;  %s8191_s29 = smov 512   ;;  %s88_s3 = int_to_ptr.vmem [resolvable:$true] %s87_s3 }
   0xe   :  { %s8192_s30 = smov 32   ;;  %s8193_s10 = smov [#allocation2]  }
   0xf   :  { %93 = dma.hbm_to_vmem [thread:$0]  %s86_s24, 32768, %s88_s3, [#allocation12], %s8191_s29, %s8191_s29, %s8192_s30  }
  0x10   :  { %s26_s11 = sshll.u32 %s8193_s10, 4  ;;  %s8194_s12 = smov 64   ;;  %s27_s11 = int_to_ptr.vmem [resolvable:$true] %s26_s11 }
  0x11   :  { %s8195_s13 = smov 4   ;;  %s51_s15 = sshll.u32 %s9277_s2, 4  ;;  %s52_s15 = int_to_ptr.hbm [resolvable:$true] %s51_s15 }
  0x12   :  { %32 = dma.hbm_to_vmem [thread:$0]  %s25_s28, 1024, %s27_s11, [#allocation3], %s8194_s12, %s8194_s12, %s8195_s13  }
  0x13   :  { %s8196_s16 = smov [#allocation7]   ;;  %s75_s1 = sshll.u32 %s9279_s4, 4  ;;  %s76_s1 = int_to_ptr.hbm [resolvable:$true] %s75_s1 }
  0x14   :  { %s53_s19 = sshll.u32 %s8196_s16, 4  ;;  %s8197_s21 = smov [#allocation10]   ;;  %s54_s19 = int_to_ptr.vmem [resolvable:$true] %s53_s19 }
  0x15   :  { %56 = dma.hbm_to_vmem [thread:$0]  %s52_s15, 32, %s54_s19, [#allocation6]  }
  0x16   :  { %s77_s22 = sshll.u32 %s8197_s21, 4  ;;  %s99_s25 = sshll.u32 %s9281_s6, 4  ;;  %s78_s22 = int_to_ptr.vmem [resolvable:$true] %s77_s22  ;;  %s100_s25 = int_to_ptr.hbm [resolvable:$true] %s99_s25 }
  0x17   :  { %80 = dma.hbm_to_vmem [thread:$0]  %s76_s1, 64, %s78_s22, [#allocation9]  }
  0x18   :  { %s109_s26 = sshll.u32 %s9282_s7, 4  ;;  %s8198_s27 = smov [#allocation13]   ;;  %s110_s26 = int_to_ptr.hbm [resolvable:$true] %s109_s26 }
  0x19   :  { %s101_s28 = sshll.u32 %s8198_s27, 4  ;;  %s8199_s4 = smov [#allocation14]   ;;  %s102_s28 = int_to_ptr.vmem [resolvable:$true] %s101_s28 }
  0x1a   :  { %104 = dma.hbm_to_vmem [thread:$0]  %s100_s25, 128, %s102_s28, [#allocation12]  }
  0x1b   :  { %s111_s29 = sshll.u32 %s8199_s4, 4  ;;  %s112_s29 = int_to_ptr.vmem [resolvable:$true] %s111_s29 }
  0x1c   :  { %117 = dma.hbm_to_vmem [thread:$0]  %s110_s26, 8192, %s112_s29, [#allocation15], %s8194_s12, %s8194_s12, %s8195_s13  }
  0x1d   :  { %8172 = dma.done.wait [#allocation3], 1024  }
  0x1e   :  { %8173 = vsyncadd [#allocation3], 4294966272 }
  0x1f   :  { %8174 = dma.done.wait [#allocation6], 2080  }
  0x20   :  { %8175 = vsyncadd [#allocation6], 4294965216 }
  0x21   :  { %8176 = dma.done.wait [#allocation9], 8256  }
  0x22   :  { %8177 = vsyncadd [#allocation9], 4294959040 }
  0x23   :  { %8178 = dma.done.wait [#allocation12], 32896  }
  0x24   :  { %8179 = vsyncadd [#allocation12], 4294934400 }
  0x25   :  { %8180 = dma.done.wait [#allocation15], 8192  }
  0x26   :  { %8181 = vsyncadd [#allocation15], 4294959104  ;;  %v5937_v0 = vld [vmem:[#allocation5 + $0x70] sm:$0xf]  ;;  %v7502_v1 = vld [vmem:[#allocation5 + $0x74] sm:$0xf0] }
  0x27   :  { %v7501_v2 = vld [vmem:[#allocation5 + $0x74] sm:$0xf]  ;;  %v5938_v3 = vor.u32 %v7502_v1, %v5937_v0  ;;  %v5939_v4 = vld [vmem:[#allocation5 + $0x78] sm:$0xf0]  ;;  %v5929_v5 = vld [vmem:[#allocation5 + $0x60] sm:$0xf] }
  0x28   :  { %v7500_v6 = vld [vmem:[#allocation5 + $0x64] sm:$0xf0]  ;;  %v5942_v7 = vor.u32 %v7501_v2, %v5939_v4  ;;  %v7499_v8 = vld [vmem:[#allocation5 + $0x64] sm:$0xf]  ;;  %v5931_v9 = vld [vmem:[#allocation5 + $0x68] sm:$0xf0] }
  0x29   :  { %318 = vmatpush.bf16.msra.mxu0 %v5938_v3  ;;  %v5930_v10 = vor.u32 %v7500_v6, %v5929_v5  ;;  %7887 = vmatpush.bf16.msra.mxu2 %v5938_v3  ;;  %v5934_v11 = vor.u32 %v7499_v8, %v5931_v9  ;;  %v5921_v12 = vld [vmem:[#allocation5 + $0x50] sm:$0xf]  ;;  %v7498_v13 = vld [vmem:[#allocation5 + $0x54] sm:$0xf0]  ;;  %v7497_v14 = vld [vmem:[#allocation5 + $0x54] sm:$0xf] }
  0x2a   :  { %367 = vmatpush.bf16.msra.mxu1 %v5942_v7  ;;  %7895 = vmatpush.bf16.msra.mxu3 %v5942_v7  ;;  %v5923_v15 = vld [vmem:[#allocation5 + $0x58] sm:$0xf0]  ;;  %v5922_v16 = vor.u32 %v7498_v13, %v5921_v12  ;;  %v5913_v18 = vld [vmem:[#allocation5 + $0x40] sm:$0xf]  ;;  %v7496_v19 = vld [vmem:[#allocation5 + $0x44] sm:$0xf0] }
  0x2b   :  { %v5926_v17 = vor.u32 %v7497_v14, %v5923_v15  ;;  %v7495_v20 = vld [vmem:[#allocation5 + $0x44] sm:$0xf]  ;;  %v5915_v21 = vld [vmem:[#allocation5 + $0x48] sm:$0xf0]  ;;  %v5914_v22 = vor.u32 %v7496_v19, %v5913_v18  ;;  %v5905_v24 = vld [vmem:[#allocation5 + $0x30] sm:$0xf] }
  0x2c   :  { %v5918_v23 = vor.u32 %v7495_v20, %v5915_v21  ;;  %v7494_v25 = vld [vmem:[#allocation5 + $0x34] sm:$0xf0]  ;;  %v7493_v26 = vld [vmem:[#allocation5 + $0x34] sm:$0xf]  ;;  %v5907_v27 = vld [vmem:[#allocation5 + $0x38] sm:$0xf0] }
  0x2d   :  { %319 = vmatpush.bf16.msra.mxu0 %v5930_v10  ;;  %7888 = vmatpush.bf16.msra.mxu2 %v5930_v10  ;;  %v5906_v28 = vor.u32 %v7494_v25, %v5905_v24  ;;  %v5910_v29 = vor.u32 %v7493_v26, %v5907_v27  ;;  %v5897_v30 = vld [vmem:[#allocation5 + $0x20] sm:$0xf]  ;;  %v7492_v31 = vld [vmem:[#allocation5 + $0x24] sm:$0xf0]  ;;  %v7491_v32 = vld [vmem:[#allocation5 + $0x24] sm:$0xf] }
  0x2e   :  { %368 = vmatpush.bf16.msra.mxu1 %v5934_v11  ;;  %7896 = vmatpush.bf16.msra.mxu3 %v5934_v11  ;;  %v5899_v33 = vld [vmem:[#allocation5 + $0x28] sm:$0xf0]  ;;  %v5898_v34 = vor.u32 %v7492_v31, %v5897_v30  ;;  %v5889_v36 = vld [vmem:[#allocation5 + $0x10] sm:$0xf]  ;;  %v7490_v37 = vld [vmem:[#allocation5 + $0x14] sm:$0xf0] }
  0x2f   :  { %v5902_v35 = vor.u32 %v7491_v32, %v5899_v33  ;;  %v7489_v38 = vld [vmem:[#allocation5 + $0x14] sm:$0xf]  ;;  %v5891_v39 = vld [vmem:[#allocation5 + $0x18] sm:$0xf0]  ;;  %v5890_v40 = vor.u32 %v7490_v37, %v5889_v36  ;;  %v5881_v42 = vld [vmem:[#allocation5] sm:$0xf] }
  0x30   :  { %v5894_v41 = vor.u32 %v7489_v38, %v5891_v39  ;;  %v7488_v43 = vld [vmem:[#allocation5 + $0x4] sm:$0xf0]  ;;  %v7487_v44 = vld [vmem:[#allocation5 + $0x4] sm:$0xf]  ;;  %v5883_v45 = vld [vmem:[#allocation5 + $0x8] sm:$0xf0] }
  0x31   :  { %320 = vmatpush.bf16.msra.mxu0 %v5922_v16  ;;  %7889 = vmatpush.bf16.msra.mxu2 %v5922_v16  ;;  %v5882_v46 = vor.u32 %v7488_v43, %v5881_v42  ;;  %v5886_v47 = vor.u32 %v7487_v44, %v5883_v45  ;;  %v7479_v48 = vld [vmem:[#allocation2] sm:$0xff]  ;;  %v7480_v49 = vld [vmem:[#allocation2 + $0x8] sm:$0xff]  ;;  %v7533_v52 = vld [vmem:[#allocation8 + $0xec] sm:$0xf0]  ;;  %s5830_s12 = sshll.u32 %s9284_s9, 4  ;;  %s5831_s12 = int_to_ptr.hbm [resolvable:$true] %s5830_s12 }
  0x32   :  { %369 = vmatpush.bf16.msra.mxu1 %v5926_v17  ;;  %7897 = vmatpush.bf16.msra.mxu3 %v5926_v17  ;;  %v7483_v50 = vld [vmem:[#allocation2 + $0x20] sm:$0xff]  ;;  %v7565_v55 = vld [vmem:[#allocation8 + $0x1ec] sm:$0xf0]  ;;  %v6059_v61 = vld [vmem:[#allocation8 + $0xf0] sm:$0xf0] }
  0x33   :  { %v6057_v51 = vld [vmem:[#allocation8 + $0xe0] sm:$0xf]  ;;  %v7529_v58 = vld [vmem:[#allocation8 + $0xcc] sm:$0xf0]  ;;  %v7531_v59 = vld [vmem:[#allocation8 + $0xe4] sm:$0xf] }
  0x34   :  { %v6058_v53 = vor.u32 %v7533_v52, %v6057_v51  ;;  %v6185_v54 = vld [vmem:[#allocation8 + $0x1e0] sm:$0xf]  ;;  %v7561_v63 = vld [vmem:[#allocation8 + $0x1cc] sm:$0xf0]  ;;  %v6062_v0 = vor.u32 %v7531_v59, %v6059_v61  ;;  %v7563_v2 = vld [vmem:[#allocation8 + $0x1e4] sm:$0xf] }
  0x35   :  { %321 = vmatpush.bf16.msra.mxu0 %v5914_v22  ;;  %7890 = vmatpush.bf16.msra.mxu2 %v5914_v22  ;;  %v6186_v56 = vor.u32 %v7565_v55, %v6185_v54  ;;  %v6041_v57 = vld [vmem:[#allocation8 + $0xc0] sm:$0xf]  ;;  %v6187_v3 = vld [vmem:[#allocation8 + $0x1f0] sm:$0xf0]  ;;  %v7525_v6 = vld [vmem:[#allocation8 + $0xac] sm:$0xf0] }
  0x36   :  { %370 = vmatpush.bf16.msra.mxu1 %v5918_v23  ;;  %7898 = vmatpush.bf16.msra.mxu3 %v5918_v23  ;;  %v6042_v60 = vor.u32 %v7529_v58, %v6041_v57  ;;  %v6169_v62 = vld [vmem:[#allocation8 + $0x1c0] sm:$0xf]  ;;  %v6190_v5 = vor.u32 %v7563_v2, %v6187_v3  ;;  %v7527_v7 = vld [vmem:[#allocation8 + $0xc4] sm:$0xf]  ;;  %v6043_v8 = vld [vmem:[#allocation8 + $0xd0] sm:$0xf0] }
  0x37   :  { %v6170_v1 = vor.u32 %v7561_v63, %v6169_v62  ;;  %v6025_v4 = vld [vmem:[#allocation8 + $0xa0] sm:$0xf]  ;;  %v6046_v9 = vor.u32 %v7527_v7, %v6043_v8  ;;  %v7481_v11 = vld [vmem:[#allocation2 + $0x10] sm:$0xff]  ;;  %v7484_v12 = vld [vmem:[#allocation2 + $0x28] sm:$0xff] }
  0x38   :  { %v6026_v10 = vor.u32 %v7525_v6, %v6025_v4  ;;  %v6153_v13 = vld [vmem:[#allocation8 + $0x1a0] sm:$0xf]  ;;  %v7557_v14 = vld [vmem:[#allocation8 + $0x1ac] sm:$0xf0]  ;;  %v7559_v15 = vld [vmem:[#allocation8 + $0x1c4] sm:$0xf] }
  0x39   :  { %322 = vmatpush.bf16.msra.mxu0 %v5906_v28  ;;  %7891 = vmatpush.bf16.msra.mxu2 %v5906_v28  ;;  %v6154_v16 = vor.u32 %v7557_v14, %v6153_v13  ;;  %v6171_v17 = vld [vmem:[#allocation8 + $0x1d0] sm:$0xf0]  ;;  %v6009_v18 = vld [vmem:[#allocation8 + $0x80] sm:$0xf]  ;;  %v7521_v19 = vld [vmem:[#allocation8 + $0x8c] sm:$0xf0] }
  0x3a   :  { %371 = vmatpush.bf16.msra.mxu1 %v5910_v29  ;;  %7899 = vmatpush.bf16.msra.mxu3 %v5910_v29  ;;  %v6174_v20 = vor.u32 %v7559_v15, %v6171_v17  ;;  %v6010_v21 = vor.u32 %v7521_v19, %v6009_v18  ;;  %v7523_v22 = vld [vmem:[#allocation8 + $0xa4] sm:$0xf]  ;;  %v6027_v23 = vld [vmem:[#allocation8 + $0xb0] sm:$0xf0]  ;;  %v6137_v24 = vld [vmem:[#allocation8 + $0x180] sm:$0xf] }
  0x3b   :  { %v6030_v25 = vor.u32 %v7523_v22, %v6027_v23  ;;  %v7553_v26 = vld [vmem:[#allocation8 + $0x18c] sm:$0xf0]  ;;  %v7555_v27 = vld [vmem:[#allocation8 + $0x1a4] sm:$0xf]  ;;  %v6155_v28 = vld [vmem:[#allocation8 + $0x1b0] sm:$0xf0] }
  0x3c   :  { %v6138_v29 = vor.u32 %v7553_v26, %v6137_v24  ;;  %v6158_v30 = vor.u32 %v7555_v27, %v6155_v28  ;;  %v5993_v31 = vld [vmem:[#allocation8 + $0x60] sm:$0xf]  ;;  %v7517_v32 = vld [vmem:[#allocation8 + $0x6c] sm:$0xf0]  ;;  %v7519_v33 = vld [vmem:[#allocation8 + $0x84] sm:$0xf] }
  0x3d   :  { %323 = vmatpush.bf16.msra.mxu0 %v5898_v34  ;;  %7892 = vmatpush.bf16.msra.mxu2 %v5898_v34  ;;  %v5994_v34 = vor.u32 %v7517_v32, %v5993_v31  ;;  %v6121_v36 = vld [vmem:[#allocation8 + $0x160] sm:$0xf]  ;;  %v7549_v37 = vld [vmem:[#allocation8 + $0x16c] sm:$0xf0]  ;;  %v7551_v39 = vld [vmem:[#allocation8 + $0x184] sm:$0xf] }
  0x3e   :  { %372 = vmatpush.bf16.msra.mxu1 %v5902_v35  ;;  %7900 = vmatpush.bf16.msra.mxu3 %v5902_v35  ;;  %v6011_v35 = vld [vmem:[#allocation8 + $0x90] sm:$0xf0]  ;;  %v6122_v42 = vor.u32 %v7549_v37, %v6121_v36  ;;  %v7513_v43 = vld [vmem:[#allocation8 + $0x4c] sm:$0xf0]  ;;  %v7515_v44 = vld [vmem:[#allocation8 + $0x64] sm:$0xf] }
  0x3f   :  { %v6014_v38 = vor.u32 %v7519_v33, %v6011_v35  ;;  %v5995_v45 = vld [vmem:[#allocation8 + $0x70] sm:$0xf0]  ;;  %v7547_v51 = vld [vmem:[#allocation8 + $0x164] sm:$0xf]  ;;  %v5961_v63 = vld [vmem:[#allocation8 + $0x20] sm:$0xf] }
  0x40   :  { %v6123_v52 = vld [vmem:[#allocation8 + $0x170] sm:$0xf0]  ;;  %v7511_v58 = vld [vmem:[#allocation8 + $0x44] sm:$0xf]  ;;  %v7541_v4 = vld [vmem:[#allocation8 + $0x12c] sm:$0xf0] }
  0x41   :  { %324 = vmatpush.bf16.msra.mxu0 %v5890_v40  ;;  %7893 = vmatpush.bf16.msra.mxu2 %v5890_v40  ;;  %v6139_v40 = vld [vmem:[#allocation8 + $0x190] sm:$0xf0]  ;;  %v7507_v6 = vld [vmem:[#allocation8 + $0x24] sm:$0xf]  ;;  %v7505_v13 = vld [vmem:[#allocation8 + $0xc] sm:$0xf0] }
  0x42   :  { %373 = vmatpush.bf16.msra.mxu1 %v5894_v41  ;;  %7901 = vmatpush.bf16.msra.mxu3 %v5894_v41  ;;  %v5977_v41 = vld [vmem:[#allocation8 + $0x40] sm:$0xf]  ;;  %v7485_v55 = vld [vmem:[#allocation2 + $0x30] sm:$0xff]  ;;  %v7486_v57 = vld [vmem:[#allocation2 + $0x38] sm:$0xff] }
  0x43   :  { %v5979_v59 = vld [vmem:[#allocation8 + $0x50] sm:$0xf0]  ;;  %v7539_v8 = vld [vmem:[#allocation8 + $0x124] sm:$0xf]  ;;  %v6073_v14 = vld [vmem:[#allocation8 + $0x100] sm:$0xf] }
  0x44   :  { %v5982_v61 = vor.u32 %v7511_v58, %v5979_v59  ;;  %v6107_v62 = vld [vmem:[#allocation8 + $0x150] sm:$0xf0]  ;;  %v7503_v17 = vld [vmem:[#allocation8 + $0x4] sm:$0xf]  ;;  %v6065_v24 = vld [vmem:[#allocation8 + $0xe8] sm:$0xf] }
  0x45   :  { %325 = vmatpush.bf16.msra.mxu0 %v5882_v46  ;;  %7894 = vmatpush.bf16.msra.mxu2 %v5882_v46  ;;  %v6142_v46 = vor.u32 %v7551_v39, %v6139_v40  ;;  %v5963_v7 = vld [vmem:[#allocation8 + $0x30] sm:$0xf0]  ;;  %v6193_v26 = vld [vmem:[#allocation8 + $0x1e8] sm:$0xf]  ;;  %v7566_v28 = vld [vmem:[#allocation8 + $0x1f4] sm:$0xf0] }
  0x46   :  { %374 = vmatpush.bf16.msra.mxu1 %v5886_v47  ;;  %7902 = vmatpush.bf16.msra.mxu3 %v5886_v47  ;;  %v5978_v47 = vor.u32 %v7513_v43, %v5977_v41  ;;  %v5947_v18 = vld [vmem:[#allocation8 + $0x10] sm:$0xf0]  ;;  %v7532_v32 = vld [vmem:[#allocation8 + $0xec] sm:$0xf]  ;;  %v6067_v33 = vld [vmem:[#allocation8 + $0xf8] sm:$0xf0] }
  0x47   :  { %v6075_v22 = vld [vmem:[#allocation8 + $0x110] sm:$0xf0]  ;;  %v6070_v37 = vor.u32 %v7532_v32, %v6067_v33  ;;  %v6049_v43 = vld [vmem:[#allocation8 + $0xc8] sm:$0xf]  ;;  %v7556_v32 = vld [vmem:[#allocation8 + $0x1ac] sm:$0xf] }
  0x48   :  { %326 = vmatmul.bf16.vlgmr.msra.gmra.mxu0 %v7479_v48  ;;  %346 = vmatmul.bf16.vlgmr.msra.gmra.mxu2 %v7483_v50 }
  0x49   :  { %375 = vmatmul.bf16.vlgmr.msra.gmra.mxu1 %v7479_v48  ;;  %395 = vmatmul.bf16.vlgmr.msra.gmra.mxu3 %v7483_v50  ;;  %v6105_v48 = vld [vmem:[#allocation8 + $0x140] sm:$0xf]  ;;  %v5998_v50 = vor.u32 %v7515_v44, %v5995_v45  ;;  %v7530_v44 = vld [vmem:[#allocation8 + $0xd4] sm:$0xf0]  ;;  %v6177_v45 = vld [vmem:[#allocation8 + $0x1c8] sm:$0xf] }
  0x4a   :  { %890 = vmatpush.bf16.msrb.mxu2 %v6058_v53  ;;  %939 = vmatpush.bf16.msrb.mxu3 %v6186_v56  ;;  %v7482_v53 = vld [vmem:[#allocation2 + $0x18] sm:$0xff]  ;;  %v6126_v56 = vor.u32 %v7547_v51, %v6123_v52 }
  0x4b   :  { %988 = vmatpush.bf16.msrb.mxu0 %v6062_v0  ;;  %1037 = vmatpush.bf16.msrb.mxu1 %v6190_v5  ;;  %v7509_v0 = vld [vmem:[#allocation8 + $0x2c] sm:$0xf0] }
  0x4c   :  { %v5962_v3 = vor.u32 %v7509_v0, %v5961_v63  ;;  %v7528_v0 = vld [vmem:[#allocation8 + $0xcc] sm:$0xf] }
  0x4e   :  { %891 = vmatpush.bf16.msrb.mxu2 %v6042_v60  ;;  %940 = vmatpush.bf16.msrb.mxu3 %v6170_v1  ;;  %v7543_v60 = vld [vmem:[#allocation8 + $0x144] sm:$0xf]  ;;  %v6089_v1 = vld [vmem:[#allocation8 + $0x120] sm:$0xf] }
  0x4f   :  { %989 = vmatpush.bf16.msrb.mxu0 %v6046_v9  ;;  %1038 = vmatpush.bf16.msrb.mxu1 %v6174_v20  ;;  %v6110_v2 = vor.u32 %v7543_v60, %v6107_v62  ;;  %v6090_v5 = vor.u32 %v7541_v4, %v6089_v1  ;;  %v5966_v9 = vor.u32 %v7507_v6, %v5963_v7  ;;  %v6051_v1 = vld [vmem:[#allocation8 + $0xd8] sm:$0xf0] }
  0x50   :  { %v5950_v20 = vor.u32 %v7503_v17, %v5947_v18  ;;  %v6054_v4 = vor.u32 %v7528_v0, %v6051_v1 }
  0x52   :  { %892 = vmatpush.bf16.msrb.mxu2 %v6026_v10  ;;  %941 = vmatpush.bf16.msrb.mxu3 %v6154_v16  ;;  %v6091_v10 = vld [vmem:[#allocation8 + $0x130] sm:$0xf0]  ;;  %v7537_v16 = vld [vmem:[#allocation8 + $0x10c] sm:$0xf0] }
  0x53   :  { %990 = vmatpush.bf16.msrb.mxu0 %v6030_v25  ;;  %1039 = vmatpush.bf16.msrb.mxu1 %v6158_v30  ;;  %v6074_v19 = vor.u32 %v7537_v16, %v6073_v14  ;;  %v7534_v25 = vld [vmem:[#allocation8 + $0xf4] sm:$0xf0]  ;;  %v184_v30 = vld [vmem:[#allocation7] sm:$0x3] }
  0x54   :  { %v6066_v27 = vor.u32 %v7534_v25, %v6065_v24  ;;  %v8278_v35 = vperm.slane %v184_v30, 0  ;;  %v8280_v39 = vperm.slane %v184_v30, 1  ;;  %v7524_v30 = vld [vmem:[#allocation8 + $0xac] sm:$0xf] }
  0x56   :  { %893 = vmatpush.bf16.msrb.mxu2 %v6010_v21  ;;  %942 = vmatpush.bf16.msrb.mxu3 %v6138_v29  ;;  %v7535_v21 = vld [vmem:[#allocation8 + $0x104] sm:$0xf]  ;;  %v6194_v29 = vor.u32 %v7566_v28, %v6193_v26 }
  0x57   :  { %991 = vmatpush.bf16.msrb.mxu0 %v6014_v38  ;;  %1040 = vmatpush.bf16.msrb.mxu1 %v6142_v46  ;;  %v6078_v23 = vor.u32 %v7535_v21, %v6075_v22  ;;  %v6195_v38 = vld [vmem:[#allocation8 + $0x1f8] sm:$0xf0]  ;;  %v6050_v46 = vor.u32 %v7530_v44, %v6049_v43  ;;  %v7554_v43 = vld [vmem:[#allocation8 + $0x194] sm:$0xf0]  ;;  %v7520_v44 = vld [vmem:[#allocation8 + $0x8c] sm:$0xf] }
  0x58   :  { %331 = vmatmul.bf16.gmra.mxu0 %v7480_v49  ;;  %351 = vmatmul.bf16.gmra.mxu2 %v7484_v12 }
  0x59   :  { %380 = vmatmul.bf16.gmra.mxu1 %v7480_v49  ;;  %400 = vmatmul.bf16.gmra.mxu3 %v7484_v12  ;;  %v7545_v49 = vld [vmem:[#allocation8 + $0x14c] sm:$0xf0]  ;;  %v5945_v12 = vld [vmem:[#allocation8] sm:$0xf] }
  0x5a   :  { %894 = vmatpush.bf16.msrb.mxu2 %v5994_v34  ;;  %943 = vmatpush.bf16.msrb.mxu3 %v6122_v42  ;;  %v6106_v54 = vor.u32 %v7545_v49, %v6105_v48  ;;  %v5946_v15 = vor.u32 %v7505_v13, %v5945_v12  ;;  %v7564_v34 = vld [vmem:[#allocation8 + $0x1ec] sm:$0xf]  ;;  %v7558_v13 = vld [vmem:[#allocation8 + $0x1b4] sm:$0xf0] }
  0x5b   :  { %992 = vmatpush.bf16.msrb.mxu0 %v5998_v50  ;;  %1041 = vmatpush.bf16.msrb.mxu1 %v6126_v56  ;;  %v6198_v40 = vor.u32 %v7564_v34, %v6195_v38  ;;  %v6017_v38 = vld [vmem:[#allocation8 + $0x88] sm:$0xf] }
  0x5e   :  { %895 = vmatpush.bf16.msrb.mxu2 %v5978_v47  ;;  %944 = vmatpush.bf16.msrb.mxu3 %v6106_v54  ;;  %v7562_v47 = vld [vmem:[#allocation8 + $0x1d4] sm:$0xf0] }
  0x5f   :  { %993 = vmatpush.bf16.msrb.mxu0 %v5982_v61  ;;  %1042 = vmatpush.bf16.msrb.mxu1 %v6110_v2  ;;  %v6178_v49 = vor.u32 %v7562_v47, %v6177_v45  ;;  %v7560_v2 = vld [vmem:[#allocation8 + $0x1cc] sm:$0xf]  ;;  %v6019_v47 = vld [vmem:[#allocation8 + $0x98] sm:$0xf0] }
  0x62   :  { %896 = vmatpush.bf16.msrb.mxu2 %v5962_v3  ;;  %945 = vmatpush.bf16.msrb.mxu3 %v6090_v5  ;;  %v6179_v5 = vld [vmem:[#allocation8 + $0x1d8] sm:$0xf0] }
  0x63   :  { %994 = vmatpush.bf16.msrb.mxu0 %v5966_v9  ;;  %v6182_v6 = vor.u32 %v7560_v2, %v6179_v5  ;;  %v6033_v9 = vld [vmem:[#allocation8 + $0xa8] sm:$0xf] }
  0x66   :  { %897 = vmatpush.bf16.msrb.mxu2 %v5946_v15  ;;  %946 = vmatpush.bf16.msrb.mxu3 %v6074_v19 }
  0x67   :  { %995 = vmatpush.bf16.msrb.mxu0 %v5950_v20 }
  0x68   :  { %336 = vmatmul.bf16.gmra.mxu0 %v7481_v11  ;;  %356 = vmatmul.bf16.gmra.mxu2 %v7485_v55 }
  0x69   :  { %385 = vmatmul.bf16.gmra.mxu1 %v7481_v11  ;;  %405 = vmatmul.bf16.gmra.mxu3 %v7485_v55  ;;  %v6094_v11 = vor.u32 %v7539_v8, %v6091_v10  ;;  %v7526_v10 = vld [vmem:[#allocation8 + $0xb4] sm:$0xf0] }
  0x6a   :  { %1086 = vmatpush.bf16.msra.mxu2 %v6066_v27  ;;  %1135 = vmatpush.bf16.msra.mxu3 %v6194_v29  ;;  %v6034_v12 = vor.u32 %v7526_v10, %v6033_v9  ;;  %v6001_v9 = vld [vmem:[#allocation8 + $0x68] sm:$0xf]  ;;  %v7518_v10 = vld [vmem:[#allocation8 + $0x74] sm:$0xf0] }
  0x6b   :  { %1043 = vmatpush.bf16.msrb.mxu1 %v6094_v11  ;;  %1184 = vmatpush.bf16.msra.mxu0 %v6070_v37  ;;  %v6161_v11 = vld [vmem:[#allocation8 + $0x1a8] sm:$0xf] }
  0x6c   :  { %v6162_v15 = vor.u32 %v7558_v13, %v6161_v11  ;;  %v6002_v11 = vor.u32 %v7518_v10, %v6001_v9  ;;  %v7550_v13 = vld [vmem:[#allocation8 + $0x174] sm:$0xf0] }
  0x6e   :  { %1087 = vmatpush.bf16.msra.mxu2 %v6050_v46  ;;  %1136 = vmatpush.bf16.msra.mxu3 %v6178_v49 }
  0x6f   :  { %1044 = vmatpush.bf16.msrb.mxu1 %v6078_v23  ;;  %1185 = vmatpush.bf16.msra.mxu0 %v6054_v4 }
  0x72   :  { %1088 = vmatpush.bf16.msra.mxu2 %v6034_v12  ;;  %1137 = vmatpush.bf16.msra.mxu3 %v6162_v15  ;;  %v6129_v12 = vld [vmem:[#allocation8 + $0x168] sm:$0xf] }
  0x73   :  { %1233 = vmatpush.bf16.msra.mxu1 %v6198_v40  ;;  %v7522_v40 = vld [vmem:[#allocation8 + $0x94] sm:$0xf0]  ;;  %v6130_v15 = vor.u32 %v7550_v13, %v6129_v12 }
  0x77   :  { %1234 = vmatpush.bf16.msra.mxu1 %v6182_v6 }
  0x78   :  { %341 = vmatmul.bf16.gmra.mxu0 %v7482_v53  ;;  %361 = vmatmul.bf16.gmra.mxu2 %v7486_v57 }
  0x79   :  { %390 = vmatmul.bf16.gmra.mxu1 %v7482_v53  ;;  %410 = vmatmul.bf16.gmra.mxu3 %v7486_v57 }
  0xc5   :  { %v327_v31 = vpop.f32.mrf.mxu0 }
  0xc6   :  { %v376_v36 = vpop.f32.mrf.mxu1  ;;  %v328_v41 = vadd.f32 %v327_v31, %v8278_v35  ;;  %v6035_v31 = vld [vmem:[#allocation8 + $0xb8] sm:$0xf0] }
  0xc7   :  { %v377_v42 = vadd.f32 %v376_v36, %v8280_v39  ;;  %v6038_v34 = vor.u32 %v7524_v30, %v6035_v31  ;;  %v6163_v36 = vld [vmem:[#allocation8 + $0x1b8] sm:$0xf0] }
  0xc8   :  { %v416_v50 = vmul.f32 0.2, %v328_v41  ;;  %v6166_v37 = vor.u32 %v7556_v32, %v6163_v36 }
  0xc9   :  { %v417_v53 = vmul.f32 0.2, %v377_v42  ;;  %1186 = vmatpush.bf16.msra.mxu0 %v6038_v34 }
  0xca   :  { %v448_v57 = vmax.f32 %v328_v41, %v416_v50  ;;  %v6145_v41 = vld [vmem:[#allocation8 + $0x188] sm:$0xf]  ;;  %1235 = vmatpush.bf16.msra.mxu1 %v6166_v37  ;;  %v6022_v50 = vor.u32 %v7520_v44, %v6019_v47 }
  0xcb   :  { %v449_v59 = vmax.f32 %v377_v42, %v417_v53  ;;  %v6018_v42 = vor.u32 %v7522_v40, %v6017_v38  ;;  %v6146_v46 = vor.u32 %v7554_v43, %v6145_v41 }
  0xcd   :  { %v329_v48 = vpop.f32.mrf.mxu0  ;;  %1089 = vmatpush.bf16.msra.mxu2 %v6018_v42  ;;  %1138 = vmatpush.bf16.msra.mxu3 %v6146_v46  ;;  %v7514_v46 = vld [vmem:[#allocation8 + $0x54] sm:$0xf0] }
  0xce   :  { %v330_v51 = vadd.f32 %v329_v48, %v8278_v35  ;;  %v378_v52 = vpop.f32.mrf.mxu1  ;;  %v7552_v48 = vld [vmem:[#allocation8 + $0x18c] sm:$0xf]  ;;  %1187 = vmatpush.bf16.msra.mxu0 %v6022_v50  ;;  %v6113_v50 = vld [vmem:[#allocation8 + $0x148] sm:$0xf] }
  0xcf   :  { %v379_v54 = vadd.f32 %v378_v52, %v8280_v39 }
  0xd0   :  { %v418_v55 = vmul.f32 0.2, %v330_v51 }
  0xd1   :  { %v419_v56 = vmul.f32 0.2, %v379_v54  ;;  %1090 = vmatpush.bf16.msra.mxu2 %v6002_v11  ;;  %1139 = vmatpush.bf16.msra.mxu3 %v6130_v15  ;;  %v7510_v15 = vld [vmem:[#allocation8 + $0x34] sm:$0xf0] }
  0xd2   :  { %v450_v58 = vmax.f32 %v330_v51, %v418_v55  ;;  %v6147_v51 = vld [vmem:[#allocation8 + $0x198] sm:$0xf0] }
  0xd3   :  { %v451_v60 = vmax.f32 %v379_v54, %v419_v56  ;;  %v6150_v52 = vor.u32 %v7552_v48, %v6147_v51  ;;  %v7546_v51 = vld [vmem:[#allocation8 + $0x154] sm:$0xf0] }
  0xd4   :  { %v8286_v61 = vpack.c.bf16 %v450_v58, %v448_v57 }
  0xd5   :  { %v8288_v62 = vpack.c.bf16 %v451_v60, %v449_v59  ;;  %v332_v63 = vpop.f32.mrf.mxu0  ;;  %1236 = vmatpush.bf16.msra.mxu1 %v6150_v52  ;;  %v347_v59 = vpop.f32.mrf.mxu2  ;;  %v7512_v52 = vld [vmem:[#allocation8 + $0x4c] sm:$0xf] }
  0xd6   :  { %v381_v3 = vpop.f32.mrf.mxu1  ;;  %898 = vmatmul.bf16.vlgmr.msrb.gmra.mxu2 %v8286_v61  ;;  %996 = vmatmul.bf16.vlgmr.msrb.gmra.mxu0 %v8286_v61  ;;  %v333_v7 = vadd.f32 %v332_v63, %v8278_v35  ;;  %v396_v63 = vpop.f32.mrf.mxu3  ;;  %v348_v47 = vadd.f32 %v347_v59, %v8278_v35 }
  0xd7   :  { %947 = vmatmul.bf16.vlgmr.msrb.gmra.mxu3 %v8288_v62  ;;  %1045 = vmatmul.bf16.vlgmr.msrb.gmra.mxu1 %v8288_v62  ;;  %v382_v8 = vadd.f32 %v381_v3, %v8280_v39 }
  0xd8   :  { %v420_v16 = vmul.f32 0.2, %v333_v7 }
  0xd9   :  { %v421_v19 = vmul.f32 0.2, %v382_v8 }
  0xda   :  { %v452_v23 = vmax.f32 %v333_v7, %v420_v16  ;;  %v7516_v16 = vld [vmem:[#allocation8 + $0x6c] sm:$0xf] }
  0xdb   :  { %v453_v25 = vmax.f32 %v382_v8, %v421_v19  ;;  %v6003_v19 = vld [vmem:[#allocation8 + $0x78] sm:$0xf0] }
  0xdd   :  { %v334_v14 = vpop.f32.mrf.mxu0 }
  0xde   :  { %v335_v17 = vadd.f32 %v334_v14, %v8278_v35  ;;  %v383_v18 = vpop.f32.mrf.mxu1  ;;  %v349_v14 = vpop.f32.mrf.mxu2 }
  0xdf   :  { %v384_v20 = vadd.f32 %v383_v18, %v8280_v39  ;;  %v398_v18 = vpop.f32.mrf.mxu3  ;;  %v350_v48 = vadd.f32 %v349_v14, %v8278_v35  ;;  %v5969_v14 = vld [vmem:[#allocation8 + $0x28] sm:$0xf] }
  0xe0   :  { %v422_v21 = vmul.f32 0.2, %v335_v17 }
  0xe1   :  { %v423_v22 = vmul.f32 0.2, %v384_v20  ;;  %v434_v59 = vmul.f32 0.2, %v350_v48 }
  0xe2   :  { %v454_v24 = vmax.f32 %v335_v17, %v422_v21  ;;  %v6131_v21 = vld [vmem:[#allocation8 + $0x178] sm:$0xf0] }
  0xe3   :  { %v455_v26 = vmax.f32 %v384_v20, %v423_v22  ;;  %v7548_v20 = vld [vmem:[#allocation8 + $0x16c] sm:$0xf] }
  0xe4   :  { %v8298_v27 = vpack.c.bf16 %v454_v24, %v452_v23  ;;  %v6006_v23 = vor.u32 %v7516_v16, %v6003_v19  ;;  %v6134_v24 = vor.u32 %v7548_v20, %v6131_v21  ;;  %v5970_v19 = vor.u32 %v7510_v15, %v5969_v14  ;;  %v6097_v20 = vld [vmem:[#allocation8 + $0x128] sm:$0xf]  ;;  %v7542_v21 = vld [vmem:[#allocation8 + $0x134] sm:$0xf0] }
  0xe5   :  { %v8300_v28 = vpack.c.bf16 %v455_v26, %v453_v25  ;;  %v337_v29 = vpop.f32.mrf.mxu0 }
  0xe6   :  { %v386_v33 = vpop.f32.mrf.mxu1  ;;  %903 = vmatmul.bf16.gmra.mxu2 %v8298_v27  ;;  %1001 = vmatmul.bf16.gmra.mxu0 %v8298_v27  ;;  %v338_v45 = vadd.f32 %v337_v29, %v8278_v35  ;;  %v352_v41 = vpop.f32.mrf.mxu2 }
  0xe7   :  { %952 = vmatmul.bf16.gmra.mxu3 %v8300_v28  ;;  %1050 = vmatmul.bf16.gmra.mxu1 %v8300_v28  ;;  %v387_v49 = vadd.f32 %v386_v33, %v8280_v39  ;;  %v401_v43 = vpop.f32.mrf.mxu3  ;;  %v353_v16 = vadd.f32 %v352_v41, %v8278_v35 }
  0xe8   :  { %v424_v54 = vmul.f32 0.2, %v338_v45  ;;  %1188 = vmatpush.bf16.msra.mxu0 %v6006_v23  ;;  %1237 = vmatpush.bf16.msra.mxu1 %v6134_v24  ;;  %v402_v23 = vadd.f32 %v401_v43, %v8280_v39 }
  0xe9   :  { %v425_v57 = vmul.f32 0.2, %v387_v49 }
  0xea   :  { %v456_v1 = vmax.f32 %v338_v45, %v424_v54  ;;  %v5985_v45 = vld [vmem:[#allocation8 + $0x48] sm:$0xf]  ;;  %v399_v54 = vadd.f32 %v398_v18, %v8280_v39 }
  0xeb   :  { %v457_v3 = vmax.f32 %v387_v49, %v425_v57  ;;  %v5986_v49 = vor.u32 %v7514_v46, %v5985_v45  ;;  %v7544_v57 = vld [vmem:[#allocation8 + $0x14c] sm:$0xf] }
  0xed   :  { %v339_v53 = vpop.f32.mrf.mxu0  ;;  %1091 = vmatpush.bf16.msra.mxu2 %v5986_v49  ;;  %v5953_v49 = vld [vmem:[#allocation8 + $0x8] sm:$0xf] }
  0xee   :  { %v340_v55 = vadd.f32 %v339_v53, %v8278_v35  ;;  %v388_v56 = vpop.f32.mrf.mxu1  ;;  %v397_v53 = vadd.f32 %v396_v63, %v8280_v39  ;;  %v466_v63 = vmax.f32 %v350_v48, %v434_v59  ;;  %v7536_v59 = vld [vmem:[#allocation8 + $0x10c] sm:$0xf] }
  0xef   :  { %v389_v58 = vadd.f32 %v388_v56, %v8280_v39  ;;  %v5987_v56 = vld [vmem:[#allocation8 + $0x58] sm:$0xf0] }
  0xf0   :  { %v426_v60 = vmul.f32 0.2, %v340_v55 }
  0xf1   :  { %v427_v0 = vmul.f32 0.2, %v389_v58  ;;  %1092 = vmatpush.bf16.msra.mxu2 %v5970_v19 }
  0xf2   :  { %v458_v2 = vmax.f32 %v340_v55, %v426_v60  ;;  %v6114_v55 = vor.u32 %v7546_v51, %v6113_v50  ;;  %v6115_v60 = vld [vmem:[#allocation8 + $0x158] sm:$0xf0]  ;;  %v7506_v50 = vld [vmem:[#allocation8 + $0x14] sm:$0xf0]  ;;  %v6081_v51 = vld [vmem:[#allocation8 + $0x108] sm:$0xf] }
  0xf3   :  { %v459_v4 = vmax.f32 %v389_v58, %v427_v0  ;;  %v5990_v58 = vor.u32 %v7512_v52, %v5987_v56  ;;  %v6118_v0 = vor.u32 %v7544_v57, %v6115_v60  ;;  %v7504_v56 = vld [vmem:[#allocation8 + $0xc] sm:$0xf]  ;;  %v5955_v57 = vld [vmem:[#allocation8 + $0x18] sm:$0xf0] }
  0xf4   :  { %v8310_v5 = vpack.c.bf16 %v458_v2, %v456_v1  ;;  %1140 = vmatpush.bf16.msra.mxu3 %v6114_v55  ;;  %v432_v1 = vmul.f32 0.2, %v348_v47  ;;  %v433_v2 = vmul.f32 0.2, %v397_v53  ;;  %v7538_v55 = vld [vmem:[#allocation8 + $0x114] sm:$0xf0] }
  0xf5   :  { %v8312_v6 = vpack.c.bf16 %v459_v4, %v457_v3  ;;  %v342_v7 = vpop.f32.mrf.mxu0  ;;  %1189 = vmatpush.bf16.msra.mxu0 %v5990_v58  ;;  %v435_v3 = vmul.f32 0.2, %v399_v54  ;;  %v354_v4 = vpop.f32.mrf.mxu2  ;;  %1238 = vmatpush.bf16.msra.mxu1 %v6118_v0  ;;  %v6082_v0 = vor.u32 %v7538_v55, %v6081_v51 }
  0xf6   :  { %v391_v8 = vpop.f32.mrf.mxu1  ;;  %908 = vmatmul.bf16.gmra.mxu2 %v8310_v5  ;;  %1006 = vmatmul.bf16.gmra.mxu0 %v8310_v5  ;;  %v343_v17 = vadd.f32 %v342_v7, %v8278_v35  ;;  %v403_v7 = vpop.f32.mrf.mxu3  ;;  %v465_v9 = vmax.f32 %v397_v53, %v433_v2  ;;  %v6083_v2 = vld [vmem:[#allocation8 + $0x118] sm:$0xf0] }
  0xf7   :  { %957 = vmatmul.bf16.gmra.mxu3 %v8312_v6  ;;  %1055 = vmatmul.bf16.gmra.mxu1 %v8312_v6  ;;  %v392_v22 = vadd.f32 %v391_v8, %v8280_v39  ;;  %v464_v8 = vmax.f32 %v348_v47, %v432_v1  ;;  %v467_v10 = vmax.f32 %v399_v54, %v435_v3 }
  0xf8   :  { %v428_v26 = vmul.f32 0.2, %v343_v17  ;;  %v404_v24 = vadd.f32 %v403_v7, %v8280_v39  ;;  %v5954_v54 = vor.u32 %v7506_v50, %v5953_v49  ;;  %v5958_v1 = vor.u32 %v7504_v56, %v5955_v57  ;;  %v7819_v56 = vld [vmem:[#allocation11 + $0x7dc] sm:$0xf0] }
  0xf9   :  { %v429_v31 = vmul.f32 0.2, %v392_v22  ;;  %v8334_v11 = vpack.c.bf16 %v466_v63, %v464_v8  ;;  %v8336_v12 = vpack.c.bf16 %v467_v10, %v465_v9  ;;  %v6086_v3 = vor.u32 %v7536_v59, %v6083_v2  ;;  %v6393_v2 = vld [vmem:[#allocation11 + $0x180] sm:$0xf] }
  0xfa   :  { %v460_v36 = vmax.f32 %v343_v17, %v428_v26  ;;  %v355_v17 = vadd.f32 %v354_v4, %v8278_v35  ;;  %v5971_v26 = vld [vmem:[#allocation8 + $0x38] sm:$0xf0]  ;;  %1093 = vmatpush.bf16.msra.mxu2 %v5954_v54  ;;  %v7193_v54 = vld [vmem:[#allocation11 + $0x7c0] sm:$0xf] }
  0xfb   :  { %v461_v38 = vmax.f32 %v392_v22, %v429_v31  ;;  %v7508_v22 = vld [vmem:[#allocation8 + $0x2c] sm:$0xf]  ;;  %v6099_v31 = vld [vmem:[#allocation8 + $0x138] sm:$0xf0] }
  0xfd   :  { %v344_v25 = vpop.f32.mrf.mxu0  ;;  %v357_v13 = vpop.f32.mrf.mxu2 }
  0xfe   :  { %v345_v29 = vadd.f32 %v344_v25, %v8278_v35  ;;  %v393_v30 = vpop.f32.mrf.mxu1  ;;  %v406_v18 = vpop.f32.mrf.mxu3  ;;  %v6098_v25 = vor.u32 %v7542_v21, %v6097_v20  ;;  %v358_v52 = vadd.f32 %v357_v13, %v8278_v35 }
  0xff   :  { %v394_v32 = vadd.f32 %v393_v30, %v8280_v39  ;;  %v5974_v30 = vor.u32 %v7508_v22, %v5971_v26  ;;  %v407_v58 = vadd.f32 %v406_v18, %v8280_v39 }
 0x100   :  { %v430_v33 = vmul.f32 0.2, %v345_v29  ;;  %1141 = vmatpush.bf16.msra.mxu3 %v6098_v25  ;;  %v440_v7 = vmul.f32 0.2, %v358_v52 }
 0x101   :  { %v431_v34 = vmul.f32 0.2, %v394_v32  ;;  %1190 = vmatpush.bf16.msra.mxu0 %v5974_v30  ;;  %v441_v9 = vmul.f32 0.2, %v407_v58 }
 0x102   :  { %v462_v37 = vmax.f32 %v345_v29, %v430_v33  ;;  %v7540_v29 = vld [vmem:[#allocation8 + $0x12c] sm:$0xf]  ;;  %v436_v33 = vmul.f32 0.2, %v353_v16  ;;  %v472_v13 = vmax.f32 %v358_v52, %v440_v7  ;;  %v6937_v52 = vld [vmem:[#allocation11 + $0x5c0] sm:$0xf] }
 0x103   :  { %v463_v40 = vmax.f32 %v394_v32, %v431_v34  ;;  %v6102_v32 = vor.u32 %v7540_v29, %v6099_v31  ;;  %v438_v34 = vmul.f32 0.2, %v355_v17  ;;  %v473_v15 = vmax.f32 %v407_v58, %v441_v9 }
 0x104   :  { %v8322_v42 = vpack.c.bf16 %v462_v37, %v460_v36  ;;  %v437_v36 = vmul.f32 0.2, %v402_v23  ;;  %v439_v37 = vmul.f32 0.2, %v404_v24  ;;  %1142 = vmatpush.bf16.msra.mxu3 %v6082_v0 }
 0x105   :  { %v8324_v44 = vpack.c.bf16 %v463_v40, %v461_v38  ;;  %1239 = vmatpush.bf16.msra.mxu1 %v6102_v32  ;;  %v468_v38 = vmax.f32 %v353_v16, %v436_v33  ;;  %v470_v40 = vmax.f32 %v355_v17, %v438_v34  ;;  %v359_v45 = vpop.f32.mrf.mxu2  ;;  %1191 = vmatpush.bf16.msra.mxu0 %v5958_v1 }
 0x106   :  { %913 = vmatmul.bf16.gmra.mxu2 %v8322_v42  ;;  %1011 = vmatmul.bf16.gmra.mxu0 %v8322_v42  ;;  %v469_v41 = vmax.f32 %v402_v23, %v437_v36  ;;  %v471_v43 = vmax.f32 %v404_v24, %v439_v37  ;;  %v408_v46 = vpop.f32.mrf.mxu3  ;;  %v360_v53 = vadd.f32 %v359_v45, %v8278_v35  ;;  %v8378_v45 = vld [vmem:[#allocation10] sm:$0xf] }
 0x107   :  { %962 = vmatmul.bf16.gmra.mxu3 %v8324_v44  ;;  %1060 = vmatmul.bf16.gmra.mxu1 %v8324_v44  ;;  %v8346_v47 = vpack.c.bf16 %v470_v40, %v468_v38  ;;  %v409_v60 = vadd.f32 %v408_v46, %v8280_v39  ;;  %v6681_v38 = vld [vmem:[#allocation11 + $0x3c0] sm:$0xf]  ;;  %v8381_v46 = vperm.slane %v8378_v45, 1  ;;  %v8387_v58 = vperm.slane %v8378_v45, 0 }
 0x108   :  { %v8348_v48 = vpack.c.bf16 %v471_v43, %v469_v41  ;;  %v442_v8 = vmul.f32 0.2, %v360_v53  ;;  %v7691_v41 = vld [vmem:[#allocation11 + $0x3dc] sm:$0xf0] }
 0x109   :  { %1240 = vmatpush.bf16.msra.mxu1 %v6086_v3  ;;  %v443_v10 = vmul.f32 0.2, %v409_v60  ;;  %v6682_v43 = vor.u32 %v7691_v41, %v6681_v38  ;;  %v7619_v3 = vld [vmem:[#allocation11 + $0x19c] sm:$0xf0] }
 0x10a   :  { %v474_v14 = vmax.f32 %v360_v53, %v442_v8  ;;  %v7755_v53 = vld [vmem:[#allocation11 + $0x5dc] sm:$0xf0]  ;;  %v6394_v8 = vor.u32 %v7619_v3, %v6393_v2 }
 0x10b   :  { %v475_v16 = vmax.f32 %v409_v60, %v443_v10  ;;  %3045 = vmatpush.bf16.msrb.mxu3 %v6682_v43  ;;  %v6938_v55 = vor.u32 %v7755_v53, %v6937_v52  ;;  %v7194_v60 = vor.u32 %v7819_v56, %v7193_v54  ;;  %v6361_v53 = vld [vmem:[#allocation11 + $0x140] sm:$0xf] }
 0x10c   :  { %v8358_v17 = vpack.c.bf16 %v474_v14, %v472_v13  ;;  %v7611_v54 = vld [vmem:[#allocation11 + $0x15c] sm:$0xf0] }
 0x10d   :  { %v362_v4 = vpop.f32.mrf.mxu2  ;;  %v8360_v18 = vpack.c.bf16 %v475_v16, %v473_v15  ;;  %3094 = vmatpush.bf16.msrb.mxu0 %v6938_v55  ;;  %3143 = vmatpush.bf16.msrb.mxu1 %v7194_v60  ;;  %v6617_v55 = vld [vmem:[#allocation11 + $0x340] sm:$0xf] }
 0x10e   :  { %v411_v63 = vpop.f32.mrf.mxu3  ;;  %v363_v21 = vadd.f32 %v362_v4, %v8278_v35  ;;  %v6649_v4 = vld [vmem:[#allocation11 + $0x380] sm:$0xf] }
 0x10f   :  { %v412_v23 = vadd.f32 %v411_v63, %v8280_v39 }
 0x110   :  { %v444_v25 = vmul.f32 0.2, %v363_v21 }
 0x111   :  { %v445_v29 = vmul.f32 0.2, %v412_v23 }
 0x112   :  { %v476_v31 = vmax.f32 %v363_v21, %v444_v25 }
 0x113   :  { %v477_v33 = vmax.f32 %v412_v23, %v445_v29 }
 0x115   :  { %v364_v19 = vpop.f32.mrf.mxu2 }
 0x116   :  { %918 = vmatmul.bf16.gmra.mxu2 %v8334_v11  ;;  %1016 = vmatmul.bf16.gmra.mxu0 %v8334_v11  ;;  %v413_v20 = vpop.f32.mrf.mxu3  ;;  %v365_v22 = vadd.f32 %v364_v19, %v8278_v35  ;;  %v6425_v35 = vld [vmem:[#allocation11 + $0x1c0] sm:$0xf] }
 0x117   :  { %967 = vmatmul.bf16.gmra.mxu3 %v8336_v12  ;;  %1065 = vmatmul.bf16.gmra.mxu1 %v8336_v12  ;;  %v414_v24 = vadd.f32 %v413_v20, %v8280_v39  ;;  %v7627_v39 = vld [vmem:[#allocation11 + $0x1dc] sm:$0xf0] }
 0x118   :  { %v446_v26 = vmul.f32 0.2, %v365_v22  ;;  %v6426_v40 = vor.u32 %v7627_v39, %v6425_v35  ;;  %v7811_v35 = vld [vmem:[#allocation11 + $0x79c] sm:$0xf0] }
 0x119   :  { %v447_v30 = vmul.f32 0.2, %v414_v24 }
 0x11a   :  { %v478_v32 = vmax.f32 %v365_v22, %v446_v26  ;;  %2996 = vmatpush.bf16.msrb.mxu2 %v6426_v40 }
 0x11b   :  { %v479_v34 = vmax.f32 %v414_v24, %v447_v30 }
 0x11c   :  { %v8370_v36 = vpack.c.bf16 %v478_v32, %v476_v31  ;;  %v6905_v31 = vld [vmem:[#allocation11 + $0x580] sm:$0xf] }
 0x11d   :  { %v8372_v37 = vpack.c.bf16 %v479_v34, %v477_v33  ;;  %v7747_v32 = vld [vmem:[#allocation11 + $0x59c] sm:$0xf0] }
 0x11e   :  { %2997 = vmatpush.bf16.msrb.mxu2 %v6394_v8  ;;  %v7161_v33 = vld [vmem:[#allocation11 + $0x780] sm:$0xf]  ;;  %v6906_v34 = vor.u32 %v7747_v32, %v6905_v31 }
 0x11f   :  { %v7162_v40 = vor.u32 %v7811_v35, %v7161_v33  ;;  %v6329_v35 = vld [vmem:[#allocation11 + $0x100] sm:$0xf] }
 0x120   :  { %3095 = vmatpush.bf16.msrb.mxu0 %v6906_v34 }
 0x121   :  { %3144 = vmatpush.bf16.msrb.mxu1 %v7162_v40 }
 0x126   :  { %923 = vmatmul.bf16.gmra.mxu2 %v8346_v47  ;;  %1021 = vmatmul.bf16.gmra.mxu0 %v8346_v47 }
 0x127   :  { %972 = vmatmul.bf16.gmra.mxu3 %v8348_v48  ;;  %1070 = vmatmul.bf16.gmra.mxu1 %v8348_v48 }
 0x136   :  { %928 = vmatmul.bf16.gmra.mxu2 %v8358_v17  ;;  %1026 = vmatmul.bf16.gmra.mxu0 %v8358_v17 }
 0x137   :  { %977 = vmatmul.bf16.gmra.mxu3 %v8360_v18  ;;  %1075 = vmatmul.bf16.gmra.mxu1 %v8360_v18 }
 0x146   :  { %933 = vmatmul.bf16.gmra.mxu2 %v8370_v36  ;;  %1031 = vmatmul.bf16.gmra.mxu0 %v8370_v36 }
 0x147   :  { %982 = vmatmul.bf16.gmra.mxu3 %v8372_v37  ;;  %1080 = vmatmul.bf16.gmra.mxu1 %v8372_v37 }
 0x153   :  { %v997_v49 = vpop.f32.mrf.mxu0 }
 0x154   :  { %v998_v50 = vadd.f32 %v997_v49, %v8381_v46  ;;  %v1046_v51 = vpop.f32.mrf.mxu1 }
 0x156   :  { %v1047_v57 = vadd.f32 %v1046_v51, %v998_v50  ;;  %1094 = vmatmul.bf16.vlgmr.msra.gmra.mxu2 %v8286_v61  ;;  %1192 = vmatmul.bf16.vlgmr.msra.gmra.mxu0 %v8286_v61  ;;  %v7683_v61 = vld [vmem:[#allocation11 + $0x39c] sm:$0xf0] }
 0x157   :  { %1143 = vmatmul.bf16.vlgmr.msra.gmra.mxu3 %v8288_v62  ;;  %1241 = vmatmul.bf16.vlgmr.msra.gmra.mxu1 %v8288_v62  ;;  %v6650_v13 = vor.u32 %v7683_v61, %v6649_v4 }
 0x158   :  { %v1283_v14 = vmul.f32 0.2, %v1047_v57 }
 0x159   :  { %v899_v0 = vpop.f32.mrf.mxu2  ;;  %3046 = vmatpush.bf16.msrb.mxu3 %v6650_v13 }
 0x15a   :  { %v900_v1 = vadd.f32 %v899_v0, %v8387_v58  ;;  %v948_v59 = vpop.f32.mrf.mxu3  ;;  %v1347_v19 = vmax.f32 %v1047_v57, %v1283_v14  ;;  %v7675_v57 = vld [vmem:[#allocation11 + $0x35c] sm:$0xf0] }
 0x15b   :  { %v999_v7 = vpop.f32.mrf.mxu0 }
 0x15c   :  { %v949_v63 = vadd.f32 %v948_v59, %v900_v1  ;;  %v1000_v9 = vadd.f32 %v999_v7, %v8381_v46  ;;  %v1048_v10 = vpop.f32.mrf.mxu1  ;;  %v6618_v1 = vor.u32 %v7675_v57, %v6617_v55 }
 0x15e   :  { %v1049_v62 = vadd.f32 %v1048_v10, %v1000_v9  ;;  %v1282_v23 = vmul.f32 0.2, %v949_v63  ;;  %3047 = vmatpush.bf16.msrb.mxu3 %v6618_v1 }
 0x160   :  { %v1287_v15 = vmul.f32 0.2, %v1049_v62  ;;  %v1346_v41 = vmax.f32 %v949_v63, %v1282_v23 }
 0x161   :  { %v901_v16 = vpop.f32.mrf.mxu2 }
 0x162   :  { %v1351_v20 = vmax.f32 %v1049_v62, %v1287_v15  ;;  %v902_v21 = vadd.f32 %v901_v16, %v8387_v58  ;;  %v950_v22 = vpop.f32.mrf.mxu3  ;;  %v6873_v16 = vld [vmem:[#allocation11 + $0x540] sm:$0xf] }
 0x163   :  { %v1002_v24 = vpop.f32.mrf.mxu0 }
 0x164   :  { %v8394_v25 = vpack.c.bf16 %v1351_v20, %v1347_v19  ;;  %v951_v26 = vadd.f32 %v950_v22, %v902_v21  ;;  %v1003_v29 = vadd.f32 %v1002_v24, %v8381_v46  ;;  %v1051_v30 = vpop.f32.mrf.mxu1  ;;  %v7739_v19 = vld [vmem:[#allocation11 + $0x55c] sm:$0xf0] }
 0x165   :  { %v7129_v20 = vld [vmem:[#allocation11 + $0x740] sm:$0xf]  ;;  %v6874_v21 = vor.u32 %v7739_v19, %v6873_v16 }
 0x166   :  { %v1286_v39 = vmul.f32 0.2, %v951_v26  ;;  %v1052_v38 = vadd.f32 %v1051_v30, %v1003_v29  ;;  %1099 = vmatmul.bf16.gmra.mxu2 %v8298_v27  ;;  %1197 = vmatmul.bf16.gmra.mxu0 %v8298_v27  ;;  %v6362_v27 = vor.u32 %v7611_v54, %v6361_v53  ;;  %v7803_v22 = vld [vmem:[#allocation11 + $0x75c] sm:$0xf0] }
 0x167   :  { %1148 = vmatmul.bf16.gmra.mxu3 %v8300_v28  ;;  %1246 = vmatmul.bf16.gmra.mxu1 %v8300_v28 }
 0x168   :  { %v1350_v43 = vmax.f32 %v951_v26, %v1286_v39  ;;  %2998 = vmatpush.bf16.msrb.mxu2 %v6362_v27  ;;  %v1291_v59 = vmul.f32 0.2, %v1052_v38  ;;  %v7130_v26 = vor.u32 %v7803_v22, %v7129_v20  ;;  %3096 = vmatpush.bf16.msrb.mxu0 %v6874_v21  ;;  %v7603_v39 = vld [vmem:[#allocation11 + $0x11c] sm:$0xf0] }
 0x169   :  { %v904_v49 = vpop.f32.mrf.mxu2  ;;  %v6297_v22 = vld [vmem:[#allocation11 + $0xc0] sm:$0xf] }
 0x16a   :  { %v8401_v50 = vpack.c.bf16 %v1350_v43, %v1346_v41  ;;  %v905_v51 = vadd.f32 %v904_v49, %v8387_v58  ;;  %v953_v52 = vpop.f32.mrf.mxu3  ;;  %v1355_v7 = vmax.f32 %v1052_v38, %v1291_v59  ;;  %3145 = vmatpush.bf16.msrb.mxu1 %v7130_v26  ;;  %v6585_v38 = vld [vmem:[#allocation11 + $0x300] sm:$0xf] }
 0x16b   :  { %v1004_v56 = vpop.f32.mrf.mxu0  ;;  %v7667_v41 = vld [vmem:[#allocation11 + $0x31c] sm:$0xf0] }
 0x16c   :  { %v954_v60 = vadd.f32 %v953_v52, %v905_v51  ;;  %v1005_v0 = vadd.f32 %v1004_v56, %v8381_v46  ;;  %v1053_v28 = vpop.f32.mrf.mxu1  ;;  %v6586_v51 = vor.u32 %v7667_v41, %v6585_v38 }
 0x16e   :  { %v1054_v2 = vadd.f32 %v1053_v28, %v1005_v0  ;;  %v1290_v9 = vmul.f32 0.2, %v954_v60  ;;  %3048 = vmatpush.bf16.msrb.mxu3 %v6586_v51 }
 0x170   :  { %v1295_v3 = vmul.f32 0.2, %v1054_v2  ;;  %v1354_v29 = vmax.f32 %v954_v60, %v1290_v9 }
 0x171   :  { %v906_v4 = vpop.f32.mrf.mxu2 }
 0x172   :  { %v1359_v8 = vmax.f32 %v1054_v2, %v1295_v3  ;;  %v907_v61 = vadd.f32 %v906_v4, %v8387_v58  ;;  %v955_v63 = vpop.f32.mrf.mxu3  ;;  %v6841_v4 = vld [vmem:[#allocation11 + $0x500] sm:$0xf] }
 0x173   :  { %v1007_v10 = vpop.f32.mrf.mxu0 }
 0x174   :  { %v8406_v13 = vpack.c.bf16 %v1359_v8, %v1355_v7  ;;  %v956_v14 = vadd.f32 %v955_v63, %v907_v61  ;;  %v1008_v62 = vadd.f32 %v1007_v10, %v8381_v46  ;;  %v1056_v15 = vpop.f32.mrf.mxu1  ;;  %v7731_v7 = vld [vmem:[#allocation11 + $0x51c] sm:$0xf0] }
 0x175   :  { %v7097_v8 = vld [vmem:[#allocation11 + $0x700] sm:$0xf]  ;;  %v6842_v61 = vor.u32 %v7731_v7, %v6841_v4 }
 0x176   :  { %v1294_v23 = vmul.f32 0.2, %v956_v14  ;;  %v1057_v24 = vadd.f32 %v1056_v15, %v1008_v62  ;;  %1104 = vmatmul.bf16.gmra.mxu2 %v8310_v5  ;;  %1202 = vmatmul.bf16.gmra.mxu0 %v8310_v5  ;;  %v6330_v5 = vor.u32 %v7603_v39, %v6329_v35  ;;  %v7795_v63 = vld [vmem:[#allocation11 + $0x71c] sm:$0xf0] }
 0x177   :  { %1153 = vmatmul.bf16.gmra.mxu3 %v8312_v6  ;;  %1251 = vmatmul.bf16.gmra.mxu1 %v8312_v6 }
 0x178   :  { %v1358_v30 = vmax.f32 %v956_v14, %v1294_v23  ;;  %2999 = vmatpush.bf16.msrb.mxu2 %v6330_v5  ;;  %v1299_v52 = vmul.f32 0.2, %v1057_v24  ;;  %v7098_v14 = vor.u32 %v7795_v63, %v7097_v8  ;;  %3097 = vmatpush.bf16.msrb.mxu0 %v6842_v61  ;;  %v7595_v23 = vld [vmem:[#allocation11 + $0xdc] sm:$0xf0] }
 0x179   :  { %v909_v31 = vpop.f32.mrf.mxu2  ;;  %v6265_v63 = vld [vmem:[#allocation11 + $0x80] sm:$0xf] }
 0x17a   :  { %v8413_v32 = vpack.c.bf16 %v1358_v30, %v1354_v29  ;;  %v910_v33 = vadd.f32 %v909_v31, %v8387_v58  ;;  %v958_v34 = vpop.f32.mrf.mxu3  ;;  %v1363_v56 = vmax.f32 %v1057_v24, %v1299_v52  ;;  %3146 = vmatpush.bf16.msrb.mxu1 %v7098_v14  ;;  %v6553_v24 = vld [vmem:[#allocation11 + $0x2c0] sm:$0xf] }
 0x17b   :  { %v1009_v40 = vpop.f32.mrf.mxu0  ;;  %v7659_v29 = vld [vmem:[#allocation11 + $0x2dc] sm:$0xf0] }
 0x17c   :  { %v959_v43 = vadd.f32 %v958_v34, %v910_v33  ;;  %v1010_v49 = vadd.f32 %v1009_v40, %v8381_v46  ;;  %v1058_v6 = vpop.f32.mrf.mxu1  ;;  %v6554_v33 = vor.u32 %v7659_v29, %v6553_v24 }
 0x17e   :  { %v1059_v53 = vadd.f32 %v1058_v6, %v1010_v49  ;;  %v1298_v0 = vmul.f32 0.2, %v959_v43  ;;  %3049 = vmatpush.bf16.msrb.mxu3 %v6554_v33 }
 0x180   :  { %v1303_v54 = vmul.f32 0.2, %v1059_v53  ;;  %v1362_v62 = vmax.f32 %v959_v43, %v1298_v0 }
 0x181   :  { %v911_v55 = vpop.f32.mrf.mxu2 }
 0x182   :  { %v1367_v27 = vmax.f32 %v1059_v53, %v1303_v54  ;;  %v912_v57 = vadd.f32 %v911_v55, %v8387_v58  ;;  %v960_v60 = vpop.f32.mrf.mxu3  ;;  %v6809_v55 = vld [vmem:[#allocation11 + $0x4c0] sm:$0xf] }
 0x183   :  { %v1012_v28 = vpop.f32.mrf.mxu0 }
 0x184   :  { %v8418_v1 = vpack.c.bf16 %v1367_v27, %v1363_v56  ;;  %v961_v59 = vadd.f32 %v960_v60, %v912_v57  ;;  %v1013_v2 = vadd.f32 %v1012_v28, %v8381_v46  ;;  %v1061_v3 = vpop.f32.mrf.mxu1  ;;  %v7723_v56 = vld [vmem:[#allocation11 + $0x4dc] sm:$0xf0] }
 0x185   :  { %v7065_v27 = vld [vmem:[#allocation11 + $0x6c0] sm:$0xf]  ;;  %v6810_v57 = vor.u32 %v7723_v56, %v6809_v55 }
 0x186   :  { %v1302_v9 = vmul.f32 0.2, %v961_v59  ;;  %v1062_v10 = vadd.f32 %v1061_v3, %v1013_v2  ;;  %1109 = vmatmul.bf16.gmra.mxu2 %v8322_v42  ;;  %1207 = vmatmul.bf16.gmra.mxu0 %v8322_v42  ;;  %v6298_v42 = vor.u32 %v7595_v23, %v6297_v22  ;;  %v7787_v60 = vld [vmem:[#allocation11 + $0x6dc] sm:$0xf0] }
 0x187   :  { %1158 = vmatmul.bf16.gmra.mxu3 %v8324_v44  ;;  %1256 = vmatmul.bf16.gmra.mxu1 %v8324_v44  ;;  %v7643_v56 = vld [vmem:[#allocation11 + $0x25c] sm:$0xf0] }
 0x188   :  { %v1366_v15 = vmax.f32 %v961_v59, %v1302_v9  ;;  %3000 = vmatpush.bf16.msrb.mxu2 %v6298_v42  ;;  %v1307_v34 = vmul.f32 0.2, %v1062_v10  ;;  %v7066_v59 = vor.u32 %v7787_v60, %v7065_v27  ;;  %3098 = vmatpush.bf16.msrb.mxu0 %v6810_v57  ;;  %v7587_v9 = vld [vmem:[#allocation11 + $0x9c] sm:$0xf0] }
 0x189   :  { %v914_v16 = vpop.f32.mrf.mxu2 }
 0x18a   :  { %v8425_v19 = vpack.c.bf16 %v1366_v15, %v1362_v62  ;;  %v915_v20 = vadd.f32 %v914_v16, %v8387_v58  ;;  %v963_v21 = vpop.f32.mrf.mxu3  ;;  %v1371_v40 = vmax.f32 %v1062_v10, %v1307_v34  ;;  %3147 = vmatpush.bf16.msrb.mxu1 %v7066_v59  ;;  %v6521_v10 = vld [vmem:[#allocation11 + $0x280] sm:$0xf] }
 0x18b   :  { %v1014_v26 = vpop.f32.mrf.mxu0  ;;  %v7651_v62 = vld [vmem:[#allocation11 + $0x29c] sm:$0xf0] }
 0x18c   :  { %v964_v30 = vadd.f32 %v963_v21, %v915_v20  ;;  %v1015_v31 = vadd.f32 %v1014_v26, %v8381_v46  ;;  %v1063_v44 = vpop.f32.mrf.mxu1  ;;  %v7779_v34 = vld [vmem:[#allocation11 + $0x69c] sm:$0xf0] }
 0x18d   :  { %v7571_v59 = vld [vmem:[#allocation11 + $0x1c] sm:$0xf0] }
 0x18e   :  { %v1064_v35 = vadd.f32 %v1063_v44, %v1015_v31  ;;  %v1306_v49 = vmul.f32 0.2, %v964_v30  ;;  %v7715_v31 = vld [vmem:[#allocation11 + $0x49c] sm:$0xf0] }
 0x18f   :  { %v7033_v44 = vld [vmem:[#allocation11 + $0x680] sm:$0xf] }
 0x190   :  { %v1311_v39 = vmul.f32 0.2, %v1064_v35  ;;  %v1370_v2 = vmax.f32 %v964_v30, %v1306_v49  ;;  %v6777_v30 = vld [vmem:[#allocation11 + $0x480] sm:$0xf] }
 0x191   :  { %v916_v38 = vpop.f32.mrf.mxu2  ;;  %v6778_v33 = vor.u32 %v7715_v31, %v6777_v30 }
 0x192   :  { %v1375_v5 = vmax.f32 %v1064_v35, %v1311_v39  ;;  %v917_v41 = vadd.f32 %v916_v38, %v8387_v58  ;;  %v965_v43 = vpop.f32.mrf.mxu3  ;;  %v7034_v38 = vor.u32 %v7779_v34, %v7033_v44 }
 0x193   :  { %v1017_v6 = vpop.f32.mrf.mxu0  ;;  %3099 = vmatpush.bf16.msrb.mxu0 %v6778_v33 }
 0x194   :  { %v8430_v51 = vpack.c.bf16 %v1375_v5, %v1371_v40  ;;  %v966_v52 = vadd.f32 %v965_v43, %v917_v41  ;;  %v1018_v53 = vadd.f32 %v1017_v6, %v8381_v46  ;;  %v1066_v54 = vpop.f32.mrf.mxu1  ;;  %3148 = vmatpush.bf16.msrb.mxu1 %v7034_v38 }
 0x196   :  { %v1310_v0 = vmul.f32 0.2, %v966_v52  ;;  %v8433_v28 = vadd.f32 %v1066_v54, %v1018_v53  ;;  %1114 = vmatmul.bf16.gmra.mxu2 %v8334_v11  ;;  %1212 = vmatmul.bf16.gmra.mxu0 %v8334_v11  ;;  %v6266_v11 = vor.u32 %v7587_v9, %v6265_v63  ;;  %v7579_v53 = vld [vmem:[#allocation11 + $0x5c] sm:$0xf0] }
 0x197   :  { %1163 = vmatmul.bf16.gmra.mxu3 %v8336_v12  ;;  %1261 = vmatmul.bf16.gmra.mxu1 %v8336_v12  ;;  %v6522_v12 = vor.u32 %v7651_v62, %v6521_v10  ;;  %v6489_v54 = vld [vmem:[#allocation11 + $0x240] sm:$0xf] }
 0x198   :  { %v1374_v3 = vmax.f32 %v966_v52, %v1310_v0  ;;  %3001 = vmatpush.bf16.msrb.mxu2 %v6266_v11  ;;  %v6233_v52 = vld [vmem:[#allocation11 + $0x40] sm:$0xf] }
 0x199   :  { %v919_v4 = vpop.f32.mrf.mxu2  ;;  %3050 = vmatpush.bf16.msrb.mxu3 %v6522_v12  ;;  %v6201_v0 = vld [vmem:[#allocation11] sm:$0xf] }
 0x19a   :  { %v8439_v7 = vpack.c.bf16 %v1374_v3, %v1370_v2  ;;  %v920_v8 = vadd.f32 %v919_v4, %v8387_v58  ;;  %v968_v61 = vpop.f32.mrf.mxu3  ;;  %v6457_v2 = vld [vmem:[#allocation11 + $0x200] sm:$0xf] }
 0x19b   :  { %v8442_v14 = vpop.f32.mrf.mxu0  ;;  %v6745_v12 = vld [vmem:[#allocation11 + $0x440] sm:$0xf] }
 0x19c   :  { %v969_v15 = vadd.f32 %v968_v61, %v920_v8  ;;  %v8444_v16 = vpop.f32.mrf.mxu1  ;;  %v6202_v8 = vor.u32 %v7571_v59, %v6201_v0  ;;  %v7635_v61 = vld [vmem:[#allocation11 + $0x21c] sm:$0xf0] }
 0x19d   :  { %v6458_v10 = vor.u32 %v7635_v61, %v6457_v2 }
 0x19e   :  { %v1314_v23 = vmul.f32 0.2, %v969_v15 }
 0x1a0   :  { %v1378_v40 = vmax.f32 %v969_v15, %v1314_v23  ;;  %v7771_v23 = vld [vmem:[#allocation11 + $0x65c] sm:$0xf0] }
 0x1a1   :  { %v921_v20 = vpop.f32.mrf.mxu2 }
 0x1a2   :  { %v922_v21 = vadd.f32 %v921_v20, %v8387_v58  ;;  %v970_v22 = vpop.f32.mrf.mxu3  ;;  %v7707_v20 = vld [vmem:[#allocation11 + $0x45c] sm:$0xf0] }
 0x1a3   :  { %v1022_v24 = vpop.f32.mrf.mxu0 }
 0x1a4   :  { %v971_v26 = vadd.f32 %v970_v22, %v922_v21  ;;  %v1023_v42 = vadd.f32 %v1022_v24, %v8381_v46  ;;  %v1071_v29 = vpop.f32.mrf.mxu1  ;;  %v7001_v21 = vld [vmem:[#allocation11 + $0x640] sm:$0xf]  ;;  %v6746_v22 = vor.u32 %v7707_v20, %v6745_v12 }
 0x1a6   :  { %v1318_v35 = vmul.f32 0.2, %v971_v26  ;;  %v8448_v39 = vadd.f32 %v1071_v29, %v1023_v42  ;;  %1119 = vmatmul.bf16.gmra.mxu2 %v8346_v47  ;;  %1217 = vmatmul.bf16.gmra.mxu0 %v8346_v47  ;;  %v6234_v47 = vor.u32 %v7579_v53, %v6233_v52  ;;  %v7002_v42 = vor.u32 %v7771_v23, %v7001_v21 }
 0x1a7   :  { %1168 = vmatmul.bf16.gmra.mxu3 %v8348_v48  ;;  %1266 = vmatmul.bf16.gmra.mxu1 %v8348_v48  ;;  %v6490_v48 = vor.u32 %v7643_v56, %v6489_v54 }
 0x1a8   :  { %v1382_v5 = vmax.f32 %v971_v26, %v1318_v35  ;;  %3002 = vmatpush.bf16.msrb.mxu2 %v6234_v47  ;;  %3100 = vmatpush.bf16.msrb.mxu0 %v6746_v22 }
 0x1a9   :  { %v924_v41 = vpop.f32.mrf.mxu2  ;;  %3051 = vmatpush.bf16.msrb.mxu3 %v6490_v48  ;;  %3149 = vmatpush.bf16.msrb.mxu1 %v7002_v42  ;;  %v7699_v48 = vld [vmem:[#allocation11 + $0x41c] sm:$0xf0] }
 0x1aa   :  { %v8454_v43 = vpack.c.bf16 %v1382_v5, %v1378_v40  ;;  %v925_v49 = vadd.f32 %v924_v41, %v8387_v58  ;;  %v973_v6 = vpop.f32.mrf.mxu3  ;;  %v6969_v5 = vld [vmem:[#allocation11 + $0x600] sm:$0xf] }
 0x1ab   :  { %v8457_v55 = vpop.f32.mrf.mxu0  ;;  %v7763_v41 = vld [vmem:[#allocation11 + $0x61c] sm:$0xf0] }
 0x1ac   :  { %v974_v27 = vadd.f32 %v973_v6, %v925_v49  ;;  %v8459_v57 = vpop.f32.mrf.mxu1  ;;  %3003 = vmatpush.bf16.msrb.mxu2 %v6202_v8  ;;  %v6970_v6 = vor.u32 %v7763_v41, %v6969_v5  ;;  %v7195_v5 = vld [vmem:[#allocation11 + $0x7e0] sm:$0xf0] }
 0x1ad   :  { %3052 = vmatpush.bf16.msrb.mxu3 %v6458_v10  ;;  %v6427_v10 = vld [vmem:[#allocation11 + $0x1e0] sm:$0xf0] }
 0x1ae   :  { %v1322_v63 = vmul.f32 0.2, %v974_v27  ;;  %3150 = vmatpush.bf16.msrb.mxu1 %v6970_v6 }
 0x1b0   :  { %v1386_v29 = vmax.f32 %v974_v27, %v1322_v63  ;;  %v6713_v27 = vld [vmem:[#allocation11 + $0x400] sm:$0xf] }
 0x1b1   :  { %v926_v60 = vpop.f32.mrf.mxu2 }
 0x1b2   :  { %v927_v3 = vadd.f32 %v926_v60, %v8387_v58  ;;  %v975_v4 = vpop.f32.mrf.mxu3  ;;  %v6714_v60 = vor.u32 %v7699_v48, %v6713_v27  ;;  %v7615_v27 = vld [vmem:[#allocation11 + $0x184] sm:$0xf] }
 0x1b3   :  { %v1027_v9 = vpop.f32.mrf.mxu0  ;;  %v6395_v48 = vld [vmem:[#allocation11 + $0x1a0] sm:$0xf0] }
 0x1b4   :  { %v976_v11 = vadd.f32 %v975_v4, %v927_v3  ;;  %v1028_v62 = vadd.f32 %v1027_v9, %v8381_v46  ;;  %v1076_v15 = vpop.f32.mrf.mxu1  ;;  %3101 = vmatpush.bf16.msrb.mxu0 %v6714_v60  ;;  %v7623_v9 = vld [vmem:[#allocation11 + $0x1c4] sm:$0xf] }
 0x1b5   :  { %v7679_v60 = vld [vmem:[#allocation11 + $0x384] sm:$0xf] }
 0x1b6   :  { %v1326_v24 = vmul.f32 0.2, %v976_v11  ;;  %v8463_v26 = vadd.f32 %v1076_v15, %v1028_v62  ;;  %1124 = vmatmul.bf16.gmra.mxu2 %v8358_v17  ;;  %1222 = vmatmul.bf16.gmra.mxu0 %v8358_v17  ;;  %v6430_v15 = vor.u32 %v7623_v9, %v6427_v10 }
 0x1b7   :  { %1173 = vmatmul.bf16.gmra.mxu3 %v8360_v18  ;;  %1271 = vmatmul.bf16.gmra.mxu1 %v8360_v18 }
 0x1b8   :  { %v1390_v30 = vmax.f32 %v976_v11, %v1326_v24  ;;  %v7687_v11 = vld [vmem:[#allocation11 + $0x3c4] sm:$0xf]  ;;  %3192 = vmatpush.bf16.msra.mxu2 %v6430_v15  ;;  %v8493_v24 = vperm.slane %v8378_v45, 3 }
 0x1b9   :  { %v929_v31 = vpop.f32.mrf.mxu2 }
 0x1ba   :  { %v8469_v44 = vpack.c.bf16 %v1390_v30, %v1386_v29  ;;  %v930_v33 = vadd.f32 %v929_v31, %v8387_v58  ;;  %v978_v34 = vpop.f32.mrf.mxu3 }
 0x1bb   :  { %v8472_v35 = vpop.f32.mrf.mxu0 }
 0x1bc   :  { %v979_v38 = vadd.f32 %v978_v34, %v930_v33  ;;  %v8474_v40 = vpop.f32.mrf.mxu1  ;;  %v7751_v33 = vld [vmem:[#allocation11 + $0x5c4] sm:$0xf] }
 0x1bd   :  { %v6939_v34 = vld [vmem:[#allocation11 + $0x5e0] sm:$0xf0] }
 0x1be   :  { %v1330_v53 = vmul.f32 0.2, %v979_v38 }
 0x1c0   :  { %v1394_v2 = vmax.f32 %v979_v38, %v1330_v53  ;;  %v7815_v38 = vld [vmem:[#allocation11 + $0x7c4] sm:$0xf] }
 0x1c1   :  { %v931_v17 = vpop.f32.mrf.mxu2 }
 0x1c2   :  { %v932_v18 = vadd.f32 %v931_v17, %v8387_v58  ;;  %v980_v49 = vpop.f32.mrf.mxu3  ;;  %v6942_v17 = vor.u32 %v7751_v33, %v6939_v34  ;;  %v7743_v33 = vld [vmem:[#allocation11 + $0x584] sm:$0xf] }
 0x1c3   :  { %v1032_v52 = vpop.f32.mrf.mxu0  ;;  %v6907_v34 = vld [vmem:[#allocation11 + $0x5a0] sm:$0xf0] }
 0x1c4   :  { %v981_v54 = vadd.f32 %v980_v49, %v932_v18  ;;  %v1033_v47 = vadd.f32 %v1032_v52, %v8381_v46  ;;  %v1081_v56 = vpop.f32.mrf.mxu1  ;;  %v7198_v49 = vor.u32 %v7815_v38, %v7195_v5  ;;  %3290 = vmatpush.bf16.msra.mxu0 %v6942_v17  ;;  %v7807_v38 = vld [vmem:[#allocation11 + $0x784] sm:$0xf]  ;;  %v6910_v17 = vor.u32 %v7743_v33, %v6907_v34 }
 0x1c5   :  { %v7163_v5 = vld [vmem:[#allocation11 + $0x7a0] sm:$0xf0] }
 0x1c6   :  { %v1334_v0 = vmul.f32 0.2, %v981_v54  ;;  %v8478_v59 = vadd.f32 %v1081_v56, %v1033_v47  ;;  %1129 = vmatmul.bf16.gmra.mxu2 %v8370_v36  ;;  %1227 = vmatmul.bf16.gmra.mxu0 %v8370_v36  ;;  %v6683_v36 = vld [vmem:[#allocation11 + $0x3e0] sm:$0xf0] }
 0x1c7   :  { %1178 = vmatmul.bf16.gmra.mxu3 %v8372_v37  ;;  %1276 = vmatmul.bf16.gmra.mxu1 %v8372_v37  ;;  %v6686_v37 = vor.u32 %v7687_v11, %v6683_v36 }
 0x1c8   :  { %v1398_v3 = vmax.f32 %v981_v54, %v1334_v0  ;;  %3339 = vmatpush.bf16.msra.mxu1 %v7198_v49  ;;  %v7166_v49 = vor.u32 %v7807_v38, %v7163_v5  ;;  %3291 = vmatpush.bf16.msra.mxu0 %v6910_v17  ;;  %v7735_v38 = vld [vmem:[#allocation11 + $0x544] sm:$0xf] }
 0x1c9   :  { %v934_v4 = vpop.f32.mrf.mxu2  ;;  %3241 = vmatpush.bf16.msra.mxu3 %v6686_v37  ;;  %v6875_v17 = vld [vmem:[#allocation11 + $0x560] sm:$0xf0] }
 0x1ca   :  { %v8484_v8 = vpack.c.bf16 %v1398_v3, %v1394_v2  ;;  %v935_v61 = vadd.f32 %v934_v4, %v8387_v58  ;;  %v983_v63 = vpop.f32.mrf.mxu3  ;;  %v6398_v3 = vor.u32 %v7615_v27, %v6395_v48  ;;  %v6651_v4 = vld [vmem:[#allocation11 + $0x3a0] sm:$0xf0] }
 0x1cb   :  { %v8487_v62 = vpop.f32.mrf.mxu0  ;;  %v7607_v48 = vld [vmem:[#allocation11 + $0x144] sm:$0xf] }
 0x1cc   :  { %v984_v12 = vadd.f32 %v983_v63, %v935_v61  ;;  %v8489_v20 = vpop.f32.mrf.mxu1  ;;  %v6654_v63 = vor.u32 %v7679_v60, %v6651_v4  ;;  %3193 = vmatpush.bf16.msra.mxu2 %v6398_v3  ;;  %3340 = vmatpush.bf16.msra.mxu1 %v7166_v49  ;;  %v6363_v60 = vld [vmem:[#allocation11 + $0x160] sm:$0xf0] }
 0x1cd   :  { %v6366_v4 = vor.u32 %v7607_v48, %v6363_v60  ;;  %v7799_v5 = vld [vmem:[#allocation11 + $0x744] sm:$0xf] }
 0x1ce   :  { %v1338_v42 = vmul.f32 0.2, %v984_v12  ;;  %3242 = vmatpush.bf16.msra.mxu3 %v6654_v63 }
 0x1d0   :  { %v1402_v6 = vmax.f32 %v984_v12, %v1338_v42  ;;  %3194 = vmatpush.bf16.msra.mxu2 %v6366_v4  ;;  %v7663_v4 = vld [vmem:[#allocation11 + $0x304] sm:$0xf] }
 0x1d1   :  { %v936_v21 = vpop.f32.mrf.mxu2 }
 0x1d2   :  { %v937_v22 = vadd.f32 %v936_v21, %v8387_v58  ;;  %v985_v23 = vpop.f32.mrf.mxu3  ;;  %v8499_v58 = vperm.slane %v8378_v45, 2 }
 0x1d3   :  { %v1193_v29 = vpop.f32.mrf.mxu0 }
 0x1d4   :  { %v986_v30 = vadd.f32 %v985_v23, %v937_v22  ;;  %v1242_v31 = vpop.f32.mrf.mxu1  ;;  %v1194_v18 = vadd.f32 %v1193_v29, %v8493_v24 }
 0x1d6   :  { %v1342_v41 = vmul.f32 0.2, %v986_v30  ;;  %3004 = vmatmul.bf16.vlgmr.msrb.gmra.mxu2 %v8401_v50  ;;  %v1243_v47 = vadd.f32 %v1242_v31, %v1194_v18 }
 0x1d7   :  { %3053 = vmatmul.bf16.vlgmr.msrb.gmra.mxu3 %v8394_v25 }
 0x1d8   :  { %v1406_v52 = vmax.f32 %v986_v30, %v1342_v41  ;;  %v1285_v9 = vmul.f32 0.2, %v1243_v47 }
 0x1d9   :  { %v1095_v53 = vpop.f32.mrf.mxu2 }
 0x1da   :  { %v8501_v54 = vpack.c.bf16 %v1406_v52, %v1402_v6  ;;  %v1144_v56 = vpop.f32.mrf.mxu3  ;;  %v1096_v0 = vadd.f32 %v1095_v53, %v8499_v58  ;;  %v1349_v12 = vmax.f32 %v1243_v47, %v1285_v9 }
 0x1db   :  { %v1195_v2 = vpop.f32.mrf.mxu0 }
 0x1dc   :  { %v1196_v45 = vadd.f32 %v1195_v2, %v8493_v24  ;;  %v1244_v61 = vpop.f32.mrf.mxu1  ;;  %v1145_v11 = vadd.f32 %v1144_v56, %v1096_v0  ;;  %v7671_v0 = vld [vmem:[#allocation11 + $0x344] sm:$0xf] }
 0x1de   :  { %v1245_v10 = vadd.f32 %v1244_v61, %v1196_v45  ;;  %v1284_v23 = vmul.f32 0.2, %v1145_v11  ;;  %v6619_v45 = vld [vmem:[#allocation11 + $0x360] sm:$0xf0] }
 0x1df   :  { %v6622_v9 = vor.u32 %v7671_v0, %v6619_v45 }
 0x1e0   :  { %v1289_v15 = vmul.f32 0.2, %v1245_v10  ;;  %v1348_v6 = vmax.f32 %v1145_v11, %v1284_v23 }
 0x1e1   :  { %v1097_v36 = vpop.f32.mrf.mxu2  ;;  %3243 = vmatpush.bf16.msra.mxu3 %v6622_v9  ;;  %v6587_v9 = vld [vmem:[#allocation11 + $0x320] sm:$0xf0] }
 0x1e2   :  { %v1353_v37 = vmax.f32 %v1245_v10, %v1289_v15  ;;  %v1098_v21 = vadd.f32 %v1097_v36, %v8499_v58  ;;  %v1146_v22 = vpop.f32.mrf.mxu3 }
 0x1e3   :  { %v1198_v42 = vpop.f32.mrf.mxu0 }
 0x1e4   :  { %v8506_v29 = vpack.c.bf16 %v1353_v37, %v1349_v12  ;;  %v1147_v30 = vadd.f32 %v1146_v22, %v1098_v21  ;;  %v1247_v31 = vpop.f32.mrf.mxu1  ;;  %v1199_v18 = vadd.f32 %v1198_v42, %v8493_v24 }
 0x1e6   :  { %v1288_v41 = vmul.f32 0.2, %v1147_v30  ;;  %3009 = vmatmul.bf16.gmra.mxu2 %v8413_v32  ;;  %3151 = vmatmul.bf16.vlgmr.msrb.gmra.mxu1 %v8506_v29  ;;  %v1248_v56 = vadd.f32 %v1247_v31, %v1199_v18  ;;  %v7131_v18 = vld [vmem:[#allocation11 + $0x760] sm:$0xf0] }
 0x1e7   :  { %3058 = vmatmul.bf16.gmra.mxu3 %v8406_v13 }
 0x1e8   :  { %v1352_v52 = vmax.f32 %v1147_v30, %v1288_v41  ;;  %v1293_v10 = vmul.f32 0.2, %v1248_v56  ;;  %v6878_v41 = vor.u32 %v7735_v38, %v6875_v17 }
 0x1e9   :  { %v1100_v53 = vpop.f32.mrf.mxu2 }
 0x1ea   :  { %v8512_v47 = vpack.c.bf16 %v1352_v52, %v1348_v6  ;;  %v1149_v27 = vpop.f32.mrf.mxu3  ;;  %v1101_v2 = vadd.f32 %v1100_v53, %v8499_v58  ;;  %v1357_v37 = vmax.f32 %v1248_v56, %v1293_v10  ;;  %v7134_v52 = vor.u32 %v7799_v5, %v7131_v18  ;;  %3292 = vmatpush.bf16.msra.mxu0 %v6878_v41  ;;  %v7727_v18 = vld [vmem:[#allocation11 + $0x504] sm:$0xf] }
 0x1eb   :  { %v1200_v3 = vpop.f32.mrf.mxu0 }
 0x1ec   :  { %v1201_v61 = vadd.f32 %v1200_v3, %v8493_v24  ;;  %v1249_v63 = vpop.f32.mrf.mxu1  ;;  %3102 = vmatmul.bf16.vlgmr.msrb.gmra.mxu0 %v8512_v47  ;;  %v1150_v15 = vadd.f32 %v1149_v27, %v1101_v2  ;;  %3341 = vmatpush.bf16.msra.mxu1 %v7134_v52  ;;  %v7599_v2 = vld [vmem:[#allocation11 + $0x104] sm:$0xf]  ;;  %v1020_v52 = vadd.f32 %v8442_v14, %v8381_v46 }
 0x1ed   :  { %v6331_v3 = vld [vmem:[#allocation11 + $0x120] sm:$0xf0] }
 0x1ee   :  { %v1250_v11 = vadd.f32 %v1249_v63, %v1201_v61  ;;  %v1292_v42 = vmul.f32 0.2, %v1150_v15  ;;  %v6334_v63 = vor.u32 %v7599_v2, %v6331_v3 }
 0x1f0   :  { %v1297_v36 = vmul.f32 0.2, %v1250_v11  ;;  %v1356_v53 = vmax.f32 %v1150_v15, %v1292_v42  ;;  %v6590_v15 = vor.u32 %v7663_v4, %v6587_v9  ;;  %3195 = vmatpush.bf16.msra.mxu2 %v6334_v63  ;;  %v1069_v4 = vadd.f32 %v8444_v16, %v1020_v52  ;;  %v7591_v9 = vld [vmem:[#allocation11 + $0xc4] sm:$0xf] }
 0x1f1   :  { %v1102_v12 = vpop.f32.mrf.mxu2 }
 0x1f2   :  { %v1361_v21 = vmax.f32 %v1250_v11, %v1297_v36  ;;  %v1103_v22 = vadd.f32 %v1102_v12, %v8499_v58  ;;  %v1151_v23 = vpop.f32.mrf.mxu3  ;;  %3244 = vmatpush.bf16.msra.mxu3 %v6590_v15  ;;  %v1319_v16 = vmul.f32 0.2, %v1069_v4 }
 0x1f3   :  { %v1203_v30 = vpop.f32.mrf.mxu0 }
 0x1f4   :  { %v8518_v31 = vpack.c.bf16 %v1361_v21, %v1357_v37  ;;  %v1152_v33 = vadd.f32 %v1151_v23, %v1103_v22  ;;  %v1252_v34 = vpop.f32.mrf.mxu1  ;;  %v1204_v6 = vadd.f32 %v1203_v30, %v8493_v24 }
 0x1f6   :  { %v1296_v49 = vmul.f32 0.2, %v1152_v33  ;;  %3014 = vmatmul.bf16.gmra.mxu2 %v8425_v19  ;;  %3156 = vmatmul.bf16.gmra.mxu1 %v8518_v31  ;;  %v1253_v60 = vadd.f32 %v1252_v34, %v1204_v6  ;;  %v7791_v6 = vld [vmem:[#allocation11 + $0x704] sm:$0xf] }
 0x1f7   :  { %3063 = vmatmul.bf16.gmra.mxu3 %v8418_v1 }
 0x1f8   :  { %v1360_v56 = vmax.f32 %v1152_v33, %v1296_v49  ;;  %v1301_v36 = vmul.f32 0.2, %v1253_v60  ;;  %v6843_v49 = vld [vmem:[#allocation11 + $0x520] sm:$0xf0] }
 0x1f9   :  { %v1105_v27 = vpop.f32.mrf.mxu2 }
 0x1fa   :  { %v8524_v48 = vpack.c.bf16 %v1360_v56, %v1356_v53  ;;  %v1154_v0 = vpop.f32.mrf.mxu3  ;;  %v1106_v45 = vadd.f32 %v1105_v27, %v8499_v58  ;;  %v1365_v23 = vmax.f32 %v1253_v60, %v1301_v36  ;;  %v6846_v53 = vor.u32 %v7727_v18, %v6843_v49  ;;  %v7099_v56 = vld [vmem:[#allocation11 + $0x720] sm:$0xf0] }
 0x1fb   :  { %v1205_v61 = vpop.f32.mrf.mxu0 }
 0x1fc   :  { %v1206_v10 = vadd.f32 %v1205_v61, %v8493_v24  ;;  %v1254_v11 = vpop.f32.mrf.mxu1  ;;  %3107 = vmatmul.bf16.gmra.mxu0 %v8524_v48  ;;  %v1155_v37 = vadd.f32 %v1154_v0, %v1106_v45  ;;  %v7102_v0 = vor.u32 %v7791_v6, %v7099_v56 }
 0x1fd   :  { %3293 = vmatpush.bf16.msra.mxu0 %v6846_v53 }
 0x1fe   :  { %v1255_v12 = vadd.f32 %v1254_v11, %v1206_v10  ;;  %v1300_v34 = vmul.f32 0.2, %v1155_v37  ;;  %3342 = vmatpush.bf16.msra.mxu1 %v7102_v0  ;;  %v6299_v10 = vld [vmem:[#allocation11 + $0xe0] sm:$0xf0] }
 0x1ff   :  { %v7655_v11 = vld [vmem:[#allocation11 + $0x2c4] sm:$0xf] }
 0x200   :  { %v1305_v21 = vmul.f32 0.2, %v1255_v12  ;;  %v1364_v2 = vmax.f32 %v1155_v37, %v1300_v34 }
 0x201   :  { %v1107_v22 = vpop.f32.mrf.mxu2 }
 0x202   :  { %v1369_v42 = vmax.f32 %v1255_v12, %v1305_v21  ;;  %v1108_v30 = vadd.f32 %v1107_v22, %v8499_v58  ;;  %v1156_v33 = vpop.f32.mrf.mxu3  ;;  %v6302_v12 = vor.u32 %v7591_v9, %v6299_v10  ;;  %v6555_v21 = vld [vmem:[#allocation11 + $0x2e0] sm:$0xf0] }
 0x203   :  { %v1208_v38 = vpop.f32.mrf.mxu0  ;;  %v7783_v9 = vld [vmem:[#allocation11 + $0x6c4] sm:$0xf] }
 0x204   :  { %v8530_v17 = vpack.c.bf16 %v1369_v42, %v1365_v23  ;;  %v1157_v5 = vadd.f32 %v1156_v33, %v1108_v30  ;;  %v1257_v41 = vpop.f32.mrf.mxu1  ;;  %v1209_v60 = vadd.f32 %v1208_v38, %v8493_v24  ;;  %v6558_v23 = vor.u32 %v7655_v11, %v6555_v21  ;;  %3196 = vmatpush.bf16.msra.mxu2 %v6302_v12  ;;  %v7067_v10 = vld [vmem:[#allocation11 + $0x6e0] sm:$0xf0] }
 0x205   :  { %v1315_v33 = vmul.f32 0.2, %v8433_v28 }
 0x206   :  { %v1304_v27 = vmul.f32 0.2, %v1157_v5  ;;  %3019 = vmatmul.bf16.gmra.mxu2 %v8439_v7  ;;  %3161 = vmatmul.bf16.gmra.mxu1 %v8530_v17  ;;  %v1258_v61 = vadd.f32 %v1257_v41, %v1209_v60 }
 0x207   :  { %3068 = vmatmul.bf16.gmra.mxu3 %v8430_v51  ;;  %v1379_v53 = vmax.f32 %v8433_v28, %v1315_v33  ;;  %v7070_v28 = vor.u32 %v7783_v9, %v7067_v10 }
 0x208   :  { %v1368_v3 = vmax.f32 %v1157_v5, %v1304_v27  ;;  %v1309_v42 = vmul.f32 0.2, %v1258_v61  ;;  %3245 = vmatpush.bf16.msra.mxu3 %v6558_v23  ;;  %v1383_v5 = vmax.f32 %v1069_v4, %v1319_v16  ;;  %v1025_v4 = vadd.f32 %v8457_v55, %v8381_v46  ;;  %v7583_v16 = vld [vmem:[#allocation11 + $0x84] sm:$0xf] }
 0x209   :  { %v1110_v45 = vpop.f32.mrf.mxu2  ;;  %3343 = vmatpush.bf16.msra.mxu1 %v7070_v28 }
 0x20a   :  { %v8539_v14 = vpack.c.bf16 %v1368_v3, %v1364_v2  ;;  %v1159_v63 = vpop.f32.mrf.mxu3  ;;  %v1111_v15 = vadd.f32 %v1110_v45, %v8499_v58  ;;  %v1373_v18 = vmax.f32 %v1258_v61, %v1309_v42  ;;  %v7719_v3 = vld [vmem:[#allocation11 + $0x4c4] sm:$0xf]  ;;  %v1074_v21 = vadd.f32 %v8459_v57, %v1025_v4 }
 0x20b   :  { %v1210_v36 = vpop.f32.mrf.mxu0  ;;  %v6811_v45 = vld [vmem:[#allocation11 + $0x4e0] sm:$0xf0] }
 0x20c   :  { %v1211_v22 = vadd.f32 %v1210_v36, %v8493_v24  ;;  %v1259_v37 = vpop.f32.mrf.mxu1  ;;  %3112 = vmatmul.bf16.gmra.mxu0 %v8539_v14  ;;  %v1160_v34 = vadd.f32 %v1159_v63, %v1111_v15  ;;  %v8549_v63 = vpack.c.bf16 %v1383_v5, %v1379_v53  ;;  %v6814_v61 = vor.u32 %v7719_v3, %v6811_v45  ;;  %v6267_v42 = vld [vmem:[#allocation11 + $0xa0] sm:$0xf0] }
 0x20d   :  { %v6270_v5 = vor.u32 %v7583_v16, %v6267_v42  ;;  %v1327_v57 = vmul.f32 0.2, %v1074_v21  ;;  %v1323_v53 = vmul.f32 0.2, %v8448_v39  ;;  %v7775_v16 = vld [vmem:[#allocation11 + $0x684] sm:$0xf] }
 0x20e   :  { %v1260_v30 = vadd.f32 %v1259_v37, %v1211_v22  ;;  %v1308_v56 = vmul.f32 0.2, %v1160_v34  ;;  %3294 = vmatpush.bf16.msra.mxu0 %v6814_v61  ;;  %v7035_v42 = vld [vmem:[#allocation11 + $0x6a0] sm:$0xf0] }
 0x20f   :  { %3197 = vmatpush.bf16.msra.mxu2 %v6270_v5  ;;  %v1387_v61 = vmax.f32 %v8448_v39, %v1323_v53  ;;  %v7038_v39 = vor.u32 %v7775_v16, %v7035_v42  ;;  %v7631_v16 = vld [vmem:[#allocation11 + $0x204] sm:$0xf] }
 0x210   :  { %v1313_v38 = vmul.f32 0.2, %v1260_v30  ;;  %v1372_v36 = vmax.f32 %v1160_v34, %v1308_v56 }
 0x211   :  { %v1112_v41 = vpop.f32.mrf.mxu2  ;;  %3344 = vmatpush.bf16.msra.mxu1 %v7038_v39  ;;  %v6459_v39 = vld [vmem:[#allocation11 + $0x220] sm:$0xf0] }
 0x212   :  { %v1377_v49 = vmax.f32 %v1260_v30, %v1313_v38  ;;  %v1113_v6 = vadd.f32 %v1112_v41, %v8499_v58  ;;  %v1161_v52 = vpop.f32.mrf.mxu3  ;;  %v7647_v30 = vld [vmem:[#allocation11 + $0x284] sm:$0xf] }
 0x213   :  { %v1213_v27 = vpop.f32.mrf.mxu0  ;;  %v6523_v41 = vld [vmem:[#allocation11 + $0x2a0] sm:$0xf0] }
 0x214   :  { %v8547_v60 = vpack.c.bf16 %v1377_v49, %v1373_v18  ;;  %v1162_v0 = vadd.f32 %v1161_v52, %v1113_v6  ;;  %v1262_v2 = vpop.f32.mrf.mxu1  ;;  %v1214_v15 = vadd.f32 %v1213_v27, %v8493_v24  ;;  %v6526_v49 = vor.u32 %v7647_v30, %v6523_v41 }
 0x216   :  { %v1312_v11 = vmul.f32 0.2, %v1162_v0  ;;  %3024 = vmatmul.bf16.gmra.mxu2 %v8454_v43  ;;  %3166 = vmatmul.bf16.gmra.mxu1 %v8547_v60  ;;  %v1263_v37 = vadd.f32 %v1262_v2, %v1214_v15 }
 0x217   :  { %3073 = vmatmul.bf16.gmra.mxu3 %v8549_v63 }
 0x218   :  { %v1376_v12 = vmax.f32 %v1162_v0, %v1312_v11  ;;  %v1317_v6 = vmul.f32 0.2, %v1263_v37  ;;  %3246 = vmatpush.bf16.msra.mxu3 %v6526_v49  ;;  %v1391_v0 = vmax.f32 %v1074_v21, %v1327_v57  ;;  %v1030_v21 = vadd.f32 %v8472_v35, %v8381_v46  ;;  %v7575_v57 = vld [vmem:[#allocation11 + $0x44] sm:$0xf] }
 0x219   :  { %v1115_v22 = vpop.f32.mrf.mxu2 }
 0x21a   :  { %v8558_v55 = vpack.c.bf16 %v1376_v12, %v1372_v36  ;;  %v1164_v23 = vpop.f32.mrf.mxu3  ;;  %v1116_v33 = vadd.f32 %v1115_v22, %v8499_v58  ;;  %v1381_v3 = vmax.f32 %v1263_v37, %v1317_v6  ;;  %v7711_v12 = vld [vmem:[#allocation11 + $0x484] sm:$0xf]  ;;  %v1079_v41 = vadd.f32 %v8474_v40, %v1030_v21 }
 0x21b   :  { %v1215_v38 = vpop.f32.mrf.mxu0  ;;  %v6779_v22 = vld [vmem:[#allocation11 + $0x4a0] sm:$0xf0] }
 0x21c   :  { %v1216_v18 = vadd.f32 %v1215_v38, %v8493_v24  ;;  %v1264_v34 = vpop.f32.mrf.mxu1  ;;  %3117 = vmatmul.bf16.gmra.mxu0 %v8558_v55  ;;  %v1165_v56 = vadd.f32 %v1164_v23, %v1116_v33  ;;  %v8568_v23 = vpack.c.bf16 %v1391_v0, %v1387_v61  ;;  %v6782_v37 = vor.u32 %v7711_v12, %v6779_v22  ;;  %v6235_v6 = vld [vmem:[#allocation11 + $0x60] sm:$0xf0] }
 0x21d   :  { %v6238_v0 = vor.u32 %v7575_v57, %v6235_v6  ;;  %v1335_v40 = vmul.f32 0.2, %v1079_v41  ;;  %v1331_v61 = vmul.f32 0.2, %v8463_v26  ;;  %v7567_v12 = vld [vmem:[#allocation11 + $0x4] sm:$0xf]  ;;  %v6462_v57 = vor.u32 %v7631_v16, %v6459_v39 }
 0x21e   :  { %v1265_v52 = vadd.f32 %v1264_v34, %v1216_v18  ;;  %v1316_v10 = vmul.f32 0.2, %v1165_v56  ;;  %3295 = vmatpush.bf16.msra.mxu0 %v6782_v37  ;;  %v6203_v22 = vld [vmem:[#allocation11 + $0x20] sm:$0xf0] }
 0x21f   :  { %3198 = vmatpush.bf16.msra.mxu2 %v6238_v0  ;;  %v1035_v0 = vadd.f32 %v8487_v62, %v8381_v46  ;;  %v7695_v16 = vld [vmem:[#allocation11 + $0x404] sm:$0xf] }
 0x220   :  { %v1321_v27 = vmul.f32 0.2, %v1265_v52  ;;  %v1380_v38 = vmax.f32 %v1165_v56, %v1316_v10 }
 0x221   :  { %v1117_v2 = vpop.f32.mrf.mxu2 }
 0x222   :  { %v1385_v45 = vmax.f32 %v1265_v52, %v1321_v27  ;;  %v1118_v9 = vadd.f32 %v1117_v2, %v8499_v58  ;;  %v1166_v4 = vpop.f32.mrf.mxu3  ;;  %v7639_v52 = vld [vmem:[#allocation11 + $0x244] sm:$0xf] }
 0x223   :  { %v1218_v11 = vpop.f32.mrf.mxu0  ;;  %v6491_v2 = vld [vmem:[#allocation11 + $0x260] sm:$0xf0] }
 0x224   :  { %v8566_v15 = vpack.c.bf16 %v1385_v45, %v1381_v3  ;;  %v1167_v28 = vadd.f32 %v1166_v4, %v1118_v9  ;;  %v1267_v36 = vpop.f32.mrf.mxu1  ;;  %v1219_v33 = vadd.f32 %v1218_v11, %v8493_v24  ;;  %v6494_v45 = vor.u32 %v7639_v52, %v6491_v2  ;;  %v7703_v52 = vld [vmem:[#allocation11 + $0x444] sm:$0xf] }
 0x226   :  { %v1320_v30 = vmul.f32 0.2, %v1167_v28  ;;  %3029 = vmatmul.bf16.gmra.mxu2 %v8469_v44  ;;  %3171 = vmatmul.bf16.gmra.mxu1 %v8566_v15  ;;  %v1268_v34 = vadd.f32 %v1267_v36, %v1219_v33  ;;  %v6206_v33 = vor.u32 %v7567_v12, %v6203_v22 }
 0x227   :  { %3078 = vmatmul.bf16.gmra.mxu3 %v8568_v23 }
 0x228   :  { %v1384_v5 = vmax.f32 %v1167_v28, %v1320_v30  ;;  %v1325_v9 = vmul.f32 0.2, %v1268_v34  ;;  %3247 = vmatpush.bf16.msra.mxu3 %v6494_v45  ;;  %v1399_v28 = vmax.f32 %v1079_v41, %v1335_v40  ;;  %3199 = vmatpush.bf16.msra.mxu2 %v6206_v33 }
 0x229   :  { %v1120_v18 = vpop.f32.mrf.mxu2 }
 0x22a   :  { %v8577_v35 = vpack.c.bf16 %v1384_v5, %v1380_v38  ;;  %v1169_v49 = vpop.f32.mrf.mxu3  ;;  %v1121_v53 = vadd.f32 %v1120_v18, %v8499_v58  ;;  %v1389_v21 = vmax.f32 %v1268_v34, %v1325_v9  ;;  %v1395_v38 = vmax.f32 %v8463_v26, %v1331_v61 }
 0x22b   :  { %v1220_v27 = vpop.f32.mrf.mxu0 }
 0x22c   :  { %v1221_v3 = vadd.f32 %v1220_v27, %v8493_v24  ;;  %v1269_v56 = vpop.f32.mrf.mxu1  ;;  %3122 = vmatmul.bf16.gmra.mxu0 %v8577_v35  ;;  %v1170_v10 = vadd.f32 %v1169_v49, %v1121_v53  ;;  %v6747_v53 = vld [vmem:[#allocation11 + $0x460] sm:$0xf0]  ;;  %v8587_v34 = vpack.c.bf16 %v1399_v28, %v1395_v38  ;;  %3248 = vmatpush.bf16.msra.mxu3 %v6462_v57  ;;  %v1339_v38 = vmul.f32 0.2, %v8478_v59 }
 0x22d   :  { %v7767_v27 = vld [vmem:[#allocation11 + $0x644] sm:$0xf]  ;;  %v6750_v2 = vor.u32 %v7703_v52, %v6747_v53 }
 0x22e   :  { %v1270_v4 = vadd.f32 %v1269_v56, %v1221_v3  ;;  %v1324_v5 = vmul.f32 0.2, %v1170_v10  ;;  %v7003_v3 = vld [vmem:[#allocation11 + $0x660] sm:$0xf0] }
 0x22f   :  { %v7006_v45 = vor.u32 %v7767_v27, %v7003_v3  ;;  %3296 = vmatpush.bf16.msra.mxu0 %v6750_v2 }
 0x230   :  { %v1329_v11 = vmul.f32 0.2, %v1270_v4  ;;  %v1388_v40 = vmax.f32 %v1170_v10, %v1324_v5  ;;  %v7759_v10 = vld [vmem:[#allocation11 + $0x604] sm:$0xf] }
 0x231   :  { %v1122_v36 = vpop.f32.mrf.mxu2  ;;  %3345 = vmatpush.bf16.msra.mxu1 %v7006_v45 }
 0x232   :  { %v1393_v37 = vmax.f32 %v1270_v4, %v1329_v11  ;;  %v1123_v42 = vadd.f32 %v1122_v36, %v8499_v58  ;;  %v1171_v30 = vpop.f32.mrf.mxu3  ;;  %v1084_v4 = vadd.f32 %v8489_v20, %v1035_v0  ;;  %v1403_v0 = vmax.f32 %v8478_v59, %v1339_v38 }
 0x233   :  { %v1223_v18 = vpop.f32.mrf.mxu0 }
 0x234   :  { %v8585_v6 = vpack.c.bf16 %v1393_v37, %v1389_v21  ;;  %v1172_v49 = vadd.f32 %v1171_v30, %v1123_v42  ;;  %v1272_v41 = vpop.f32.mrf.mxu1  ;;  %v1224_v56 = vadd.f32 %v1223_v18, %v8493_v24  ;;  %v6715_v21 = vld [vmem:[#allocation11 + $0x420] sm:$0xf0]  ;;  %v1343_v37 = vmul.f32 0.2, %v1084_v4 }
 0x235   :  { %v6718_v42 = vor.u32 %v7695_v16, %v6715_v21  ;;  %v6971_v30 = vld [vmem:[#allocation11 + $0x620] sm:$0xf0] }
 0x236   :  { %v1328_v26 = vmul.f32 0.2, %v1172_v49  ;;  %3034 = vmatmul.bf16.gmra.mxu2 %v8484_v8  ;;  %3176 = vmatmul.bf16.gmra.mxu1 %v8585_v6  ;;  %v1273_v61 = vadd.f32 %v1272_v41, %v1224_v56  ;;  %v6974_v39 = vor.u32 %v7759_v10, %v6971_v30  ;;  %v1407_v57 = vmax.f32 %v1084_v4, %v1343_v37 }
 0x237   :  { %3083 = vmatmul.bf16.gmra.mxu3 %v8587_v34  ;;  %3297 = vmatpush.bf16.msra.mxu0 %v6718_v42 }
 0x238   :  { %v1392_v9 = vmax.f32 %v1172_v49, %v1328_v26  ;;  %v1333_v20 = vmul.f32 0.2, %v1273_v61  ;;  %3346 = vmatpush.bf16.msra.mxu1 %v6974_v39 }
 0x239   :  { %v1125_v46 = vpop.f32.mrf.mxu2 }
 0x23a   :  { %v8596_v62 = vpack.c.bf16 %v1392_v9, %v1388_v40  ;;  %v1174_v11 = vpop.f32.mrf.mxu3  ;;  %v1126_v28 = vadd.f32 %v1125_v46, %v8499_v58  ;;  %v1397_v41 = vmax.f32 %v1273_v61, %v1333_v20  ;;  %v6433_v40 = vld [vmem:[#allocation11 + $0x1c8] sm:$0xf] }
 0x23b   :  { %v1225_v36 = vpop.f32.mrf.mxu0  ;;  %v7628_v9 = vld [vmem:[#allocation11 + $0x1e4] sm:$0xf0] }
 0x23c   :  { %v1226_v12 = vadd.f32 %v1225_v36, %v8493_v24  ;;  %v1274_v22 = vpop.f32.mrf.mxu1  ;;  %3127 = vmatmul.bf16.gmra.mxu0 %v8596_v62  ;;  %v1175_v5 = vadd.f32 %v1174_v11, %v1126_v28  ;;  %v6689_v46 = vld [vmem:[#allocation11 + $0x3c8] sm:$0xf]  ;;  %v8606_v11 = vpack.c.bf16 %v1407_v57, %v1403_v0  ;;  %v6434_v4 = vor.u32 %v7628_v9, %v6433_v40 }
 0x23d   :  { %v7692_v28 = vld [vmem:[#allocation11 + $0x3e4] sm:$0xf0] }
 0x23e   :  { %v1275_v33 = vadd.f32 %v1274_v22, %v1226_v12  ;;  %v1332_v2 = vmul.f32 0.2, %v1175_v5  ;;  %v6690_v59 = vor.u32 %v7692_v28, %v6689_v46  ;;  %3388 = vmatpush.bf16.msrb.mxu2 %v6434_v4 }
 0x240   :  { %v1337_v18 = vmul.f32 0.2, %v1275_v33  ;;  %v1396_v12 = vmax.f32 %v1175_v5, %v1332_v2  ;;  %3437 = vmatpush.bf16.msrb.mxu3 %v6690_v59  ;;  %v6945_v5 = vld [vmem:[#allocation11 + $0x5c8] sm:$0xf] }
 0x241   :  { %v1127_v49 = vpop.f32.mrf.mxu2 }
 0x242   :  { %v1401_v52 = vmax.f32 %v1275_v33, %v1337_v18  ;;  %v1128_v53 = vadd.f32 %v1127_v49, %v8499_v58  ;;  %v1176_v27 = vpop.f32.mrf.mxu3  ;;  %v7756_v49 = vld [vmem:[#allocation11 + $0x5e4] sm:$0xf0] }
 0x243   :  { %v1228_v3 = vpop.f32.mrf.mxu0 }
 0x244   :  { %v8604_v26 = vpack.c.bf16 %v1401_v52, %v1397_v41  ;;  %v1177_v56 = vadd.f32 %v1176_v27, %v1128_v53  ;;  %v1277_v45 = vpop.f32.mrf.mxu1  ;;  %v1229_v36 = vadd.f32 %v1228_v3, %v8493_v24  ;;  %v6946_v52 = vor.u32 %v7756_v49, %v6945_v5  ;;  %v7201_v53 = vld [vmem:[#allocation11 + $0x7c8] sm:$0xf] }
 0x245   :  { %v7820_v27 = vld [vmem:[#allocation11 + $0x7e4] sm:$0xf0] }
 0x246   :  { %v1336_v61 = vmul.f32 0.2, %v1177_v56  ;;  %3039 = vmatmul.bf16.gmra.mxu2 %v8501_v54  ;;  %3181 = vmatmul.bf16.gmra.mxu1 %v8604_v26  ;;  %v1278_v10 = vadd.f32 %v1277_v45, %v1229_v36  ;;  %v7202_v45 = vor.u32 %v7820_v27, %v7201_v53  ;;  %v7812_v49 = vld [vmem:[#allocation11 + $0x7a4] sm:$0xf0] }
 0x247   :  { %3088 = vmatmul.bf16.gmra.mxu3 %v8606_v11  ;;  %3486 = vmatpush.bf16.msrb.mxu0 %v6946_v52 }
 0x248   :  { %v1400_v22 = vmax.f32 %v1177_v56, %v1336_v61  ;;  %v1341_v39 = vmul.f32 0.2, %v1278_v10  ;;  %3535 = vmatpush.bf16.msrb.mxu1 %v7202_v45 }
 0x249   :  { %v1130_v16 = vpop.f32.mrf.mxu2 }
 0x24a   :  { %v8612_v21 = vpack.c.bf16 %v1400_v22, %v1396_v12  ;;  %v1179_v37 = vpop.f32.mrf.mxu3  ;;  %v1131_v30 = vadd.f32 %v1130_v16, %v8499_v58  ;;  %v1405_v0 = vmax.f32 %v1278_v10, %v1341_v39  ;;  %v6401_v16 = vld [vmem:[#allocation11 + $0x188] sm:$0xf] }
 0x24b   :  { %v1230_v42 = vpop.f32.mrf.mxu0  ;;  %v7620_v10 = vld [vmem:[#allocation11 + $0x1a4] sm:$0xf0] }
 0x24c   :  { %v1231_v20 = vadd.f32 %v1230_v42, %v8493_v24  ;;  %3132 = vmatmul.bf16.gmra.mxu0 %v8612_v21  ;;  %v1279_v33 = vpop.f32.mrf.mxu1  ;;  %v1180_v18 = vadd.f32 %v1179_v37, %v1131_v30  ;;  %v8618_v24 = vld [vmem:[#allocation13] sm:$0xff]  ;;  %v6657_v37 = vld [vmem:[#allocation11 + $0x388] sm:$0xf]  ;;  %v6402_v42 = vor.u32 %v7620_v10, %v6401_v16 }
 0x24d   :  { %v8625_v28 = vperm.slane %v8618_v24, 0  ;;  %v7684_v30 = vld [vmem:[#allocation11 + $0x3a4] sm:$0xf0] }
 0x24e   :  { %v1280_v38 = vadd.f32 %v1279_v33, %v1231_v20  ;;  %v1340_v40 = vmul.f32 0.2, %v1180_v18  ;;  %v6658_v33 = vor.u32 %v7684_v30, %v6657_v37  ;;  %3389 = vmatpush.bf16.msrb.mxu2 %v6402_v42  ;;  %v6913_v39 = vld [vmem:[#allocation11 + $0x588] sm:$0xf] }
 0x24f   :  { %v6881_v37 = vld [vmem:[#allocation11 + $0x548] sm:$0xf] }
 0x250   :  { %v1345_v57 = vmul.f32 0.2, %v1280_v38  ;;  %3438 = vmatpush.bf16.msrb.mxu3 %v6658_v33  ;;  %v7740_v42 = vld [vmem:[#allocation11 + $0x564] sm:$0xf0] }
 0x251   :  { %v1132_v41 = vpop.f32.mrf.mxu2  ;;  %v7137_v30 = vld [vmem:[#allocation11 + $0x748] sm:$0xf] }
 0x252   :  { %v1409_v2 = vmax.f32 %v1280_v38, %v1345_v57  ;;  %v1133_v3 = vadd.f32 %v1132_v41, %v8499_v58  ;;  %v1181_v56 = vpop.f32.mrf.mxu3  ;;  %v1404_v58 = vmax.f32 %v1180_v18, %v1340_v40  ;;  %v7748_v38 = vld [vmem:[#allocation11 + $0x5a4] sm:$0xf0] }
 0x253   :  { %v7169_v18 = vld [vmem:[#allocation11 + $0x788] sm:$0xf]  ;;  %v6914_v5 = vor.u32 %v7748_v38, %v6913_v39  ;;  %v6882_v38 = vor.u32 %v7740_v42, %v6881_v37 }
 0x254   :  { %v8620_v9 = vpack.c.bf16 %v1409_v2, %v1405_v0  ;;  %v1182_v46 = vadd.f32 %v1181_v56, %v1133_v3  ;;  %v7170_v53 = vor.u32 %v7812_v49, %v7169_v18  ;;  %v6369_v2 = vld [vmem:[#allocation11 + $0x148] sm:$0xf] }
 0x255   :  { %3487 = vmatpush.bf16.msrb.mxu0 %v6914_v5  ;;  %v7612_v3 = vld [vmem:[#allocation11 + $0x164] sm:$0xf0] }
 0x256   :  { %v1344_v4 = vmul.f32 0.2, %v1182_v46  ;;  %3186 = vmatmul.bf16.gmra.mxu1 %v8620_v9  ;;  %3200 = vmatmul.bf16.vlgmr.msra.gmra.mxu2 %v8401_v50  ;;  %v6625_v56 = vld [vmem:[#allocation11 + $0x348] sm:$0xf] }
 0x257   :  { %3249 = vmatmul.bf16.vlgmr.msra.gmra.mxu3 %v8394_v25  ;;  %3536 = vmatpush.bf16.msrb.mxu1 %v7170_v53  ;;  %v7804_v18 = vld [vmem:[#allocation11 + $0x764] sm:$0xf0] }
 0x258   :  { %v1408_v61 = vmax.f32 %v1182_v46, %v1344_v4  ;;  %v6370_v46 = vor.u32 %v7612_v3, %v6369_v2  ;;  %v7676_v4 = vld [vmem:[#allocation11 + $0x364] sm:$0xf0] }
 0x259   :  { %v3005_v36 = vpop.f32.mrf.mxu2  ;;  %3488 = vmatpush.bf16.msrb.mxu0 %v6882_v38  ;;  %v7732_v38 = vld [vmem:[#allocation11 + $0x524] sm:$0xf0] }
 0x25a   :  { %v8628_v59 = vpack.c.bf16 %v1408_v61, %v1404_v58  ;;  %v3006_v12 = vadd.f32 %v3005_v36, %v8625_v28  ;;  %v3054_v22 = vpop.f32.mrf.mxu3  ;;  %3390 = vmatpush.bf16.msrb.mxu2 %v6370_v46  ;;  %v6593_v46 = vld [vmem:[#allocation11 + $0x308] sm:$0xf] }
 0x25c   :  { %v3055_v20 = vadd.f32 %v3054_v22, %v3006_v12  ;;  %3137 = vmatmul.bf16.gmra.mxu0 %v8628_v59  ;;  %v6626_v12 = vor.u32 %v7676_v4, %v6625_v56 }
 0x25e   :  { %3439 = vmatpush.bf16.msrb.mxu3 %v6626_v12 }
 0x261   :  { %v3007_v57 = vpop.f32.mrf.mxu2 }
 0x262   :  { %v3008_v41 = vadd.f32 %v3007_v57, %v8625_v28  ;;  %v3056_v52 = vpop.f32.mrf.mxu3 }
 0x263   :  { %v3152_v27 = vpop.f32.mrf.mxu1 }
 0x264   :  { %v3057_v0 = vadd.f32 %v3056_v52, %v3008_v41 }
 0x266   :  { %3205 = vmatmul.bf16.gmra.mxu2 %v8413_v32  ;;  %3347 = vmatmul.bf16.vlgmr.msra.gmra.mxu1 %v8506_v29 }
 0x267   :  { %3254 = vmatmul.bf16.gmra.mxu3 %v8406_v13 }
 0x269   :  { %v3010_v45 = vpop.f32.mrf.mxu2  ;;  %v3103_v40 = vpop.f32.mrf.mxu0 }
 0x26a   :  { %v3011_v58 = vadd.f32 %v3010_v45, %v8625_v28  ;;  %v3059_v61 = vpop.f32.mrf.mxu3  ;;  %v3104_v36 = vadd.f32 %v3103_v40, %v3055_v20  ;;  %v7138_v20 = vor.u32 %v7804_v18, %v7137_v30  ;;  %v6337_v45 = vld [vmem:[#allocation11 + $0x108] sm:$0xf] }
 0x26b   :  { %v3154_v22 = vpop.f32.mrf.mxu1  ;;  %v7604_v40 = vld [vmem:[#allocation11 + $0x124] sm:$0xf0] }
 0x26c   :  { %v3060_v16 = vadd.f32 %v3059_v61, %v3011_v58  ;;  %v3153_v10 = vadd.f32 %v3152_v27, %v3104_v36  ;;  %3298 = vmatmul.bf16.vlgmr.msra.gmra.mxu0 %v8512_v47  ;;  %3537 = vmatpush.bf16.msrb.mxu1 %v7138_v20  ;;  %v6338_v58 = vor.u32 %v7604_v40, %v6337_v45  ;;  %v7668_v61 = vld [vmem:[#allocation11 + $0x324] sm:$0xf0] }
 0x26d   :  { %v6594_v42 = vor.u32 %v7668_v61, %v6593_v46  ;;  %v7105_v18 = vld [vmem:[#allocation11 + $0x708] sm:$0xf] }
 0x26e   :  { %v4564_v52 = vmul.f32 0.2, %v3153_v10  ;;  %3391 = vmatpush.bf16.msrb.mxu2 %v6338_v58  ;;  %v7796_v20 = vld [vmem:[#allocation11 + $0x724] sm:$0xf0] }
 0x26f   :  { %3440 = vmatpush.bf16.msrb.mxu3 %v6594_v42  ;;  %v7596_v58 = vld [vmem:[#allocation11 + $0xe4] sm:$0xf0] }
 0x270   :  { %v4692_v3 = vmax.f32 %v3153_v10, %v4564_v52  ;;  %v6849_v10 = vld [vmem:[#allocation11 + $0x508] sm:$0xf] }
 0x271   :  { %v3012_v33 = vpop.f32.mrf.mxu2  ;;  %v3105_v39 = vpop.f32.mrf.mxu0  ;;  %v6561_v61 = vld [vmem:[#allocation11 + $0x2c8] sm:$0xf] }
 0x272   :  { %v3013_v57 = vadd.f32 %v3012_v33, %v8625_v28  ;;  %v3061_v5 = vpop.f32.mrf.mxu3  ;;  %v3106_v49 = vadd.f32 %v3105_v39, %v3057_v0 }
 0x273   :  { %v3157_v41 = vpop.f32.mrf.mxu1 }
 0x274   :  { %v3062_v53 = vadd.f32 %v3061_v5, %v3013_v57  ;;  %v3155_v27 = vadd.f32 %v3154_v22, %v3106_v49  ;;  %v6850_v49 = vor.u32 %v7732_v38, %v6849_v10 }
 0x276   :  { %v4572_v2 = vmul.f32 0.2, %v3155_v27  ;;  %3210 = vmatmul.bf16.gmra.mxu2 %v8425_v19  ;;  %3352 = vmatmul.bf16.gmra.mxu1 %v8518_v31 }
 0x277   :  { %3259 = vmatmul.bf16.gmra.mxu3 %v8418_v1  ;;  %3489 = vmatpush.bf16.msrb.mxu0 %v6850_v49 }
 0x278   :  { %v4700_v56 = vmax.f32 %v3155_v27, %v4572_v2 }
 0x279   :  { %v3015_v0 = vpop.f32.mrf.mxu2  ;;  %v3108_v4 = vpop.f32.mrf.mxu0 }
 0x27a   :  { %v8642_v36 = vpack.c.bf16 %v4700_v56, %v4692_v3  ;;  %v3016_v12 = vadd.f32 %v3015_v0, %v8625_v28  ;;  %v3064_v22 = vpop.f32.mrf.mxu3  ;;  %v3109_v37 = vadd.f32 %v3108_v4, %v3060_v16  ;;  %v7106_v16 = vor.u32 %v7796_v20, %v7105_v18  ;;  %v6305_v4 = vld [vmem:[#allocation11 + $0xc8] sm:$0xf] }
 0x27b   :  { %v3159_v30 = vpop.f32.mrf.mxu1  ;;  %v7724_v20 = vld [vmem:[#allocation11 + $0x4e4] sm:$0xf0] }
 0x27c   :  { %v3065_v33 = vadd.f32 %v3064_v22, %v3016_v12  ;;  %v3158_v39 = vadd.f32 %v3157_v41, %v3109_v37  ;;  %3303 = vmatmul.bf16.gmra.mxu0 %v8524_v48  ;;  %3538 = vmatpush.bf16.msrb.mxu1 %v7106_v16  ;;  %v6306_v22 = vor.u32 %v7596_v58, %v6305_v4  ;;  %v7660_v37 = vld [vmem:[#allocation11 + $0x2e4] sm:$0xf0] }
 0x27d   :  { %v6562_v38 = vor.u32 %v7660_v37, %v6561_v61  ;;  %v7588_v37 = vld [vmem:[#allocation11 + $0xa4] sm:$0xf0] }
 0x27e   :  { %v4580_v56 = vmul.f32 0.2, %v3158_v39  ;;  %3392 = vmatpush.bf16.msrb.mxu2 %v6306_v22  ;;  %v6273_v22 = vld [vmem:[#allocation11 + $0x88] sm:$0xf] }
 0x27f   :  { %3441 = vmatpush.bf16.msrb.mxu3 %v6562_v38  ;;  %v7652_v38 = vld [vmem:[#allocation11 + $0x2a4] sm:$0xf0] }
 0x280   :  { %v4708_v46 = vmax.f32 %v3158_v39, %v4580_v56  ;;  %v6817_v39 = vld [vmem:[#allocation11 + $0x4c8] sm:$0xf] }
 0x281   :  { %v3017_v57 = vpop.f32.mrf.mxu2  ;;  %v3110_v5 = vpop.f32.mrf.mxu0  ;;  %v6818_v16 = vor.u32 %v7724_v20, %v6817_v39  ;;  %v7788_v56 = vld [vmem:[#allocation11 + $0x6e4] sm:$0xf0] }
 0x282   :  { %v3018_v52 = vadd.f32 %v3017_v57, %v8625_v28  ;;  %v3066_v27 = vpop.f32.mrf.mxu3  ;;  %v3111_v2 = vadd.f32 %v3110_v5, %v3062_v53 }
 0x283   :  { %v3162_v3 = vpop.f32.mrf.mxu1  ;;  %3490 = vmatpush.bf16.msrb.mxu0 %v6818_v16 }
 0x284   :  { %v3067_v45 = vadd.f32 %v3066_v27, %v3018_v52  ;;  %v3160_v41 = vadd.f32 %v3159_v30, %v3111_v2  ;;  %v7073_v52 = vld [vmem:[#allocation11 + $0x6c8] sm:$0xf] }
 0x286   :  { %v4588_v40 = vmul.f32 0.2, %v3160_v41  ;;  %3215 = vmatmul.bf16.gmra.mxu2 %v8439_v7  ;;  %3357 = vmatmul.bf16.gmra.mxu1 %v8530_v17 }
 0x287   :  { %3264 = vmatmul.bf16.gmra.mxu3 %v8430_v51 }
 0x288   :  { %v4716_v0 = vmax.f32 %v3160_v41, %v4588_v40 }
 0x289   :  { %v3020_v53 = vpop.f32.mrf.mxu2  ;;  %v3113_v12 = vpop.f32.mrf.mxu0 }
 0x28a   :  { %v3021_v42 = vadd.f32 %v3020_v53, %v8625_v28  ;;  %v3069_v30 = vpop.f32.mrf.mxu3  ;;  %v3114_v10 = vadd.f32 %v3113_v12, %v3065_v33  ;;  %v8651_v18 = vpack.c.bf16 %v4716_v0, %v4708_v46  ;;  %v7074_v46 = vor.u32 %v7788_v56, %v7073_v52 }
 0x28b   :  { %v3164_v57 = vpop.f32.mrf.mxu1 }
 0x28c   :  { %v3070_v5 = vadd.f32 %v3069_v30, %v3021_v42  ;;  %v3163_v49 = vadd.f32 %v3162_v3, %v3114_v10  ;;  %3308 = vmatmul.bf16.gmra.mxu0 %v8539_v14  ;;  %3539 = vmatpush.bf16.msrb.mxu1 %v7074_v46  ;;  %v6529_v42 = vld [vmem:[#allocation11 + $0x288] sm:$0xf]  ;;  %v6274_v10 = vor.u32 %v7588_v37, %v6273_v22 }
 0x28d   :  { %v6530_v52 = vor.u32 %v7652_v38, %v6529_v42  ;;  %v6241_v38 = vld [vmem:[#allocation11 + $0x48] sm:$0xf] }
 0x28e   :  { %v4596_v4 = vmul.f32 0.2, %v3163_v49  ;;  %3393 = vmatpush.bf16.msrb.mxu2 %v6274_v10 }
 0x28f   :  { %3442 = vmatpush.bf16.msrb.mxu3 %v6530_v52 }
 0x290   :  { %v4724_v53 = vmax.f32 %v3163_v49, %v4596_v4  ;;  %v6785_v49 = vld [vmem:[#allocation11 + $0x488] sm:$0xf] }
 0x291   :  { %v3022_v27 = vpop.f32.mrf.mxu2  ;;  %v3115_v2 = vpop.f32.mrf.mxu0 }
 0x292   :  { %v3023_v41 = vadd.f32 %v3022_v27, %v8625_v28  ;;  %v3071_v33 = vpop.f32.mrf.mxu3  ;;  %v3116_v40 = vadd.f32 %v3115_v2, %v3067_v45 }
 0x293   :  { %v3167_v0 = vpop.f32.mrf.mxu1 }
 0x294   :  { %v3072_v58 = vadd.f32 %v3071_v33, %v3023_v41  ;;  %v3165_v3 = vadd.f32 %v3164_v57, %v3116_v40  ;;  %v7716_v41 = vld [vmem:[#allocation11 + $0x4a4] sm:$0xf0] }
 0x295   :  { %v7041_v33 = vld [vmem:[#allocation11 + $0x688] sm:$0xf]  ;;  %v6786_v4 = vor.u32 %v7716_v41, %v6785_v49 }
 0x296   :  { %v4604_v61 = vmul.f32 0.2, %v3165_v3  ;;  %3220 = vmatmul.bf16.gmra.mxu2 %v8454_v43  ;;  %3362 = vmatmul.bf16.gmra.mxu1 %v8547_v60  ;;  %v7644_v49 = vld [vmem:[#allocation11 + $0x264] sm:$0xf0] }
 0x297   :  { %3269 = vmatmul.bf16.gmra.mxu3 %v8549_v63  ;;  %3491 = vmatpush.bf16.msrb.mxu0 %v6786_v4 }
 0x298   :  { %v4732_v12 = vmax.f32 %v3165_v3, %v4604_v61  ;;  %v7780_v3 = vld [vmem:[#allocation11 + $0x6a4] sm:$0xf0] }
 0x299   :  { %v3025_v45 = vpop.f32.mrf.mxu2  ;;  %v3118_v30 = vpop.f32.mrf.mxu0 }
 0x29a   :  { %v3026_v39 = vadd.f32 %v3025_v45, %v8625_v28  ;;  %v3074_v57 = vpop.f32.mrf.mxu3  ;;  %v3119_v20 = vadd.f32 %v3118_v30, %v3070_v5  ;;  %v8659_v27 = vpack.c.bf16 %v4732_v12, %v4724_v53  ;;  %v7042_v53 = vor.u32 %v7780_v3, %v7041_v33 }
 0x29b   :  { %v3169_v2 = vpop.f32.mrf.mxu1 }
 0x29c   :  { %9285 = vst [vmem:[#allocation23_spill] sm:$0xff] %v8659_v27  ;;  %v3075_v16 = vadd.f32 %v3074_v57, %v3026_v39  ;;  %v3168_v56 = vadd.f32 %v3167_v0, %v3119_v20  ;;  %3313 = vmatmul.bf16.gmra.mxu0 %v8558_v55  ;;  %3540 = vmatpush.bf16.msrb.mxu1 %v7042_v53  ;;  %v7580_v39 = vld [vmem:[#allocation11 + $0x64] sm:$0xf0]  ;;  %v7789_v27 = vld [vmem:[#allocation11 + $0x6ec] sm:$0xf0] }
 0x29d   :  { %v6497_v57 = vld [vmem:[#allocation11 + $0x248] sm:$0xf]  ;;  %v6242_v52 = vor.u32 %v7580_v39, %v6241_v38 }
 0x29e   :  { %v4612_v37 = vmul.f32 0.2, %v3168_v56  ;;  %v6209_v38 = vld [vmem:[#allocation11 + $0x8] sm:$0xf] }
 0x29f   :  { %3394 = vmatpush.bf16.msrb.mxu2 %v6242_v52  ;;  %v7572_v39 = vld [vmem:[#allocation11 + $0x24] sm:$0xf0] }
 0x2a0   :  { %v4740_v30 = vmax.f32 %v3168_v56, %v4612_v37  ;;  %v6753_v56 = vld [vmem:[#allocation11 + $0x448] sm:$0xf] }
 0x2a1   :  { %v3027_v40 = vpop.f32.mrf.mxu2  ;;  %v3120_v46 = vpop.f32.mrf.mxu0 }
 0x2a2   :  { %v3028_v61 = vadd.f32 %v3027_v40, %v8625_v28  ;;  %v3076_v5 = vpop.f32.mrf.mxu3  ;;  %v3121_v22 = vadd.f32 %v3120_v46, %v3072_v58  ;;  %v6498_v40 = vor.u32 %v7644_v49, %v6497_v57 }
 0x2a3   :  { %v3172_v12 = vpop.f32.mrf.mxu1 }
 0x2a4   :  { %v3077_v42 = vadd.f32 %v3076_v5, %v3028_v61  ;;  %v3170_v0 = vadd.f32 %v3169_v2, %v3121_v22  ;;  %3443 = vmatpush.bf16.msrb.mxu3 %v6498_v40  ;;  %v7708_v5 = vld [vmem:[#allocation11 + $0x464] sm:$0xf0] }
 0x2a5   :  { %v7009_v22 = vld [vmem:[#allocation11 + $0x648] sm:$0xf] }
 0x2a6   :  { %v4620_v45 = vmul.f32 0.2, %v3170_v0  ;;  %3225 = vmatmul.bf16.gmra.mxu2 %v8469_v44  ;;  %3367 = vmatmul.bf16.gmra.mxu1 %v8566_v15 }
 0x2a7   :  { %3274 = vmatmul.bf16.gmra.mxu3 %v8568_v23 }
 0x2a8   :  { %v4748_v10 = vmax.f32 %v3170_v0, %v4620_v45  ;;  %v6754_v0 = vor.u32 %v7708_v5, %v6753_v56  ;;  %v7772_v45 = vld [vmem:[#allocation11 + $0x664] sm:$0xf0] }
 0x2a9   :  { %v3030_v58 = vpop.f32.mrf.mxu2  ;;  %v3123_v20 = vpop.f32.mrf.mxu0  ;;  %v7010_v57 = vor.u32 %v7772_v45, %v7009_v22 }
 0x2aa   :  { %v3031_v41 = vadd.f32 %v3030_v58, %v8625_v28  ;;  %v3079_v2 = vpop.f32.mrf.mxu3  ;;  %v3124_v33 = vadd.f32 %v3123_v20, %v3075_v16  ;;  %v8667_v46 = vpack.c.bf16 %v4748_v10, %v4740_v30  ;;  %v6210_v58 = vor.u32 %v7572_v39, %v6209_v38  ;;  %v6465_v20 = vld [vmem:[#allocation11 + $0x208] sm:$0xf]  ;;  %3492 = vmatpush.bf16.msrb.mxu0 %v6754_v0 }
 0x2ab   :  { %v3174_v4 = vpop.f32.mrf.mxu1  ;;  %3541 = vmatpush.bf16.msrb.mxu1 %v7010_v57 }
 0x2ac   :  { %9286 = vst [vmem:[#allocation24_spill] sm:$0xff] %v8667_v46  ;;  %v3080_v3 = vadd.f32 %v3079_v2, %v3031_v41  ;;  %v3173_v61 = vadd.f32 %v3172_v12, %v3124_v33  ;;  %3318 = vmatmul.bf16.gmra.mxu0 %v8577_v35  ;;  %v7636_v12 = vld [vmem:[#allocation11 + $0x224] sm:$0xf0]  ;;  %3395 = vmatpush.bf16.msrb.mxu2 %v6210_v58  ;;  %v7011_v46 = vld [vmem:[#allocation11 + $0x668] sm:$0xf0] }
 0x2ad   :  { %v6466_v49 = vor.u32 %v7636_v12, %v6465_v20  ;;  %v7764_v20 = vld [vmem:[#allocation11 + $0x624] sm:$0xf0] }
 0x2ae   :  { %v4628_v41 = vmul.f32 0.2, %v3173_v61 }
 0x2af   :  { %3444 = vmatpush.bf16.msrb.mxu3 %v6466_v49 }
 0x2b1   :  { %v3032_v53 = vpop.f32.mrf.mxu2  ;;  %v3125_v37 = vpop.f32.mrf.mxu0 }
 0x2b2   :  { %v3033_v16 = vadd.f32 %v3032_v53, %v8625_v28  ;;  %v3081_v30 = vpop.f32.mrf.mxu3  ;;  %v3126_v10 = vadd.f32 %v3125_v37, %v3077_v42  ;;  %v4756_v42 = vmax.f32 %v3173_v61, %v4628_v41 }
 0x2b3   :  { %v3177_v52 = vpop.f32.mrf.mxu1 }
 0x2b4   :  { %v3082_v2 = vadd.f32 %v3081_v30, %v3033_v16  ;;  %v3175_v33 = vadd.f32 %v3174_v4, %v3126_v10  ;;  %v6721_v16 = vld [vmem:[#allocation11 + $0x408] sm:$0xf] }
 0x2b5   :  { %v7700_v30 = vld [vmem:[#allocation11 + $0x424] sm:$0xf0] }
 0x2b6   :  { %v4636_v40 = vmul.f32 0.2, %v3175_v33  ;;  %3230 = vmatmul.bf16.gmra.mxu2 %v8484_v8  ;;  %3372 = vmatmul.bf16.gmra.mxu1 %v8585_v6  ;;  %v6977_v10 = vld [vmem:[#allocation11 + $0x608] sm:$0xf]  ;;  %v6722_v61 = vor.u32 %v7700_v30, %v6721_v16 }
 0x2b7   :  { %3279 = vmatmul.bf16.gmra.mxu3 %v8587_v34 }
 0x2b8   :  { %v4764_v56 = vmax.f32 %v3175_v33, %v4636_v40  ;;  %v6978_v33 = vor.u32 %v7764_v20, %v6977_v10  ;;  %3493 = vmatpush.bf16.msrb.mxu0 %v6722_v61  ;;  %v6691_v10 = vld [vmem:[#allocation11 + $0x3e8] sm:$0xf0] }
 0x2b9   :  { %v3035_v5 = vpop.f32.mrf.mxu2  ;;  %v3128_v22 = vpop.f32.mrf.mxu0 }
 0x2ba   :  { %v3036_v53 = vadd.f32 %v3035_v5, %v8625_v28  ;;  %v3084_v37 = vpop.f32.mrf.mxu3  ;;  %v3129_v0 = vadd.f32 %v3128_v22, %v3080_v3  ;;  %v8675_v45 = vpack.c.bf16 %v4764_v56, %v4756_v42  ;;  %3542 = vmatpush.bf16.msrb.mxu1 %v6978_v33  ;;  %v6947_v33 = vld [vmem:[#allocation11 + $0x5e8] sm:$0xf0] }
 0x2bb   :  { %v3179_v4 = vpop.f32.mrf.mxu1 }
 0x2bc   :  { %9287 = vst [vmem:[#allocation25_spill] sm:$0xff] %v8675_v45  ;;  %v3085_v38 = vadd.f32 %v3084_v37, %v3036_v53  ;;  %v3178_v39 = vadd.f32 %v3177_v52, %v3129_v0  ;;  %3323 = vmatmul.bf16.gmra.mxu0 %v8596_v62  ;;  %v7624_v53 = vld [vmem:[#allocation11 + $0x1cc] sm:$0xf] }
 0x2bd   :  { %v6435_v37 = vld [vmem:[#allocation11 + $0x1e8] sm:$0xf0] }
 0x2be   :  { %v4644_v40 = vmul.f32 0.2, %v3178_v39  ;;  %v7688_v0 = vld [vmem:[#allocation11 + $0x3cc] sm:$0xf]  ;;  %v6438_v30 = vor.u32 %v7624_v53, %v6435_v37 }
 0x2bf   :  { %v6694_v61 = vor.u32 %v7688_v0, %v6691_v10  ;;  %v7203_v37 = vld [vmem:[#allocation11 + $0x7e8] sm:$0xf0] }
 0x2c0   :  { %v4772_v5 = vmax.f32 %v3178_v39, %v4644_v40  ;;  %3584 = vmatpush.bf16.msra.mxu2 %v6438_v30  ;;  %v7752_v39 = vld [vmem:[#allocation11 + $0x5cc] sm:$0xf] }
 0x2c1   :  { %v3037_v57 = vpop.f32.mrf.mxu2  ;;  %v3130_v58 = vpop.f32.mrf.mxu0  ;;  %3633 = vmatpush.bf16.msra.mxu3 %v6694_v61  ;;  %v7816_v40 = vld [vmem:[#allocation11 + $0x7cc] sm:$0xf]  ;;  %v6950_v53 = vor.u32 %v7752_v39, %v6947_v33 }
 0x2c2   :  { %v3038_v12 = vadd.f32 %v3037_v57, %v8625_v28  ;;  %v3086_v49 = vpop.f32.mrf.mxu3  ;;  %v3131_v41 = vadd.f32 %v3130_v58, %v3082_v2  ;;  %v7043_v45 = vld [vmem:[#allocation11 + $0x6a8] sm:$0xf0] }
 0x2c3   :  { %v3182_v3 = vpop.f32.mrf.mxu1  ;;  %3682 = vmatpush.bf16.msra.mxu0 %v6950_v53 }
 0x2c4   :  { %v3087_v42 = vadd.f32 %v3086_v49, %v3038_v12  ;;  %v3180_v56 = vadd.f32 %v3179_v4, %v3131_v41 }
 0x2c6   :  { %v4652_v52 = vmul.f32 0.2, %v3180_v56  ;;  %3235 = vmatmul.bf16.gmra.mxu2 %v8501_v54  ;;  %3377 = vmatmul.bf16.gmra.mxu1 %v8604_v26 }
 0x2c7   :  { %3284 = vmatmul.bf16.gmra.mxu3 %v8606_v11 }
 0x2c8   :  { %v4780_v22 = vmax.f32 %v3180_v56, %v4652_v52 }
 0x2c9   :  { %v3040_v2 = vpop.f32.mrf.mxu2  ;;  %v3133_v16 = vpop.f32.mrf.mxu0 }
 0x2ca   :  { %v3041_v57 = vadd.f32 %v3040_v2, %v8625_v28  ;;  %v3089_v4 = vpop.f32.mrf.mxu3  ;;  %v3134_v58 = vadd.f32 %v3133_v16, %v3085_v38  ;;  %v8683_v20 = vpack.c.bf16 %v4780_v22, %v4772_v5  ;;  %v7206_v5 = vor.u32 %v7816_v40, %v7203_v37  ;;  %v6403_v40 = vld [vmem:[#allocation11 + $0x1a8] sm:$0xf0] }
 0x2cb   :  { %v3184_v12 = vpop.f32.mrf.mxu1 }
 0x2cc   :  { %9288 = vst [vmem:[#allocation26_spill] sm:$0xff] %v8683_v20  ;;  %v3090_v49 = vadd.f32 %v3089_v4, %v3041_v57  ;;  %v3183_v41 = vadd.f32 %v3182_v3, %v3134_v58  ;;  %3328 = vmatmul.bf16.gmra.mxu0 %v8612_v21  ;;  %3731 = vmatpush.bf16.msra.mxu1 %v7206_v5  ;;  %v8690_v57 = vperm.slane %v8618_v24, 1  ;;  %v7808_v5 = vld [vmem:[#allocation11 + $0x78c] sm:$0xf] }
 0x2cd   :  { %v7075_v20 = vld [vmem:[#allocation11 + $0x6e8] sm:$0xf0] }
 0x2ce   :  { %v4660_v16 = vmul.f32 0.2, %v3183_v41 }
 0x2d1   :  { %v3042_v56 = vpop.f32.mrf.mxu2  ;;  %v3135_v52 = vpop.f32.mrf.mxu0 }
 0x2d2   :  { %v3043_v2 = vadd.f32 %v3042_v56, %v8625_v28  ;;  %v3091_v38 = vpop.f32.mrf.mxu3  ;;  %v3136_v0 = vadd.f32 %v3135_v52, %v3087_v42  ;;  %v4788_v28 = vmax.f32 %v3183_v41, %v4660_v16  ;;  %v7680_v56 = vld [vmem:[#allocation11 + $0x38c] sm:$0xf] }
 0x2d3   :  { %v3187_v22 = vpop.f32.mrf.mxu1 }
 0x2d4   :  { %v3092_v30 = vadd.f32 %v3091_v38, %v3043_v2  ;;  %v3185_v3 = vadd.f32 %v3184_v12, %v3136_v0  ;;  %v7616_v12 = vld [vmem:[#allocation11 + $0x18c] sm:$0xf] }
 0x2d5   :  { %v6406_v37 = vor.u32 %v7616_v12, %v6403_v40  ;;  %v6659_v2 = vld [vmem:[#allocation11 + $0x3a8] sm:$0xf0] }
 0x2d6   :  { %v4668_v10 = vmul.f32 0.2, %v3185_v3  ;;  %3382 = vmatmul.bf16.gmra.mxu1 %v8620_v9  ;;  %3396 = vmatmul.bf16.vlgmr.msrb.gmra.mxu2 %v8401_v50  ;;  %v6662_v41 = vor.u32 %v7680_v56, %v6659_v2  ;;  %v7744_v0 = vld [vmem:[#allocation11 + $0x58c] sm:$0xf] }
 0x2d7   :  { %3445 = vmatmul.bf16.vlgmr.msrb.gmra.mxu3 %v8394_v25  ;;  %3585 = vmatpush.bf16.msra.mxu2 %v6406_v37  ;;  %v6371_v2 = vld [vmem:[#allocation11 + $0x168] sm:$0xf0] }
 0x2d8   :  { %v4796_v4 = vmax.f32 %v3185_v3, %v4668_v10  ;;  %3634 = vmatpush.bf16.msra.mxu3 %v6662_v41  ;;  %v7672_v41 = vld [vmem:[#allocation11 + $0x34c] sm:$0xf] }
 0x2d9   :  { %v3138_v42 = vpop.f32.mrf.mxu0  ;;  %v3201_v58 = vpop.f32.mrf.mxu2 }
 0x2da   :  { %v3139_v61 = vadd.f32 %v3138_v42, %v3090_v49  ;;  %v3202_v39 = vadd.f32 %v3201_v58, %v8690_v57  ;;  %v3250_v33 = vpop.f32.mrf.mxu3  ;;  %v8694_v52 = vpack.c.bf16 %v4796_v4, %v4788_v28  ;;  %v6915_v49 = vld [vmem:[#allocation11 + $0x5a8] sm:$0xf0] }
 0x2db   :  { %v3189_v53 = vpop.f32.mrf.mxu1  ;;  %v6918_v10 = vor.u32 %v7744_v0, %v6915_v49  ;;  %v7171_v42 = vld [vmem:[#allocation11 + $0x7a8] sm:$0xf0] }
 0x2dc   :  { %9289 = vst [vmem:[#allocation27_spill] sm:$0xff] %v8694_v52  ;;  %v3188_v24 = vadd.f32 %v3187_v22, %v3139_v61  ;;  %v3251_v38 = vadd.f32 %v3250_v33, %v3202_v39  ;;  %3333 = vmatmul.bf16.gmra.mxu0 %v8628_v59  ;;  %v7174_v12 = vor.u32 %v7808_v5, %v7171_v42  ;;  %v7139_v52 = vld [vmem:[#allocation11 + $0x768] sm:$0xf0] }
 0x2dd   :  { %3683 = vmatpush.bf16.msra.mxu0 %v6918_v10 }
 0x2de   :  { %v4676_v22 = vmul.f32 0.2, %v3188_v24  ;;  %3732 = vmatpush.bf16.msra.mxu1 %v7174_v12 }
 0x2e0   :  { %v4804_v56 = vmax.f32 %v3188_v24, %v4676_v22  ;;  %v7736_v24 = vld [vmem:[#allocation11 + $0x54c] sm:$0xf] }
 0x2e1   :  { %v3140_v16 = vpop.f32.mrf.mxu0  ;;  %v3203_v3 = vpop.f32.mrf.mxu2  ;;  %v6883_v22 = vld [vmem:[#allocation11 + $0x568] sm:$0xf0] }
 0x2e2   :  { %v3141_v58 = vadd.f32 %v3140_v16, %v3092_v30  ;;  %v3204_v28 = vadd.f32 %v3203_v3, %v8690_v57  ;;  %v3252_v4 = vpop.f32.mrf.mxu3  ;;  %v7608_v30 = vld [vmem:[#allocation11 + $0x14c] sm:$0xf] }
 0x2e3   :  { %v3348_v40 = vpop.f32.mrf.mxu1  ;;  %v6374_v5 = vor.u32 %v7608_v30, %v6371_v2  ;;  %v6627_v16 = vld [vmem:[#allocation11 + $0x368] sm:$0xf0]  ;;  %v6886_v2 = vor.u32 %v7736_v24, %v6883_v22 }
 0x2e4   :  { %v3190_v61 = vadd.f32 %v3189_v53, %v3141_v58  ;;  %v3253_v39 = vadd.f32 %v3252_v4, %v3204_v28  ;;  %v6630_v42 = vor.u32 %v7672_v41, %v6627_v16  ;;  %v7664_v24 = vld [vmem:[#allocation11 + $0x30c] sm:$0xf] }
 0x2e5   :  { %3586 = vmatpush.bf16.msra.mxu2 %v6374_v5  ;;  %3684 = vmatpush.bf16.msra.mxu0 %v6886_v2 }
 0x2e6   :  { %v4684_v33 = vmul.f32 0.2, %v3190_v61  ;;  %3401 = vmatmul.bf16.gmra.mxu2 %v8413_v32  ;;  %3543 = vmatmul.bf16.vlgmr.msrb.gmra.mxu1 %v8506_v29 }
 0x2e7   :  { %3450 = vmatmul.bf16.gmra.mxu3 %v8406_v13 }
 0x2e8   :  { %v4812_v37 = vmax.f32 %v3190_v61, %v4684_v33  ;;  %3635 = vmatpush.bf16.msra.mxu3 %v6630_v42  ;;  %v7800_v61 = vld [vmem:[#allocation11 + $0x74c] sm:$0xf] }
 0x2e9   :  { %v3206_v0 = vpop.f32.mrf.mxu2  ;;  %v3299_v49 = vpop.f32.mrf.mxu0  ;;  %v6339_v42 = vld [vmem:[#allocation11 + $0x128] sm:$0xf0] }
 0x2ea   :  { %v3207_v53 = vadd.f32 %v3206_v0, %v8690_v57  ;;  %v3255_v3 = vpop.f32.mrf.mxu3  ;;  %v3300_v10 = vadd.f32 %v3299_v49, %v3251_v38  ;;  %v8702_v58 = vpack.c.bf16 %v4812_v37, %v4804_v56  ;;  %v7142_v56 = vor.u32 %v7800_v61, %v7139_v52  ;;  %v6595_v61 = vld [vmem:[#allocation11 + $0x328] sm:$0xf0] }
 0x2eb   :  { %v3350_v28 = vpop.f32.mrf.mxu1 }
 0x2ec   :  { %9290 = vst [vmem:[#allocation28_spill] sm:$0xff] %v8702_v58  ;;  %v3256_v4 = vadd.f32 %v3255_v3, %v3207_v53  ;;  %v3349_v12 = vadd.f32 %v3348_v40, %v3300_v10  ;;  %3494 = vmatmul.bf16.vlgmr.msrb.gmra.mxu0 %v8512_v47  ;;  %3733 = vmatpush.bf16.msra.mxu1 %v7142_v56  ;;  %v7600_v10 = vld [vmem:[#allocation11 + $0x10c] sm:$0xf] }
 0x2ed   :  { %v6342_v22 = vor.u32 %v7600_v10, %v6339_v42 }
 0x2ee   :  { %v4565_v49 = vmul.f32 0.2, %v3349_v12 }
 0x2ef   :  { %3587 = vmatpush.bf16.msra.mxu2 %v6342_v22 }
 0x2f0   :  { %v4693_v53 = vmax.f32 %v3349_v12, %v4565_v49  ;;  %v7728_v12 = vld [vmem:[#allocation11 + $0x50c] sm:$0xf] }
 0x2f1   :  { %v3208_v33 = vpop.f32.mrf.mxu2  ;;  %v3301_v30 = vpop.f32.mrf.mxu0  ;;  %v6851_v49 = vld [vmem:[#allocation11 + $0x528] sm:$0xf0] }
 0x2f2   :  { %v3209_v0 = vadd.f32 %v3208_v33, %v8690_v57  ;;  %v3257_v38 = vpop.f32.mrf.mxu3  ;;  %v3302_v41 = vadd.f32 %v3301_v30, %v3253_v39  ;;  %v6854_v42 = vor.u32 %v7728_v12, %v6851_v49  ;;  %v7656_v12 = vld [vmem:[#allocation11 + $0x2cc] sm:$0xf] }
 0x2f3   :  { %v3353_v37 = vpop.f32.mrf.mxu1 }
 0x2f4   :  { %v3258_v5 = vadd.f32 %v3257_v38, %v3209_v0  ;;  %v3351_v40 = vadd.f32 %v3350_v28, %v3302_v41  ;;  %v6598_v0 = vor.u32 %v7664_v24, %v6595_v61  ;;  %3685 = vmatpush.bf16.msra.mxu0 %v6854_v42 }
 0x2f6   :  { %v4573_v16 = vmul.f32 0.2, %v3351_v40  ;;  %3406 = vmatmul.bf16.gmra.mxu2 %v8425_v19  ;;  %3548 = vmatmul.bf16.gmra.mxu1 %v8518_v31 }
 0x2f7   :  { %3455 = vmatmul.bf16.gmra.mxu3 %v8418_v1 }
 0x2f8   :  { %v4701_v3 = vmax.f32 %v3351_v40, %v4573_v16  ;;  %3636 = vmatpush.bf16.msra.mxu3 %v6598_v0  ;;  %v7792_v40 = vld [vmem:[#allocation11 + $0x70c] sm:$0xf] }
 0x2f9   :  { %v3211_v39 = vpop.f32.mrf.mxu2  ;;  %v3304_v52 = vpop.f32.mrf.mxu0  ;;  %v6307_v0 = vld [vmem:[#allocation11 + $0xe8] sm:$0xf0] }
 0x2fa   :  { %v8709_v33 = vpack.c.bf16 %v4701_v3, %v4693_v53  ;;  %v3212_v28 = vadd.f32 %v3211_v39, %v8690_v57  ;;  %v3260_v30 = vpop.f32.mrf.mxu3  ;;  %v3305_v2 = vadd.f32 %v3304_v52, %v3256_v4  ;;  %v7107_v53 = vld [vmem:[#allocation11 + $0x728] sm:$0xf0] }
 0x2fb   :  { %v3355_v38 = vpop.f32.mrf.mxu1  ;;  %v7110_v4 = vor.u32 %v7792_v40, %v7107_v53 }
 0x2fc   :  { %v3261_v41 = vadd.f32 %v3260_v30, %v3212_v28  ;;  %v3354_v56 = vadd.f32 %v3353_v37, %v3305_v2  ;;  %3499 = vmatmul.bf16.gmra.mxu0 %v8524_v48  ;;  %v7592_v2 = vld [vmem:[#allocation11 + $0xcc] sm:$0xf] }
 0x2fd   :  { %3734 = vmatpush.bf16.msra.mxu1 %v7110_v4  ;;  %v6310_v40 = vor.u32 %v7592_v2, %v6307_v0 }
 0x2fe   :  { %v4581_v52 = vmul.f32 0.2, %v3354_v56 }
 0x2ff   :  { %3588 = vmatpush.bf16.msra.mxu2 %v6310_v40 }
 0x300   :  { %v4709_v28 = vmax.f32 %v3354_v56, %v4581_v52  ;;  %v7720_v56 = vld [vmem:[#allocation11 + $0x4cc] sm:$0xf] }
 0x301   :  { %v3213_v16 = vpop.f32.mrf.mxu2  ;;  %v3306_v10 = vpop.f32.mrf.mxu0  ;;  %v6819_v52 = vld [vmem:[#allocation11 + $0x4e8] sm:$0xf0] }
 0x302   :  { %v3214_v3 = vadd.f32 %v3213_v16, %v8690_v57  ;;  %v3262_v39 = vpop.f32.mrf.mxu3  ;;  %v3307_v58 = vadd.f32 %v3306_v10, %v3258_v5  ;;  %v6563_v16 = vld [vmem:[#allocation11 + $0x2e8] sm:$0xf0]  ;;  %v6822_v0 = vor.u32 %v7720_v56, %v6819_v52 }
 0x303   :  { %v3358_v24 = vpop.f32.mrf.mxu1  ;;  %v6566_v42 = vor.u32 %v7656_v12, %v6563_v16  ;;  %v7648_v56 = vld [vmem:[#allocation11 + $0x28c] sm:$0xf] }
 0x304   :  { %v3263_v22 = vadd.f32 %v3262_v39, %v3214_v3  ;;  %v3356_v37 = vadd.f32 %v3355_v38, %v3307_v58  ;;  %3686 = vmatpush.bf16.msra.mxu0 %v6822_v0 }
 0x305   :  { %3637 = vmatpush.bf16.msra.mxu3 %v6566_v42  ;;  %v6275_v42 = vld [vmem:[#allocation11 + $0xa8] sm:$0xf0] }
 0x306   :  { %v4589_v61 = vmul.f32 0.2, %v3356_v37  ;;  %3411 = vmatmul.bf16.gmra.mxu2 %v8439_v7  ;;  %3553 = vmatmul.bf16.gmra.mxu1 %v8530_v17 }
 0x307   :  { %3460 = vmatmul.bf16.gmra.mxu3 %v8430_v51 }
 0x308   :  { %v4717_v30 = vmax.f32 %v3356_v37, %v4589_v61  ;;  %v7784_v37 = vld [vmem:[#allocation11 + $0x6cc] sm:$0xf] }
 0x309   :  { %v3216_v5 = vpop.f32.mrf.mxu2  ;;  %v3309_v49 = vpop.f32.mrf.mxu0 }
 0x30a   :  { %v3217_v10 = vadd.f32 %v3216_v5, %v8690_v57  ;;  %v3265_v58 = vpop.f32.mrf.mxu3  ;;  %v3310_v38 = vadd.f32 %v3309_v49, %v3261_v41  ;;  %v8718_v53 = vpack.c.bf16 %v4717_v30, %v4709_v28  ;;  %v7078_v28 = vor.u32 %v7784_v37, %v7075_v20  ;;  %v6531_v37 = vld [vmem:[#allocation11 + $0x2a8] sm:$0xf0] }
 0x30b   :  { %v3360_v3 = vpop.f32.mrf.mxu1  ;;  %v6534_v0 = vor.u32 %v7648_v56, %v6531_v37 }
 0x30c   :  { %9291 = vst [vmem:[#allocation29_spill] sm:$0xff] %v8718_v53  ;;  %v3266_v39 = vadd.f32 %v3265_v58, %v3217_v10  ;;  %v3359_v4 = vadd.f32 %v3358_v24, %v3310_v38  ;;  %3504 = vmatmul.bf16.gmra.mxu0 %v8539_v14  ;;  %3735 = vmatpush.bf16.msra.mxu1 %v7078_v28  ;;  %v7584_v38 = vld [vmem:[#allocation11 + $0x8c] sm:$0xf]  ;;  %v7574_v53 = vld [vmem:[#allocation11 + $0x34] sm:$0xf0] }
 0x30d   :  { %v6278_v52 = vor.u32 %v7584_v38, %v6275_v42  ;;  %3638 = vmatpush.bf16.msra.mxu3 %v6534_v0  ;;  %v6243_v0 = vld [vmem:[#allocation11 + $0x68] sm:$0xf0] }
 0x30e   :  { %v4597_v49 = vmul.f32 0.2, %v3359_v4 }
 0x30f   :  { %3589 = vmatpush.bf16.msra.mxu2 %v6278_v52 }
 0x310   :  { %v4725_v10 = vmax.f32 %v3359_v4, %v4597_v49  ;;  %v7712_v4 = vld [vmem:[#allocation11 + $0x48c] sm:$0xf] }
 0x311   :  { %v3218_v61 = vpop.f32.mrf.mxu2  ;;  %v3311_v2 = vpop.f32.mrf.mxu0  ;;  %v6787_v49 = vld [vmem:[#allocation11 + $0x4a8] sm:$0xf0] }
 0x312   :  { %v3219_v5 = vadd.f32 %v3218_v61, %v8690_v57  ;;  %v3267_v41 = vpop.f32.mrf.mxu3  ;;  %v3312_v12 = vadd.f32 %v3311_v2, %v3263_v22  ;;  %v6790_v42 = vor.u32 %v7712_v4, %v6787_v49  ;;  %v7640_v4 = vld [vmem:[#allocation11 + $0x24c] sm:$0xf] }
 0x313   :  { %v3363_v30 = vpop.f32.mrf.mxu1 }
 0x314   :  { %v3268_v40 = vadd.f32 %v3267_v41, %v3219_v5  ;;  %v3361_v24 = vadd.f32 %v3360_v3, %v3312_v12  ;;  %3687 = vmatpush.bf16.msra.mxu0 %v6790_v42 }
 0x316   :  { %v4605_v16 = vmul.f32 0.2, %v3361_v24  ;;  %3416 = vmatmul.bf16.gmra.mxu2 %v8454_v43  ;;  %3558 = vmatmul.bf16.gmra.mxu1 %v8547_v60 }
 0x317   :  { %3465 = vmatmul.bf16.gmra.mxu3 %v8549_v63 }
 0x318   :  { %v4733_v58 = vmax.f32 %v3361_v24, %v4605_v16  ;;  %v7776_v24 = vld [vmem:[#allocation11 + $0x68c] sm:$0xf] }
 0x319   :  { %v3221_v22 = vpop.f32.mrf.mxu2  ;;  %v3314_v20 = vpop.f32.mrf.mxu0 }
 0x31a   :  { %v3222_v61 = vadd.f32 %v3221_v22, %v8690_v57  ;;  %v3270_v3 = vpop.f32.mrf.mxu3  ;;  %v3315_v2 = vadd.f32 %v3314_v20, %v3266_v39  ;;  %v8726_v5 = vpack.c.bf16 %v4733_v58, %v4725_v10  ;;  %v7046_v10 = vor.u32 %v7776_v24, %v7043_v45  ;;  %v6499_v24 = vld [vmem:[#allocation11 + $0x268] sm:$0xf0] }
 0x31b   :  { %v3365_v41 = vpop.f32.mrf.mxu1  ;;  %v6502_v42 = vor.u32 %v7640_v4, %v6499_v24 }
 0x31c   :  { %9292 = vst [vmem:[#allocation30_spill] sm:$0xff] %v8726_v5  ;;  %v3271_v12 = vadd.f32 %v3270_v3, %v3222_v61  ;;  %v3364_v28 = vadd.f32 %v3363_v30, %v3315_v2  ;;  %3509 = vmatmul.bf16.gmra.mxu0 %v8558_v55  ;;  %3736 = vmatpush.bf16.msra.mxu1 %v7046_v10  ;;  %v7576_v2 = vld [vmem:[#allocation11 + $0x4c] sm:$0xf] }
 0x31d   :  { %v6246_v49 = vor.u32 %v7576_v2, %v6243_v0  ;;  %3639 = vmatpush.bf16.msra.mxu3 %v6502_v42  ;;  %v6211_v5 = vld [vmem:[#allocation11 + $0x28] sm:$0xf0] }
 0x31e   :  { %v4613_v20 = vmul.f32 0.2, %v3364_v28 }
 0x31f   :  { %3590 = vmatpush.bf16.msra.mxu2 %v6246_v49  ;;  %v7632_v49 = vld [vmem:[#allocation11 + $0x20c] sm:$0xf] }
 0x320   :  { %v4741_v61 = vmax.f32 %v3364_v28, %v4613_v20  ;;  %v7704_v28 = vld [vmem:[#allocation11 + $0x44c] sm:$0xf] }
 0x321   :  { %v3223_v16 = vpop.f32.mrf.mxu2  ;;  %v3316_v38 = vpop.f32.mrf.mxu0  ;;  %v6755_v20 = vld [vmem:[#allocation11 + $0x468] sm:$0xf0] }
 0x322   :  { %v3224_v22 = vadd.f32 %v3223_v16, %v8690_v57  ;;  %v3272_v39 = vpop.f32.mrf.mxu3  ;;  %v3317_v56 = vadd.f32 %v3316_v38, %v3268_v40  ;;  %v6758_v0 = vor.u32 %v7704_v28, %v6755_v20 }
 0x323   :  { %v3368_v58 = vpop.f32.mrf.mxu1 }
 0x324   :  { %v3273_v52 = vadd.f32 %v3272_v39, %v3224_v22  ;;  %v3366_v30 = vadd.f32 %v3365_v41, %v3317_v56  ;;  %3688 = vmatpush.bf16.msra.mxu0 %v6758_v0 }
 0x326   :  { %v4621_v37 = vmul.f32 0.2, %v3366_v30  ;;  %3421 = vmatmul.bf16.gmra.mxu2 %v8469_v44  ;;  %3563 = vmatmul.bf16.gmra.mxu1 %v8566_v15 }
 0x327   :  { %3470 = vmatmul.bf16.gmra.mxu3 %v8568_v23 }
 0x328   :  { %v4749_v3 = vmax.f32 %v3366_v30, %v4621_v37  ;;  %v7768_v30 = vld [vmem:[#allocation11 + $0x64c] sm:$0xf] }
 0x329   :  { %v3226_v40 = vpop.f32.mrf.mxu2  ;;  %v3319_v45 = vpop.f32.mrf.mxu0  ;;  %v7014_v4 = vor.u32 %v7768_v30, %v7011_v46 }
 0x32a   :  { %v3227_v16 = vadd.f32 %v3226_v40, %v8690_v57  ;;  %v3275_v41 = vpop.f32.mrf.mxu3  ;;  %v3320_v38 = vadd.f32 %v3319_v45, %v3271_v12  ;;  %v8734_v22 = vpack.c.bf16 %v4749_v3, %v4741_v61  ;;  %v7568_v40 = vld [vmem:[#allocation11 + $0xc] sm:$0xf] }
 0x32b   :  { %v3370_v39 = vpop.f32.mrf.mxu1  ;;  %v6214_v45 = vor.u32 %v7568_v40, %v6211_v5  ;;  %3737 = vmatpush.bf16.msra.mxu1 %v7014_v4  ;;  %v7760_v4 = vld [vmem:[#allocation11 + $0x60c] sm:$0xf] }
 0x32c   :  { %9293 = vst [vmem:[#allocation31_spill] sm:$0xff] %v8734_v22  ;;  %v3276_v56 = vadd.f32 %v3275_v41, %v3227_v16  ;;  %v3369_v10 = vadd.f32 %v3368_v58, %v3320_v38  ;;  %3514 = vmatmul.bf16.gmra.mxu0 %v8577_v35  ;;  %v6467_v58 = vld [vmem:[#allocation11 + $0x228] sm:$0xf0] }
 0x32d   :  { %v6470_v16 = vor.u32 %v7632_v49, %v6467_v58  ;;  %3591 = vmatpush.bf16.msra.mxu2 %v6214_v45  ;;  %v6979_v58 = vld [vmem:[#allocation11 + $0x628] sm:$0xf0] }
 0x32e   :  { %v4629_v41 = vmul.f32 0.2, %v3369_v10 }
 0x32f   :  { %3640 = vmatpush.bf16.msra.mxu3 %v6470_v16 }
 0x330   :  { %v4757_v46 = vmax.f32 %v3369_v10, %v4629_v41 }
 0x331   :  { %v3228_v37 = vpop.f32.mrf.mxu2  ;;  %v3321_v2 = vpop.f32.mrf.mxu0 }
 0x332   :  { %v3229_v12 = vadd.f32 %v3228_v37, %v8690_v57  ;;  %v3277_v61 = vpop.f32.mrf.mxu3  ;;  %v3322_v3 = vadd.f32 %v3321_v2, %v3273_v52 }
 0x333   :  { %v3373_v24 = vpop.f32.mrf.mxu1 }
 0x334   :  { %v3278_v38 = vadd.f32 %v3277_v61, %v3229_v12  ;;  %v3371_v42 = vadd.f32 %v3370_v39, %v3322_v3  ;;  %v7696_v61 = vld [vmem:[#allocation11 + $0x40c] sm:$0xf] }
 0x335   :  { %v6723_v3 = vld [vmem:[#allocation11 + $0x428] sm:$0xf0] }
 0x336   :  { %v4637_v28 = vmul.f32 0.2, %v3371_v42  ;;  %3426 = vmatmul.bf16.gmra.mxu2 %v8484_v8  ;;  %3568 = vmatmul.bf16.gmra.mxu1 %v8585_v6  ;;  %v6726_v10 = vor.u32 %v7696_v61, %v6723_v3  ;;  %v6697_v61 = vld [vmem:[#allocation11 + $0x3d0] sm:$0xf] }
 0x337   :  { %3475 = vmatmul.bf16.gmra.mxu3 %v8587_v34 }
 0x338   :  { %v4765_v5 = vmax.f32 %v3371_v42, %v4637_v28  ;;  %v6982_v28 = vor.u32 %v7760_v4, %v6979_v58  ;;  %3689 = vmatpush.bf16.msra.mxu0 %v6726_v10 }
 0x339   :  { %v3231_v52 = vpop.f32.mrf.mxu2  ;;  %v3324_v20 = vpop.f32.mrf.mxu0 }
 0x33a   :  { %v3232_v30 = vadd.f32 %v3231_v52, %v8690_v57  ;;  %v3280_v37 = vpop.f32.mrf.mxu3  ;;  %v3325_v2 = vadd.f32 %v3324_v20, %v3276_v56  ;;  %v8742_v0 = vpack.c.bf16 %v4765_v5, %v4757_v46  ;;  %3738 = vmatpush.bf16.msra.mxu1 %v6982_v28 }
 0x33b   :  { %v3375_v39 = vpop.f32.mrf.mxu1 }
 0x33c   :  { %9294 = vst [vmem:[#allocation32_spill] sm:$0xff] %v8742_v0  ;;  %v3281_v40 = vadd.f32 %v3280_v37, %v3232_v30  ;;  %v3374_v12 = vadd.f32 %v3373_v24, %v3325_v2  ;;  %3519 = vmatmul.bf16.gmra.mxu0 %v8596_v62  ;;  %v6441_v37 = vld [vmem:[#allocation11 + $0x1d0] sm:$0xf] }
 0x33d   :  { %v7629_v2 = vld [vmem:[#allocation11 + $0x1ec] sm:$0xf0] }
 0x33e   :  { %v4645_v46 = vmul.f32 0.2, %v3374_v12  ;;  %v6442_v4 = vor.u32 %v7629_v2, %v6441_v37  ;;  %v7821_v0 = vld [vmem:[#allocation11 + $0x7ec] sm:$0xf0] }
 0x340   :  { %v4773_v20 = vmax.f32 %v3374_v12, %v4645_v46  ;;  %3780 = vmatpush.bf16.msrb.mxu2 %v6442_v4  ;;  %v6953_v12 = vld [vmem:[#allocation11 + $0x5d0] sm:$0xf] }
 0x341   :  { %v3233_v45 = vpop.f32.mrf.mxu2  ;;  %v3326_v49 = vpop.f32.mrf.mxu0  ;;  %v7757_v46 = vld [vmem:[#allocation11 + $0x5ec] sm:$0xf0] }
 0x342   :  { %v3234_v16 = vadd.f32 %v3233_v45, %v8690_v57  ;;  %v3282_v41 = vpop.f32.mrf.mxu3  ;;  %v3327_v42 = vadd.f32 %v3326_v49, %v3278_v38  ;;  %v7693_v45 = vld [vmem:[#allocation11 + $0x3ec] sm:$0xf0]  ;;  %v6954_v2 = vor.u32 %v7757_v46, %v6953_v12 }
 0x343   :  { %v3378_v56 = vpop.f32.mrf.mxu1  ;;  %v6698_v58 = vor.u32 %v7693_v45, %v6697_v61  ;;  %v6409_v46 = vld [vmem:[#allocation11 + $0x190] sm:$0xf] }
 0x344   :  { %v3283_v5 = vadd.f32 %v3282_v41, %v3234_v16  ;;  %v3376_v52 = vadd.f32 %v3375_v39, %v3327_v42  ;;  %3878 = vmatpush.bf16.msrb.mxu0 %v6954_v2 }
 0x345   :  { %3829 = vmatpush.bf16.msrb.mxu3 %v6698_v58 }
 0x346   :  { %v4653_v24 = vmul.f32 0.2, %v3376_v52  ;;  %3431 = vmatmul.bf16.gmra.mxu2 %v8501_v54  ;;  %3573 = vmatmul.bf16.gmra.mxu1 %v8604_v26 }
 0x347   :  { %3480 = vmatmul.bf16.gmra.mxu3 %v8606_v11 }
 0x348   :  { %v4781_v30 = vmax.f32 %v3376_v52, %v4653_v24  ;;  %v7209_v52 = vld [vmem:[#allocation11 + $0x7d0] sm:$0xf] }
 0x349   :  { %v3236_v38 = vpop.f32.mrf.mxu2  ;;  %v3329_v3 = vpop.f32.mrf.mxu0 }
 0x34a   :  { %v3237_v49 = vadd.f32 %v3236_v38, %v8690_v57  ;;  %v3285_v39 = vpop.f32.mrf.mxu3  ;;  %v3330_v10 = vadd.f32 %v3329_v3, %v3281_v40  ;;  %v8750_v16 = vpack.c.bf16 %v4781_v30, %v4773_v20  ;;  %v7210_v20 = vor.u32 %v7821_v0, %v7209_v52  ;;  %v7621_v52 = vld [vmem:[#allocation11 + $0x1ac] sm:$0xf0] }
 0x34b   :  { %v3380_v41 = vpop.f32.mrf.mxu1 }
 0x34c   :  { %9295 = vst [vmem:[#allocation33_spill] sm:$0xff] %v8750_v16  ;;  %v3286_v42 = vadd.f32 %v3285_v39, %v3237_v49  ;;  %v3379_v28 = vadd.f32 %v3378_v56, %v3330_v10  ;;  %3524 = vmatmul.bf16.gmra.mxu0 %v8612_v21  ;;  %3927 = vmatpush.bf16.msrb.mxu1 %v7210_v20  ;;  %v8756_v49 = vld [vmem:[#allocation13] sm:$0xff]  ;;  %v7813_v16 = vld [vmem:[#allocation11 + $0x7ac] sm:$0xf0] }
 0x34d   :  { %v8759_v39 = vperm.slane %v8756_v49, 2 }
 0x34e   :  { %v4661_v3 = vmul.f32 0.2, %v3379_v28 }
 0x351   :  { %v3238_v24 = vpop.f32.mrf.mxu2  ;;  %v3331_v37 = vpop.f32.mrf.mxu0 }
 0x352   :  { %v3239_v38 = vadd.f32 %v3238_v24, %v8690_v57  ;;  %v3287_v40 = vpop.f32.mrf.mxu3  ;;  %v3332_v61 = vadd.f32 %v3331_v37, %v3283_v5  ;;  %v4789_v57 = vmax.f32 %v3379_v28, %v4661_v3  ;;  %v6665_v24 = vld [vmem:[#allocation11 + $0x390] sm:$0xf] }
 0x353   :  { %v3383_v30 = vpop.f32.mrf.mxu1  ;;  %v6921_v3 = vld [vmem:[#allocation11 + $0x590] sm:$0xf] }
 0x354   :  { %v3288_v4 = vadd.f32 %v3287_v40, %v3239_v38  ;;  %v3381_v56 = vadd.f32 %v3380_v41, %v3332_v61  ;;  %v6410_v38 = vor.u32 %v7621_v52, %v6409_v46  ;;  %v7685_v40 = vld [vmem:[#allocation11 + $0x3ac] sm:$0xf0] }
 0x355   :  { %v6666_v28 = vor.u32 %v7685_v40, %v6665_v24  ;;  %v7613_v40 = vld [vmem:[#allocation11 + $0x16c] sm:$0xf0] }
 0x356   :  { %v4669_v45 = vmul.f32 0.2, %v3381_v56  ;;  %3578 = vmatmul.bf16.gmra.mxu1 %v8620_v9  ;;  %3592 = vmatmul.bf16.vlgmr.msra.gmra.mxu2 %v8401_v50 }
 0x357   :  { %3641 = vmatmul.bf16.vlgmr.msra.gmra.mxu3 %v8394_v25  ;;  %3781 = vmatpush.bf16.msrb.mxu2 %v6410_v38 }
 0x358   :  { %v4797_v0 = vmax.f32 %v3381_v56, %v4669_v45  ;;  %3830 = vmatpush.bf16.msrb.mxu3 %v6666_v28  ;;  %v7177_v56 = vld [vmem:[#allocation11 + $0x790] sm:$0xf] }
 0x359   :  { %v3334_v5 = vpop.f32.mrf.mxu0  ;;  %v3397_v10 = vpop.f32.mrf.mxu2  ;;  %v7178_v46 = vor.u32 %v7813_v16, %v7177_v56  ;;  %v6633_v28 = vld [vmem:[#allocation11 + $0x350] sm:$0xf] }
 0x35a   :  { %v3335_v58 = vadd.f32 %v3334_v5, %v3286_v42  ;;  %v3398_v41 = vadd.f32 %v3397_v10, %v8759_v39  ;;  %v3446_v12 = vpop.f32.mrf.mxu3  ;;  %v8763_v37 = vpack.c.bf16 %v4797_v0, %v4789_v57  ;;  %v7749_v42 = vld [vmem:[#allocation11 + $0x5ac] sm:$0xf0] }
 0x35b   :  { %v3385_v2 = vpop.f32.mrf.mxu1  ;;  %v6922_v10 = vor.u32 %v7749_v42, %v6921_v3  ;;  %3928 = vmatpush.bf16.msrb.mxu1 %v7178_v46  ;;  %v7677_v56 = vld [vmem:[#allocation11 + $0x36c] sm:$0xf0] }
 0x35c   :  { %9296 = vst [vmem:[#allocation34_spill] sm:$0xff] %v8763_v37  ;;  %v3384_v61 = vadd.f32 %v3383_v30, %v3335_v58  ;;  %v3447_v20 = vadd.f32 %v3446_v12, %v3398_v41  ;;  %3529 = vmatmul.bf16.gmra.mxu0 %v8628_v59  ;;  %v7805_v37 = vld [vmem:[#allocation11 + $0x76c] sm:$0xf0] }
 0x35d   :  { %3879 = vmatpush.bf16.msrb.mxu0 %v6922_v10 }
 0x35e   :  { %v4677_v30 = vmul.f32 0.2, %v3384_v61 }
 0x360   :  { %v4805_v24 = vmax.f32 %v3384_v61, %v4677_v30  ;;  %v6889_v61 = vld [vmem:[#allocation11 + $0x550] sm:$0xf] }
 0x361   :  { %v3336_v45 = vpop.f32.mrf.mxu0  ;;  %v3399_v5 = vpop.f32.mrf.mxu2  ;;  %v7741_v30 = vld [vmem:[#allocation11 + $0x56c] sm:$0xf0] }
 0x362   :  { %v3337_v22 = vadd.f32 %v3336_v45, %v3288_v4  ;;  %v3400_v57 = vadd.f32 %v3399_v5, %v8759_v39  ;;  %v3448_v0 = vpop.f32.mrf.mxu3  ;;  %v6377_v4 = vld [vmem:[#allocation11 + $0x150] sm:$0xf]  ;;  %v6634_v5 = vor.u32 %v7677_v56, %v6633_v28 }
 0x363   :  { %v3544_v52 = vpop.f32.mrf.mxu1  ;;  %v6378_v42 = vor.u32 %v7613_v40, %v6377_v4  ;;  %v6890_v40 = vor.u32 %v7741_v30, %v6889_v61  ;;  %v6601_v61 = vld [vmem:[#allocation11 + $0x310] sm:$0xf] }
 0x364   :  { %v3386_v58 = vadd.f32 %v3385_v2, %v3337_v22  ;;  %v3449_v41 = vadd.f32 %v3448_v0, %v3400_v57  ;;  %3831 = vmatpush.bf16.msrb.mxu3 %v6634_v5  ;;  %v7605_v5 = vld [vmem:[#allocation11 + $0x12c] sm:$0xf0] }
 0x365   :  { %3782 = vmatpush.bf16.msrb.mxu2 %v6378_v42  ;;  %3880 = vmatpush.bf16.msrb.mxu0 %v6890_v40 }
 0x366   :  { %v4685_v12 = vmul.f32 0.2, %v3386_v58  ;;  %3597 = vmatmul.bf16.gmra.mxu2 %v8413_v32  ;;  %3739 = vmatmul.bf16.vlgmr.msra.gmra.mxu1 %v8506_v29 }
 0x367   :  { %3646 = vmatmul.bf16.gmra.mxu3 %v8406_v13 }
 0x368   :  { %v4813_v38 = vmax.f32 %v3386_v58, %v4685_v12  ;;  %v7145_v58 = vld [vmem:[#allocation11 + $0x750] sm:$0xf] }
 0x369   :  { %v3402_v3 = vpop.f32.mrf.mxu2  ;;  %v3495_v16 = vpop.f32.mrf.mxu0 }
 0x36a   :  { %v3403_v22 = vadd.f32 %v3402_v3, %v8759_v39  ;;  %v3451_v2 = vpop.f32.mrf.mxu3  ;;  %v3496_v45 = vadd.f32 %v3495_v16, %v3447_v20  ;;  %v8771_v10 = vpack.c.bf16 %v4813_v38, %v4805_v24  ;;  %v7146_v24 = vor.u32 %v7805_v37, %v7145_v58  ;;  %v7669_v58 = vld [vmem:[#allocation11 + $0x32c] sm:$0xf0] }
 0x36b   :  { %v3546_v57 = vpop.f32.mrf.mxu1 }
 0x36c   :  { %9297 = vst [vmem:[#allocation35_spill] sm:$0xff] %v8771_v10  ;;  %v3452_v0 = vadd.f32 %v3451_v2, %v3403_v22  ;;  %v3545_v46 = vadd.f32 %v3544_v52, %v3496_v45  ;;  %3690 = vmatmul.bf16.vlgmr.msra.gmra.mxu0 %v8512_v47  ;;  %3929 = vmatpush.bf16.msrb.mxu1 %v7146_v24  ;;  %v6345_v45 = vld [vmem:[#allocation11 + $0x110] sm:$0xf] }
 0x36d   :  { %v6346_v30 = vor.u32 %v7605_v5, %v6345_v45 }
 0x36e   :  { %v4566_v16 = vmul.f32 0.2, %v3545_v46 }
 0x36f   :  { %3783 = vmatpush.bf16.msrb.mxu2 %v6346_v30 }
 0x370   :  { %v4694_v22 = vmax.f32 %v3545_v46, %v4566_v16  ;;  %v6857_v46 = vld [vmem:[#allocation11 + $0x510] sm:$0xf] }
 0x371   :  { %v3404_v12 = vpop.f32.mrf.mxu2  ;;  %v3497_v4 = vpop.f32.mrf.mxu0  ;;  %v7733_v16 = vld [vmem:[#allocation11 + $0x52c] sm:$0xf0] }
 0x372   :  { %v3405_v3 = vadd.f32 %v3404_v12, %v8759_v39  ;;  %v3453_v20 = vpop.f32.mrf.mxu3  ;;  %v3498_v28 = vadd.f32 %v3497_v4, %v3449_v41  ;;  %v6858_v5 = vor.u32 %v7733_v16, %v6857_v46  ;;  %v6569_v46 = vld [vmem:[#allocation11 + $0x2d0] sm:$0xf] }
 0x373   :  { %v3549_v38 = vpop.f32.mrf.mxu1 }
 0x374   :  { %v3454_v42 = vadd.f32 %v3453_v20, %v3405_v3  ;;  %v3547_v52 = vadd.f32 %v3546_v57, %v3498_v28  ;;  %v6602_v3 = vor.u32 %v7669_v58, %v6601_v61  ;;  %3881 = vmatpush.bf16.msrb.mxu0 %v6858_v5 }
 0x376   :  { %v4574_v56 = vmul.f32 0.2, %v3547_v52  ;;  %3602 = vmatmul.bf16.gmra.mxu2 %v8425_v19  ;;  %3744 = vmatmul.bf16.gmra.mxu1 %v8518_v31 }
 0x377   :  { %3651 = vmatmul.bf16.gmra.mxu3 %v8418_v1 }
 0x378   :  { %v4702_v2 = vmax.f32 %v3547_v52, %v4574_v56  ;;  %3832 = vmatpush.bf16.msrb.mxu3 %v6602_v3  ;;  %v7113_v52 = vld [vmem:[#allocation11 + $0x710] sm:$0xf] }
 0x379   :  { %v3407_v41 = vpop.f32.mrf.mxu2  ;;  %v3500_v37 = vpop.f32.mrf.mxu0  ;;  %v7597_v3 = vld [vmem:[#allocation11 + $0xec] sm:$0xf0] }
 0x37a   :  { %v8778_v12 = vpack.c.bf16 %v4702_v2, %v4694_v22  ;;  %v3408_v57 = vadd.f32 %v3407_v41, %v8759_v39  ;;  %v3456_v4 = vpop.f32.mrf.mxu3  ;;  %v3501_v40 = vadd.f32 %v3500_v37, %v3452_v0  ;;  %v7797_v22 = vld [vmem:[#allocation11 + $0x72c] sm:$0xf0] }
 0x37b   :  { %v3551_v20 = vpop.f32.mrf.mxu1  ;;  %v7114_v0 = vor.u32 %v7797_v22, %v7113_v52 }
 0x37c   :  { %9298 = vst [vmem:[#allocation36_spill] sm:$0xff] %v8778_v12  ;;  %v3457_v28 = vadd.f32 %v3456_v4, %v3408_v57  ;;  %v3550_v24 = vadd.f32 %v3549_v38, %v3501_v40  ;;  %3695 = vmatmul.bf16.gmra.mxu0 %v8524_v48  ;;  %v6313_v40 = vld [vmem:[#allocation11 + $0xd0] sm:$0xf] }
 0x37d   :  { %3930 = vmatpush.bf16.msrb.mxu1 %v7114_v0  ;;  %v6314_v52 = vor.u32 %v7597_v3, %v6313_v40  ;;  %v7573_v12 = vld [vmem:[#allocation11 + $0x2c] sm:$0xf0] }
 0x37e   :  { %v4582_v37 = vmul.f32 0.2, %v3550_v24 }
 0x37f   :  { %3784 = vmatpush.bf16.msrb.mxu2 %v6314_v52 }
 0x380   :  { %v4710_v57 = vmax.f32 %v3550_v24, %v4582_v37  ;;  %v6825_v24 = vld [vmem:[#allocation11 + $0x4d0] sm:$0xf] }
 0x381   :  { %v3409_v56 = vpop.f32.mrf.mxu2  ;;  %v3502_v45 = vpop.f32.mrf.mxu0  ;;  %v7725_v37 = vld [vmem:[#allocation11 + $0x4ec] sm:$0xf0] }
 0x382   :  { %v3410_v2 = vadd.f32 %v3409_v56, %v8759_v39  ;;  %v3458_v41 = vpop.f32.mrf.mxu3  ;;  %v3503_v10 = vadd.f32 %v3502_v45, %v3454_v42  ;;  %v7661_v56 = vld [vmem:[#allocation11 + $0x2ec] sm:$0xf0]  ;;  %v6826_v3 = vor.u32 %v7725_v37, %v6825_v24 }
 0x383   :  { %v3554_v61 = vpop.f32.mrf.mxu1  ;;  %v6570_v5 = vor.u32 %v7661_v56, %v6569_v46  ;;  %v6537_v24 = vld [vmem:[#allocation11 + $0x290] sm:$0xf] }
 0x384   :  { %v3459_v30 = vadd.f32 %v3458_v41, %v3410_v2  ;;  %v3552_v38 = vadd.f32 %v3551_v20, %v3503_v10  ;;  %3882 = vmatpush.bf16.msrb.mxu0 %v6826_v3 }
 0x385   :  { %3833 = vmatpush.bf16.msrb.mxu3 %v6570_v5  ;;  %v7589_v5 = vld [vmem:[#allocation11 + $0xac] sm:$0xf0] }
 0x386   :  { %v4590_v58 = vmul.f32 0.2, %v3552_v38  ;;  %3607 = vmatmul.bf16.gmra.mxu2 %v8439_v7  ;;  %3749 = vmatmul.bf16.gmra.mxu1 %v8530_v17 }
 0x387   :  { %3656 = vmatmul.bf16.gmra.mxu3 %v8430_v51 }
 0x388   :  { %v4718_v4 = vmax.f32 %v3552_v38, %v4590_v58  ;;  %v7081_v38 = vld [vmem:[#allocation11 + $0x6d0] sm:$0xf] }
 0x389   :  { %v3412_v42 = vpop.f32.mrf.mxu2  ;;  %v3505_v16 = vpop.f32.mrf.mxu0 }
 0x38a   :  { %v3413_v45 = vadd.f32 %v3412_v42, %v8759_v39  ;;  %v3461_v10 = vpop.f32.mrf.mxu3  ;;  %v3506_v20 = vadd.f32 %v3505_v16, %v3457_v28  ;;  %v8787_v22 = vpack.c.bf16 %v4718_v4, %v4710_v57  ;;  %v7082_v57 = vor.u32 %v7789_v27, %v7081_v38  ;;  %v7653_v38 = vld [vmem:[#allocation11 + $0x2ac] sm:$0xf0] }
 0x38b   :  { %v3556_v2 = vpop.f32.mrf.mxu1  ;;  %v6538_v3 = vor.u32 %v7653_v38, %v6537_v24 }
 0x38c   :  { %9299 = vst [vmem:[#allocation37_spill] sm:$0xff] %v8787_v22  ;;  %v3462_v41 = vadd.f32 %v3461_v10, %v3413_v45  ;;  %v3555_v0 = vadd.f32 %v3554_v61, %v3506_v20  ;;  %3700 = vmatmul.bf16.gmra.mxu0 %v8539_v14  ;;  %3931 = vmatpush.bf16.msrb.mxu1 %v7082_v57  ;;  %v6281_v20 = vld [vmem:[#allocation11 + $0x90] sm:$0xf] }
 0x38d   :  { %v6282_v37 = vor.u32 %v7589_v5, %v6281_v20  ;;  %3834 = vmatpush.bf16.msrb.mxu3 %v6538_v3  ;;  %v7781_v22 = vld [vmem:[#allocation11 + $0x6ac] sm:$0xf0] }
 0x38e   :  { %v4598_v16 = vmul.f32 0.2, %v3555_v0  ;;  %v7581_v3 = vld [vmem:[#allocation11 + $0x6c] sm:$0xf0] }
 0x38f   :  { %3785 = vmatpush.bf16.msrb.mxu2 %v6282_v37 }
 0x390   :  { %v4726_v45 = vmax.f32 %v3555_v0, %v4598_v16  ;;  %v6793_v0 = vld [vmem:[#allocation11 + $0x490] sm:$0xf] }
 0x391   :  { %v3414_v58 = vpop.f32.mrf.mxu2  ;;  %v3507_v40 = vpop.f32.mrf.mxu0  ;;  %v7717_v16 = vld [vmem:[#allocation11 + $0x4ac] sm:$0xf0] }
 0x392   :  { %v3415_v42 = vadd.f32 %v3414_v58, %v8759_v39  ;;  %v3463_v28 = vpop.f32.mrf.mxu3  ;;  %v3508_v46 = vadd.f32 %v3507_v40, %v3459_v30  ;;  %v6794_v5 = vor.u32 %v7717_v16, %v6793_v0  ;;  %v6505_v0 = vld [vmem:[#allocation11 + $0x250] sm:$0xf] }
 0x393   :  { %v3559_v4 = vpop.f32.mrf.mxu1 }
 0x394   :  { %v3464_v52 = vadd.f32 %v3463_v28, %v3415_v42  ;;  %v3557_v61 = vadd.f32 %v3556_v2, %v3508_v46  ;;  %3883 = vmatpush.bf16.msrb.mxu0 %v6794_v5 }
 0x396   :  { %v4606_v56 = vmul.f32 0.2, %v3557_v61  ;;  %3612 = vmatmul.bf16.gmra.mxu2 %v8454_v43  ;;  %3754 = vmatmul.bf16.gmra.mxu1 %v8547_v60 }
 0x397   :  { %3661 = vmatmul.bf16.gmra.mxu3 %v8549_v63 }
 0x398   :  { %v4734_v10 = vmax.f32 %v3557_v61, %v4606_v56  ;;  %v7049_v61 = vld [vmem:[#allocation11 + $0x690] sm:$0xf] }
 0x399   :  { %v3417_v30 = vpop.f32.mrf.mxu2  ;;  %v3510_v27 = vpop.f32.mrf.mxu0 }
 0x39a   :  { %v3418_v58 = vadd.f32 %v3417_v30, %v8759_v39  ;;  %v3466_v2 = vpop.f32.mrf.mxu3  ;;  %v3511_v40 = vadd.f32 %v3510_v27, %v3462_v41  ;;  %v8795_v42 = vpack.c.bf16 %v4734_v10, %v4726_v45  ;;  %v7050_v45 = vor.u32 %v7781_v22, %v7049_v61  ;;  %v7645_v61 = vld [vmem:[#allocation11 + $0x26c] sm:$0xf0] }
 0x39b   :  { %v3561_v28 = vpop.f32.mrf.mxu1  ;;  %v6506_v5 = vor.u32 %v7645_v61, %v6505_v0 }
 0x39c   :  { %9300 = vst [vmem:[#allocation38_spill] sm:$0xff] %v8795_v42  ;;  %v3467_v46 = vadd.f32 %v3466_v2, %v3418_v58  ;;  %v3560_v57 = vadd.f32 %v3559_v4, %v3511_v40  ;;  %3705 = vmatmul.bf16.gmra.mxu0 %v8558_v55  ;;  %3932 = vmatpush.bf16.msrb.mxu1 %v7050_v45  ;;  %v6249_v40 = vld [vmem:[#allocation11 + $0x50] sm:$0xf] }
 0x39d   :  { %v6250_v16 = vor.u32 %v7581_v3, %v6249_v40  ;;  %3835 = vmatpush.bf16.msrb.mxu3 %v6506_v5  ;;  %v7773_v42 = vld [vmem:[#allocation11 + $0x66c] sm:$0xf0] }
 0x39e   :  { %v4614_v27 = vmul.f32 0.2, %v3560_v57 }
 0x39f   :  { %3786 = vmatpush.bf16.msrb.mxu2 %v6250_v16  ;;  %v6473_v16 = vld [vmem:[#allocation11 + $0x210] sm:$0xf] }
 0x3a0   :  { %v4742_v58 = vmax.f32 %v3560_v57, %v4614_v27  ;;  %v6761_v57 = vld [vmem:[#allocation11 + $0x450] sm:$0xf] }
 0x3a1   :  { %v3419_v56 = vpop.f32.mrf.mxu2  ;;  %v3512_v20 = vpop.f32.mrf.mxu0  ;;  %v7709_v27 = vld [vmem:[#allocation11 + $0x46c] sm:$0xf0] }
 0x3a2   :  { %v3420_v30 = vadd.f32 %v3419_v56, %v8759_v39  ;;  %v3468_v41 = vpop.f32.mrf.mxu3  ;;  %v3513_v24 = vadd.f32 %v3512_v20, %v3464_v52  ;;  %v6762_v3 = vor.u32 %v7709_v27, %v6761_v57 }
 0x3a3   :  { %v3564_v10 = vpop.f32.mrf.mxu1 }
 0x3a4   :  { %v3469_v37 = vadd.f32 %v3468_v41, %v3420_v30  ;;  %v3562_v4 = vadd.f32 %v3561_v28, %v3513_v24  ;;  %3884 = vmatpush.bf16.msrb.mxu0 %v6762_v3 }
 0x3a6   :  { %v4622_v38 = vmul.f32 0.2, %v3562_v4  ;;  %3617 = vmatmul.bf16.gmra.mxu2 %v8469_v44  ;;  %3759 = vmatmul.bf16.gmra.mxu1 %v8566_v15 }
 0x3a7   :  { %3666 = vmatmul.bf16.gmra.mxu3 %v8568_v23 }
 0x3a8   :  { %v4750_v2 = vmax.f32 %v3562_v4, %v4622_v38  ;;  %v7017_v4 = vld [vmem:[#allocation11 + $0x650] sm:$0xf] }
 0x3a9   :  { %v3422_v52 = vpop.f32.mrf.mxu2  ;;  %v3515_v22 = vpop.f32.mrf.mxu0  ;;  %v7018_v0 = vor.u32 %v7773_v42, %v7017_v4 }
 0x3aa   :  { %v3423_v56 = vadd.f32 %v3422_v52, %v8759_v39  ;;  %v3471_v28 = vpop.f32.mrf.mxu3  ;;  %v3516_v20 = vadd.f32 %v3515_v22, %v3467_v46  ;;  %v8803_v30 = vpack.c.bf16 %v4750_v2, %v4742_v58  ;;  %v6217_v52 = vld [vmem:[#allocation11 + $0x10] sm:$0xf] }
 0x3ab   :  { %v3566_v41 = vpop.f32.mrf.mxu1  ;;  %v6218_v22 = vor.u32 %v7573_v12, %v6217_v52  ;;  %3933 = vmatpush.bf16.msrb.mxu1 %v7018_v0  ;;  %v6985_v0 = vld [vmem:[#allocation11 + $0x610] sm:$0xf] }
 0x3ac   :  { %9301 = vst [vmem:[#allocation39_spill] sm:$0xff] %v8803_v30  ;;  %v3472_v24 = vadd.f32 %v3471_v28, %v3423_v56  ;;  %v3565_v45 = vadd.f32 %v3564_v10, %v3516_v20  ;;  %3710 = vmatmul.bf16.gmra.mxu0 %v8577_v35  ;;  %v7637_v10 = vld [vmem:[#allocation11 + $0x22c] sm:$0xf0]  ;;  %v7051_v30 = vld [vmem:[#allocation11 + $0x6b0] sm:$0xf0] }
 0x3ad   :  { %v6474_v56 = vor.u32 %v7637_v10, %v6473_v16  ;;  %3787 = vmatpush.bf16.msrb.mxu2 %v6218_v22  ;;  %v7765_v10 = vld [vmem:[#allocation11 + $0x62c] sm:$0xf0] }
 0x3ae   :  { %v4630_v28 = vmul.f32 0.2, %v3565_v45 }
 0x3af   :  { %3836 = vmatpush.bf16.msrb.mxu3 %v6474_v56 }
 0x3b0   :  { %v4758_v42 = vmax.f32 %v3565_v45, %v4630_v28 }
 0x3b1   :  { %v3424_v38 = vpop.f32.mrf.mxu2  ;;  %v3517_v40 = vpop.f32.mrf.mxu0 }
 0x3b2   :  { %v3425_v46 = vadd.f32 %v3424_v38, %v8759_v39  ;;  %v3473_v58 = vpop.f32.mrf.mxu3  ;;  %v3518_v2 = vadd.f32 %v3517_v40, %v3469_v37 }
 0x3b3   :  { %v3569_v61 = vpop.f32.mrf.mxu1 }
 0x3b4   :  { %v3474_v20 = vadd.f32 %v3473_v58, %v3425_v46  ;;  %v3567_v5 = vadd.f32 %v3566_v41, %v3518_v2  ;;  %v6729_v58 = vld [vmem:[#allocation11 + $0x410] sm:$0xf] }
 0x3b5   :  { %v7701_v2 = vld [vmem:[#allocation11 + $0x42c] sm:$0xf0] }
 0x3b6   :  { %v4638_v57 = vmul.f32 0.2, %v3567_v5  ;;  %3622 = vmatmul.bf16.gmra.mxu2 %v8484_v8  ;;  %3764 = vmatmul.bf16.gmra.mxu1 %v8585_v6  ;;  %v6730_v45 = vor.u32 %v7701_v2, %v6729_v58  ;;  %v7689_v58 = vld [vmem:[#allocation11 + $0x3d4] sm:$0xf] }
 0x3b7   :  { %3671 = vmatmul.bf16.gmra.mxu3 %v8587_v34 }
 0x3b8   :  { %v4766_v12 = vmax.f32 %v3567_v5, %v4638_v57  ;;  %v6986_v57 = vor.u32 %v7765_v10, %v6985_v0  ;;  %3885 = vmatpush.bf16.msrb.mxu0 %v6730_v45 }
 0x3b9   :  { %v3427_v37 = vpop.f32.mrf.mxu2  ;;  %v3520_v27 = vpop.f32.mrf.mxu0 }
 0x3ba   :  { %v3428_v4 = vadd.f32 %v3427_v37, %v8759_v39  ;;  %v3476_v38 = vpop.f32.mrf.mxu3  ;;  %v3521_v40 = vadd.f32 %v3520_v27, %v3472_v24  ;;  %v8811_v3 = vpack.c.bf16 %v4766_v12, %v4758_v42  ;;  %3934 = vmatpush.bf16.msrb.mxu1 %v6986_v57 }
 0x3bb   :  { %v3571_v41 = vpop.f32.mrf.mxu1 }
 0x3bc   :  { %9302 = vst [vmem:[#allocation40_spill] sm:$0xff] %v8811_v3  ;;  %v3477_v52 = vadd.f32 %v3476_v38, %v3428_v4  ;;  %v3570_v46 = vadd.f32 %v3569_v61, %v3521_v40  ;;  %3715 = vmatmul.bf16.gmra.mxu0 %v8596_v62  ;;  %v7625_v38 = vld [vmem:[#allocation11 + $0x1d4] sm:$0xf] }
 0x3bd   :  { %v6443_v40 = vld [vmem:[#allocation11 + $0x1f0] sm:$0xf0] }
 0x3be   :  { %v4646_v42 = vmul.f32 0.2, %v3570_v46  ;;  %v6446_v0 = vor.u32 %v7625_v38, %v6443_v40  ;;  %v7211_v3 = vld [vmem:[#allocation11 + $0x7f0] sm:$0xf0] }
 0x3c0   :  { %v4774_v27 = vmax.f32 %v3570_v46, %v4646_v42  ;;  %3976 = vmatpush.bf16.msra.mxu2 %v6446_v0  ;;  %v7753_v46 = vld [vmem:[#allocation11 + $0x5d4] sm:$0xf] }
 0x3c1   :  { %v3429_v22 = vpop.f32.mrf.mxu2  ;;  %v3522_v16 = vpop.f32.mrf.mxu0  ;;  %v6955_v42 = vld [vmem:[#allocation11 + $0x5f0] sm:$0xf0] }
 0x3c2   :  { %v3430_v56 = vadd.f32 %v3429_v22, %v8759_v39  ;;  %v3478_v28 = vpop.f32.mrf.mxu3  ;;  %v3523_v5 = vadd.f32 %v3522_v16, %v3474_v20  ;;  %v6699_v22 = vld [vmem:[#allocation11 + $0x3f0] sm:$0xf0]  ;;  %v6958_v40 = vor.u32 %v7753_v46, %v6955_v42 }
 0x3c3   :  { %v3574_v24 = vpop.f32.mrf.mxu1  ;;  %v6702_v10 = vor.u32 %v7689_v58, %v6699_v22  ;;  %v6411_v42 = vld [vmem:[#allocation11 + $0x1b0] sm:$0xf0] }
 0x3c4   :  { %v3479_v12 = vadd.f32 %v3478_v28, %v3430_v56  ;;  %v3572_v37 = vadd.f32 %v3571_v41, %v3523_v5  ;;  %4074 = vmatpush.bf16.msra.mxu0 %v6958_v40 }
 0x3c5   :  { %4025 = vmatpush.bf16.msra.mxu3 %v6702_v10 }
 0x3c6   :  { %v4654_v61 = vmul.f32 0.2, %v3572_v37  ;;  %3627 = vmatmul.bf16.gmra.mxu2 %v8501_v54  ;;  %3769 = vmatmul.bf16.gmra.mxu1 %v8604_v26 }
 0x3c7   :  { %3676 = vmatmul.bf16.gmra.mxu3 %v8606_v11 }
 0x3c8   :  { %v4782_v4 = vmax.f32 %v3572_v37, %v4654_v61  ;;  %v7817_v37 = vld [vmem:[#allocation11 + $0x7d4] sm:$0xf] }
 0x3c9   :  { %v3432_v20 = vpop.f32.mrf.mxu2  ;;  %v3525_v2 = vpop.f32.mrf.mxu0 }
 0x3ca   :  { %v3433_v16 = vadd.f32 %v3432_v20, %v8759_v39  ;;  %v3481_v41 = vpop.f32.mrf.mxu3  ;;  %v3526_v45 = vadd.f32 %v3525_v2, %v3477_v52  ;;  %v8819_v56 = vpack.c.bf16 %v4782_v4, %v4774_v27  ;;  %v7214_v27 = vor.u32 %v7817_v37, %v7211_v3  ;;  %v7681_v37 = vld [vmem:[#allocation11 + $0x394] sm:$0xf] }
 0x3cb   :  { %v3576_v28 = vpop.f32.mrf.mxu1 }
 0x3cc   :  { %9303 = vst [vmem:[#allocation41_spill] sm:$0xff] %v8819_v56  ;;  %v3482_v5 = vadd.f32 %v3481_v41, %v3433_v16  ;;  %v3575_v57 = vadd.f32 %v3574_v24, %v3526_v45  ;;  %3720 = vmatmul.bf16.gmra.mxu0 %v8612_v21  ;;  %4123 = vmatpush.bf16.msra.mxu1 %v7214_v27  ;;  %v8826_v16 = vperm.slane %v8756_v49, 3  ;;  %v7809_v27 = vld [vmem:[#allocation11 + $0x794] sm:$0xf] }
 0x3cd   :  { %v7083_v56 = vld [vmem:[#allocation11 + $0x6f0] sm:$0xf0] }
 0x3ce   :  { %v4662_v2 = vmul.f32 0.2, %v3575_v57 }
 0x3d1   :  { %v3434_v61 = vpop.f32.mrf.mxu2  ;;  %v3527_v38 = vpop.f32.mrf.mxu0 }
 0x3d2   :  { %v3435_v20 = vadd.f32 %v3434_v61, %v8759_v39  ;;  %v3483_v52 = vpop.f32.mrf.mxu3  ;;  %v3528_v58 = vadd.f32 %v3527_v38, %v3479_v12  ;;  %v4790_v39 = vmax.f32 %v3575_v57, %v4662_v2 }
 0x3d3   :  { %v3579_v4 = vpop.f32.mrf.mxu1 }
 0x3d4   :  { %v3484_v0 = vadd.f32 %v3483_v52, %v3435_v20  ;;  %v3577_v24 = vadd.f32 %v3576_v28, %v3528_v58  ;;  %v7617_v28 = vld [vmem:[#allocation11 + $0x194] sm:$0xf] }
 0x3d5   :  { %v6414_v40 = vor.u32 %v7617_v28, %v6411_v42  ;;  %v6667_v20 = vld [vmem:[#allocation11 + $0x3b0] sm:$0xf0] }
 0x3d6   :  { %v4670_v22 = vmul.f32 0.2, %v3577_v24  ;;  %3774 = vmatmul.bf16.gmra.mxu1 %v8620_v9  ;;  %3788 = vmatmul.bf16.vlgmr.msrb.gmra.mxu2 %v8401_v50  ;;  %v6670_v57 = vor.u32 %v7681_v37, %v6667_v20  ;;  %v7745_v58 = vld [vmem:[#allocation11 + $0x594] sm:$0xf] }
 0x3d7   :  { %3837 = vmatmul.bf16.vlgmr.msrb.gmra.mxu3 %v8394_v25  ;;  %3977 = vmatpush.bf16.msra.mxu2 %v6414_v40  ;;  %v6379_v20 = vld [vmem:[#allocation11 + $0x170] sm:$0xf0] }
 0x3d8   :  { %v4798_v41 = vmax.f32 %v3577_v24, %v4670_v22  ;;  %4026 = vmatpush.bf16.msra.mxu3 %v6670_v57  ;;  %v7673_v57 = vld [vmem:[#allocation11 + $0x354] sm:$0xf] }
 0x3d9   :  { %v3530_v12 = vpop.f32.mrf.mxu0  ;;  %v3593_v3 = vpop.f32.mrf.mxu2 }
 0x3da   :  { %v3531_v45 = vadd.f32 %v3530_v12, %v3482_v5  ;;  %v3594_v10 = vadd.f32 %v3593_v3, %v8826_v16  ;;  %v3642_v46 = vpop.f32.mrf.mxu3  ;;  %v8830_v61 = vpack.c.bf16 %v4798_v41, %v4790_v39  ;;  %v6923_v5 = vld [vmem:[#allocation11 + $0x5b0] sm:$0xf0] }
 0x3db   :  { %v3581_v38 = vpop.f32.mrf.mxu1  ;;  %v6926_v22 = vor.u32 %v7745_v58, %v6923_v5  ;;  %v7179_v12 = vld [vmem:[#allocation11 + $0x7b0] sm:$0xf0] }
 0x3dc   :  { %9304 = vst [vmem:[#allocation42_spill] sm:$0xff] %v8830_v61  ;;  %v3580_v49 = vadd.f32 %v3579_v4, %v3531_v45  ;;  %v3643_v52 = vadd.f32 %v3642_v46, %v3594_v10  ;;  %3725 = vmatmul.bf16.gmra.mxu0 %v8628_v59  ;;  %v7182_v28 = vor.u32 %v7809_v27, %v7179_v12  ;;  %v7147_v61 = vld [vmem:[#allocation11 + $0x770] sm:$0xf0] }
 0x3dd   :  { %4075 = vmatpush.bf16.msra.mxu0 %v6926_v22 }
 0x3de   :  { %v4678_v4 = vmul.f32 0.2, %v3580_v49  ;;  %4124 = vmatpush.bf16.msra.mxu1 %v7182_v28 }
 0x3e0   :  { %v4806_v37 = vmax.f32 %v3580_v49, %v4678_v4  ;;  %v7737_v49 = vld [vmem:[#allocation11 + $0x554] sm:$0xf] }
 0x3e1   :  { %v3532_v2 = vpop.f32.mrf.mxu0  ;;  %v3595_v24 = vpop.f32.mrf.mxu2  ;;  %v6891_v4 = vld [vmem:[#allocation11 + $0x570] sm:$0xf0] }
 0x3e2   :  { %v3533_v3 = vadd.f32 %v3532_v2, %v3484_v0  ;;  %v3596_v39 = vadd.f32 %v3595_v24, %v8826_v16  ;;  %v3644_v41 = vpop.f32.mrf.mxu3  ;;  %v7609_v0 = vld [vmem:[#allocation11 + $0x154] sm:$0xf] }
 0x3e3   :  { %v3740_v42 = vpop.f32.mrf.mxu1  ;;  %v6382_v27 = vor.u32 %v7609_v0, %v6379_v20  ;;  %v6635_v2 = vld [vmem:[#allocation11 + $0x370] sm:$0xf0]  ;;  %v6894_v20 = vor.u32 %v7737_v49, %v6891_v4 }
 0x3e4   :  { %v3582_v45 = vadd.f32 %v3581_v38, %v3533_v3  ;;  %v3645_v10 = vadd.f32 %v3644_v41, %v3596_v39  ;;  %v6638_v12 = vor.u32 %v7673_v57, %v6635_v2  ;;  %v7665_v49 = vld [vmem:[#allocation11 + $0x314] sm:$0xf] }
 0x3e5   :  { %3978 = vmatpush.bf16.msra.mxu2 %v6382_v27  ;;  %4076 = vmatpush.bf16.msra.mxu0 %v6894_v20 }
 0x3e6   :  { %v4686_v46 = vmul.f32 0.2, %v3582_v45  ;;  %3793 = vmatmul.bf16.gmra.mxu2 %v8413_v32  ;;  %3935 = vmatmul.bf16.vlgmr.msrb.gmra.mxu1 %v8506_v29 }
 0x3e7   :  { %3842 = vmatmul.bf16.gmra.mxu3 %v8406_v13 }
 0x3e8   :  { %v4814_v40 = vmax.f32 %v3582_v45, %v4686_v46  ;;  %4027 = vmatpush.bf16.msra.mxu3 %v6638_v12  ;;  %v7801_v45 = vld [vmem:[#allocation11 + $0x754] sm:$0xf] }
 0x3e9   :  { %v3598_v58 = vpop.f32.mrf.mxu2  ;;  %v3691_v5 = vpop.f32.mrf.mxu0  ;;  %v6347_v12 = vld [vmem:[#allocation11 + $0x130] sm:$0xf0] }
 0x3ea   :  { %v3599_v38 = vadd.f32 %v3598_v58, %v8826_v16  ;;  %v3647_v24 = vpop.f32.mrf.mxu3  ;;  %v3692_v22 = vadd.f32 %v3691_v5, %v3643_v52  ;;  %v8838_v3 = vpack.c.bf16 %v4814_v40, %v4806_v37  ;;  %v7150_v37 = vor.u32 %v7801_v45, %v7147_v61  ;;  %v6603_v45 = vld [vmem:[#allocation11 + $0x330] sm:$0xf0] }
 0x3eb   :  { %v3742_v39 = vpop.f32.mrf.mxu1 }
 0x3ec   :  { %9305 = vst [vmem:[#allocation43_spill] sm:$0xff] %v8838_v3  ;;  %v3648_v41 = vadd.f32 %v3647_v24, %v3599_v38  ;;  %v3741_v28 = vadd.f32 %v3740_v42, %v3692_v22  ;;  %3886 = vmatmul.bf16.vlgmr.msrb.gmra.mxu0 %v8512_v47  ;;  %4125 = vmatpush.bf16.msra.mxu1 %v7150_v37  ;;  %v7601_v22 = vld [vmem:[#allocation11 + $0x114] sm:$0xf] }
 0x3ed   :  { %v6350_v4 = vor.u32 %v7601_v22, %v6347_v12 }
 0x3ee   :  { %v4567_v5 = vmul.f32 0.2, %v3741_v28 }
 0x3ef   :  { %3979 = vmatpush.bf16.msra.mxu2 %v6350_v4 }
 0x3f0   :  { %v4695_v38 = vmax.f32 %v3741_v28, %v4567_v5  ;;  %v7729_v28 = vld [vmem:[#allocation11 + $0x514] sm:$0xf] }
 0x3f1   :  { %v3600_v46 = vpop.f32.mrf.mxu2  ;;  %v3693_v0 = vpop.f32.mrf.mxu0  ;;  %v6859_v5 = vld [vmem:[#allocation11 + $0x530] sm:$0xf0] }
 0x3f2   :  { %v3601_v58 = vadd.f32 %v3600_v46, %v8826_v16  ;;  %v3649_v52 = vpop.f32.mrf.mxu3  ;;  %v3694_v57 = vadd.f32 %v3693_v0, %v3645_v10  ;;  %v6862_v12 = vor.u32 %v7729_v28, %v6859_v5  ;;  %v7657_v28 = vld [vmem:[#allocation11 + $0x2d4] sm:$0xf] }
 0x3f3   :  { %v3745_v40 = vpop.f32.mrf.mxu1 }
 0x3f4   :  { %v3650_v27 = vadd.f32 %v3649_v52, %v3601_v58  ;;  %v3743_v42 = vadd.f32 %v3742_v39, %v3694_v57  ;;  %v6606_v58 = vor.u32 %v7665_v49, %v6603_v45  ;;  %4077 = vmatpush.bf16.msra.mxu0 %v6862_v12 }
 0x3f6   :  { %v4575_v2 = vmul.f32 0.2, %v3743_v42  ;;  %3798 = vmatmul.bf16.gmra.mxu2 %v8425_v19  ;;  %3940 = vmatmul.bf16.gmra.mxu1 %v8518_v31 }
 0x3f7   :  { %3847 = vmatmul.bf16.gmra.mxu3 %v8418_v1 }
 0x3f8   :  { %v4703_v24 = vmax.f32 %v3743_v42, %v4575_v2  ;;  %4028 = vmatpush.bf16.msra.mxu3 %v6606_v58  ;;  %v7793_v42 = vld [vmem:[#allocation11 + $0x714] sm:$0xf] }
 0x3f9   :  { %v3603_v10 = vpop.f32.mrf.mxu2  ;;  %v3696_v61 = vpop.f32.mrf.mxu0  ;;  %v6315_v58 = vld [vmem:[#allocation11 + $0xf0] sm:$0xf0] }
 0x3fa   :  { %v8845_v46 = vpack.c.bf16 %v4703_v24, %v4695_v38  ;;  %v3604_v39 = vadd.f32 %v3603_v10, %v8826_v16  ;;  %v3652_v0 = vpop.f32.mrf.mxu3  ;;  %v3697_v20 = vadd.f32 %v3696_v61, %v3648_v41  ;;  %v7115_v38 = vld [vmem:[#allocation11 + $0x730] sm:$0xf0] }
 0x3fb   :  { %v3747_v52 = vpop.f32.mrf.mxu1  ;;  %v7118_v41 = vor.u32 %v7793_v42, %v7115_v38 }
 0x3fc   :  { %v3653_v57 = vadd.f32 %v3652_v0, %v3604_v39  ;;  %v3746_v37 = vadd.f32 %v3745_v40, %v3697_v20  ;;  %3891 = vmatmul.bf16.gmra.mxu0 %v8524_v48  ;;  %v7593_v20 = vld [vmem:[#allocation11 + $0xd4] sm:$0xf] }
 0x3fd   :  { %4126 = vmatpush.bf16.msra.mxu1 %v7118_v41  ;;  %v6318_v42 = vor.u32 %v7593_v20, %v6315_v58 }
 0x3fe   :  { %v4583_v61 = vmul.f32 0.2, %v3746_v37 }
 0x3ff   :  { %3980 = vmatpush.bf16.msra.mxu2 %v6318_v42 }
 0x400   :  { %v4711_v39 = vmax.f32 %v3746_v37, %v4583_v61  ;;  %v7721_v37 = vld [vmem:[#allocation11 + $0x4d4] sm:$0xf] }
 0x401   :  { %v3605_v2 = vpop.f32.mrf.mxu2  ;;  %v3698_v22 = vpop.f32.mrf.mxu0  ;;  %v6827_v61 = vld [vmem:[#allocation11 + $0x4f0] sm:$0xf0] }
 0x402   :  { %v3606_v24 = vadd.f32 %v3605_v2, %v8826_v16  ;;  %v3654_v10 = vpop.f32.mrf.mxu3  ;;  %v3699_v3 = vadd.f32 %v3698_v22, %v3650_v27  ;;  %v6571_v2 = vld [vmem:[#allocation11 + $0x2f0] sm:$0xf0]  ;;  %v6830_v58 = vor.u32 %v7721_v37, %v6827_v61 }
 0x403   :  { %v3750_v49 = vpop.f32.mrf.mxu1  ;;  %v6574_v12 = vor.u32 %v7657_v28, %v6571_v2  ;;  %v7649_v37 = vld [vmem:[#allocation11 + $0x294] sm:$0xf] }
 0x404   :  { %v3655_v4 = vadd.f32 %v3654_v10, %v3606_v24  ;;  %v3748_v40 = vadd.f32 %v3747_v52, %v3699_v3  ;;  %4078 = vmatpush.bf16.msra.mxu0 %v6830_v58 }
 0x405   :  { %4029 = vmatpush.bf16.msra.mxu3 %v6574_v12  ;;  %v6283_v12 = vld [vmem:[#allocation11 + $0xb0] sm:$0xf0] }
 0x406   :  { %v4591_v45 = vmul.f32 0.2, %v3748_v40  ;;  %3803 = vmatmul.bf16.gmra.mxu2 %v8439_v7  ;;  %3945 = vmatmul.bf16.gmra.mxu1 %v8530_v17 }
 0x407   :  { %3852 = vmatmul.bf16.gmra.mxu3 %v8430_v51 }
 0x408   :  { %v4719_v0 = vmax.f32 %v3748_v40, %v4591_v45  ;;  %v7785_v40 = vld [vmem:[#allocation11 + $0x6d4] sm:$0xf] }
 0x409   :  { %v3608_v27 = vpop.f32.mrf.mxu2  ;;  %v3701_v5 = vpop.f32.mrf.mxu0 }
 0x40a   :  { %v3609_v22 = vadd.f32 %v3608_v27, %v8826_v16  ;;  %v3657_v3 = vpop.f32.mrf.mxu3  ;;  %v3702_v52 = vadd.f32 %v3701_v5, %v3653_v57  ;;  %v8854_v38 = vpack.c.bf16 %v4719_v0, %v4711_v39  ;;  %v7086_v39 = vor.u32 %v7785_v40, %v7083_v56  ;;  %v6539_v40 = vld [vmem:[#allocation11 + $0x2b0] sm:$0xf0] }
 0x40b   :  { %v3752_v24 = vpop.f32.mrf.mxu1  ;;  %v6542_v58 = vor.u32 %v7649_v37, %v6539_v40 }
 0x40c   :  { %9306 = vst [vmem:[#allocation44_spill] sm:$0xff] %v8854_v38  ;;  %v3658_v10 = vadd.f32 %v3657_v3, %v3609_v22  ;;  %v3751_v41 = vadd.f32 %v3750_v49, %v3702_v52  ;;  %3896 = vmatmul.bf16.gmra.mxu0 %v8539_v14  ;;  %4127 = vmatpush.bf16.msra.mxu1 %v7086_v39  ;;  %v7585_v52 = vld [vmem:[#allocation11 + $0x94] sm:$0xf] }
 0x40d   :  { %v6286_v61 = vor.u32 %v7585_v52, %v6283_v12  ;;  %4030 = vmatpush.bf16.msra.mxu3 %v6542_v58  ;;  %v6251_v58 = vld [vmem:[#allocation11 + $0x70] sm:$0xf0] }
 0x40e   :  { %v4599_v5 = vmul.f32 0.2, %v3751_v41  ;;  %v6219_v38 = vld [vmem:[#allocation11 + $0x30] sm:$0xf0] }
 0x40f   :  { %3981 = vmatpush.bf16.msra.mxu2 %v6286_v61 }
 0x410   :  { %v4727_v22 = vmax.f32 %v3751_v41, %v4599_v5  ;;  %v7713_v41 = vld [vmem:[#allocation11 + $0x494] sm:$0xf] }
 0x411   :  { %v3610_v45 = vpop.f32.mrf.mxu2  ;;  %v3703_v20 = vpop.f32.mrf.mxu0  ;;  %v6795_v5 = vld [vmem:[#allocation11 + $0x4b0] sm:$0xf0] }
 0x412   :  { %v3611_v27 = vadd.f32 %v3610_v45, %v8826_v16  ;;  %v3659_v57 = vpop.f32.mrf.mxu3  ;;  %v3704_v28 = vadd.f32 %v3703_v20, %v3655_v4  ;;  %v6798_v12 = vor.u32 %v7713_v41, %v6795_v5  ;;  %v7641_v41 = vld [vmem:[#allocation11 + $0x254] sm:$0xf] }
 0x413   :  { %v3755_v0 = vpop.f32.mrf.mxu1 }
 0x414   :  { %v3660_v42 = vadd.f32 %v3659_v57, %v3611_v27  ;;  %v3753_v49 = vadd.f32 %v3752_v24, %v3704_v28  ;;  %4079 = vmatpush.bf16.msra.mxu0 %v6798_v12 }
 0x416   :  { %v4607_v2 = vmul.f32 0.2, %v3753_v49  ;;  %3808 = vmatmul.bf16.gmra.mxu2 %v8454_v43  ;;  %3950 = vmatmul.bf16.gmra.mxu1 %v8547_v60 }
 0x417   :  { %3857 = vmatmul.bf16.gmra.mxu3 %v8549_v63 }
 0x418   :  { %v4735_v3 = vmax.f32 %v3753_v49, %v4607_v2  ;;  %v7777_v49 = vld [vmem:[#allocation11 + $0x694] sm:$0xf] }
 0x419   :  { %v3613_v4 = vpop.f32.mrf.mxu2  ;;  %v3706_v56 = vpop.f32.mrf.mxu0 }
 0x41a   :  { %v3614_v45 = vadd.f32 %v3613_v4, %v8826_v16  ;;  %v3662_v24 = vpop.f32.mrf.mxu3  ;;  %v3707_v20 = vadd.f32 %v3706_v56, %v3658_v10  ;;  %v8862_v27 = vpack.c.bf16 %v4735_v3, %v4727_v22  ;;  %v7054_v22 = vor.u32 %v7777_v49, %v7051_v30  ;;  %v6507_v49 = vld [vmem:[#allocation11 + $0x270] sm:$0xf0] }
 0x41b   :  { %v3757_v57 = vpop.f32.mrf.mxu1  ;;  %v6510_v12 = vor.u32 %v7641_v41, %v6507_v49 }
 0x41c   :  { %9307 = vst [vmem:[#allocation45_spill] sm:$0xff] %v8862_v27  ;;  %v3663_v28 = vadd.f32 %v3662_v24, %v3614_v45  ;;  %v3756_v39 = vadd.f32 %v3755_v0, %v3707_v20  ;;  %3901 = vmatmul.bf16.gmra.mxu0 %v8558_v55  ;;  %4128 = vmatpush.bf16.msra.mxu1 %v7054_v22  ;;  %v7577_v20 = vld [vmem:[#allocation11 + $0x54] sm:$0xf] }
 0x41d   :  { %v6254_v5 = vor.u32 %v7577_v20, %v6251_v58  ;;  %4031 = vmatpush.bf16.msra.mxu3 %v6510_v12  ;;  %v7019_v27 = vld [vmem:[#allocation11 + $0x670] sm:$0xf0] }
 0x41e   :  { %v4615_v56 = vmul.f32 0.2, %v3756_v39 }
 0x41f   :  { %3982 = vmatpush.bf16.msra.mxu2 %v6254_v5  ;;  %v7633_v5 = vld [vmem:[#allocation11 + $0x214] sm:$0xf] }
 0x420   :  { %v4743_v45 = vmax.f32 %v3756_v39, %v4615_v56  ;;  %v7705_v39 = vld [vmem:[#allocation11 + $0x454] sm:$0xf] }
 0x421   :  { %v3615_v2 = vpop.f32.mrf.mxu2  ;;  %v3708_v52 = vpop.f32.mrf.mxu0  ;;  %v6763_v56 = vld [vmem:[#allocation11 + $0x470] sm:$0xf0] }
 0x422   :  { %v3616_v4 = vadd.f32 %v3615_v2, %v8826_v16  ;;  %v3664_v10 = vpop.f32.mrf.mxu3  ;;  %v3709_v37 = vadd.f32 %v3708_v52, %v3660_v42  ;;  %v6766_v58 = vor.u32 %v7705_v39, %v6763_v56 }
 0x423   :  { %v3760_v3 = vpop.f32.mrf.mxu1 }
 0x424   :  { %v3665_v61 = vadd.f32 %v3664_v10, %v3616_v4  ;;  %v3758_v0 = vadd.f32 %v3757_v57, %v3709_v37  ;;  %4080 = vmatpush.bf16.msra.mxu0 %v6766_v58 }
 0x426   :  { %v4623_v40 = vmul.f32 0.2, %v3758_v0  ;;  %3813 = vmatmul.bf16.gmra.mxu2 %v8469_v44  ;;  %3955 = vmatmul.bf16.gmra.mxu1 %v8566_v15 }
 0x427   :  { %3862 = vmatmul.bf16.gmra.mxu3 %v8568_v23 }
 0x428   :  { %v4751_v24 = vmax.f32 %v3758_v0, %v4623_v40  ;;  %v7769_v0 = vld [vmem:[#allocation11 + $0x654] sm:$0xf] }
 0x429   :  { %v3618_v42 = vpop.f32.mrf.mxu2  ;;  %v3711_v30 = vpop.f32.mrf.mxu0  ;;  %v7022_v41 = vor.u32 %v7769_v0, %v7019_v27 }
 0x42a   :  { %v3619_v2 = vadd.f32 %v3618_v42, %v8826_v16  ;;  %v3667_v57 = vpop.f32.mrf.mxu3  ;;  %v3712_v52 = vadd.f32 %v3711_v30, %v3663_v28  ;;  %v8870_v4 = vpack.c.bf16 %v4751_v24, %v4743_v45  ;;  %v7569_v42 = vld [vmem:[#allocation11 + $0x14] sm:$0xf] }
 0x42b   :  { %v3762_v10 = vpop.f32.mrf.mxu1  ;;  %v6222_v30 = vor.u32 %v7569_v42, %v6219_v38  ;;  %4129 = vmatpush.bf16.msra.mxu1 %v7022_v41  ;;  %v7761_v41 = vld [vmem:[#allocation11 + $0x614] sm:$0xf] }
 0x42c   :  { %9308 = vst [vmem:[#allocation46_spill] sm:$0xff] %v8870_v4  ;;  %v3668_v37 = vadd.f32 %v3667_v57, %v3619_v2  ;;  %v3761_v22 = vadd.f32 %v3760_v3, %v3712_v52  ;;  %3906 = vmatmul.bf16.gmra.mxu0 %v8577_v35  ;;  %v6475_v3 = vld [vmem:[#allocation11 + $0x230] sm:$0xf0] }
 0x42d   :  { %v6478_v2 = vor.u32 %v7633_v5, %v6475_v3  ;;  %3983 = vmatpush.bf16.msra.mxu2 %v6222_v30  ;;  %v6987_v3 = vld [vmem:[#allocation11 + $0x630] sm:$0xf0] }
 0x42e   :  { %v4631_v57 = vmul.f32 0.2, %v3761_v22 }
 0x42f   :  { %4032 = vmatpush.bf16.msra.mxu3 %v6478_v2 }
 0x430   :  { %v4759_v27 = vmax.f32 %v3761_v22, %v4631_v57 }
 0x431   :  { %v3620_v40 = vpop.f32.mrf.mxu2  ;;  %v3713_v20 = vpop.f32.mrf.mxu0 }
 0x432   :  { %v3621_v28 = vadd.f32 %v3620_v40, %v8826_v16  ;;  %v3669_v45 = vpop.f32.mrf.mxu3  ;;  %v3714_v24 = vadd.f32 %v3713_v20, %v3665_v61 }
 0x433   :  { %v3765_v49 = vpop.f32.mrf.mxu1 }
 0x434   :  { %v3670_v52 = vadd.f32 %v3669_v45, %v3621_v28  ;;  %v3763_v12 = vadd.f32 %v3762_v10, %v3714_v24  ;;  %v7697_v45 = vld [vmem:[#allocation11 + $0x414] sm:$0xf] }
 0x435   :  { %v6731_v24 = vld [vmem:[#allocation11 + $0x430] sm:$0xf0] }
 0x436   :  { %v4639_v39 = vmul.f32 0.2, %v3763_v12  ;;  %3818 = vmatmul.bf16.gmra.mxu2 %v8484_v8  ;;  %3960 = vmatmul.bf16.gmra.mxu1 %v8585_v6  ;;  %v6734_v22 = vor.u32 %v7697_v45, %v6731_v24  ;;  %v6705_v45 = vld [vmem:[#allocation11 + $0x3d8] sm:$0xf] }
 0x437   :  { %3867 = vmatmul.bf16.gmra.mxu3 %v8587_v34 }
 0x438   :  { %v4767_v38 = vmax.f32 %v3763_v12, %v4639_v39  ;;  %v6990_v39 = vor.u32 %v7761_v41, %v6987_v3  ;;  %4081 = vmatpush.bf16.msra.mxu0 %v6734_v22 }
 0x439   :  { %v3623_v61 = vpop.f32.mrf.mxu2  ;;  %v3716_v56 = vpop.f32.mrf.mxu0 }
 0x43a   :  { %v3624_v0 = vadd.f32 %v3623_v61, %v8826_v16  ;;  %v3672_v40 = vpop.f32.mrf.mxu3  ;;  %v3717_v20 = vadd.f32 %v3716_v56, %v3668_v37  ;;  %v8878_v58 = vpack.c.bf16 %v4767_v38, %v4759_v27  ;;  %4130 = vmatpush.bf16.msra.mxu1 %v6990_v39 }
 0x43b   :  { %v3767_v10 = vpop.f32.mrf.mxu1 }
 0x43c   :  { %9309 = vst [vmem:[#allocation47_spill] sm:$0xff] %v8878_v58  ;;  %v3673_v42 = vadd.f32 %v3672_v40, %v3624_v0  ;;  %v3766_v28 = vadd.f32 %v3765_v49, %v3717_v20  ;;  %3911 = vmatmul.bf16.gmra.mxu0 %v8596_v62  ;;  %v6449_v40 = vld [vmem:[#allocation11 + $0x1d8] sm:$0xf] }
 0x43d   :  { %v7630_v20 = vld [vmem:[#allocation11 + $0x1f4] sm:$0xf0] }
 0x43e   :  { %v4647_v27 = vmul.f32 0.2, %v3766_v28  ;;  %v6450_v41 = vor.u32 %v7630_v20, %v6449_v40  ;;  %v7822_v58 = vld [vmem:[#allocation11 + $0x7f4] sm:$0xf0] }
 0x440   :  { %v4775_v56 = vmax.f32 %v3766_v28, %v4647_v27  ;;  %4172 = vmatpush.bf16.msrb.mxu2 %v6450_v41  ;;  %v6961_v28 = vld [vmem:[#allocation11 + $0x5d8] sm:$0xf] }
 0x441   :  { %v3625_v30 = vpop.f32.mrf.mxu2  ;;  %v3718_v5 = vpop.f32.mrf.mxu0  ;;  %v7758_v27 = vld [vmem:[#allocation11 + $0x5f4] sm:$0xf0] }
 0x442   :  { %v3626_v2 = vadd.f32 %v3625_v30, %v8826_v16  ;;  %v3674_v57 = vpop.f32.mrf.mxu3  ;;  %v3719_v12 = vadd.f32 %v3718_v5, %v3670_v52  ;;  %v7694_v30 = vld [vmem:[#allocation11 + $0x3f4] sm:$0xf0]  ;;  %v6962_v20 = vor.u32 %v7758_v27, %v6961_v28 }
 0x443   :  { %v3770_v37 = vpop.f32.mrf.mxu1  ;;  %v6706_v3 = vor.u32 %v7694_v30, %v6705_v45  ;;  %v6417_v27 = vld [vmem:[#allocation11 + $0x198] sm:$0xf] }
 0x444   :  { %v3675_v38 = vadd.f32 %v3674_v57, %v3626_v2  ;;  %v3768_v61 = vadd.f32 %v3767_v10, %v3719_v12  ;;  %4270 = vmatpush.bf16.msrb.mxu0 %v6962_v20 }
 0x445   :  { %4221 = vmatpush.bf16.msrb.mxu3 %v6706_v3 }
 0x446   :  { %v4655_v49 = vmul.f32 0.2, %v3768_v61  ;;  %3823 = vmatmul.bf16.gmra.mxu2 %v8501_v54  ;;  %3965 = vmatmul.bf16.gmra.mxu1 %v8604_v26 }
 0x447   :  { %3872 = vmatmul.bf16.gmra.mxu3 %v8606_v11 }
 0x448   :  { %v4783_v0 = vmax.f32 %v3768_v61, %v4655_v49  ;;  %v7217_v61 = vld [vmem:[#allocation11 + $0x7d8] sm:$0xf] }
 0x449   :  { %v3628_v52 = vpop.f32.mrf.mxu2  ;;  %v3721_v24 = vpop.f32.mrf.mxu0 }
 0x44a   :  { %v3629_v5 = vadd.f32 %v3628_v52, %v8826_v16  ;;  %v3677_v10 = vpop.f32.mrf.mxu3  ;;  %v3722_v22 = vadd.f32 %v3721_v24, %v3673_v42  ;;  %v8886_v2 = vpack.c.bf16 %v4783_v0, %v4775_v56  ;;  %v7218_v56 = vor.u32 %v7822_v58, %v7217_v61  ;;  %v7622_v61 = vld [vmem:[#allocation11 + $0x1b4] sm:$0xf0] }
 0x44b   :  { %v3772_v57 = vpop.f32.mrf.mxu1 }
 0x44c   :  { %9310 = vst [vmem:[#allocation48_spill] sm:$0xff] %v8886_v2  ;;  %v3678_v12 = vadd.f32 %v3677_v10, %v3629_v5  ;;  %v3771_v39 = vadd.f32 %v3770_v37, %v3722_v22  ;;  %3916 = vmatmul.bf16.gmra.mxu0 %v8612_v21  ;;  %4319 = vmatpush.bf16.msrb.mxu1 %v7218_v56  ;;  %v8892_v5 = vld [vmem:[#allocation13] sm:$0xff]  ;;  %v7814_v2 = vld [vmem:[#allocation11 + $0x7b4] sm:$0xf0] }
 0x44d   :  { %v8895_v10 = vperm.slane %v8892_v5, 4 }
 0x44e   :  { %v4663_v24 = vmul.f32 0.2, %v3771_v39 }
 0x451   :  { %v3630_v49 = vpop.f32.mrf.mxu2  ;;  %v3723_v40 = vpop.f32.mrf.mxu0 }
 0x452   :  { %v3631_v52 = vadd.f32 %v3630_v49, %v8826_v16  ;;  %v3679_v42 = vpop.f32.mrf.mxu3  ;;  %v3724_v45 = vadd.f32 %v3723_v40, %v3675_v38  ;;  %v4791_v16 = vmax.f32 %v3771_v39, %v4663_v24  ;;  %v6673_v49 = vld [vmem:[#allocation11 + $0x398] sm:$0xf] }
 0x453   :  { %v3775_v0 = vpop.f32.mrf.mxu1  ;;  %v6929_v24 = vld [vmem:[#allocation11 + $0x598] sm:$0xf] }
 0x454   :  { %v3680_v41 = vadd.f32 %v3679_v42, %v3631_v52  ;;  %v3773_v37 = vadd.f32 %v3772_v57, %v3724_v45  ;;  %v6418_v52 = vor.u32 %v7622_v61, %v6417_v27  ;;  %v7686_v42 = vld [vmem:[#allocation11 + $0x3b4] sm:$0xf0] }
 0x455   :  { %v6674_v39 = vor.u32 %v7686_v42, %v6673_v49  ;;  %v7614_v42 = vld [vmem:[#allocation11 + $0x174] sm:$0xf0] }
 0x456   :  { %v4671_v30 = vmul.f32 0.2, %v3773_v37  ;;  %3970 = vmatmul.bf16.gmra.mxu1 %v8620_v9  ;;  %3984 = vmatmul.bf16.vlgmr.msra.gmra.mxu2 %v8401_v50 }
 0x457   :  { %4033 = vmatmul.bf16.vlgmr.msra.gmra.mxu3 %v8394_v25  ;;  %4173 = vmatpush.bf16.msrb.mxu2 %v6418_v52 }
 0x458   :  { %v4799_v58 = vmax.f32 %v3773_v37, %v4671_v30  ;;  %4222 = vmatpush.bf16.msrb.mxu3 %v6674_v39  ;;  %v7185_v37 = vld [vmem:[#allocation11 + $0x798] sm:$0xf] }
 0x459   :  { %v3726_v38 = vpop.f32.mrf.mxu0  ;;  %v3789_v22 = vpop.f32.mrf.mxu2  ;;  %v7186_v27 = vor.u32 %v7814_v2, %v7185_v37  ;;  %v6641_v39 = vld [vmem:[#allocation11 + $0x358] sm:$0xf] }
 0x45a   :  { %v3727_v3 = vadd.f32 %v3726_v38, %v3678_v12  ;;  %v3790_v57 = vadd.f32 %v3789_v22, %v8895_v10  ;;  %v3838_v28 = vpop.f32.mrf.mxu3  ;;  %v8899_v40 = vpack.c.bf16 %v4799_v58, %v4791_v16  ;;  %v7750_v12 = vld [vmem:[#allocation11 + $0x5b4] sm:$0xf0] }
 0x45b   :  { %v3777_v20 = vpop.f32.mrf.mxu1  ;;  %v6930_v22 = vor.u32 %v7750_v12, %v6929_v24  ;;  %4320 = vmatpush.bf16.msrb.mxu1 %v7186_v27  ;;  %v7678_v37 = vld [vmem:[#allocation11 + $0x374] sm:$0xf0] }
 0x45c   :  { %9311 = vst [vmem:[#allocation49_spill] sm:$0xff] %v8899_v40  ;;  %v3776_v45 = vadd.f32 %v3775_v0, %v3727_v3  ;;  %v3839_v56 = vadd.f32 %v3838_v28, %v3790_v57  ;;  %3921 = vmatmul.bf16.gmra.mxu0 %v8628_v59  ;;  %v7806_v40 = vld [vmem:[#allocation11 + $0x774] sm:$0xf0] }
 0x45d   :  { %4271 = vmatpush.bf16.msrb.mxu0 %v6930_v22 }
 0x45e   :  { %v4679_v0 = vmul.f32 0.2, %v3776_v45 }
 0x460   :  { %v4807_v49 = vmax.f32 %v3776_v45, %v4679_v0  ;;  %v6897_v45 = vld [vmem:[#allocation11 + $0x558] sm:$0xf] }
 0x461   :  { %v3728_v30 = vpop.f32.mrf.mxu0  ;;  %v3791_v38 = vpop.f32.mrf.mxu2  ;;  %v7742_v0 = vld [vmem:[#allocation11 + $0x574] sm:$0xf0] }
 0x462   :  { %v3729_v4 = vadd.f32 %v3728_v30, %v3680_v41  ;;  %v3792_v16 = vadd.f32 %v3791_v38, %v8895_v10  ;;  %v3840_v58 = vpop.f32.mrf.mxu3  ;;  %v6385_v41 = vld [vmem:[#allocation11 + $0x158] sm:$0xf]  ;;  %v6642_v38 = vor.u32 %v7678_v37, %v6641_v39 }
 0x463   :  { %v3936_v61 = vpop.f32.mrf.mxu1  ;;  %v6386_v12 = vor.u32 %v7614_v42, %v6385_v41  ;;  %v6898_v42 = vor.u32 %v7742_v0, %v6897_v45  ;;  %v6609_v45 = vld [vmem:[#allocation11 + $0x318] sm:$0xf] }
 0x464   :  { %v3778_v3 = vadd.f32 %v3777_v20, %v3729_v4  ;;  %v3841_v57 = vadd.f32 %v3840_v58, %v3792_v16  ;;  %4223 = vmatpush.bf16.msrb.mxu3 %v6642_v38  ;;  %v7606_v38 = vld [vmem:[#allocation11 + $0x134] sm:$0xf0] }
 0x465   :  { %4174 = vmatpush.bf16.msrb.mxu2 %v6386_v12  ;;  %4272 = vmatpush.bf16.msrb.mxu0 %v6898_v42 }
 0x466   :  { %v4687_v28 = vmul.f32 0.2, %v3778_v3  ;;  %3989 = vmatmul.bf16.gmra.mxu2 %v8413_v32  ;;  %4131 = vmatmul.bf16.vlgmr.msra.gmra.mxu1 %v8506_v29 }
 0x467   :  { %4038 = vmatmul.bf16.gmra.mxu3 %v8406_v13 }
 0x468   :  { %v4815_v52 = vmax.f32 %v3778_v3, %v4687_v28  ;;  %v7153_v3 = vld [vmem:[#allocation11 + $0x758] sm:$0xf] }
 0x469   :  { %v3794_v24 = vpop.f32.mrf.mxu2  ;;  %v3887_v2 = vpop.f32.mrf.mxu0 }
 0x46a   :  { %v3795_v4 = vadd.f32 %v3794_v24, %v8895_v10  ;;  %v3843_v20 = vpop.f32.mrf.mxu3  ;;  %v3888_v30 = vadd.f32 %v3887_v2, %v3839_v56  ;;  %v8907_v22 = vpack.c.bf16 %v4815_v52, %v4807_v49  ;;  %v7154_v49 = vor.u32 %v7806_v40, %v7153_v3  ;;  %v7670_v3 = vld [vmem:[#allocation11 + $0x334] sm:$0xf0] }
 0x46b   :  { %v3938_v16 = vpop.f32.mrf.mxu1 }
 0x46c   :  { %9312 = vst [vmem:[#allocation50_spill] sm:$0xff] %v8907_v22  ;;  %v3844_v58 = vadd.f32 %v3843_v20, %v3795_v4  ;;  %v3937_v27 = vadd.f32 %v3936_v61, %v3888_v30  ;;  %4082 = vmatmul.bf16.vlgmr.msra.gmra.mxu0 %v8512_v47  ;;  %4321 = vmatpush.bf16.msrb.mxu1 %v7154_v49  ;;  %v6353_v30 = vld [vmem:[#allocation11 + $0x118] sm:$0xf] }
 0x46d   :  { %v6354_v0 = vor.u32 %v7606_v38, %v6353_v30  ;;  %v7790_v22 = vld [vmem:[#allocation11 + $0x6f4] sm:$0xf0] }
 0x46e   :  { %v4568_v2 = vmul.f32 0.2, %v3937_v27 }
 0x46f   :  { %4175 = vmatpush.bf16.msrb.mxu2 %v6354_v0 }
 0x470   :  { %v4696_v4 = vmax.f32 %v3937_v27, %v4568_v2  ;;  %v6865_v27 = vld [vmem:[#allocation11 + $0x518] sm:$0xf] }
 0x471   :  { %v3796_v28 = vpop.f32.mrf.mxu2  ;;  %v3889_v41 = vpop.f32.mrf.mxu0  ;;  %v7734_v2 = vld [vmem:[#allocation11 + $0x534] sm:$0xf0] }
 0x472   :  { %v3797_v24 = vadd.f32 %v3796_v28, %v8895_v10  ;;  %v3845_v56 = vpop.f32.mrf.mxu3  ;;  %v3890_v39 = vadd.f32 %v3889_v41, %v3841_v57  ;;  %v6866_v38 = vor.u32 %v7734_v2, %v6865_v27  ;;  %v6577_v27 = vld [vmem:[#allocation11 + $0x2d8] sm:$0xf] }
 0x473   :  { %v3941_v52 = vpop.f32.mrf.mxu1 }
 0x474   :  { %v3846_v12 = vadd.f32 %v3845_v56, %v3797_v24  ;;  %v3939_v61 = vadd.f32 %v3938_v16, %v3890_v39  ;;  %v6610_v24 = vor.u32 %v7670_v3, %v6609_v45  ;;  %4273 = vmatpush.bf16.msrb.mxu0 %v6866_v38 }
 0x476   :  { %v4576_v37 = vmul.f32 0.2, %v3939_v61  ;;  %3994 = vmatmul.bf16.gmra.mxu2 %v8425_v19  ;;  %4136 = vmatmul.bf16.gmra.mxu1 %v8518_v31 }
 0x477   :  { %4043 = vmatmul.bf16.gmra.mxu3 %v8418_v1 }
 0x478   :  { %v4704_v20 = vmax.f32 %v3939_v61, %v4576_v37  ;;  %4224 = vmatpush.bf16.msrb.mxu3 %v6610_v24  ;;  %v7121_v61 = vld [vmem:[#allocation11 + $0x718] sm:$0xf] }
 0x479   :  { %v3799_v57 = vpop.f32.mrf.mxu2  ;;  %v3892_v40 = vpop.f32.mrf.mxu0  ;;  %v7598_v24 = vld [vmem:[#allocation11 + $0xf4] sm:$0xf0] }
 0x47a   :  { %v8914_v28 = vpack.c.bf16 %v4704_v20, %v4696_v4  ;;  %v3800_v16 = vadd.f32 %v3799_v57, %v8895_v10  ;;  %v3848_v41 = vpop.f32.mrf.mxu3  ;;  %v3893_v42 = vadd.f32 %v3892_v40, %v3844_v58  ;;  %v7798_v4 = vld [vmem:[#allocation11 + $0x734] sm:$0xf0] }
 0x47b   :  { %v3943_v56 = vpop.f32.mrf.mxu1  ;;  %v7122_v58 = vor.u32 %v7798_v4, %v7121_v61 }
 0x47c   :  { %9313 = vst [vmem:[#allocation51_spill] sm:$0xff] %v8914_v28  ;;  %v3849_v39 = vadd.f32 %v3848_v41, %v3800_v16  ;;  %v3942_v49 = vadd.f32 %v3941_v52, %v3893_v42  ;;  %4087 = vmatmul.bf16.gmra.mxu0 %v8524_v48  ;;  %v6321_v42 = vld [vmem:[#allocation11 + $0xd8] sm:$0xf] }
 0x47d   :  { %4322 = vmatpush.bf16.msrb.mxu1 %v7122_v58  ;;  %v6322_v61 = vor.u32 %v7598_v24, %v6321_v42 }
 0x47e   :  { %v4584_v40 = vmul.f32 0.2, %v3942_v49 }
 0x47f   :  { %4176 = vmatpush.bf16.msrb.mxu2 %v6322_v61 }
 0x480   :  { %v4712_v16 = vmax.f32 %v3942_v49, %v4584_v40  ;;  %v6833_v49 = vld [vmem:[#allocation11 + $0x4d8] sm:$0xf] }
 0x481   :  { %v3801_v37 = vpop.f32.mrf.mxu2  ;;  %v3894_v30 = vpop.f32.mrf.mxu0  ;;  %v7726_v40 = vld [vmem:[#allocation11 + $0x4f4] sm:$0xf0] }
 0x482   :  { %v3802_v20 = vadd.f32 %v3801_v37, %v8895_v10  ;;  %v3850_v57 = vpop.f32.mrf.mxu3  ;;  %v3895_v28 = vadd.f32 %v3894_v30, %v3846_v12  ;;  %v7662_v37 = vld [vmem:[#allocation11 + $0x2f4] sm:$0xf0]  ;;  %v6834_v24 = vor.u32 %v7726_v40, %v6833_v49 }
 0x483   :  { %v3946_v45 = vpop.f32.mrf.mxu1  ;;  %v6578_v38 = vor.u32 %v7662_v37, %v6577_v27  ;;  %v6545_v49 = vld [vmem:[#allocation11 + $0x298] sm:$0xf] }
 0x484   :  { %v3851_v0 = vadd.f32 %v3850_v57, %v3802_v20  ;;  %v3944_v52 = vadd.f32 %v3943_v56, %v3895_v28  ;;  %4274 = vmatpush.bf16.msrb.mxu0 %v6834_v24 }
 0x485   :  { %4225 = vmatpush.bf16.msrb.mxu3 %v6578_v38  ;;  %v7590_v38 = vld [vmem:[#allocation11 + $0xb4] sm:$0xf0] }
 0x486   :  { %v4592_v3 = vmul.f32 0.2, %v3944_v52  ;;  %3999 = vmatmul.bf16.gmra.mxu2 %v8439_v7  ;;  %4141 = vmatmul.bf16.gmra.mxu1 %v8530_v17 }
 0x487   :  { %4048 = vmatmul.bf16.gmra.mxu3 %v8430_v51 }
 0x488   :  { %v4720_v41 = vmax.f32 %v3944_v52, %v4592_v3  ;;  %v7089_v52 = vld [vmem:[#allocation11 + $0x6d8] sm:$0xf] }
 0x489   :  { %v3804_v12 = vpop.f32.mrf.mxu2  ;;  %v3897_v2 = vpop.f32.mrf.mxu0 }
 0x48a   :  { %v3805_v30 = vadd.f32 %v3804_v12, %v8895_v10  ;;  %v3853_v28 = vpop.f32.mrf.mxu3  ;;  %v3898_v56 = vadd.f32 %v3897_v2, %v3849_v39  ;;  %v8923_v4 = vpack.c.bf16 %v4720_v41, %v4712_v16  ;;  %v7090_v16 = vor.u32 %v7790_v22, %v7089_v52  ;;  %v7654_v52 = vld [vmem:[#allocation11 + $0x2b4] sm:$0xf0] }
 0x48b   :  { %v3948_v20 = vpop.f32.mrf.mxu1  ;;  %v6546_v24 = vor.u32 %v7654_v52, %v6545_v49 }
 0x48c   :  { %9314 = vst [vmem:[#allocation52_spill] sm:$0xff] %v8923_v4  ;;  %v3854_v57 = vadd.f32 %v3853_v28, %v3805_v30  ;;  %v3947_v58 = vadd.f32 %v3946_v45, %v3898_v56  ;;  %4092 = vmatmul.bf16.gmra.mxu0 %v8539_v14  ;;  %4323 = vmatpush.bf16.msrb.mxu1 %v7090_v16  ;;  %v6289_v56 = vld [vmem:[#allocation11 + $0x98] sm:$0xf] }
 0x48d   :  { %v6290_v40 = vor.u32 %v7590_v38, %v6289_v56  ;;  %4226 = vmatpush.bf16.msrb.mxu3 %v6546_v24  ;;  %v7782_v4 = vld [vmem:[#allocation11 + $0x6b4] sm:$0xf0] }
 0x48e   :  { %v4600_v2 = vmul.f32 0.2, %v3947_v58  ;;  %v7582_v24 = vld [vmem:[#allocation11 + $0x74] sm:$0xf0] }
 0x48f   :  { %4177 = vmatpush.bf16.msrb.mxu2 %v6290_v40 }
 0x490   :  { %v4728_v30 = vmax.f32 %v3947_v58, %v4600_v2  ;;  %v6801_v58 = vld [vmem:[#allocation11 + $0x498] sm:$0xf] }
 0x491   :  { %v3806_v3 = vpop.f32.mrf.mxu2  ;;  %v3899_v42 = vpop.f32.mrf.mxu0  ;;  %v7718_v2 = vld [vmem:[#allocation11 + $0x4b4] sm:$0xf0] }
 0x492   :  { %v3807_v12 = vadd.f32 %v3806_v3, %v8895_v10  ;;  %v3855_v39 = vpop.f32.mrf.mxu3  ;;  %v3900_v27 = vadd.f32 %v3899_v42, %v3851_v0  ;;  %v6802_v38 = vor.u32 %v7718_v2, %v6801_v58  ;;  %v6513_v58 = vld [vmem:[#allocation11 + $0x258] sm:$0xf] }
 0x493   :  { %v3951_v41 = vpop.f32.mrf.mxu1 }
 0x494   :  { %v3856_v61 = vadd.f32 %v3855_v39, %v3807_v12  ;;  %v3949_v45 = vadd.f32 %v3948_v20, %v3900_v27  ;;  %4275 = vmatpush.bf16.msrb.mxu0 %v6802_v38 }
 0x496   :  { %v4608_v37 = vmul.f32 0.2, %v3949_v45  ;;  %4004 = vmatmul.bf16.gmra.mxu2 %v8454_v43  ;;  %4146 = vmatmul.bf16.gmra.mxu1 %v8547_v60 }
 0x497   :  { %4053 = vmatmul.bf16.gmra.mxu3 %v8549_v63 }
 0x498   :  { %v4736_v28 = vmax.f32 %v3949_v45, %v4608_v37  ;;  %v7057_v45 = vld [vmem:[#allocation11 + $0x698] sm:$0xf] }
 0x499   :  { %v3809_v0 = vpop.f32.mrf.mxu2  ;;  %v3902_v22 = vpop.f32.mrf.mxu0 }
 0x49a   :  { %v3810_v3 = vadd.f32 %v3809_v0, %v8895_v10  ;;  %v3858_v20 = vpop.f32.mrf.mxu3  ;;  %v3903_v42 = vadd.f32 %v3902_v22, %v3854_v57  ;;  %v8931_v12 = vpack.c.bf16 %v4736_v28, %v4728_v30  ;;  %v7058_v30 = vor.u32 %v7782_v4, %v7057_v45  ;;  %v7646_v45 = vld [vmem:[#allocation11 + $0x274] sm:$0xf0] }
 0x49b   :  { %v3953_v39 = vpop.f32.mrf.mxu1  ;;  %v6514_v38 = vor.u32 %v7646_v45, %v6513_v58 }
 0x49c   :  { %9315 = vst [vmem:[#allocation53_spill] sm:$0xff] %v8931_v12  ;;  %v3859_v27 = vadd.f32 %v3858_v20, %v3810_v3  ;;  %v3952_v16 = vadd.f32 %v3951_v41, %v3903_v42  ;;  %4097 = vmatmul.bf16.gmra.mxu0 %v8558_v55  ;;  %4324 = vmatpush.bf16.msrb.mxu1 %v7058_v30  ;;  %v6257_v42 = vld [vmem:[#allocation11 + $0x58] sm:$0xf] }
 0x49d   :  { %v6258_v2 = vor.u32 %v7582_v24, %v6257_v42  ;;  %4227 = vmatpush.bf16.msrb.mxu3 %v6514_v38  ;;  %v7774_v12 = vld [vmem:[#allocation11 + $0x674] sm:$0xf0] }
 0x49e   :  { %v4616_v22 = vmul.f32 0.2, %v3952_v16 }
 0x49f   :  { %4178 = vmatpush.bf16.msrb.mxu2 %v6258_v2  ;;  %v6481_v2 = vld [vmem:[#allocation11 + $0x218] sm:$0xf] }
 0x4a0   :  { %v4744_v3 = vmax.f32 %v3952_v16, %v4616_v22  ;;  %v6769_v16 = vld [vmem:[#allocation11 + $0x458] sm:$0xf] }
 0x4a1   :  { %v3811_v37 = vpop.f32.mrf.mxu2  ;;  %v3904_v56 = vpop.f32.mrf.mxu0  ;;  %v7710_v22 = vld [vmem:[#allocation11 + $0x474] sm:$0xf0] }
 0x4a2   :  { %v3812_v0 = vadd.f32 %v3811_v37, %v8895_v10  ;;  %v3860_v57 = vpop.f32.mrf.mxu3  ;;  %v3905_v49 = vadd.f32 %v3904_v56, %v3856_v61  ;;  %v6770_v24 = vor.u32 %v7710_v22, %v6769_v16 }
 0x4a3   :  { %v3956_v28 = vpop.f32.mrf.mxu1 }
 0x4a4   :  { %v3861_v40 = vadd.f32 %v3860_v57, %v3812_v0  ;;  %v3954_v41 = vadd.f32 %v3953_v39, %v3905_v49  ;;  %4276 = vmatpush.bf16.msrb.mxu0 %v6770_v24 }
 0x4a6   :  { %v4624_v52 = vmul.f32 0.2, %v3954_v41  ;;  %4009 = vmatmul.bf16.gmra.mxu2 %v8469_v44  ;;  %4151 = vmatmul.bf16.gmra.mxu1 %v8566_v15 }
 0x4a7   :  { %4058 = vmatmul.bf16.gmra.mxu3 %v8568_v23 }
 0x4a8   :  { %v4752_v20 = vmax.f32 %v3954_v41, %v4624_v52  ;;  %v7025_v41 = vld [vmem:[#allocation11 + $0x658] sm:$0xf] }
 0x4a9   :  { %v3814_v61 = vpop.f32.mrf.mxu2  ;;  %v3907_v4 = vpop.f32.mrf.mxu0  ;;  %v7026_v58 = vor.u32 %v7774_v12, %v7025_v41 }
 0x4aa   :  { %v3815_v37 = vadd.f32 %v3814_v61, %v8895_v10  ;;  %v3863_v39 = vpop.f32.mrf.mxu3  ;;  %v3908_v56 = vadd.f32 %v3907_v4, %v3859_v27  ;;  %v8939_v0 = vpack.c.bf16 %v4752_v20, %v4744_v3  ;;  %v6225_v61 = vld [vmem:[#allocation11 + $0x18] sm:$0xf] }
 0x4ab   :  { %v3958_v57 = vpop.f32.mrf.mxu1  ;;  %v6226_v4 = vor.u32 %v7574_v53, %v6225_v61  ;;  %4325 = vmatpush.bf16.msrb.mxu1 %v7026_v58  ;;  %v6993_v58 = vld [vmem:[#allocation11 + $0x618] sm:$0xf] }
 0x4ac   :  { %9316 = vst [vmem:[#allocation54_spill] sm:$0xff] %v8939_v0  ;;  %v3864_v49 = vadd.f32 %v3863_v39, %v3815_v37  ;;  %v3957_v30 = vadd.f32 %v3956_v28, %v3908_v56  ;;  %4102 = vmatmul.bf16.gmra.mxu0 %v8577_v35  ;;  %v7638_v28 = vld [vmem:[#allocation11 + $0x234] sm:$0xf0]  ;;  %v7059_v0 = vld [vmem:[#allocation11 + $0x6b8] sm:$0xf0] }
 0x4ad   :  { %v6482_v37 = vor.u32 %v7638_v28, %v6481_v2  ;;  %4179 = vmatpush.bf16.msrb.mxu2 %v6226_v4  ;;  %v7766_v28 = vld [vmem:[#allocation11 + $0x634] sm:$0xf0] }
 0x4ae   :  { %v4632_v39 = vmul.f32 0.2, %v3957_v30 }
 0x4af   :  { %4228 = vmatpush.bf16.msrb.mxu3 %v6482_v37 }
 0x4b0   :  { %v4760_v12 = vmax.f32 %v3957_v30, %v4632_v39 }
 0x4b1   :  { %v3816_v52 = vpop.f32.mrf.mxu2  ;;  %v3909_v42 = vpop.f32.mrf.mxu0 }
 0x4b2   :  { %v3817_v27 = vadd.f32 %v3816_v52, %v8895_v10  ;;  %v3865_v3 = vpop.f32.mrf.mxu3  ;;  %v3910_v20 = vadd.f32 %v3909_v42, %v3861_v40 }
 0x4b3   :  { %v3961_v45 = vpop.f32.mrf.mxu1 }
 0x4b4   :  { %v3866_v56 = vadd.f32 %v3865_v3, %v3817_v27  ;;  %v3959_v38 = vadd.f32 %v3958_v57, %v3910_v20  ;;  %v6737_v3 = vld [vmem:[#allocation11 + $0x418] sm:$0xf] }
 0x4b5   :  { %v7702_v20 = vld [vmem:[#allocation11 + $0x434] sm:$0xf0] }
 0x4b6   :  { %v4640_v16 = vmul.f32 0.2, %v3959_v38  ;;  %4014 = vmatmul.bf16.gmra.mxu2 %v8484_v8  ;;  %4156 = vmatmul.bf16.gmra.mxu1 %v8585_v6  ;;  %v6738_v30 = vor.u32 %v7702_v20, %v6737_v3  ;;  %v7690_v3 = vld [vmem:[#allocation11 + $0x3dc] sm:$0xf] }
 0x4b7   :  { %4063 = vmatmul.bf16.gmra.mxu3 %v8587_v34 }
 0x4b8   :  { %v4768_v53 = vmax.f32 %v3959_v38, %v4640_v16  ;;  %v6994_v16 = vor.u32 %v7766_v28, %v6993_v58  ;;  %4277 = vmatpush.bf16.msrb.mxu0 %v6738_v30 }
 0x4b9   :  { %v3819_v40 = vpop.f32.mrf.mxu2  ;;  %v3912_v22 = vpop.f32.mrf.mxu0 }
 0x4ba   :  { %v3820_v41 = vadd.f32 %v3819_v40, %v8895_v10  ;;  %v3868_v52 = vpop.f32.mrf.mxu3  ;;  %v3913_v42 = vadd.f32 %v3912_v22, %v3864_v49  ;;  %v8947_v24 = vpack.c.bf16 %v4768_v53, %v4760_v12  ;;  %4326 = vmatpush.bf16.msrb.mxu1 %v6994_v16 }
 0x4bb   :  { %v3963_v57 = vpop.f32.mrf.mxu1 }
 0x4bc   :  { %9317 = vst [vmem:[#allocation55_spill] sm:$0xff] %v8947_v24  ;;  %v3869_v61 = vadd.f32 %v3868_v52, %v3820_v41  ;;  %v3962_v27 = vadd.f32 %v3961_v45, %v3913_v42  ;;  %4107 = vmatmul.bf16.gmra.mxu0 %v8596_v62  ;;  %v7626_v52 = vld [vmem:[#allocation11 + $0x1dc] sm:$0xf] }
 0x4bd   :  { %v6451_v42 = vld [vmem:[#allocation11 + $0x1f8] sm:$0xf0] }
 0x4be   :  { %v4648_v12 = vmul.f32 0.2, %v3962_v27  ;;  %v6454_v58 = vor.u32 %v7626_v52, %v6451_v42  ;;  %v7219_v24 = vld [vmem:[#allocation11 + $0x7f8] sm:$0xf0] }
 0x4c0   :  { %v4776_v22 = vmax.f32 %v3962_v27, %v4648_v12  ;;  %4368 = vmatpush.bf16.msra.mxu2 %v6454_v58  ;;  %v7754_v27 = vld [vmem:[#allocation11 + $0x5dc] sm:$0xf] }
 0x4c1   :  { %v3821_v4 = vpop.f32.mrf.mxu2  ;;  %v3914_v2 = vpop.f32.mrf.mxu0  ;;  %v6963_v12 = vld [vmem:[#allocation11 + $0x5f8] sm:$0xf0] }
 0x4c2   :  { %v3822_v37 = vadd.f32 %v3821_v4, %v8895_v10  ;;  %v3870_v39 = vpop.f32.mrf.mxu3  ;;  %v3915_v38 = vadd.f32 %v3914_v2, %v3866_v56  ;;  %v6707_v4 = vld [vmem:[#allocation11 + $0x3f8] sm:$0xf0]  ;;  %v6966_v42 = vor.u32 %v7754_v27, %v6963_v12 }
 0x4c3   :  { %v3966_v49 = vpop.f32.mrf.mxu1  ;;  %v6710_v28 = vor.u32 %v7690_v3, %v6707_v4  ;;  %v6419_v12 = vld [vmem:[#allocation11 + $0x1b8] sm:$0xf0] }
 0x4c4   :  { %v3871_v53 = vadd.f32 %v3870_v39, %v3822_v37  ;;  %v3964_v40 = vadd.f32 %v3963_v57, %v3915_v38  ;;  %4466 = vmatpush.bf16.msra.mxu0 %v6966_v42 }
 0x4c5   :  { %4417 = vmatpush.bf16.msra.mxu3 %v6710_v28 }
 0x4c6   :  { %v4656_v45 = vmul.f32 0.2, %v3964_v40  ;;  %4019 = vmatmul.bf16.gmra.mxu2 %v8501_v54  ;;  %4161 = vmatmul.bf16.gmra.mxu1 %v8604_v26 }
 0x4c7   :  { %4068 = vmatmul.bf16.gmra.mxu3 %v8606_v11 }
 0x4c8   :  { %v4784_v41 = vmax.f32 %v3964_v40, %v4656_v45  ;;  %v7818_v40 = vld [vmem:[#allocation11 + $0x7dc] sm:$0xf] }
 0x4c9   :  { %v3824_v56 = vpop.f32.mrf.mxu2  ;;  %v3917_v20 = vpop.f32.mrf.mxu0 }
 0x4ca   :  { %v3825_v2 = vadd.f32 %v3824_v56, %v8895_v10  ;;  %v3873_v57 = vpop.f32.mrf.mxu3  ;;  %v3918_v30 = vadd.f32 %v3917_v20, %v3869_v61  ;;  %v8955_v37 = vpack.c.bf16 %v4784_v41, %v4776_v22  ;;  %v7222_v22 = vor.u32 %v7818_v40, %v7219_v24  ;;  %v7682_v40 = vld [vmem:[#allocation11 + $0x39c] sm:$0xf] }
 0x4cb   :  { %v3968_v39 = vpop.f32.mrf.mxu1 }
 0x4cc   :  { %9318 = vst [vmem:[#allocation56_spill] sm:$0xff] %v8955_v37  ;;  %v3874_v38 = vadd.f32 %v3873_v57, %v3825_v2  ;;  %v3967_v16 = vadd.f32 %v3966_v49, %v3918_v30  ;;  %4112 = vmatmul.bf16.gmra.mxu0 %v8612_v21  ;;  %4515 = vmatpush.bf16.msra.mxu1 %v7222_v22  ;;  %v8962_v2 = vperm.slane %v8892_v5, 5  ;;  %v7810_v22 = vld [vmem:[#allocation11 + $0x79c] sm:$0xf] }
 0x4cd   :  { %v7091_v37 = vld [vmem:[#allocation11 + $0x6f8] sm:$0xf0] }
 0x4ce   :  { %v4664_v20 = vmul.f32 0.2, %v3967_v16 }
 0x4d1   :  { %v3826_v45 = vpop.f32.mrf.mxu2  ;;  %v3919_v52 = vpop.f32.mrf.mxu0 }
 0x4d2   :  { %v3827_v56 = vadd.f32 %v3826_v45, %v8895_v10  ;;  %v3875_v61 = vpop.f32.mrf.mxu3  ;;  %v3920_v3 = vadd.f32 %v3919_v52, %v3871_v53  ;;  %v4792_v10 = vmax.f32 %v3967_v16, %v4664_v20 }
 0x4d3   :  { %v3971_v41 = vpop.f32.mrf.mxu1 }
 0x4d4   :  { %v3876_v58 = vadd.f32 %v3875_v61, %v3827_v56  ;;  %v3969_v49 = vadd.f32 %v3968_v39, %v3920_v3  ;;  %v7618_v39 = vld [vmem:[#allocation11 + $0x19c] sm:$0xf] }
 0x4d5   :  { %v6422_v42 = vor.u32 %v7618_v39, %v6419_v12  ;;  %v6675_v56 = vld [vmem:[#allocation11 + $0x3b8] sm:$0xf0] }
 0x4d6   :  { %v4672_v4 = vmul.f32 0.2, %v3969_v49  ;;  %4166 = vmatmul.bf16.gmra.mxu1 %v8620_v9  ;;  %4180 = vmatmul.bf16.vlgmr.msrb.gmra.mxu2 %v8401_v50  ;;  %v6678_v16 = vor.u32 %v7682_v40, %v6675_v56  ;;  %v7746_v3 = vld [vmem:[#allocation11 + $0x59c] sm:$0xf] }
 0x4d7   :  { %4229 = vmatmul.bf16.vlgmr.msrb.gmra.mxu3 %v8394_v25  ;;  %4369 = vmatpush.bf16.msra.mxu2 %v6422_v42  ;;  %v6387_v56 = vld [vmem:[#allocation11 + $0x178] sm:$0xf0] }
 0x4d8   :  { %v4800_v57 = vmax.f32 %v3969_v49, %v4672_v4  ;;  %4418 = vmatpush.bf16.msra.mxu3 %v6678_v16  ;;  %v7674_v16 = vld [vmem:[#allocation11 + $0x35c] sm:$0xf] }
 0x4d9   :  { %v3922_v53 = vpop.f32.mrf.mxu0  ;;  %v3985_v24 = vpop.f32.mrf.mxu2 }
 0x4da   :  { %v3923_v30 = vadd.f32 %v3922_v53, %v3874_v38  ;;  %v3986_v28 = vadd.f32 %v3985_v24, %v8962_v2  ;;  %v4034_v27 = vpop.f32.mrf.mxu3  ;;  %v8966_v45 = vpack.c.bf16 %v4800_v57, %v4792_v10  ;;  %v6931_v38 = vld [vmem:[#allocation11 + $0x5b8] sm:$0xf0] }
 0x4db   :  { %v3973_v52 = vpop.f32.mrf.mxu1  ;;  %v6934_v4 = vor.u32 %v7746_v3, %v6931_v38  ;;  %v7187_v53 = vld [vmem:[#allocation11 + $0x7b8] sm:$0xf0] }
 0x4dc   :  { %9319 = vst [vmem:[#allocation57_spill] sm:$0xff] %v8966_v45  ;;  %v3972_v5 = vadd.f32 %v3971_v41, %v3923_v30  ;;  %v4035_v61 = vadd.f32 %v4034_v27, %v3986_v28  ;;  %4117 = vmatmul.bf16.gmra.mxu0 %v8628_v59  ;;  %v7190_v39 = vor.u32 %v7810_v22, %v7187_v53  ;;  %v7155_v45 = vld [vmem:[#allocation11 + $0x778] sm:$0xf0] }
 0x4dd   :  { %4467 = vmatpush.bf16.msra.mxu0 %v6934_v4 }
 0x4de   :  { %v4680_v41 = vmul.f32 0.2, %v3972_v5  ;;  %4516 = vmatpush.bf16.msra.mxu1 %v7190_v39 }
 0x4e0   :  { %v4808_v40 = vmax.f32 %v3972_v5, %v4680_v41  ;;  %v7738_v5 = vld [vmem:[#allocation11 + $0x55c] sm:$0xf] }
 0x4e1   :  { %v3924_v20 = vpop.f32.mrf.mxu0  ;;  %v3987_v49 = vpop.f32.mrf.mxu2  ;;  %v6899_v41 = vld [vmem:[#allocation11 + $0x578] sm:$0xf0] }
 0x4e2   :  { %v3925_v24 = vadd.f32 %v3924_v20, %v3876_v58  ;;  %v3988_v10 = vadd.f32 %v3987_v49, %v8962_v2  ;;  %v4036_v57 = vpop.f32.mrf.mxu3  ;;  %v7610_v58 = vld [vmem:[#allocation11 + $0x15c] sm:$0xf] }
 0x4e3   :  { %v4132_v12 = vpop.f32.mrf.mxu1  ;;  %v6390_v22 = vor.u32 %v7610_v58, %v6387_v56  ;;  %v6643_v20 = vld [vmem:[#allocation11 + $0x378] sm:$0xf0]  ;;  %v6902_v56 = vor.u32 %v7738_v5, %v6899_v41 }
 0x4e4   :  { %v3974_v30 = vadd.f32 %v3973_v52, %v3925_v24  ;;  %v4037_v28 = vadd.f32 %v4036_v57, %v3988_v10  ;;  %v6646_v53 = vor.u32 %v7674_v16, %v6643_v20  ;;  %v7666_v5 = vld [vmem:[#allocation11 + $0x31c] sm:$0xf] }
 0x4e5   :  { %4370 = vmatpush.bf16.msra.mxu2 %v6390_v22  ;;  %4468 = vmatpush.bf16.msra.mxu0 %v6902_v56 }
 0x4e6   :  { %v4688_v27 = vmul.f32 0.2, %v3974_v30  ;;  %4185 = vmatmul.bf16.gmra.mxu2 %v8413_v32  ;;  %4327 = vmatmul.bf16.vlgmr.msrb.gmra.mxu1 %v8506_v29 }
 0x4e7   :  { %4234 = vmatmul.bf16.gmra.mxu3 %v8406_v13 }
 0x4e8   :  { %v4816_v42 = vmax.f32 %v3974_v30, %v4688_v27  ;;  %4419 = vmatpush.bf16.msra.mxu3 %v6646_v53  ;;  %v7802_v30 = vld [vmem:[#allocation11 + $0x75c] sm:$0xf] }
 0x4e9   :  { %v3990_v3 = vpop.f32.mrf.mxu2  ;;  %v4083_v38 = vpop.f32.mrf.mxu0  ;;  %v6355_v53 = vld [vmem:[#allocation11 + $0x138] sm:$0xf0] }
 0x4ea   :  { %v3991_v52 = vadd.f32 %v3990_v3, %v8962_v2  ;;  %v4039_v49 = vpop.f32.mrf.mxu3  ;;  %v4084_v4 = vadd.f32 %v4083_v38, %v4035_v61  ;;  %v8974_v24 = vpack.c.bf16 %v4816_v42, %v4808_v40  ;;  %v7158_v40 = vor.u32 %v7802_v30, %v7155_v45  ;;  %v6611_v30 = vld [vmem:[#allocation11 + $0x338] sm:$0xf0] }
 0x4eb   :  { %v4134_v10 = vpop.f32.mrf.mxu1 }
 0x4ec   :  { %9320 = vst [vmem:[#allocation58_spill] sm:$0xff] %v8974_v24  ;;  %v4040_v57 = vadd.f32 %v4039_v49, %v3991_v52  ;;  %v4133_v39 = vadd.f32 %v4132_v12, %v4084_v4  ;;  %4278 = vmatmul.bf16.vlgmr.msrb.gmra.mxu0 %v8512_v47  ;;  %4517 = vmatpush.bf16.msra.mxu1 %v7158_v40  ;;  %v7602_v4 = vld [vmem:[#allocation11 + $0x11c] sm:$0xf] }
 0x4ed   :  { %v6358_v41 = vor.u32 %v7602_v4, %v6355_v53 }
 0x4ee   :  { %v4569_v38 = vmul.f32 0.2, %v4133_v39 }
 0x4ef   :  { %4371 = vmatpush.bf16.msra.mxu2 %v6358_v41 }
 0x4f0   :  { %v4697_v52 = vmax.f32 %v4133_v39, %v4569_v38  ;;  %v7730_v39 = vld [vmem:[#allocation11 + $0x51c] sm:$0xf] }
 0x4f1   :  { %v3992_v27 = vpop.f32.mrf.mxu2  ;;  %v4085_v58 = vpop.f32.mrf.mxu0  ;;  %v6867_v38 = vld [vmem:[#allocation11 + $0x538] sm:$0xf0] }
 0x4f2   :  { %v3993_v3 = vadd.f32 %v3992_v27, %v8962_v2  ;;  %v4041_v61 = vpop.f32.mrf.mxu3  ;;  %v4086_v16 = vadd.f32 %v4085_v58, %v4037_v28  ;;  %v6870_v53 = vor.u32 %v7730_v39, %v6867_v38  ;;  %v7658_v39 = vld [vmem:[#allocation11 + $0x2dc] sm:$0xf] }
 0x4f3   :  { %v4137_v42 = vpop.f32.mrf.mxu1 }
 0x4f4   :  { %v4042_v22 = vadd.f32 %v4041_v61, %v3993_v3  ;;  %v4135_v12 = vadd.f32 %v4134_v10, %v4086_v16  ;;  %v6614_v3 = vor.u32 %v7666_v5, %v6611_v30  ;;  %4469 = vmatpush.bf16.msra.mxu0 %v6870_v53 }
 0x4f6   :  { %v4577_v20 = vmul.f32 0.2, %v4135_v12  ;;  %4190 = vmatmul.bf16.gmra.mxu2 %v8425_v19  ;;  %4332 = vmatmul.bf16.gmra.mxu1 %v8518_v31 }
 0x4f7   :  { %4239 = vmatmul.bf16.gmra.mxu3 %v8418_v1 }
 0x4f8   :  { %v4705_v49 = vmax.f32 %v4135_v12, %v4577_v20  ;;  %4420 = vmatpush.bf16.msra.mxu3 %v6614_v3  ;;  %v7794_v12 = vld [vmem:[#allocation11 + $0x71c] sm:$0xf] }
 0x4f9   :  { %v3995_v28 = vpop.f32.mrf.mxu2  ;;  %v4088_v45 = vpop.f32.mrf.mxu0  ;;  %v6323_v3 = vld [vmem:[#allocation11 + $0xf8] sm:$0xf0] }
 0x4fa   :  { %v8981_v27 = vpack.c.bf16 %v4705_v49, %v4697_v52  ;;  %v3996_v10 = vadd.f32 %v3995_v28, %v8962_v2  ;;  %v4044_v58 = vpop.f32.mrf.mxu3  ;;  %v4089_v56 = vadd.f32 %v4088_v45, %v4040_v57  ;;  %v7123_v52 = vld [vmem:[#allocation11 + $0x738] sm:$0xf0] }
 0x4fb   :  { %v4139_v61 = vpop.f32.mrf.mxu1  ;;  %v7126_v57 = vor.u32 %v7794_v12, %v7123_v52 }
 0x4fc   :  { %v4045_v16 = vadd.f32 %v4044_v58, %v3996_v10  ;;  %v4138_v40 = vadd.f32 %v4137_v42, %v4089_v56  ;;  %4283 = vmatmul.bf16.gmra.mxu0 %v8524_v48  ;;  %v7594_v56 = vld [vmem:[#allocation11 + $0xdc] sm:$0xf] }
 0x4fd   :  { %4518 = vmatpush.bf16.msra.mxu1 %v7126_v57  ;;  %v6326_v12 = vor.u32 %v7594_v56, %v6323_v3 }
 0x4fe   :  { %v4585_v45 = vmul.f32 0.2, %v4138_v40 }
 0x4ff   :  { %4372 = vmatpush.bf16.msra.mxu2 %v6326_v12 }
 0x500   :  { %v4713_v10 = vmax.f32 %v4138_v40, %v4585_v45  ;;  %v7722_v40 = vld [vmem:[#allocation11 + $0x4dc] sm:$0xf] }
 0x501   :  { %v3997_v20 = vpop.f32.mrf.mxu2  ;;  %v4090_v4 = vpop.f32.mrf.mxu0  ;;  %v6835_v45 = vld [vmem:[#allocation11 + $0x4f8] sm:$0xf0] }
 0x502   :  { %v3998_v49 = vadd.f32 %v3997_v20, %v8962_v2  ;;  %v4046_v28 = vpop.f32.mrf.mxu3  ;;  %v4091_v24 = vadd.f32 %v4090_v4, %v4042_v22  ;;  %v6579_v20 = vld [vmem:[#allocation11 + $0x2f8] sm:$0xf0]  ;;  %v6838_v3 = vor.u32 %v7722_v40, %v6835_v45 }
 0x503   :  { %v4142_v5 = vpop.f32.mrf.mxu1  ;;  %v6582_v53 = vor.u32 %v7658_v39, %v6579_v20  ;;  %v7650_v40 = vld [vmem:[#allocation11 + $0x29c] sm:$0xf] }
 0x504   :  { %v4047_v41 = vadd.f32 %v4046_v28, %v3998_v49  ;;  %v4140_v42 = vadd.f32 %v4139_v61, %v4091_v24  ;;  %4470 = vmatpush.bf16.msra.mxu0 %v6838_v3 }
 0x505   :  { %4421 = vmatpush.bf16.msra.mxu3 %v6582_v53  ;;  %v6291_v53 = vld [vmem:[#allocation11 + $0xb8] sm:$0xf0] }
 0x506   :  { %v4593_v30 = vmul.f32 0.2, %v4140_v42  ;;  %4195 = vmatmul.bf16.gmra.mxu2 %v8439_v7  ;;  %4337 = vmatmul.bf16.gmra.mxu1 %v8530_v17 }
 0x507   :  { %4244 = vmatmul.bf16.gmra.mxu3 %v8430_v51 }
 0x508   :  { %v4721_v58 = vmax.f32 %v4140_v42, %v4593_v30  ;;  %v7786_v42 = vld [vmem:[#allocation11 + $0x6dc] sm:$0xf] }
 0x509   :  { %v4000_v22 = vpop.f32.mrf.mxu2  ;;  %v4093_v38 = vpop.f32.mrf.mxu0 }
 0x50a   :  { %v4001_v4 = vadd.f32 %v4000_v22, %v8962_v2  ;;  %v4049_v24 = vpop.f32.mrf.mxu3  ;;  %v4094_v61 = vadd.f32 %v4093_v38, %v4045_v16  ;;  %v8990_v52 = vpack.c.bf16 %v4721_v58, %v4713_v10  ;;  %v7094_v10 = vor.u32 %v7786_v42, %v7091_v37  ;;  %v6547_v42 = vld [vmem:[#allocation11 + $0x2b8] sm:$0xf0] }
 0x50b   :  { %v4144_v49 = vpop.f32.mrf.mxu1  ;;  %v6550_v3 = vor.u32 %v7650_v40, %v6547_v42 }
 0x50c   :  { %9321 = vst [vmem:[#allocation59_spill] sm:$0xff] %v8990_v52  ;;  %v4050_v28 = vadd.f32 %v4049_v24, %v4001_v4  ;;  %v4143_v57 = vadd.f32 %v4142_v5, %v4094_v61  ;;  %4288 = vmatmul.bf16.gmra.mxu0 %v8539_v14  ;;  %4519 = vmatpush.bf16.msra.mxu1 %v7094_v10  ;;  %v7586_v61 = vld [vmem:[#allocation11 + $0x9c] sm:$0xf] }
 0x50d   :  { %v6294_v45 = vor.u32 %v7586_v61, %v6291_v53  ;;  %4422 = vmatpush.bf16.msra.mxu3 %v6550_v3  ;;  %v6259_v3 = vld [vmem:[#allocation11 + $0x78] sm:$0xf0] }
 0x50e   :  { %v4601_v38 = vmul.f32 0.2, %v4143_v57  ;;  %v6227_v52 = vld [vmem:[#allocation11 + $0x38] sm:$0xf0] }
 0x50f   :  { %4373 = vmatpush.bf16.msra.mxu2 %v6294_v45 }
 0x510   :  { %v4729_v4 = vmax.f32 %v4143_v57, %v4601_v38  ;;  %v7714_v57 = vld [vmem:[#allocation11 + $0x49c] sm:$0xf] }
 0x511   :  { %v4002_v30 = vpop.f32.mrf.mxu2  ;;  %v4095_v56 = vpop.f32.mrf.mxu0  ;;  %v6803_v38 = vld [vmem:[#allocation11 + $0x4b8] sm:$0xf0] }
 0x512   :  { %v4003_v22 = vadd.f32 %v4002_v30, %v8962_v2  ;;  %v4051_v16 = vpop.f32.mrf.mxu3  ;;  %v4096_v39 = vadd.f32 %v4095_v56, %v4047_v41  ;;  %v6806_v53 = vor.u32 %v7714_v57, %v6803_v38  ;;  %v7642_v57 = vld [vmem:[#allocation11 + $0x25c] sm:$0xf] }
 0x513   :  { %v4147_v58 = vpop.f32.mrf.mxu1 }
 0x514   :  { %v4052_v12 = vadd.f32 %v4051_v16, %v4003_v22  ;;  %v4145_v5 = vadd.f32 %v4144_v49, %v4096_v39  ;;  %4471 = vmatpush.bf16.msra.mxu0 %v6806_v53 }
 0x516   :  { %v4609_v20 = vmul.f32 0.2, %v4145_v5  ;;  %4200 = vmatmul.bf16.gmra.mxu2 %v8454_v43  ;;  %4342 = vmatmul.bf16.gmra.mxu1 %v8547_v60 }
 0x517   :  { %4249 = vmatmul.bf16.gmra.mxu3 %v8549_v63 }
 0x518   :  { %v4737_v24 = vmax.f32 %v4145_v5, %v4609_v20  ;;  %v7778_v5 = vld [vmem:[#allocation11 + $0x69c] sm:$0xf] }
 0x519   :  { %v4005_v41 = vpop.f32.mrf.mxu2  ;;  %v4098_v37 = vpop.f32.mrf.mxu0 }
 0x51a   :  { %v4006_v30 = vadd.f32 %v4005_v41, %v8962_v2  ;;  %v4054_v49 = vpop.f32.mrf.mxu3  ;;  %v4099_v56 = vadd.f32 %v4098_v37, %v4050_v28  ;;  %v8998_v22 = vpack.c.bf16 %v4737_v24, %v4729_v4  ;;  %v7062_v4 = vor.u32 %v7778_v5, %v7059_v0  ;;  %v6515_v5 = vld [vmem:[#allocation11 + $0x278] sm:$0xf0] }
 0x51b   :  { %v4149_v16 = vpop.f32.mrf.mxu1  ;;  %v6518_v53 = vor.u32 %v7642_v57, %v6515_v5 }
 0x51c   :  { %9322 = vst [vmem:[#allocation60_spill] sm:$0xff] %v8998_v22  ;;  %v4055_v39 = vadd.f32 %v4054_v49, %v4006_v30  ;;  %v4148_v10 = vadd.f32 %v4147_v58, %v4099_v56  ;;  %4293 = vmatmul.bf16.gmra.mxu0 %v8558_v55  ;;  %4520 = vmatpush.bf16.msra.mxu1 %v7062_v4  ;;  %v7578_v56 = vld [vmem:[#allocation11 + $0x5c] sm:$0xf] }
 0x51d   :  { %v6262_v38 = vor.u32 %v7578_v56, %v6259_v3  ;;  %4423 = vmatpush.bf16.msra.mxu3 %v6518_v53  ;;  %v7027_v22 = vld [vmem:[#allocation11 + $0x678] sm:$0xf0] }
 0x51e   :  { %v4617_v37 = vmul.f32 0.2, %v4148_v10 }
 0x51f   :  { %4374 = vmatpush.bf16.msra.mxu2 %v6262_v38  ;;  %v7634_v38 = vld [vmem:[#allocation11 + $0x21c] sm:$0xf] }
 0x520   :  { %v4745_v30 = vmax.f32 %v4148_v10, %v4617_v37  ;;  %v7706_v10 = vld [vmem:[#allocation11 + $0x45c] sm:$0xf] }
 0x521   :  { %v4007_v20 = vpop.f32.mrf.mxu2  ;;  %v4100_v61 = vpop.f32.mrf.mxu0  ;;  %v6771_v37 = vld [vmem:[#allocation11 + $0x478] sm:$0xf0] }
 0x522   :  { %v4008_v41 = vadd.f32 %v4007_v20, %v8962_v2  ;;  %v4056_v28 = vpop.f32.mrf.mxu3  ;;  %v4101_v40 = vadd.f32 %v4100_v61, %v4052_v12  ;;  %v6774_v3 = vor.u32 %v7706_v10, %v6771_v37 }
 0x523   :  { %v4152_v24 = vpop.f32.mrf.mxu1 }
 0x524   :  { %v4057_v45 = vadd.f32 %v4056_v28, %v4008_v41  ;;  %v4150_v58 = vadd.f32 %v4149_v16, %v4101_v40  ;;  %4472 = vmatpush.bf16.msra.mxu0 %v6774_v3 }
 0x526   :  { %v4625_v42 = vmul.f32 0.2, %v4150_v58  ;;  %4205 = vmatmul.bf16.gmra.mxu2 %v8469_v44  ;;  %4347 = vmatmul.bf16.gmra.mxu1 %v8566_v15 }
 0x527   :  { %4254 = vmatmul.bf16.gmra.mxu3 %v8568_v23 }
 0x528   :  { %v4753_v49 = vmax.f32 %v4150_v58, %v4625_v42  ;;  %v7770_v58 = vld [vmem:[#allocation11 + $0x65c] sm:$0xf] }
 0x529   :  { %v4010_v12 = vpop.f32.mrf.mxu2  ;;  %v4103_v0 = vpop.f32.mrf.mxu0  ;;  %v7030_v57 = vor.u32 %v7770_v58, %v7027_v22 }
 0x52a   :  { %v4011_v20 = vadd.f32 %v4010_v12, %v8962_v2  ;;  %v4059_v16 = vpop.f32.mrf.mxu3  ;;  %v4104_v61 = vadd.f32 %v4103_v0, %v4055_v39  ;;  %v9006_v41 = vpack.c.bf16 %v4753_v49, %v4745_v30  ;;  %v7570_v12 = vld [vmem:[#allocation11 + $0x1c] sm:$0xf] }
 0x52b   :  { %v4154_v28 = vpop.f32.mrf.mxu1  ;;  %v6230_v0 = vor.u32 %v7570_v12, %v6227_v52  ;;  %4521 = vmatpush.bf16.msra.mxu1 %v7030_v57  ;;  %v7762_v57 = vld [vmem:[#allocation11 + $0x61c] sm:$0xf] }
 0x52c   :  { %v4060_v40 = vadd.f32 %v4059_v16, %v4011_v20  ;;  %v4153_v4 = vadd.f32 %v4152_v24, %v4104_v61  ;;  %4298 = vmatmul.bf16.gmra.mxu0 %v8577_v35  ;;  %v6483_v24 = vld [vmem:[#allocation11 + $0x238] sm:$0xf0] }
 0x52d   :  { %v6486_v20 = vor.u32 %v7634_v38, %v6483_v24  ;;  %4375 = vmatpush.bf16.msra.mxu2 %v6230_v0  ;;  %v6995_v24 = vld [vmem:[#allocation11 + $0x638] sm:$0xf0] }
 0x52e   :  { %v4633_v16 = vmul.f32 0.2, %v4153_v4 }
 0x52f   :  { %4424 = vmatpush.bf16.msra.mxu3 %v6486_v20 }
 0x530   :  { %v4761_v22 = vmax.f32 %v4153_v4, %v4633_v16 }
 0x531   :  { %v4012_v42 = vpop.f32.mrf.mxu2  ;;  %v4105_v56 = vpop.f32.mrf.mxu0 }
 0x532   :  { %v4013_v39 = vadd.f32 %v4012_v42, %v8962_v2  ;;  %v4061_v30 = vpop.f32.mrf.mxu3  ;;  %v4106_v49 = vadd.f32 %v4105_v56, %v4057_v45 }
 0x533   :  { %v4157_v5 = vpop.f32.mrf.mxu1 }
 0x534   :  { %v4062_v61 = vadd.f32 %v4061_v30, %v4013_v39  ;;  %v4155_v53 = vadd.f32 %v4154_v28, %v4106_v49  ;;  %v7698_v30 = vld [vmem:[#allocation11 + $0x41c] sm:$0xf] }
 0x535   :  { %v6739_v49 = vld [vmem:[#allocation11 + $0x438] sm:$0xf0] }
 0x536   :  { %v4641_v10 = vmul.f32 0.2, %v4155_v53  ;;  %4210 = vmatmul.bf16.gmra.mxu2 %v8484_v8  ;;  %4352 = vmatmul.bf16.gmra.mxu1 %v8585_v6  ;;  %v6742_v4 = vor.u32 %v7698_v30, %v6739_v49 }
 0x537   :  { %4259 = vmatmul.bf16.gmra.mxu3 %v8587_v34 }
 0x538   :  { %v4769_v52 = vmax.f32 %v4155_v53, %v4641_v10  ;;  %v6998_v10 = vor.u32 %v7762_v57, %v6995_v24  ;;  %4473 = vmatpush.bf16.msra.mxu0 %v6742_v4 }
 0x539   :  { %v4015_v45 = vpop.f32.mrf.mxu2  ;;  %v4108_v37 = vpop.f32.mrf.mxu0 }
 0x53a   :  { %v4016_v58 = vadd.f32 %v4015_v45, %v8962_v2  ;;  %v4064_v42 = vpop.f32.mrf.mxu3  ;;  %v4109_v56 = vadd.f32 %v4108_v37, %v4060_v40  ;;  %v9014_v3 = vpack.c.bf16 %v4769_v52, %v4761_v22  ;;  %4522 = vmatpush.bf16.msra.mxu1 %v6998_v10 }
 0x53b   :  { %v4159_v28 = vpop.f32.mrf.mxu1 }
 0x53c   :  { %v4065_v12 = vadd.f32 %v4064_v42, %v4016_v58  ;;  %v4158_v39 = vadd.f32 %v4157_v5, %v4109_v56  ;;  %4303 = vmatmul.bf16.gmra.mxu0 %v8596_v62  ;;  %v7830_v42 = vld [vmem:[#allocation14 + $0x38] sm:$0xff] }
 0x53d   :  { %v7838_v56 = vld [vmem:[#allocation14 + $0x78] sm:$0xff]  ;;  %5400 = vmatpush.bf16.msrb.mxu2 %v7830_v42 }
 0x53e   :  { %v4649_v22 = vmul.f32 0.2, %v4158_v39  ;;  %5449 = vmatpush.bf16.msrb.mxu3 %v7838_v56 }
 0x540   :  { %v4777_v37 = vmax.f32 %v4158_v39, %v4649_v22  ;;  %v7854_v39 = vld [vmem:[#allocation14 + $0xf8] sm:$0xff] }
 0x541   :  { %v4017_v0 = vpop.f32.mrf.mxu2  ;;  %v4110_v38 = vpop.f32.mrf.mxu0  ;;  %5547 = vmatpush.bf16.msrb.mxu1 %v7854_v39 }
 0x542   :  { %v4018_v20 = vadd.f32 %v4017_v0, %v8962_v2  ;;  %v4066_v16 = vpop.f32.mrf.mxu3  ;;  %v4111_v53 = vadd.f32 %v4110_v38, %v4062_v61 }
 0x543   :  { %v4162_v40 = vpop.f32.mrf.mxu1 }
 0x544   :  { %v4067_v52 = vadd.f32 %v4066_v16, %v4018_v20  ;;  %v4160_v45 = vadd.f32 %v4159_v28, %v4111_v53  ;;  %v7846_v20 = vld [vmem:[#allocation14 + $0xb8] sm:$0xff] }
 0x545   :  { %5498 = vmatpush.bf16.msrb.mxu0 %v7846_v20  ;;  %v7837_v20 = vld [vmem:[#allocation14 + $0x70] sm:$0xff] }
 0x546   :  { %v4657_v5 = vmul.f32 0.2, %v4160_v45  ;;  %4215 = vmatmul.bf16.gmra.mxu2 %v8501_v54  ;;  %4357 = vmatmul.bf16.gmra.mxu1 %v8604_v26 }
 0x547   :  { %4264 = vmatmul.bf16.gmra.mxu3 %v8606_v11 }
 0x548   :  { %v4785_v58 = vmax.f32 %v4160_v45, %v4657_v5  ;;  %5450 = vmatpush.bf16.msrb.mxu3 %v7837_v20 }
 0x549   :  { %v4020_v30 = vpop.f32.mrf.mxu2  ;;  %v4113_v61 = vpop.f32.mrf.mxu0 }
 0x54a   :  { %v4021_v49 = vadd.f32 %v4020_v30, %v8962_v2  ;;  %v4069_v57 = vpop.f32.mrf.mxu3  ;;  %v4114_v0 = vadd.f32 %v4113_v61, %v4065_v12  ;;  %v9022_v28 = vpack.c.bf16 %v4785_v58, %v4777_v37 }
 0x54b   :  { %v4164_v38 = vpop.f32.mrf.mxu1 }
 0x54c   :  { %v4070_v4 = vadd.f32 %v4069_v57, %v4021_v49  ;;  %v4163_v24 = vadd.f32 %v4162_v40, %v4114_v0  ;;  %4308 = vmatmul.bf16.gmra.mxu0 %v8612_v21  ;;  %v9028_v40 = vld [vmem:[#allocation13] sm:$0xff] }
 0x54d   :  { %v9031_v56 = vperm.slane %v9028_v40, 6 }
 0x54e   :  { %v4665_v5 = vmul.f32 0.2, %v4163_v24 }
 0x551   :  { %v4022_v16 = vpop.f32.mrf.mxu2  ;;  %v4115_v53 = vpop.f32.mrf.mxu0 }
 0x552   :  { %v4023_v10 = vadd.f32 %v4022_v16, %v8962_v2  ;;  %v4071_v22 = vpop.f32.mrf.mxu3  ;;  %v4116_v45 = vadd.f32 %v4115_v53, %v4067_v52  ;;  %v4793_v2 = vmax.f32 %v4163_v24, %v4665_v5  ;;  %v7853_v24 = vld [vmem:[#allocation14 + $0xf0] sm:$0xff] }
 0x553   :  { %v4167_v12 = vpop.f32.mrf.mxu1  ;;  %5548 = vmatpush.bf16.msrb.mxu1 %v7853_v24 }
 0x554   :  { %v4072_v42 = vadd.f32 %v4071_v22, %v4023_v10  ;;  %v4165_v37 = vadd.f32 %v4164_v38, %v4116_v45  ;;  %v7829_v38 = vld [vmem:[#allocation14 + $0x30] sm:$0xff] }
 0x555   :  { %5401 = vmatpush.bf16.msrb.mxu2 %v7829_v38 }
 0x556   :  { %v4673_v58 = vmul.f32 0.2, %v4165_v37  ;;  %4362 = vmatmul.bf16.gmra.mxu1 %v8620_v9  ;;  %4376 = vmatmul.bf16.vlgmr.msra.gmra.mxu2 %v8401_v50 }
 0x557   :  { %4425 = vmatmul.bf16.vlgmr.msra.gmra.mxu3 %v8394_v25  ;;  %v7845_v25 = vld [vmem:[#allocation14 + $0xb0] sm:$0xff] }
 0x558   :  { %v4801_v52 = vmax.f32 %v4165_v37, %v4673_v58  ;;  %5499 = vmatpush.bf16.msrb.mxu0 %v7845_v25 }
 0x559   :  { %v4118_v30 = vpop.f32.mrf.mxu0  ;;  %v4181_v61 = vpop.f32.mrf.mxu2 }
 0x55a   :  { %v4119_v49 = vadd.f32 %v4118_v30, %v4070_v4  ;;  %v4182_v57 = vadd.f32 %v4181_v61, %v9031_v56  ;;  %v4230_v0 = vpop.f32.mrf.mxu3  ;;  %v9035_v39 = vpack.c.bf16 %v4801_v52, %v4793_v2 }
 0x55b   :  { %v4169_v50 = vpop.f32.mrf.mxu1 }
 0x55c   :  { %v4168_v16 = vadd.f32 %v4167_v12, %v4119_v49  ;;  %v4231_v53 = vadd.f32 %v4230_v0, %v4182_v57  ;;  %4313 = vmatmul.bf16.gmra.mxu0 %v8628_v59  ;;  %v7828_v49 = vld [vmem:[#allocation14 + $0x28] sm:$0xff] }
 0x55d   :  { %5402 = vmatpush.bf16.msrb.mxu2 %v7828_v49  ;;  %v7835_v49 = vld [vmem:[#allocation14 + $0x60] sm:$0xff] }
 0x55e   :  { %v4681_v58 = vmul.f32 0.2, %v4168_v16 }
 0x560   :  { %v4809_v30 = vmax.f32 %v4168_v16, %v4681_v58 }
 0x561   :  { %v4120_v10 = vpop.f32.mrf.mxu0  ;;  %v4183_v22 = vpop.f32.mrf.mxu2 }
 0x562   :  { %v4121_v45 = vadd.f32 %v4120_v10, %v4072_v42  ;;  %v4184_v4 = vadd.f32 %v4183_v22, %v9031_v56  ;;  %v4232_v5 = vpop.f32.mrf.mxu3  ;;  %v7836_v42 = vld [vmem:[#allocation14 + $0x68] sm:$0xff] }
 0x563   :  { %v4328_v37 = vpop.f32.mrf.mxu1  ;;  %5451 = vmatpush.bf16.msrb.mxu3 %v7836_v42 }
 0x564   :  { %v4170_v2 = vadd.f32 %v4169_v50, %v4121_v45  ;;  %v4233_v52 = vadd.f32 %v4232_v5, %v4184_v4 }
 0x566   :  { %v4689_v12 = vmul.f32 0.2, %v4170_v2  ;;  %4381 = vmatmul.bf16.gmra.mxu2 %v8413_v32  ;;  %4523 = vmatmul.bf16.vlgmr.msra.gmra.mxu1 %v8506_v29  ;;  %v7852_v29 = vld [vmem:[#allocation14 + $0xe8] sm:$0xff] }
 0x567   :  { %4430 = vmatmul.bf16.gmra.mxu3 %v8406_v13  ;;  %v7844_v13 = vld [vmem:[#allocation14 + $0xa8] sm:$0xff]  ;;  %5549 = vmatpush.bf16.msrb.mxu1 %v7852_v29 }
 0x568   :  { %v4817_v61 = vmax.f32 %v4170_v2, %v4689_v12  ;;  %5500 = vmatpush.bf16.msrb.mxu0 %v7844_v13  ;;  %5452 = vmatpush.bf16.msrb.mxu3 %v7835_v49 }
 0x569   :  { %v4186_v57 = vpop.f32.mrf.mxu2  ;;  %v4279_v0 = vpop.f32.mrf.mxu0 }
 0x56a   :  { %v4187_v38 = vadd.f32 %v4186_v57, %v9031_v56  ;;  %v4235_v20 = vpop.f32.mrf.mxu3  ;;  %v4280_v25 = vadd.f32 %v4279_v0, %v4231_v53  ;;  %v9043_v50 = vpack.c.bf16 %v4817_v61, %v4809_v30  ;;  %v7827_v61 = vld [vmem:[#allocation14 + $0x20] sm:$0xff] }
 0x56b   :  { %v4330_v24 = vpop.f32.mrf.mxu1  ;;  %5403 = vmatpush.bf16.msrb.mxu2 %v7827_v61 }
 0x56c   :  { %v4236_v32 = vadd.f32 %v4235_v20, %v4187_v38  ;;  %v4329_v10 = vadd.f32 %v4328_v37, %v4280_v25  ;;  %4474 = vmatmul.bf16.vlgmr.msra.gmra.mxu0 %v8512_v47 }
 0x56e   :  { %v4570_v58 = vmul.f32 0.2, %v4329_v10 }
 0x570   :  { %v4698_v47 = vmax.f32 %v4329_v10, %v4570_v58 }
 0x571   :  { %v4188_v16 = vpop.f32.mrf.mxu2  ;;  %v4281_v22 = vpop.f32.mrf.mxu0 }
 0x572   :  { %v4189_v45 = vadd.f32 %v4188_v16, %v9031_v56  ;;  %v4237_v4 = vpop.f32.mrf.mxu3  ;;  %v4282_v5 = vadd.f32 %v4281_v22, %v4233_v52 }
 0x573   :  { %v4333_v53 = vpop.f32.mrf.mxu1 }
 0x574   :  { %v4238_v2 = vadd.f32 %v4237_v4, %v4189_v45  ;;  %v4331_v12 = vadd.f32 %v4330_v24, %v4282_v5 }
 0x576   :  { %v4578_v30 = vmul.f32 0.2, %v4331_v12  ;;  %4386 = vmatmul.bf16.gmra.mxu2 %v8425_v19  ;;  %4528 = vmatmul.bf16.gmra.mxu1 %v8518_v31  ;;  %v7851_v31 = vld [vmem:[#allocation14 + $0xe0] sm:$0xff] }
 0x577   :  { %4435 = vmatmul.bf16.gmra.mxu3 %v8418_v1  ;;  %v7843_v1 = vld [vmem:[#allocation14 + $0xa0] sm:$0xff]  ;;  %5550 = vmatpush.bf16.msrb.mxu1 %v7851_v31 }
 0x578   :  { %v4706_v37 = vmax.f32 %v4331_v12, %v4578_v30  ;;  %5501 = vmatpush.bf16.msrb.mxu0 %v7843_v1  ;;  %v7826_v12 = vld [vmem:[#allocation14 + $0x18] sm:$0xff] }
 0x579   :  { %v4191_v42 = vpop.f32.mrf.mxu2  ;;  %v4284_v57 = vpop.f32.mrf.mxu0  ;;  %v7834_v30 = vld [vmem:[#allocation14 + $0x58] sm:$0xff]  ;;  %5404 = vmatpush.bf16.msrb.mxu2 %v7826_v12 }
 0x57a   :  { %v9050_v52 = vpack.c.bf16 %v4706_v37, %v4698_v47  ;;  %v4192_v0 = vadd.f32 %v4191_v42, %v9031_v56  ;;  %v4240_v38 = vpop.f32.mrf.mxu3  ;;  %v4285_v20 = vadd.f32 %v4284_v57, %v4236_v32  ;;  %5453 = vmatpush.bf16.msrb.mxu3 %v7834_v30 }
 0x57b   :  { %v4335_v25 = vpop.f32.mrf.mxu1 }
 0x57c   :  { %v4241_v19 = vadd.f32 %v4240_v38, %v4192_v0  ;;  %v4334_v24 = vadd.f32 %v4333_v53, %v4285_v20  ;;  %4479 = vmatmul.bf16.gmra.mxu0 %v8524_v48 }
 0x57e   :  { %v4586_v4 = vmul.f32 0.2, %v4334_v24 }
 0x580   :  { %v4714_v48 = vmax.f32 %v4334_v24, %v4586_v4 }
 0x581   :  { %v4193_v10 = vpop.f32.mrf.mxu2  ;;  %v4286_v13 = vpop.f32.mrf.mxu0 }
 0x582   :  { %v4194_v29 = vadd.f32 %v4193_v10, %v9031_v56  ;;  %v4242_v16 = vpop.f32.mrf.mxu3  ;;  %v4287_v22 = vadd.f32 %v4286_v13, %v4238_v2 }
 0x583   :  { %v4338_v45 = vpop.f32.mrf.mxu1 }
 0x584   :  { %v4243_v32 = vadd.f32 %v4242_v16, %v4194_v29  ;;  %v4336_v5 = vadd.f32 %v4335_v25, %v4287_v22  ;;  %v7825_v22 = vld [vmem:[#allocation14 + $0x10] sm:$0xff] }
 0x585   :  { %5405 = vmatpush.bf16.msrb.mxu2 %v7825_v22 }
 0x586   :  { %v4594_v58 = vmul.f32 0.2, %v4336_v5  ;;  %4391 = vmatmul.bf16.gmra.mxu2 %v8439_v7  ;;  %4533 = vmatmul.bf16.gmra.mxu1 %v8530_v17  ;;  %v7850_v17 = vld [vmem:[#allocation14 + $0xd8] sm:$0xff] }
 0x587   :  { %4440 = vmatmul.bf16.gmra.mxu3 %v8430_v51  ;;  %v7842_v51 = vld [vmem:[#allocation14 + $0x98] sm:$0xff]  ;;  %5551 = vmatpush.bf16.msrb.mxu1 %v7850_v17 }
 0x588   :  { %v4722_v53 = vmax.f32 %v4336_v5, %v4594_v58  ;;  %5502 = vmatpush.bf16.msrb.mxu0 %v7842_v51 }
 0x589   :  { %v4196_v47 = vpop.f32.mrf.mxu2  ;;  %v4289_v37 = vpop.f32.mrf.mxu0 }
 0x58a   :  { %v4197_v2 = vadd.f32 %v4196_v47, %v9031_v56  ;;  %v4245_v61 = vpop.f32.mrf.mxu3  ;;  %v4290_v49 = vadd.f32 %v4289_v37, %v4241_v19  ;;  %v9059_v42 = vpack.c.bf16 %v4722_v53, %v4714_v48 }
 0x58b   :  { %v4340_v57 = vpop.f32.mrf.mxu1 }
 0x58c   :  { %v4246_v7 = vadd.f32 %v4245_v61, %v4197_v2  ;;  %v4339_v0 = vadd.f32 %v4338_v45, %v4290_v49  ;;  %4484 = vmatmul.bf16.gmra.mxu0 %v8539_v14  ;;  %v7833_v45 = vld [vmem:[#allocation14 + $0x50] sm:$0xff] }
 0x58d   :  { %5454 = vmatpush.bf16.msrb.mxu3 %v7833_v45 }
 0x58e   :  { %v4602_v31 = vmul.f32 0.2, %v4339_v0 }
 0x590   :  { %v4730_v14 = vmax.f32 %v4339_v0, %v4602_v31 }
 0x591   :  { %v4198_v38 = vpop.f32.mrf.mxu2  ;;  %v4291_v20 = vpop.f32.mrf.mxu0 }
 0x592   :  { %v4199_v25 = vadd.f32 %v4198_v38, %v9031_v56  ;;  %v4247_v24 = vpop.f32.mrf.mxu3  ;;  %v4292_v1 = vadd.f32 %v4291_v20, %v4243_v32  ;;  %v7824_v20 = vld [vmem:[#allocation14 + $0x8] sm:$0xff] }
 0x593   :  { %v4343_v19 = vpop.f32.mrf.mxu1  ;;  %5406 = vmatpush.bf16.msrb.mxu2 %v7824_v20 }
 0x594   :  { %v4248_v10 = vadd.f32 %v4247_v24, %v4199_v25  ;;  %v4341_v13 = vadd.f32 %v4340_v57, %v4292_v1  ;;  %v7832_v25 = vld [vmem:[#allocation14 + $0x48] sm:$0xff] }
 0x595   :  { %5455 = vmatpush.bf16.msrb.mxu3 %v7832_v25 }
 0x596   :  { %v4610_v29 = vmul.f32 0.2, %v4341_v13  ;;  %4396 = vmatmul.bf16.gmra.mxu2 %v8454_v43  ;;  %4538 = vmatmul.bf16.gmra.mxu1 %v8547_v60  ;;  %v7841_v60 = vld [vmem:[#allocation14 + $0x90] sm:$0xff] }
 0x597   :  { %4445 = vmatmul.bf16.gmra.mxu3 %v8549_v63  ;;  %v7849_v63 = vld [vmem:[#allocation14 + $0xd0] sm:$0xff]  ;;  %5503 = vmatpush.bf16.msrb.mxu0 %v7841_v60 }
 0x598   :  { %v4738_v16 = vmax.f32 %v4341_v13, %v4610_v29  ;;  %5552 = vmatpush.bf16.msrb.mxu1 %v7849_v63 }
 0x599   :  { %v4201_v4 = vpop.f32.mrf.mxu2  ;;  %v4294_v5 = vpop.f32.mrf.mxu0 }
 0x59a   :  { %v4202_v32 = vadd.f32 %v4201_v4, %v9031_v56  ;;  %v4250_v58 = vpop.f32.mrf.mxu3  ;;  %v4295_v48 = vadd.f32 %v4294_v5, %v4246_v7  ;;  %v9067_v53 = vpack.c.bf16 %v4738_v16, %v4730_v14 }
 0x59b   :  { %v4345_v12 = vpop.f32.mrf.mxu1 }
 0x59c   :  { %v4251_v43 = vadd.f32 %v4250_v58, %v4202_v32  ;;  %v4344_v30 = vadd.f32 %v4343_v19, %v4295_v48  ;;  %4489 = vmatmul.bf16.gmra.mxu0 %v8558_v55  ;;  %v7823_v32 = vld [vmem:[#allocation14] sm:$0xff] }
 0x59d   :  { %v7831_v58 = vld [vmem:[#allocation14 + $0x40] sm:$0xff]  ;;  %5407 = vmatpush.bf16.msrb.mxu2 %v7823_v32 }
 0x59e   :  { %v4618_v7 = vmul.f32 0.2, %v4344_v30  ;;  %5456 = vmatpush.bf16.msrb.mxu3 %v7831_v58 }
 0x5a0   :  { %v4746_v55 = vmax.f32 %v4344_v30, %v4618_v7 }
 0x5a1   :  { %v4203_v47 = vpop.f32.mrf.mxu2  ;;  %v4296_v37 = vpop.f32.mrf.mxu0 }
 0x5a2   :  { %v4204_v2 = vadd.f32 %v4203_v47, %v9031_v56  ;;  %v4252_v61 = vpop.f32.mrf.mxu3  ;;  %v4297_v49 = vadd.f32 %v4296_v37, %v4248_v10 }
 0x5a3   :  { %v4348_v57 = vpop.f32.mrf.mxu1 }
 0x5a4   :  { %v4253_v0 = vadd.f32 %v4252_v61, %v4204_v2  ;;  %v4346_v51 = vadd.f32 %v4345_v12, %v4297_v49 }
 0x5a6   :  { %v4626_v17 = vmul.f32 0.2, %v4346_v51  ;;  %4401 = vmatmul.bf16.gmra.mxu2 %v8469_v44  ;;  %4543 = vmatmul.bf16.gmra.mxu1 %v8566_v15  ;;  %v7840_v15 = vld [vmem:[#allocation14 + $0x88] sm:$0xff] }
 0x5a7   :  { %4450 = vmatmul.bf16.gmra.mxu3 %v8568_v23  ;;  %v7848_v23 = vld [vmem:[#allocation14 + $0xc8] sm:$0xff]  ;;  %5504 = vmatpush.bf16.msrb.mxu0 %v7840_v15 }
 0x5a8   :  { %v4754_v38 = vmax.f32 %v4346_v51, %v4626_v17  ;;  %5553 = vmatpush.bf16.msrb.mxu1 %v7848_v23  ;;  %v7847_v17 = vld [vmem:[#allocation14 + $0xc0] sm:$0xff] }
 0x5a9   :  { %v4206_v24 = vpop.f32.mrf.mxu2  ;;  %v4299_v1 = vpop.f32.mrf.mxu0 }
 0x5aa   :  { %v4207_v19 = vadd.f32 %v4206_v24, %v9031_v56  ;;  %v4255_v31 = vpop.f32.mrf.mxu3  ;;  %v4300_v10 = vadd.f32 %v4299_v1, %v4251_v43  ;;  %v9075_v13 = vpack.c.bf16 %v4754_v38, %v4746_v55 }
 0x5ab   :  { %v4350_v29 = vpop.f32.mrf.mxu1 }
 0x5ac   :  { %v4256_v44 = vadd.f32 %v4255_v31, %v4207_v19  ;;  %v4349_v14 = vadd.f32 %v4348_v57, %v4300_v10  ;;  %4494 = vmatmul.bf16.gmra.mxu0 %v8577_v35  ;;  %5554 = vmatpush.bf16.msrb.mxu1 %v7847_v17 }
 0x5ae   :  { %v4634_v12 = vmul.f32 0.2, %v4349_v14 }
 0x5b0   :  { %v4762_v35 = vmax.f32 %v4349_v14, %v4634_v12 }
 0x5b1   :  { %v4208_v16 = vpop.f32.mrf.mxu2  ;;  %v4301_v22 = vpop.f32.mrf.mxu0 }
 0x5b2   :  { %v4209_v45 = vadd.f32 %v4208_v16, %v9031_v56  ;;  %v4257_v4 = vpop.f32.mrf.mxu3  ;;  %v4302_v5 = vadd.f32 %v4301_v22, %v4253_v0 }
 0x5b3   :  { %v4353_v48 = vpop.f32.mrf.mxu1 }
 0x5b4   :  { %v4258_v43 = vadd.f32 %v4257_v4, %v4209_v45  ;;  %v4351_v30 = vadd.f32 %v4350_v29, %v4302_v5  ;;  %v7862_v29 = vld [vmem:[#allocation14 + $0x138] sm:$0xff] }
 0x5b5   :  { %5596 = vmatpush.bf16.msra.mxu2 %v7862_v29 }
 0x5b6   :  { %v4642_v60 = vmul.f32 0.2, %v4351_v30  ;;  %4406 = vmatmul.bf16.gmra.mxu2 %v8484_v8  ;;  %4548 = vmatmul.bf16.gmra.mxu1 %v8585_v6  ;;  %v7839_v8 = vld [vmem:[#allocation14 + $0x80] sm:$0xff] }
 0x5b7   :  { %4455 = vmatmul.bf16.gmra.mxu3 %v8587_v34  ;;  %5505 = vmatpush.bf16.msrb.mxu0 %v7839_v8  ;;  %v7869_v8 = vld [vmem:[#allocation14 + $0x170] sm:$0xff] }
 0x5b8   :  { %v4770_v63 = vmax.f32 %v4351_v30, %v4642_v60 }
 0x5b9   :  { %v4211_v47 = vpop.f32.mrf.mxu2  ;;  %v4304_v37 = vpop.f32.mrf.mxu0 }
 0x5ba   :  { %v4212_v2 = vadd.f32 %v4211_v47, %v9031_v56  ;;  %v4260_v61 = vpop.f32.mrf.mxu3  ;;  %v4305_v49 = vadd.f32 %v4304_v37, %v4256_v44  ;;  %v9083_v57 = vpack.c.bf16 %v4770_v63, %v4762_v35  ;;  %v7870_v44 = vld [vmem:[#allocation14 + $0x178] sm:$0xff] }
 0x5bb   :  { %v4355_v7 = vpop.f32.mrf.mxu1  ;;  %5645 = vmatpush.bf16.msra.mxu3 %v7870_v44  ;;  %v7860_v44 = vld [vmem:[#allocation14 + $0x128] sm:$0xff] }
 0x5bc   :  { %v4261_v0 = vadd.f32 %v4260_v61, %v4212_v2  ;;  %v4354_v51 = vadd.f32 %v4353_v48, %v4305_v49  ;;  %4499 = vmatmul.bf16.gmra.mxu0 %v8596_v62 }
 0x5be   :  { %v4650_v24 = vmul.f32 0.2, %v4354_v51 }
 0x5bf   :  { %5646 = vmatpush.bf16.msra.mxu3 %v7869_v8 }
 0x5c0   :  { %v4778_v62 = vmax.f32 %v4354_v51, %v4650_v24  ;;  %v7861_v51 = vld [vmem:[#allocation14 + $0x130] sm:$0xff] }
 0x5c1   :  { %v4213_v6 = vpop.f32.mrf.mxu2  ;;  %v4306_v55 = vpop.f32.mrf.mxu0  ;;  %5597 = vmatpush.bf16.msra.mxu2 %v7861_v51  ;;  %v7867_v51 = vld [vmem:[#allocation14 + $0x160] sm:$0xff] }
 0x5c2   :  { %v4214_v34 = vadd.f32 %v4213_v6, %v9031_v56  ;;  %v4262_v38 = vpop.f32.mrf.mxu3  ;;  %v4307_v20 = vadd.f32 %v4306_v55, %v4258_v43 }
 0x5c3   :  { %v4358_v25 = vpop.f32.mrf.mxu1 }
 0x5c4   :  { %v4263_v1 = vadd.f32 %v4262_v38, %v4214_v34  ;;  %v4356_v19 = vadd.f32 %v4355_v7, %v4307_v20 }
 0x5c5   :  { %5598 = vmatpush.bf16.msra.mxu2 %v7860_v44 }
 0x5c6   :  { %v4658_v31 = vmul.f32 0.2, %v4356_v19  ;;  %4411 = vmatmul.bf16.gmra.mxu2 %v8501_v54  ;;  %4553 = vmatmul.bf16.gmra.mxu1 %v8604_v26  ;;  %v7878_v26 = vld [vmem:[#allocation14 + $0x1b8] sm:$0xff] }
 0x5c7   :  { %4460 = vmatmul.bf16.gmra.mxu3 %v8606_v11  ;;  %v7886_v11 = vld [vmem:[#allocation14 + $0x1f8] sm:$0xff]  ;;  %5694 = vmatpush.bf16.msra.mxu0 %v7878_v26 }
 0x5c8   :  { %v4786_v10 = vmax.f32 %v4356_v19, %v4658_v31  ;;  %5743 = vmatpush.bf16.msra.mxu1 %v7886_v11  ;;  %v7876_v11 = vld [vmem:[#allocation14 + $0x1a8] sm:$0xff] }
 0x5c9   :  { %v4216_v14 = vpop.f32.mrf.mxu2  ;;  %v4309_v15 = vpop.f32.mrf.mxu0 }
 0x5ca   :  { %v4217_v23 = vadd.f32 %v4216_v14, %v9031_v56  ;;  %v4265_v16 = vpop.f32.mrf.mxu3  ;;  %v4310_v22 = vadd.f32 %v4309_v15, %v4261_v0  ;;  %v9091_v45 = vpack.c.bf16 %v4786_v10, %v4778_v62  ;;  %v7868_v14 = vld [vmem:[#allocation14 + $0x168] sm:$0xff] }
 0x5cb   :  { %v4360_v4 = vpop.f32.mrf.mxu1  ;;  %5647 = vmatpush.bf16.msra.mxu3 %v7868_v14 }
 0x5cc   :  { %v4266_v54 = vadd.f32 %v4265_v16, %v4217_v23  ;;  %v4359_v5 = vadd.f32 %v4358_v25, %v4310_v22  ;;  %4504 = vmatmul.bf16.gmra.mxu0 %v8612_v21  ;;  %v9098_v21 = vperm.slane %v9028_v40, 7  ;;  %v7885_v40 = vld [vmem:[#allocation14 + $0x1f0] sm:$0xff] }
 0x5cd   :  { %5744 = vmatpush.bf16.msra.mxu1 %v7885_v40 }
 0x5ce   :  { %v4666_v60 = vmul.f32 0.2, %v4359_v5 }
 0x5cf   :  { %5648 = vmatpush.bf16.msra.mxu3 %v7867_v51 }
 0x5d0   :  { %v4794_v37 = vmax.f32 %v4359_v5, %v4666_v60 }
 0x5d1   :  { %v4218_v32 = vpop.f32.mrf.mxu2  ;;  %v4311_v58 = vpop.f32.mrf.mxu0 }
 0x5d2   :  { %v4219_v48 = vadd.f32 %v4218_v32, %v9031_v56  ;;  %v4267_v12 = vpop.f32.mrf.mxu3  ;;  %v4312_v43 = vadd.f32 %v4311_v58, %v4263_v1  ;;  %v7884_v32 = vld [vmem:[#allocation14 + $0x1e8] sm:$0xff] }
 0x5d3   :  { %v4363_v30 = vpop.f32.mrf.mxu1  ;;  %5745 = vmatpush.bf16.msra.mxu1 %v7884_v32 }
 0x5d4   :  { %v4268_v35 = vadd.f32 %v4267_v12, %v4219_v48  ;;  %v4361_v63 = vadd.f32 %v4360_v4, %v4312_v43 }
 0x5d6   :  { %v4674_v47 = vmul.f32 0.2, %v4361_v63  ;;  %4558 = vmatmul.bf16.gmra.mxu1 %v8620_v9  ;;  %5408 = vmatmul.bf16.vlgmr.msrb.gmra.mxu2 %v8642_v36 }
 0x5d7   :  { %5457 = vmatmul.bf16.vlgmr.msrb.gmra.mxu3 %v8709_v33  ;;  %v7877_v33 = vld [vmem:[#allocation14 + $0x1b0] sm:$0xff] }
 0x5d8   :  { %v4802_v56 = vmax.f32 %v4361_v63, %v4674_v47  ;;  %5695 = vmatpush.bf16.msra.mxu0 %v7877_v33 }
 0x5d9   :  { %v4314_v2 = vpop.f32.mrf.mxu0  ;;  %v4377_v61 = vpop.f32.mrf.mxu2 }
 0x5da   :  { %v4315_v49 = vadd.f32 %v4314_v2, %v4266_v54  ;;  %v4378_v7 = vadd.f32 %v4377_v61, %v9098_v21  ;;  %v4426_v0 = vpop.f32.mrf.mxu3  ;;  %v9102_v17 = vpack.c.bf16 %v4802_v56, %v4794_v37  ;;  %v9325_v56 = vld [vmem:[#allocation23_spill] sm:$0xff]  ;;  %v9326_v2 = vld [vmem:[#allocation44_spill] sm:$0xff]  ;;  %v9327_v61 = vld [vmem:[#allocation30_spill] sm:$0xff] }
 0x5db   :  { %v4365_v9 = vpop.f32.mrf.mxu1 }
 0x5dc   :  { %v4364_v6 = vadd.f32 %v4363_v30, %v4315_v49  ;;  %v4427_v36 = vadd.f32 %v4426_v0, %v4378_v7  ;;  %4509 = vmatmul.bf16.gmra.mxu0 %v8628_v59  ;;  %v9323_v59 = vld [vmem:[#allocation29_spill] sm:$0xff]  ;;  %v7859_v0 = vld [vmem:[#allocation14 + $0x120] sm:$0xff] }
 0x5dd   :  { %5696 = vmatpush.bf16.msra.mxu0 %v7876_v11  ;;  %5599 = vmatpush.bf16.msra.mxu2 %v7859_v0 }
 0x5de   :  { %v4682_v1 = vmul.f32 0.2, %v4364_v6 }
 0x5e0   :  { %v4810_v10 = vmax.f32 %v4364_v6, %v4682_v1 }
 0x5e1   :  { %v4316_v55 = vpop.f32.mrf.mxu0  ;;  %v4379_v34 = vpop.f32.mrf.mxu2 }
 0x5e2   :  { %v4317_v38 = vadd.f32 %v4316_v55, %v4268_v35  ;;  %v4380_v20 = vadd.f32 %v4379_v34, %v9098_v21  ;;  %v4428_v25 = vpop.f32.mrf.mxu3 }
 0x5e3   :  { %v4524_v24 = vpop.f32.mrf.mxu1 }
 0x5e4   :  { %v4366_v19 = vadd.f32 %v4365_v9, %v4317_v38  ;;  %v4429_v31 = vadd.f32 %v4428_v25, %v4380_v20  ;;  %v9328_v20 = vld [vmem:[#allocation37_spill] sm:$0xff]  ;;  %v7875_v25 = vld [vmem:[#allocation14 + $0x1a0] sm:$0xff] }
 0x5e5   :  { %5697 = vmatpush.bf16.msra.mxu0 %v7875_v25 }
 0x5e6   :  { %v4690_v62 = vmul.f32 0.2, %v4366_v19  ;;  %5413 = vmatmul.bf16.gmra.mxu2 %v8651_v18  ;;  %5555 = vmatmul.bf16.vlgmr.msrb.gmra.mxu1 %v8845_v46  ;;  %v9324_v46 = vld [vmem:[#allocation36_spill] sm:$0xff] }
 0x5e7   :  { %5462 = vmatmul.bf16.gmra.mxu3 %v9323_v59 }
 0x5e8   :  { %v4818_v29 = vmax.f32 %v4366_v19, %v4690_v62 }
 0x5e9   :  { %v4382_v15 = vpop.f32.mrf.mxu2  ;;  %v4475_v23 = vpop.f32.mrf.mxu0 }
 0x5ea   :  { %v4383_v16 = vadd.f32 %v4382_v15, %v9098_v21  ;;  %v4431_v22 = vpop.f32.mrf.mxu3  ;;  %v4476_v4 = vadd.f32 %v4475_v23, %v4427_v36  ;;  %v9110_v54 = vpack.c.bf16 %v4818_v29, %v4810_v10  ;;  %v9329_v23 = vld [vmem:[#allocation24_spill] sm:$0xff] }
 0x5eb   :  { %v4526_v5 = vpop.f32.mrf.mxu1 }
 0x5ec   :  { %v4432_v18 = vadd.f32 %v4431_v22, %v4383_v16  ;;  %v4525_v26 = vadd.f32 %v4524_v24, %v4476_v4  ;;  %5506 = vmatmul.bf16.vlgmr.msrb.gmra.mxu0 %v9324_v46  ;;  %v7883_v24 = vld [vmem:[#allocation14 + $0x1e0] sm:$0xff]  ;;  %v9330_v16 = vld [vmem:[#allocation45_spill] sm:$0xff] }
 0x5ed   :  { %5746 = vmatpush.bf16.msra.mxu1 %v7883_v24  ;;  %v9331_v22 = vld [vmem:[#allocation31_spill] sm:$0xff] }
 0x5ee   :  { %v4571_v35 = vmul.f32 0.2, %v4525_v26 }
 0x5f0   :  { %v4699_v49 = vmax.f32 %v4525_v26, %v4571_v35  ;;  %v7866_v26 = vld [vmem:[#allocation14 + $0x158] sm:$0xff] }
 0x5f1   :  { %v4384_v58 = vpop.f32.mrf.mxu2  ;;  %v4477_v48 = vpop.f32.mrf.mxu0  ;;  %5649 = vmatpush.bf16.msra.mxu3 %v7866_v26  ;;  %v9332_v35 = vld [vmem:[#allocation38_spill] sm:$0xff] }
 0x5f2   :  { %v4385_v12 = vadd.f32 %v4384_v58, %v9098_v21  ;;  %v4433_v43 = vpop.f32.mrf.mxu3  ;;  %v4478_v30 = vadd.f32 %v4477_v48, %v4429_v31 }
 0x5f3   :  { %v4529_v60 = vpop.f32.mrf.mxu1 }
 0x5f4   :  { %v4434_v63 = vadd.f32 %v4433_v43, %v4385_v12  ;;  %v4527_v47 = vadd.f32 %v4526_v5, %v4478_v30 }
 0x5f6   :  { %v4579_v37 = vmul.f32 0.2, %v4527_v47  ;;  %5418 = vmatmul.bf16.gmra.mxu2 %v9325_v56  ;;  %5560 = vmatmul.bf16.gmra.mxu1 %v9326_v2 }
 0x5f7   :  { %5467 = vmatmul.bf16.gmra.mxu3 %v9327_v61 }
 0x5f8   :  { %v4707_v7 = vmax.f32 %v4527_v47, %v4579_v37  ;;  %v7882_v47 = vld [vmem:[#allocation14 + $0x1d8] sm:$0xff] }
 0x5f9   :  { %v4387_v8 = vpop.f32.mrf.mxu2  ;;  %v4480_v9 = vpop.f32.mrf.mxu0  ;;  %5747 = vmatpush.bf16.msra.mxu1 %v7882_v47 }
 0x5fa   :  { %v9117_v6 = vpack.c.bf16 %v4707_v7, %v4699_v49  ;;  %v4388_v36 = vadd.f32 %v4387_v8, %v9098_v21  ;;  %v4436_v33 = vpop.f32.mrf.mxu3  ;;  %v4481_v40 = vadd.f32 %v4480_v9, %v4432_v18  ;;  %v7858_v18 = vld [vmem:[#allocation14 + $0x118] sm:$0xff] }
 0x5fb   :  { %v4531_v55 = vpop.f32.mrf.mxu1  ;;  %5600 = vmatpush.bf16.msra.mxu2 %v7858_v18 }
 0x5fc   :  { %v4437_v34 = vadd.f32 %v4436_v33, %v4388_v36  ;;  %v4530_v38 = vadd.f32 %v4529_v60, %v4481_v40  ;;  %5511 = vmatmul.bf16.gmra.mxu0 %v9328_v20  ;;  %v9333_v36 = vld [vmem:[#allocation25_spill] sm:$0xff]  ;;  %v9334_v33 = vld [vmem:[#allocation46_spill] sm:$0xff]  ;;  %v9335_v40 = vld [vmem:[#allocation32_spill] sm:$0xff] }
 0x5fd   :  { %v7865_v20 = vld [vmem:[#allocation14 + $0x150] sm:$0xff] }
 0x5fe   :  { %v4587_v29 = vmul.f32 0.2, %v4530_v38  ;;  %5650 = vmatpush.bf16.msra.mxu3 %v7865_v20  ;;  %v7855_v20 = vld [vmem:[#allocation14 + $0x100] sm:$0xff] }
 0x600   :  { %v4715_v4 = vmax.f32 %v4530_v38, %v4587_v29  ;;  %v7857_v38 = vld [vmem:[#allocation14 + $0x110] sm:$0xff] }
 0x601   :  { %v4389_v1 = vpop.f32.mrf.mxu2  ;;  %v4482_v19 = vpop.f32.mrf.mxu0  ;;  %5601 = vmatpush.bf16.msra.mxu2 %v7857_v38 }
 0x602   :  { %v4390_v31 = vadd.f32 %v4389_v1, %v9098_v21  ;;  %v4438_v62 = vpop.f32.mrf.mxu3  ;;  %v4483_v59 = vadd.f32 %v4482_v19, %v4434_v63  ;;  %v7874_v63 = vld [vmem:[#allocation14 + $0x198] sm:$0xff] }
 0x603   :  { %v4534_v10 = vpop.f32.mrf.mxu1  ;;  %5698 = vmatpush.bf16.msra.mxu0 %v7874_v63  ;;  %v7864_v63 = vld [vmem:[#allocation14 + $0x148] sm:$0xff] }
 0x604   :  { %v4439_v44 = vadd.f32 %v4438_v62, %v4390_v31  ;;  %v4532_v14 = vadd.f32 %v4531_v55, %v4483_v59  ;;  %5651 = vmatpush.bf16.msra.mxu3 %v7864_v63 }
 0x606   :  { %v4595_v15 = vmul.f32 0.2, %v4532_v14  ;;  %5423 = vmatmul.bf16.gmra.mxu2 %v9329_v23  ;;  %5565 = vmatmul.bf16.gmra.mxu1 %v9330_v16 }
 0x607   :  { %5472 = vmatmul.bf16.gmra.mxu3 %v9331_v22 }
 0x608   :  { %v4723_v5 = vmax.f32 %v4532_v14, %v4595_v15  ;;  %v7873_v14 = vld [vmem:[#allocation14 + $0x190] sm:$0xff] }
 0x609   :  { %v4392_v46 = vpop.f32.mrf.mxu2  ;;  %v4485_v11 = vpop.f32.mrf.mxu0  ;;  %v7881_v15 = vld [vmem:[#allocation14 + $0x1d0] sm:$0xff]  ;;  %5699 = vmatpush.bf16.msra.mxu0 %v7873_v14 }
 0x60a   :  { %v4393_v32 = vadd.f32 %v4392_v46, %v9098_v21  ;;  %v4441_v58 = vpop.f32.mrf.mxu3  ;;  %v4486_v48 = vadd.f32 %v4485_v11, %v4437_v34  ;;  %v9126_v12 = vpack.c.bf16 %v4723_v5, %v4715_v4  ;;  %5748 = vmatpush.bf16.msra.mxu1 %v7881_v15 }
 0x60b   :  { %v4536_v43 = vpop.f32.mrf.mxu1 }
 0x60c   :  { %v4442_v30 = vadd.f32 %v4441_v58, %v4393_v32  ;;  %v4535_v60 = vadd.f32 %v4534_v10, %v4486_v48  ;;  %5516 = vmatmul.bf16.gmra.mxu0 %v9332_v35  ;;  %v9337_v58 = vld [vmem:[#allocation26_spill] sm:$0xff]  ;;  %v9338_v48 = vld [vmem:[#allocation47_spill] sm:$0xff]  ;;  %v7856_v35 = vld [vmem:[#allocation14 + $0x108] sm:$0xff] }
 0x60d   :  { %5602 = vmatpush.bf16.msra.mxu2 %v7856_v35 }
 0x60e   :  { %v4603_v0 = vmul.f32 0.2, %v4535_v60 }
 0x610   :  { %v4731_v55 = vmax.f32 %v4535_v60, %v4603_v0 }
 0x611   :  { %v4394_v37 = vpop.f32.mrf.mxu2  ;;  %v4487_v56 = vpop.f32.mrf.mxu0  ;;  %5603 = vmatpush.bf16.msra.mxu2 %v7855_v20 }
 0x612   :  { %v4395_v2 = vadd.f32 %v4394_v37, %v9098_v21  ;;  %v4443_v61 = vpop.f32.mrf.mxu3  ;;  %v4488_v49 = vadd.f32 %v4487_v56, %v4439_v44  ;;  %v9336_v44 = vld [vmem:[#allocation39_spill] sm:$0xff] }
 0x613   :  { %v4539_v7 = vpop.f32.mrf.mxu1 }
 0x614   :  { %v4444_v51 = vadd.f32 %v4443_v61, %v4395_v2  ;;  %v4537_v8 = vadd.f32 %v4536_v43, %v4488_v49  ;;  %v9339_v43 = vld [vmem:[#allocation33_spill] sm:$0xff] }
 0x616   :  { %v4611_v9 = vmul.f32 0.2, %v4537_v8  ;;  %5428 = vmatmul.bf16.gmra.mxu2 %v9333_v36  ;;  %5570 = vmatmul.bf16.gmra.mxu1 %v9334_v33  ;;  %v7880_v36 = vld [vmem:[#allocation14 + $0x1c8] sm:$0xff] }
 0x617   :  { %5477 = vmatmul.bf16.gmra.mxu3 %v9335_v40  ;;  %5749 = vmatpush.bf16.msra.mxu1 %v7880_v36 }
 0x618   :  { %v4739_v34 = vmax.f32 %v4537_v8, %v4611_v9  ;;  %v9340_v8 = vld [vmem:[#allocation40_spill] sm:$0xff] }
 0x619   :  { %v4397_v25 = vpop.f32.mrf.mxu2  ;;  %v4490_v24 = vpop.f32.mrf.mxu0  ;;  %v7872_v9 = vld [vmem:[#allocation14 + $0x188] sm:$0xff] }
 0x61a   :  { %v4398_v1 = vadd.f32 %v4397_v25, %v9098_v21  ;;  %v4446_v19 = vpop.f32.mrf.mxu3  ;;  %v4491_v31 = vadd.f32 %v4490_v24, %v4442_v30  ;;  %v9134_v62 = vpack.c.bf16 %v4739_v34, %v4731_v55  ;;  %5700 = vmatpush.bf16.msra.mxu0 %v7872_v9  ;;  %v7863_v25 = vld [vmem:[#allocation14 + $0x140] sm:$0xff] }
 0x61b   :  { %v4541_v59 = vpop.f32.mrf.mxu1  ;;  %5652 = vmatpush.bf16.msra.mxu3 %v7863_v25 }
 0x61c   :  { %v4447_v10 = vadd.f32 %v4446_v19, %v4398_v1  ;;  %v4540_v29 = vadd.f32 %v4539_v7, %v4491_v31  ;;  %5521 = vmatmul.bf16.gmra.mxu0 %v9336_v44  ;;  %v9343_v44 = vld [vmem:[#allocation34_spill] sm:$0xff] }
 0x61e   :  { %v4619_v26 = vmul.f32 0.2, %v4540_v29 }
 0x620   :  { %v4747_v30 = vmax.f32 %v4540_v29, %v4619_v26  ;;  %v9342_v29 = vld [vmem:[#allocation48_spill] sm:$0xff] }
 0x621   :  { %v4399_v23 = vpop.f32.mrf.mxu2  ;;  %v4492_v16 = vpop.f32.mrf.mxu0 }
 0x622   :  { %v4400_v22 = vadd.f32 %v4399_v23, %v9098_v21  ;;  %v4448_v4 = vpop.f32.mrf.mxu3  ;;  %v4493_v5 = vadd.f32 %v4492_v16, %v4444_v51 }
 0x623   :  { %v4544_v18 = vpop.f32.mrf.mxu1 }
 0x624   :  { %v4449_v46 = vadd.f32 %v4448_v4, %v4400_v22  ;;  %v4542_v11 = vadd.f32 %v4541_v59, %v4493_v5 }
 0x626   :  { %v4627_v32 = vmul.f32 0.2, %v4542_v11  ;;  %5433 = vmatmul.bf16.gmra.mxu2 %v9337_v58  ;;  %5575 = vmatmul.bf16.gmra.mxu1 %v9338_v48  ;;  %v7871_v58 = vld [vmem:[#allocation14 + $0x180] sm:$0xff] }
 0x627   :  { %5482 = vmatmul.bf16.gmra.mxu3 %v9339_v43  ;;  %v7879_v48 = vld [vmem:[#allocation14 + $0x1c0] sm:$0xff]  ;;  %5701 = vmatpush.bf16.msra.mxu0 %v7871_v58 }
 0x628   :  { %v4755_v60 = vmax.f32 %v4542_v11, %v4627_v32  ;;  %v9344_v32 = vld [vmem:[#allocation41_spill] sm:$0xff]  ;;  %5750 = vmatpush.bf16.msra.mxu1 %v7879_v48 }
 0x629   :  { %v4402_v47 = vpop.f32.mrf.mxu2  ;;  %v4495_v37 = vpop.f32.mrf.mxu0 }
 0x62a   :  { %v4403_v56 = vadd.f32 %v4402_v47, %v9098_v21  ;;  %v4451_v2 = vpop.f32.mrf.mxu3  ;;  %v4496_v61 = vadd.f32 %v4495_v37, %v4447_v10  ;;  %v9142_v49 = vpack.c.bf16 %v4755_v60, %v4747_v30  ;;  %v9341_v10 = vld [vmem:[#allocation27_spill] sm:$0xff] }
 0x62b   :  { %v4546_v7 = vpop.f32.mrf.mxu1 }
 0x62c   :  { %v4452_v0 = vadd.f32 %v4451_v2, %v4403_v56  ;;  %v4545_v51 = vadd.f32 %v4544_v18, %v4496_v61  ;;  %5526 = vmatmul.bf16.gmra.mxu0 %v9340_v8 }
 0x62e   :  { %v4635_v1 = vmul.f32 0.2, %v4545_v51 }
 0x630   :  { %v4763_v14 = vmax.f32 %v4545_v51, %v4635_v1  ;;  %v9347_v51 = vld [vmem:[#allocation35_spill] sm:$0xff]  ;;  %v9348_v1 = vld [vmem:[#allocation42_spill] sm:$0xff] }
 0x631   :  { %v4404_v33 = vpop.f32.mrf.mxu2  ;;  %v4497_v40 = vpop.f32.mrf.mxu0 }
 0x632   :  { %v4405_v55 = vadd.f32 %v4404_v33, %v9098_v21  ;;  %v4453_v34 = vpop.f32.mrf.mxu3  ;;  %v4498_v38 = vadd.f32 %v4497_v40, %v4449_v46 }
 0x633   :  { %v4549_v24 = vpop.f32.mrf.mxu1 }
 0x634   :  { %v4454_v19 = vadd.f32 %v4453_v34, %v4405_v55  ;;  %v4547_v31 = vadd.f32 %v4546_v7, %v4498_v38  ;;  %v9345_v7 = vld [vmem:[#allocation28_spill] sm:$0xff] }
 0x636   :  { %v4643_v59 = vmul.f32 0.2, %v4547_v31  ;;  %5438 = vmatmul.bf16.gmra.mxu2 %v9341_v10  ;;  %5580 = vmatmul.bf16.gmra.mxu1 %v9342_v29 }
 0x637   :  { %5487 = vmatmul.bf16.gmra.mxu3 %v9343_v44 }
 0x638   :  { %v4771_v15 = vmax.f32 %v4547_v31, %v4643_v59 }
 0x639   :  { %v4407_v23 = vpop.f32.mrf.mxu2  ;;  %v4500_v16 = vpop.f32.mrf.mxu0 }
 0x63a   :  { %v4408_v22 = vadd.f32 %v4407_v23, %v9098_v21  ;;  %v4456_v4 = vpop.f32.mrf.mxu3  ;;  %v4501_v5 = vadd.f32 %v4500_v16, %v4452_v0  ;;  %v9150_v18 = vpack.c.bf16 %v4771_v15, %v4763_v14  ;;  %v9346_v0 = vld [vmem:[#allocation49_spill] sm:$0xff] }
 0x63b   :  { %v4551_v26 = vpop.f32.mrf.mxu1 }
 0x63c   :  { %v4457_v46 = vadd.f32 %v4456_v4, %v4408_v22  ;;  %v4550_v11 = vadd.f32 %v4549_v24, %v4501_v5  ;;  %5531 = vmatmul.bf16.gmra.mxu0 %v9344_v32  ;;  %v9349_v22 = vld [vmem:[#allocation50_spill] sm:$0xff]  ;;  %v9350_v4 = vld [vmem:[#allocation51_spill] sm:$0xff]  ;;  %v9167_v5 = vld [vmem:[%s9283_s8] ss:$0 sm:$0xff]  ;;  %s8200_s8 = smov [#allocation16]  }
 0x63d   :  { %s5828_s30 = sshll.u32 %s8200_s8, 4  ;;  %s5829_s30 = int_to_ptr.vmem [resolvable:$true] %s5828_s30 }
 0x63e   :  { %v4651_v37 = vmul.f32 0.2, %v4550_v11 }
 0x640   :  { %v4779_v8 = vmax.f32 %v4550_v11, %v4651_v37 }
 0x641   :  { %v4409_v43 = vpop.f32.mrf.mxu2  ;;  %v4502_v30 = vpop.f32.mrf.mxu0 }
 0x642   :  { %v4410_v60 = vadd.f32 %v4409_v43, %v9098_v21  ;;  %v4458_v35 = vpop.f32.mrf.mxu3  ;;  %v4503_v63 = vadd.f32 %v4502_v30, %v4454_v19 }
 0x643   :  { %v4554_v47 = vpop.f32.mrf.mxu1 }
 0x644   :  { %v4459_v56 = vadd.f32 %v4458_v35, %v4410_v60  ;;  %v4552_v2 = vadd.f32 %v4551_v26, %v4503_v63  ;;  %v9351_v63 = vld [vmem:[#allocation43_spill] sm:$0xff] }
 0x646   :  { %v4659_v61 = vmul.f32 0.2, %v4552_v2  ;;  %5443 = vmatmul.bf16.gmra.mxu2 %v9345_v7  ;;  %5585 = vmatmul.bf16.gmra.mxu1 %v9346_v0 }
 0x647   :  { %5492 = vmatmul.bf16.gmra.mxu3 %v9347_v51 }
 0x648   :  { %v4787_v9 = vmax.f32 %v4552_v2, %v4659_v61 }
 0x649   :  { %v4412_v36 = vpop.f32.mrf.mxu2  ;;  %v4505_v33 = vpop.f32.mrf.mxu0 }
 0x64a   :  { %v4413_v40 = vadd.f32 %v4412_v36, %v9098_v21  ;;  %v4461_v55 = vpop.f32.mrf.mxu3  ;;  %v4506_v34 = vadd.f32 %v4505_v33, %v4457_v46  ;;  %v9158_v38 = vpack.c.bf16 %v4787_v9, %v4779_v8  ;;  %v9352_v9 = vld [vmem:[#allocation52_spill] sm:$0xff]  ;;  %v9353_v36 = vld [vmem:[#allocation59_spill] sm:$0xff] }
 0x64b   :  { %v4556_v20 = vpop.f32.mrf.mxu1 }
 0x64c   :  { %v4462_v25 = vadd.f32 %v4461_v55, %v4413_v40  ;;  %v4555_v24 = vadd.f32 %v4554_v47, %v4506_v34  ;;  %5536 = vmatmul.bf16.gmra.mxu0 %v9348_v1 }
 0x64e   :  { %v4667_v14 = vmul.f32 0.2, %v4555_v24 }
 0x650   :  { %v4795_v26 = vmax.f32 %v4555_v24, %v4667_v14 }
 0x651   :  { %v4414_v19 = vpop.f32.mrf.mxu2  ;;  %v4507_v31 = vpop.f32.mrf.mxu0 }
 0x652   :  { %v4415_v59 = vadd.f32 %v4414_v19, %v9098_v21  ;;  %v4463_v10 = vpop.f32.mrf.mxu3  ;;  %v4508_v29 = vadd.f32 %v4507_v31, %v4459_v56 }
 0x653   :  { %v4559_v44 = vpop.f32.mrf.mxu1 }
 0x654   :  { %v4464_v15 = vadd.f32 %v4463_v10, %v4415_v59  ;;  %v4557_v23 = vadd.f32 %v4556_v20, %v4508_v29 }
 0x656   :  { %v4675_v16 = vmul.f32 0.2, %v4557_v23  ;;  %5590 = vmatmul.bf16.gmra.mxu1 %v9349_v22  ;;  %5604 = vmatmul.bf16.vlgmr.msra.gmra.mxu2 %v9350_v4  ;;  %v9354_v22 = vld [vmem:[#allocation53_spill] sm:$0xff]  ;;  %v9355_v4 = vld [vmem:[#allocation60_spill] sm:$0xff] }
 0x657   :  { %5653 = vmatmul.bf16.vlgmr.msra.gmra.mxu3 %v8981_v27 }
 0x658   :  { %v4803_v21 = vmax.f32 %v4557_v23, %v4675_v16 }
 0x659   :  { %v4510_v46 = vpop.f32.mrf.mxu0  ;;  %v5409_v11 = vpop.f32.mrf.mxu2 }
 0x65a   :  { %v4511_v32 = vadd.f32 %v4510_v46, %v4462_v25  ;;  %v5410_v58 = vadd.f32 %v9167_v5, %v5409_v11  ;;  %v5458_v48 = vpop.f32.mrf.mxu3  ;;  %v9171_v43 = vpack.c.bf16 %v4803_v21, %v4795_v26 }
 0x65b   :  { %v4561_v30 = vpop.f32.mrf.mxu1 }
 0x65c   :  { %v4560_v60 = vadd.f32 %v4559_v44, %v4511_v32  ;;  %v5459_v35 = vadd.f32 %v5458_v48, %v5410_v58  ;;  %5541 = vmatmul.bf16.gmra.mxu0 %v9351_v63 }
 0x65e   :  { %v4683_v7 = vmul.f32 0.2, %v4560_v60 }
 0x660   :  { %v4811_v33 = vmax.f32 %v4560_v60, %v4683_v7 }
 0x661   :  { %v4512_v47 = vpop.f32.mrf.mxu0  ;;  %v5411_v37 = vpop.f32.mrf.mxu2 }
 0x662   :  { %v4513_v56 = vadd.f32 %v4512_v47, %v4464_v15  ;;  %v5412_v27 = vadd.f32 %v9167_v5, %v5411_v37  ;;  %v5460_v2 = vpop.f32.mrf.mxu3 }
 0x663   :  { %v5556_v61 = vpop.f32.mrf.mxu1 }
 0x664   :  { %v4562_v0 = vadd.f32 %v4561_v30, %v4513_v56  ;;  %v5461_v51 = vadd.f32 %v5460_v2, %v5412_v27  ;;  %v9356_v27 = vld [vmem:[#allocation54_spill] sm:$0xff] }
 0x666   :  { %v4691_v8 = vmul.f32 0.2, %v4562_v0  ;;  %5609 = vmatmul.bf16.gmra.mxu2 %v9352_v9  ;;  %5751 = vmatmul.bf16.vlgmr.msra.gmra.mxu1 %v9117_v6 }
 0x667   :  { %5658 = vmatmul.bf16.gmra.mxu3 %v9353_v36 }
 0x668   :  { %v4819_v40 = vmax.f32 %v4562_v0, %v4691_v8 }
 0x669   :  { %v5414_v55 = vpop.f32.mrf.mxu2  ;;  %v5507_v34 = vpop.f32.mrf.mxu0 }
 0x66a   :  { %v5415_v20 = vadd.f32 %v9167_v5, %v5414_v55  ;;  %v5463_v25 = vpop.f32.mrf.mxu3  ;;  %v5508_v24 = vadd.f32 %v5507_v34, %v5459_v35  ;;  %v9179_v1 = vpack.c.bf16 %v4819_v40, %v4811_v33 }
 0x66b   :  { %v5558_v19 = vpop.f32.mrf.mxu1 }
 0x66c   :  { %v5464_v31 = vadd.f32 %v5463_v25, %v5415_v20  ;;  %5702 = vmatmul.bf16.vlgmr.msra.gmra.mxu0 %v9050_v52  ;;  %v9182_v59 = vadd.f32 %v5556_v61, %v5508_v24  ;;  %v9357_v25 = vld [vmem:[#allocation55_spill] sm:$0xff] }
 0x671   :  { %v5416_v10 = vpop.f32.mrf.mxu2  ;;  %v5509_v6 = vpop.f32.mrf.mxu0 }
 0x672   :  { %v5417_v29 = vadd.f32 %v9167_v5, %v5416_v10  ;;  %v5465_v44 = vpop.f32.mrf.mxu3  ;;  %v5510_v14 = vadd.f32 %v5509_v6, %v5461_v51 }
 0x673   :  { %v5561_v15 = vpop.f32.mrf.mxu1 }
 0x674   :  { %v5466_v23 = vadd.f32 %v5465_v44, %v5417_v29  ;;  %v9185_v16 = vadd.f32 %v5558_v19, %v5510_v14 }
 0x676   :  { %5614 = vmatmul.bf16.gmra.mxu2 %v9354_v22  ;;  %5756 = vmatmul.bf16.gmra.mxu1 %v9126_v12 }
 0x677   :  { %5663 = vmatmul.bf16.gmra.mxu3 %v9355_v4 }
 0x679   :  { %v5419_v26 = vpop.f32.mrf.mxu2  ;;  %v5512_v52 = vpop.f32.mrf.mxu0 }
 0x67a   :  { %v5420_v21 = vadd.f32 %v9167_v5, %v5419_v26  ;;  %v5468_v46 = vpop.f32.mrf.mxu3  ;;  %v5513_v11 = vadd.f32 %v5512_v52, %v5464_v31  ;;  %v9358_v52 = vld [vmem:[#allocation56_spill] sm:$0xff] }
 0x67b   :  { %v5563_v32 = vpop.f32.mrf.mxu1 }
 0x67c   :  { %v5469_v58 = vadd.f32 %v5468_v46, %v5420_v21  ;;  %5707 = vmatmul.bf16.gmra.mxu0 %v9059_v42  ;;  %v9192_v48 = vadd.f32 %v5561_v15, %v5513_v11 }
 0x681   :  { %v5421_v30 = vpop.f32.mrf.mxu2  ;;  %v5514_v60 = vpop.f32.mrf.mxu0 }
 0x682   :  { %v5422_v35 = vadd.f32 %v9167_v5, %v5421_v30  ;;  %v5470_v63 = vpop.f32.mrf.mxu3  ;;  %v5515_v12 = vadd.f32 %v5514_v60, %v5466_v23 }
 0x683   :  { %v5566_v47 = vpop.f32.mrf.mxu1 }
 0x684   :  { %v5471_v37 = vadd.f32 %v5470_v63, %v5422_v35  ;;  %v9195_v56 = vadd.f32 %v5563_v32, %v5515_v12 }
 0x686   :  { %5619 = vmatmul.bf16.gmra.mxu2 %v9356_v27  ;;  %5761 = vmatmul.bf16.gmra.mxu1 %v9134_v62 }
 0x687   :  { %5668 = vmatmul.bf16.gmra.mxu3 %v9006_v41 }
 0x689   :  { %v5424_v2 = vpop.f32.mrf.mxu2  ;;  %v5517_v42 = vpop.f32.mrf.mxu0 }
 0x68a   :  { %v5425_v61 = vadd.f32 %v9167_v5, %v5424_v2  ;;  %v5473_v7 = vpop.f32.mrf.mxu3  ;;  %v5518_v0 = vadd.f32 %v5517_v42, %v5469_v58  ;;  %v9359_v2 = vld [vmem:[#allocation57_spill] sm:$0xff] }
 0x68b   :  { %v5568_v51 = vpop.f32.mrf.mxu1 }
 0x68c   :  { %v5474_v8 = vadd.f32 %v5473_v7, %v5425_v61  ;;  %5712 = vmatmul.bf16.gmra.mxu0 %v9067_v53  ;;  %v9202_v9 = vadd.f32 %v5566_v47, %v5518_v0 }
 0x691   :  { %v5426_v36 = vpop.f32.mrf.mxu2  ;;  %v5519_v33 = vpop.f32.mrf.mxu0 }
 0x692   :  { %v5427_v40 = vadd.f32 %v9167_v5, %v5426_v36  ;;  %v5475_v55 = vpop.f32.mrf.mxu3  ;;  %v5520_v62 = vadd.f32 %v5519_v33, %v5471_v37 }
 0x693   :  { %v5571_v34 = vpop.f32.mrf.mxu1 }
 0x694   :  { %v5476_v41 = vadd.f32 %v5475_v55, %v5427_v40  ;;  %v9205_v20 = vadd.f32 %v5568_v51, %v5520_v62 }
 0x696   :  { %5624 = vmatmul.bf16.gmra.mxu2 %v9357_v25  ;;  %5766 = vmatmul.bf16.gmra.mxu1 %v9142_v49  ;;  %v9360_v25 = vld [vmem:[#allocation58_spill] sm:$0xff] }
 0x697   :  { %5673 = vmatmul.bf16.gmra.mxu3 %v9014_v3 }
 0x699   :  { %v5429_v24 = vpop.f32.mrf.mxu2  ;;  %v5522_v53 = vpop.f32.mrf.mxu0 }
 0x69a   :  { %v5430_v19 = vadd.f32 %v9167_v5, %v5429_v24  ;;  %v5478_v31 = vpop.f32.mrf.mxu3  ;;  %v5523_v10 = vadd.f32 %v5522_v53, %v5474_v8 }
 0x69b   :  { %v5573_v6 = vpop.f32.mrf.mxu1 }
 0x69c   :  { %v5479_v29 = vadd.f32 %v5478_v31, %v5430_v19  ;;  %5717 = vmatmul.bf16.gmra.mxu0 %v9075_v13  ;;  %v9212_v44 = vadd.f32 %v5571_v34, %v5523_v10 }
 0x6a1   :  { %v5431_v14 = vpop.f32.mrf.mxu2  ;;  %v5524_v15 = vpop.f32.mrf.mxu0 }
 0x6a2   :  { %v5432_v23 = vadd.f32 %v9167_v5, %v5431_v14  ;;  %v5480_v22 = vpop.f32.mrf.mxu3  ;;  %v5525_v49 = vadd.f32 %v5524_v15, %v5476_v41 }
 0x6a3   :  { %v5576_v4 = vpop.f32.mrf.mxu1 }
 0x6a4   :  { %v5481_v3 = vadd.f32 %v5480_v22, %v5432_v23  ;;  %v9215_v26 = vadd.f32 %v5573_v6, %v5525_v49 }
 0x6a6   :  { %5629 = vmatmul.bf16.gmra.mxu2 %v9358_v52  ;;  %5771 = vmatmul.bf16.gmra.mxu1 %v9150_v18 }
 0x6a7   :  { %5678 = vmatmul.bf16.gmra.mxu3 %v9022_v28 }
 0x6a9   :  { %v5434_v21 = vpop.f32.mrf.mxu2  ;;  %v5527_v13 = vpop.f32.mrf.mxu0 }
 0x6aa   :  { %v5435_v46 = vadd.f32 %v9167_v5, %v5434_v21  ;;  %v5483_v11 = vpop.f32.mrf.mxu3  ;;  %v5528_v32 = vadd.f32 %v5527_v13, %v5479_v29 }
 0x6ab   :  { %v5578_v58 = vpop.f32.mrf.mxu1 }
 0x6ac   :  { %v5484_v30 = vadd.f32 %v5483_v11, %v5435_v46  ;;  %5722 = vmatmul.bf16.gmra.mxu0 %v9083_v57  ;;  %v9222_v60 = vadd.f32 %v5576_v4, %v5528_v32 }
 0x6b1   :  { %v5436_v35 = vpop.f32.mrf.mxu2  ;;  %v5529_v63 = vpop.f32.mrf.mxu0 }
 0x6b2   :  { %v5437_v12 = vadd.f32 %v9167_v5, %v5436_v35  ;;  %v5485_v47 = vpop.f32.mrf.mxu3  ;;  %v5530_v18 = vadd.f32 %v5529_v63, %v5481_v3 }
 0x6b3   :  { %v5581_v37 = vpop.f32.mrf.mxu1 }
 0x6b4   :  { %v5486_v28 = vadd.f32 %v5485_v47, %v5437_v12  ;;  %v9225_v27 = vadd.f32 %v5578_v58, %v5530_v18 }
 0x6b6   :  { %5634 = vmatmul.bf16.gmra.mxu2 %v9359_v2  ;;  %5776 = vmatmul.bf16.gmra.mxu1 %v9158_v38 }
 0x6b7   :  { %5683 = vmatmul.bf16.gmra.mxu3 %v9035_v39 }
 0x6b9   :  { %v5439_v42 = vpop.f32.mrf.mxu2  ;;  %v5532_v57 = vpop.f32.mrf.mxu0 }
 0x6ba   :  { %v5440_v61 = vadd.f32 %v9167_v5, %v5439_v42  ;;  %v5488_v7 = vpop.f32.mrf.mxu3  ;;  %v5533_v0 = vadd.f32 %v5532_v57, %v5484_v30 }
 0x6bb   :  { %v5583_v51 = vpop.f32.mrf.mxu1 }
 0x6bc   :  { %v5489_v8 = vadd.f32 %v5488_v7, %v5440_v61  ;;  %5727 = vmatmul.bf16.gmra.mxu0 %v9091_v45  ;;  %v9232_v36 = vadd.f32 %v5581_v37, %v5533_v0 }
 0x6c1   :  { %v5441_v33 = vpop.f32.mrf.mxu2  ;;  %v5534_v40 = vpop.f32.mrf.mxu0 }
 0x6c2   :  { %v5442_v55 = vadd.f32 %v9167_v5, %v5441_v33  ;;  %v5490_v62 = vpop.f32.mrf.mxu3  ;;  %v5535_v38 = vadd.f32 %v5534_v40, %v5486_v28 }
 0x6c3   :  { %v5586_v34 = vpop.f32.mrf.mxu1 }
 0x6c4   :  { %v5491_v39 = vadd.f32 %v5490_v62, %v5442_v55  ;;  %v9235_v41 = vadd.f32 %v5583_v51, %v5535_v38 }
 0x6c6   :  { %5639 = vmatmul.bf16.gmra.mxu2 %v9360_v25  ;;  %5781 = vmatmul.bf16.gmra.mxu1 %v9171_v43 }
 0x6c7   :  { %5688 = vmatmul.bf16.gmra.mxu3 %v9043_v50 }
 0x6c9   :  { %v5444_v24 = vpop.f32.mrf.mxu2  ;;  %v5537_v45 = vpop.f32.mrf.mxu0 }
 0x6ca   :  { %v5445_v53 = vadd.f32 %v9167_v5, %v5444_v24  ;;  %v5493_v19 = vpop.f32.mrf.mxu3  ;;  %v5538_v31 = vadd.f32 %v5537_v45, %v5489_v8 }
 0x6cb   :  { %v5588_v10 = vpop.f32.mrf.mxu1 }
 0x6cc   :  { %v5494_v6 = vadd.f32 %v5493_v19, %v5445_v53  ;;  %5732 = vmatmul.bf16.gmra.mxu0 %v9102_v17  ;;  %v9242_v29 = vadd.f32 %v5586_v34, %v5538_v31 }
 0x6d1   :  { %v5446_v14 = vpop.f32.mrf.mxu2  ;;  %v5539_v15 = vpop.f32.mrf.mxu0 }
 0x6d2   :  { %v5447_v23 = vadd.f32 %v9167_v5, %v5446_v14  ;;  %v5495_v22 = vpop.f32.mrf.mxu3  ;;  %v5540_v43 = vadd.f32 %v5539_v15, %v5491_v39 }
 0x6d3   :  { %v5591_v49 = vpop.f32.mrf.mxu1 }
 0x6d4   :  { %v5496_v50 = vadd.f32 %v5495_v22, %v5447_v23  ;;  %v9245_v4 = vadd.f32 %v5588_v10, %v5540_v43 }
 0x6d6   :  { %5786 = vmatmul.bf16.gmra.mxu1 %v9179_v1 }
 0x6d9   :  { %v5542_v3 = vpop.f32.mrf.mxu0  ;;  %v5605_v52 = vpop.f32.mrf.mxu2 }
 0x6da   :  { %v5543_v21 = vadd.f32 %v5542_v3, %v5494_v6  ;;  %v5654_v13 = vpop.f32.mrf.mxu3  ;;  %v5606_v35 = vadd.f32 %v5605_v52, %v9182_v59 }
 0x6db   :  { %v5593_v46 = vpop.f32.mrf.mxu1 }
 0x6dc   :  { %5737 = vmatmul.bf16.gmra.mxu0 %v9110_v54  ;;  %v9249_v17 = vadd.f32 %v5591_v49, %v5543_v21  ;;  %v5655_v12 = vadd.f32 %v5654_v13, %v5606_v35 }
 0x6e1   :  { %v5544_v11 = vpop.f32.mrf.mxu0  ;;  %v5607_v32 = vpop.f32.mrf.mxu2 }
 0x6e2   :  { %v5545_v5 = vadd.f32 %v5544_v11, %v5496_v50  ;;  %v5656_v58 = vpop.f32.mrf.mxu3  ;;  %v5608_v2 = vadd.f32 %v5607_v32, %v9185_v16 }
 0x6e3   :  { %v5752_v30 = vpop.f32.mrf.mxu1 }
 0x6e4   :  { %v9252_v63 = vadd.f32 %v5593_v46, %v5545_v5  ;;  %v5657_v42 = vadd.f32 %v5656_v58, %v5608_v2 }
 0x6e9   :  { %v5610_v1 = vpop.f32.mrf.mxu2  ;;  %v5703_v47 = vpop.f32.mrf.mxu0 }
 0x6ea   :  { %v5659_v18 = vpop.f32.mrf.mxu3  ;;  %v5704_v37 = vadd.f32 %v5703_v47, %v5655_v12  ;;  %v5611_v59 = vadd.f32 %v5610_v1, %v9192_v48 }
 0x6eb   :  { %v5754_v28 = vpop.f32.mrf.mxu1 }
 0x6ec   :  { %v5753_v54 = vadd.f32 %v5752_v30, %v5704_v37  ;;  %v5660_v40 = vadd.f32 %v5659_v18, %v5611_v59 }
 0x6ee   :  { %7921 = vtanh.f32 %v5753_v54 }
 0x6f1   :  { %v5612_v57 = vpop.f32.mrf.mxu2  ;;  %v5705_v61 = vpop.f32.mrf.mxu0 }
 0x6f2   :  { %v5661_v7 = vpop.f32.mrf.mxu3  ;;  %v5706_v0 = vadd.f32 %v5705_v61, %v5657_v42  ;;  %v5613_v25 = vadd.f32 %v5612_v57, %v9195_v56 }
 0x6f3   :  { %v5757_v51 = vpop.f32.mrf.mxu1 }
 0x6f4   :  { %v7922_v8 = vpop.eup %7921  ;;  %v5755_v33 = vadd.f32 %v5754_v28, %v5706_v0  ;;  %v5662_v45 = vadd.f32 %v5661_v7, %v5613_v25 }
 0x6f5   :  { %5808 = vst [vmem:[#allocation16] sm:$0xff] %v7922_v8 }
 0x6f6   :  { %7923 = vtanh.f32 %v5755_v33 }
 0x6f9   :  { %v5615_v55 = vpop.f32.mrf.mxu2  ;;  %v5708_v62 = vpop.f32.mrf.mxu0 }
 0x6fa   :  { %v5664_v38 = vpop.f32.mrf.mxu3  ;;  %v5709_v34 = vadd.f32 %v5708_v62, %v5660_v40  ;;  %v5616_v14 = vadd.f32 %v5615_v55, %v9202_v9 }
 0x6fb   :  { %v5759_v16 = vpop.f32.mrf.mxu1 }
 0x6fc   :  { %v7924_v39 = vpop.eup %7923  ;;  %v5758_v24 = vadd.f32 %v5757_v51, %v5709_v34  ;;  %v5665_v23 = vadd.f32 %v5664_v38, %v5616_v14 }
 0x6fd   :  { %5809 = vst [vmem:[#allocation16 + $0x8] sm:$0xff] %v7924_v39 }
 0x6fe   :  { %7925 = vtanh.f32 %v5758_v24 }
 0x701   :  { %v5617_v53 = vpop.f32.mrf.mxu2  ;;  %v5710_v19 = vpop.f32.mrf.mxu0 }
 0x702   :  { %v5666_v31 = vpop.f32.mrf.mxu3  ;;  %v5711_v48 = vadd.f32 %v5710_v19, %v5662_v45  ;;  %v5618_v52 = vadd.f32 %v5617_v53, %v9205_v20 }
 0x703   :  { %v5762_v10 = vpop.f32.mrf.mxu1 }
 0x704   :  { %v7926_v6 = vpop.eup %7925  ;;  %v5760_v15 = vadd.f32 %v5759_v16, %v5711_v48  ;;  %v5667_v13 = vadd.f32 %v5666_v31, %v5618_v52 }
 0x705   :  { %5810 = vst [vmem:[#allocation16 + $0x10] sm:$0xff] %v7926_v6 }
 0x706   :  { %7927 = vtanh.f32 %v5760_v15 }
 0x709   :  { %v5620_v22 = vpop.f32.mrf.mxu2  ;;  %v5713_v43 = vpop.f32.mrf.mxu0 }
 0x70a   :  { %v5669_v49 = vpop.f32.mrf.mxu3  ;;  %v5714_v56 = vadd.f32 %v5713_v43, %v5665_v23  ;;  %v5621_v30 = vadd.f32 %v5620_v22, %v9212_v44 }
 0x70b   :  { %v5764_v50 = vpop.f32.mrf.mxu1 }
 0x70c   :  { %v7928_v3 = vpop.eup %7927  ;;  %v5763_v21 = vadd.f32 %v5762_v10, %v5714_v56  ;;  %v5670_v12 = vadd.f32 %v5669_v49, %v5621_v30 }
 0x70d   :  { %5811 = vst [vmem:[#allocation16 + $0x18] sm:$0xff] %v7928_v3 }
 0x70e   :  { %7929 = vtanh.f32 %v5763_v21 }
 0x711   :  { %v5622_v46 = vpop.f32.mrf.mxu2  ;;  %v5715_v11 = vpop.f32.mrf.mxu0 }
 0x712   :  { %v5671_v32 = vpop.f32.mrf.mxu3  ;;  %v5716_v9 = vadd.f32 %v5715_v11, %v5667_v13  ;;  %v5623_v2 = vadd.f32 %v5622_v46, %v9215_v26 }
 0x713   :  { %v5767_v5 = vpop.f32.mrf.mxu1 }
 0x714   :  { %v7930_v58 = vpop.eup %7929  ;;  %v5765_v35 = vadd.f32 %v5764_v50, %v5716_v9  ;;  %v5672_v42 = vadd.f32 %v5671_v32, %v5623_v2 }
 0x715   :  { %5812 = vst [vmem:[#allocation16 + $0x20] sm:$0xff] %v7930_v58 }
 0x716   :  { %7931 = vtanh.f32 %v5765_v35 }
 0x719   :  { %v5625_v1 = vpop.f32.mrf.mxu2  ;;  %v5718_v47 = vpop.f32.mrf.mxu0 }
 0x71a   :  { %v5674_v18 = vpop.f32.mrf.mxu3  ;;  %v5719_v20 = vadd.f32 %v5718_v47, %v5670_v12  ;;  %v5626_v8 = vadd.f32 %v5625_v1, %v9222_v60 }
 0x71b   :  { %v5769_v37 = vpop.f32.mrf.mxu1 }
 0x71c   :  { %v7932_v28 = vpop.eup %7931  ;;  %v5768_v54 = vadd.f32 %v5767_v5, %v5719_v20  ;;  %v5675_v33 = vadd.f32 %v5674_v18, %v5626_v8 }
 0x71d   :  { %5813 = vst [vmem:[#allocation16 + $0x28] sm:$0xff] %v7932_v28 }
 0x71e   :  { %7933 = vtanh.f32 %v5768_v54 }
 0x721   :  { %v5627_v57 = vpop.f32.mrf.mxu2  ;;  %v5720_v61 = vpop.f32.mrf.mxu0 }
 0x722   :  { %v5721_v7 = vadd.f32 %v5720_v61, %v5672_v42  ;;  %v5676_v44 = vpop.f32.mrf.mxu3  ;;  %v5628_v34 = vadd.f32 %v5627_v57, %v9225_v27 }
 0x723   :  { %v5772_v0 = vpop.f32.mrf.mxu1 }
 0x724   :  { %v7934_v51 = vpop.eup %7933  ;;  %v5770_v59 = vadd.f32 %v5769_v37, %v5721_v7  ;;  %v5677_v25 = vadd.f32 %v5676_v44, %v5628_v34 }
 0x725   :  { %5814 = vst [vmem:[#allocation16 + $0x30] sm:$0xff] %v7934_v51 }
 0x726   :  { %7935 = vtanh.f32 %v5770_v59 }
 0x729   :  { %v5630_v40 = vpop.f32.mrf.mxu2  ;;  %v5723_v55 = vpop.f32.mrf.mxu0 }
 0x72a   :  { %v5724_v62 = vadd.f32 %v5723_v55, %v5675_v33  ;;  %v5679_v39 = vpop.f32.mrf.mxu3  ;;  %v5631_v31 = vadd.f32 %v5630_v40, %v9232_v36 }
 0x72b   :  { %v5774_v26 = vpop.f32.mrf.mxu1 }
 0x72c   :  { %v7936_v38 = vpop.eup %7935  ;;  %v5773_v16 = vadd.f32 %v5772_v0, %v5724_v62  ;;  %v5680_v6 = vadd.f32 %v5679_v39, %v5631_v31 }
 0x72d   :  { %5815 = vst [vmem:[#allocation16 + $0x38] sm:$0xff] %v7936_v38 }
 0x72e   :  { %7937 = vtanh.f32 %v5773_v16 }
 0x731   :  { %v5632_v24 = vpop.f32.mrf.mxu2  ;;  %v5725_v45 = vpop.f32.mrf.mxu0 }
 0x732   :  { %v5726_v53 = vadd.f32 %v5725_v45, %v5677_v25  ;;  %v5681_v10 = vpop.f32.mrf.mxu3  ;;  %v5633_v43 = vadd.f32 %v5632_v24, %v9235_v41 }
 0x733   :  { %v5777_v60 = vpop.f32.mrf.mxu1 }
 0x734   :  { %v7938_v19 = vpop.eup %7937  ;;  %v5775_v48 = vadd.f32 %v5774_v26, %v5726_v53  ;;  %v5682_v56 = vadd.f32 %v5681_v10, %v5633_v43 }
 0x735   :  { %5816 = vst [vmem:[#allocation16 + $0x40] sm:$0xff] %v7938_v19 }
 0x736   :  { %7939 = vtanh.f32 %v5775_v48 }
 0x739   :  { %v5728_v14 = vpop.f32.mrf.mxu0  ;;  %v5635_v15 = vpop.f32.mrf.mxu2 }
 0x73a   :  { %v5729_v27 = vadd.f32 %v5728_v14, %v5680_v6  ;;  %v5684_v50 = vpop.f32.mrf.mxu3  ;;  %v5636_v21 = vadd.f32 %v5635_v15, %v9242_v29 }
 0x73b   :  { %v5779_v23 = vpop.f32.mrf.mxu1 }
 0x73c   :  { %v7940_v22 = vpop.eup %7939  ;;  %v5778_v49 = vadd.f32 %v5777_v60, %v5729_v27  ;;  %v5685_v32 = vadd.f32 %v5684_v50, %v5636_v21 }
 0x73d   :  { %5817 = vst [vmem:[#allocation16 + $0x48] sm:$0xff] %v7940_v22 }
 0x73e   :  { %7941 = vtanh.f32 %v5778_v49 }
 0x741   :  { %v5730_v3 = vpop.f32.mrf.mxu0  ;;  %v5637_v13 = vpop.f32.mrf.mxu2 }
 0x742   :  { %v5731_v52 = vadd.f32 %v5730_v3, %v5682_v56  ;;  %v5686_v58 = vpop.f32.mrf.mxu3  ;;  %v5638_v30 = vadd.f32 %v5637_v13, %v9245_v4 }
 0x743   :  { %v5782_v11 = vpop.f32.mrf.mxu1 }
 0x744   :  { %v7942_v36 = vpop.eup %7941  ;;  %v5780_v46 = vadd.f32 %v5779_v23, %v5731_v52  ;;  %v5687_v47 = vadd.f32 %v5686_v58, %v5638_v30 }
 0x745   :  { %5818 = vst [vmem:[#allocation16 + $0x50] sm:$0xff] %v7942_v36 }
 0x746   :  { %7943 = vtanh.f32 %v5780_v46 }
 0x749   :  { %v5733_v9 = vpop.f32.mrf.mxu0  ;;  %v5640_v12 = vpop.f32.mrf.mxu2 }
 0x74a   :  { %v5734_v5 = vadd.f32 %v5733_v9, %v5685_v32  ;;  %v5641_v37 = vadd.f32 %v5640_v12, %v9249_v17  ;;  %v5689_v2 = vpop.f32.mrf.mxu3 }
 0x74b   :  { %v5784_v1 = vpop.f32.mrf.mxu1 }
 0x74c   :  { %v7944_v41 = vpop.eup %7943  ;;  %v5783_v35 = vadd.f32 %v5782_v11, %v5734_v5  ;;  %v5690_v54 = vadd.f32 %v5689_v2, %v5641_v37 }
 0x74d   :  { %5819 = vst [vmem:[#allocation16 + $0x58] sm:$0xff] %v7944_v41 }
 0x74e   :  { %7945 = vtanh.f32 %v5783_v35 }
 0x751   :  { %v5735_v18 = vpop.f32.mrf.mxu0  ;;  %v5642_v42 = vpop.f32.mrf.mxu2 }
 0x752   :  { %v5736_v29 = vadd.f32 %v5735_v18, %v5687_v47  ;;  %v5643_v44 = vadd.f32 %v5642_v42, %v9252_v63  ;;  %v5691_v51 = vpop.f32.mrf.mxu3 }
 0x753   :  { %v5787_v57 = vpop.f32.mrf.mxu1 }
 0x754   :  { %v7946_v20 = vpop.eup %7945  ;;  %v5785_v28 = vadd.f32 %v5784_v1, %v5736_v29  ;;  %v5692_v8 = vadd.f32 %v5691_v51, %v5643_v44 }
 0x755   :  { %5820 = vst [vmem:[#allocation16 + $0x60] sm:$0xff] %v7946_v20 }
 0x756   :  { %7947 = vtanh.f32 %v5785_v28 }
 0x759   :  { %v5738_v61 = vpop.f32.mrf.mxu0 }
 0x75a   :  { %v5739_v4 = vadd.f32 %v5738_v61, %v5690_v54 }
 0x75b   :  { %v5789_v17 = vpop.f32.mrf.mxu1 }
 0x75c   :  { %v7948_v7 = vpop.eup %7947  ;;  %v5788_v0 = vadd.f32 %v5787_v57, %v5739_v4 }
 0x75d   :  { %5821 = vst [vmem:[#allocation16 + $0x68] sm:$0xff] %v7948_v7 }
 0x75e   :  { %7949 = vtanh.f32 %v5788_v0 }
 0x761   :  { %v5740_v59 = vpop.f32.mrf.mxu0 }
 0x762   :  { %v5741_v33 = vadd.f32 %v5740_v59, %v5692_v8 }
 0x764   :  { %v7950_v40 = vpop.eup %7949  ;;  %v5790_v55 = vadd.f32 %v5789_v17, %v5741_v33 }
 0x765   :  { %5822 = vst [vmem:[#allocation16 + $0x70] sm:$0xff] %v7950_v40 }
 0x766   :  { %7951 = vtanh.f32 %v5790_v55 }
 0x76c   :  { %v7952_v63 = vpop.eup %7951 }
 0x76d   :  { %5823 = vst [vmem:[#allocation16 + $0x78] sm:$0xff] %v7952_v63 }
 0x76e   :  { %5836 = dma.vmem_to_hbm [thread:$0]  %s5829_s30, 2048, %s5831_s12, [#allocation4], %s8185_s17, %s8185_s17, %s8186_s18  }
 0x76f   :  { %8182 = dma.done.wait [#allocation4], 2048  }
 0x770   :  { %8183 = vsyncadd [#allocation4], 4294965248 }
 0x771   :  { %5841 = vsyncpa [#allocation3], 1 }
 0x772   :  { %5842 = vsyncpa [#allocation6], 1 }
 0x773   :  { %5843 = vsyncpa [#allocation9], 1 }
 0x774   :  { %5844 = vsyncpa [#allocation12], 1 }
 0x775   :  { %5845 = vsyncpa [#allocation15], 1 }
 0x776   :  { %5846 = vsyncpa [#allocation4], 1 }

</bundles_post_ra>
